<compile_context>
chip_gen: v6e
topology: v6e:2x2x1
jax: 0.10.0
libtpu: 0.0.40
codegen_flags: <defaults>
</compile_context>

<pallas_src>
import functools

import jax
import jax.numpy as jnp
from jax.experimental import pallas as pl
from jax.experimental.pallas import tpu as pltpu


def _round_up(v, m):
    return (v + m - 1) // m * m


# ----------------------- matmul + bias (+ ReLU) kernel -----------------------

def _matmul_bias_kernel(x_ref, w_ref, b_ref, o_ref, *, relu):
    acc = jnp.dot(x_ref[...], w_ref[...], preferred_element_type=jnp.float32)
    acc = acc + b_ref[...]
    if relu:
        acc = jnp.maximum(acc, 0.0)
    o_ref[...] = acc.astype(o_ref.dtype)


def matmul_bias(x, w, b, *, relu, out_dtype=jnp.bfloat16):
    """(M, K) @ (K, N) + b, optional ReLU.  bf16 MXU operands, f32 accumulate."""
    M, K = x.shape
    N = w.shape[1]
    xb = x.astype(jnp.bfloat16)
    wb = w.astype(jnp.bfloat16)
    b2 = b.reshape(1, N).astype(jnp.float32)

    # M tiling: aligned tiles (remainder is zero-padded and sliced off afterwards);
    # keep >=2 grid steps when there is enough work so both v7x TensorCores get fed.
    M8 = _round_up(M, 8)
    if M8 >= 2048:
        tm = 512
    elif M8 >= 64:
        tm = _round_up((M8 + 1) // 2, 8)
    else:
        tm = M8
    Mp = _round_up(M, tm)
    if Mp != M:
        xb = jnp.pad(xb, ((0, Mp - M), (0, 0)))

    # N tiling only for wide outputs (conv5's 1024 columns) -> 2 lane-dense steps.
    tn = 512 if (N >= 1024 and N % 512 == 0) else N
    gm, gn = Mp // tm, N // tn

    cost = pl.CostEstimate(
        flops=2 * Mp * K * N,
        transcendentals=0,
        bytes_accessed=Mp * K * 2 + K * N * 2 + N * 4
        + Mp * N * jnp.dtype(out_dtype).itemsize)

    y = pl.pallas_call(
        functools.partial(_matmul_bias_kernel, relu=relu),
        out_shape=jax.ShapeDtypeStruct((Mp, N), out_dtype),
        grid=(gm, gn),
        in_specs=[
            pl.BlockSpec((tm, K), lambda i, j: (i, 0)),
            pl.BlockSpec((K, tn), lambda i, j: (0, j)),
            pl.BlockSpec((1, tn), lambda i, j: (0, j)),
        ],
        out_specs=pl.BlockSpec((tm, tn), lambda i, j: (i, j)),
        compiler_params=pltpu.CompilerParams(
            dimension_semantics=("parallel", "parallel")),
        cost_estimate=cost,
    )(xb, wb, b2)
    return y[:M] if Mp != M else y


# --------------- fused depthwise-3x3 + pointwise-1x1 kernels ----------------

def _dw_pw_body(tap_fn, w9_ref, bdw_ref, wpw_ref, bpw_ref, o_ref, y_scr, Hout, Wout):
    """9-tap depthwise accumulate (+bias+ReLU), then 1x1 MXU matmul (+bias+ReLU)."""
    C = bdw_ref.shape[-1]
    acc = jnp.zeros((Hout, Wout, C), jnp.float32)
    for kh in range(3):
        for kw in range(3):
            t = tap_fn(kh, kw).astype(jnp.float32)          # (Hout, Wout, C)
            acc = acc + t * w9_ref[3 * kh + kw]              # (1, 1, C) broadcast
    acc = jnp.maximum(acc + bdw_ref[...], 0.0)               # depthwise block ReLU
    # Relayout (Hout, Wout, C) -> (Hout*Wout, C) through a VMEM scratch
    # (avoids in-register reshapes with non-multiple-of-8 sublane counts).
    for h in range(Hout):
        y_scr[h * Wout:(h + 1) * Wout, :] = acc[h]
    y = y_scr[...].astype(jnp.bfloat16)
    out = jnp.dot(y, wpw_ref[...], preferred_element_type=jnp.float32)
    out = jnp.maximum(out + bpw_ref[...], 0.0)               # pointwise block ReLU
    o_ref[...] = out.astype(o_ref.dtype)


def _dwpw_s1_kernel(xp_ref, w9_ref, bdw_ref, wpw_ref, bpw_ref, o_ref, y_scr,
                    *, Hout, Wout):
    def tap_fn(kh, kw):
        return xp_ref[kh:kh + Hout, kw:kw + Wout, :]
    _dw_pw_body(tap_fn, w9_ref, bdw_ref, wpw_ref, bpw_ref, o_ref, y_scr, Hout, Wout)


def _dwpw_s2_kernel(p00_ref, p01_ref, p10_ref, p11_ref, w9_ref, bdw_ref, wpw_ref,
                    bpw_ref, o_ref, y_scr, *, Hout, Wout):
    phases = ((p00_ref, p01_ref), (p10_ref, p11_ref))
    def tap_fn(kh, kw):
        ref = phases[kh % 2][kw % 2]          # polyphase: row/col parity picks the phase
        dh, dw = kh // 2, kw // 2
        return ref[dh:dh + Hout, dw:dw + Wout, :]
    _dw_pw_body(tap_fn, w9_ref, bdw_ref, wpw_ref, bpw_ref, o_ref, y_scr, Hout, Wout)


def _dw_weight_args(w9, b_dw, wp, b_pw, C, Cout):
    return (w9.reshape(9, 1, 1, C).astype(jnp.float32),
            b_dw.reshape(1, 1, C).astype(jnp.float32),
            wp.astype(jnp.bfloat16),
            b_pw.reshape(1, Cout).astype(jnp.float32))


def _dw_weight_specs(C, Cout):
    return [
        pl.BlockSpec((9, 1, 1, C), lambda n: (0, 0, 0, 0)),
        pl.BlockSpec((1, 1, C), lambda n: (0, 0, 0)),
        pl.BlockSpec((C, Cout), lambda n: (0, 0)),
        pl.BlockSpec((1, Cout), lambda n: (0, 0)),
    ]


def dwpw_block(x, dw_params, pw_params, stride):
    """Fused: 3x3 depthwise conv (pad 1, stride 1/2, bias, ReLU) + 1x1 conv (bias, ReLU)."""
    w9, b_dw = dw_params
    wp, b_pw = pw_params
    N, H, W, C = x.shape
    Cout = wp.shape[1]

    if stride == 1:
        Hout, Wout = H, W
        xp = jnp.pad(x.astype(jnp.bfloat16), ((0, 0), (1, 1), (1, 1), (0, 0)))
        acts = (xp,)
        act_specs = [pl.BlockSpec((None, H + 2, W + 2, C), lambda n: (n, 0, 0, 0))]
        act_bytes = xp.size * 2
        kern = functools.partial(_dwpw_s1_kernel, Hout=Hout, Wout=Wout)
    else:
        Hout, Wout = H // 2, W // 2
        xp = jnp.pad(x.astype(jnp.bfloat16), ((0, 0), (1, 1), (1, 1), (0, 0)))
        # Four polyphase slices (total bytes == padded input); taps become static slices.
        acts = tuple(xp[:, a::2, b::2, :] for a in (0, 1) for b in (0, 1))
        Hp2, Wp2 = Hout + 1, Wout + 1
        act_specs = [pl.BlockSpec((None, Hp2, Wp2, C), lambda n: (n, 0, 0, 0))
                     for _ in range(4)]
        act_bytes = sum(a.size for a in acts) * 2
        kern = functools.partial(_dwpw_s2_kernel, Hout=Hout, Wout=Wout)

    cost = pl.CostEstimate(
        flops=N * Hout * Wout * C * (18 + 2 * Cout),
        transcendentals=0,
        bytes_accessed=act_bytes + 9 * C * 4 + C * 4 + C * Cout * 2 + Cout * 4
        + N * Hout * Wout * Cout * 2)

    out = pl.pallas_call(
        kern,
        out_shape=jax.ShapeDtypeStruct((N, Hout * Wout, Cout), jnp.bfloat16),
        grid=(N,),
        in_specs=act_specs + _dw_weight_specs(C, Cout),
        out_specs=pl.BlockSpec((None, Hout * Wout, Cout), lambda n: (n, 0, 0)),
        scratch_shapes=[pltpu.VMEM((Hout * Wout, C), jnp.float32)],
        compiler_params=pltpu.CompilerParams(dimension_semantics=("parallel",)),
        cost_estimate=cost,
    )(*acts, *_dw_weight_args(w9, b_dw, wp, b_pw, C, Cout))
    return out.reshape(N, Hout, Wout, Cout)


# ------------------------------ Conv blocks ---------------------------------

def pointwise_block(x, w, b, relu=True):
    """1x1 conv, stride 1, groups=1 (per-pixel channel matmul) + bias (+ ReLU)."""
    N, H, W, Cin = x.shape
    y = matmul_bias(x.reshape(N * H * W, Cin), w, b, relu=relu)
    return y.reshape(N, H, W, -1)


def _shifted_strided_taps(x, k, stride, pad):
    """Glue (stage0 only, 3-channel input): k*k shifted/strided views for im2col."""
    N, H, W, C = x.shape
    xp = jnp.pad(x, ((0, 0), (pad, pad), (pad, pad), (0, 0)))
    Hout = (H + 2 * pad - k) // stride + 1
    Wout = (W + 2 * pad - k) // stride + 1
    taps = []
    for kh in range(k):
        for kw in range(k):
            taps.append(xp[:, kh:kh + (Hout - 1) * stride + 1:stride,
                           kw:kw + (Wout - 1) * stride + 1:stride, :])
    return taps, Hout, Wout


def full_conv3x3_block(x, w, b, stride, relu=True):
    """Dense 3x3 conv (stage0, Cin=3): tiny im2col glue + MXU matmul kernel."""
    N, H, W, Cin = x.shape
    taps, Hout, Wout = _shifted_strided_taps(x, 3, stride, 1)
    patches = jnp.stack(taps, axis=3).reshape(N * Hout * Wout, 9 * Cin)
    y = matmul_bias(patches, w, b, relu=relu)
    return y.reshape(N, Hout, Wout, -1)


# -------------------------- MobileShuffle structure -------------------------

def concat_shuffle2(s, r):
    """channel_shuffle(cat([s, r], ch), groups=2) == interleave channels of s and r."""
    N, H, W, C = s.shape
    return jnp.stack([s, r], axis=-1).reshape(N, H, W, 2 * C)


def unit_forward(x, p, channels, stride):
    if stride == 2:
        residual = shortcut = x
    else:
        # channel_split: first half -> residual, second half -> shortcut
        residual, shortcut = x[..., :channels], x[..., channels:]
    r = pointwise_block(residual, *p["res0"], relu=True)
    r = dwpw_block(r, p["res1"], p["res2"], stride)        # fused res1 (dw) + res2 (1x1)
    if stride == 2:
        s = dwpw_block(shortcut, p["sc0"], p["sc1"], stride)  # fused sc0 (dw) + sc1 (1x1)
    else:
        s = shortcut
    return concat_shuffle2(s, r)


def mobileshuffle_forward(params, x_nchw):
    x = jnp.transpose(x_nchw, (0, 2, 3, 1)).astype(jnp.bfloat16)   # NCHW -> NHWC, bf16
    x = full_conv3x3_block(x, *params["stage0"], stride=2)
    for planes, units in zip(params["planes"], params["stages"]):
        for u in units:
            x = unit_forward(x, u["p"], planes, u["stride"])
    x = pointwise_block(x, *params["conv5"], relu=True)            # conv5: 1x1 + ReLU
    x = jnp.mean(x.astype(jnp.float32), axis=(1, 2))               # gap + flatten (glue)
    logits = matmul_bias(x, params["linear"][0], params["linear"][1],
                         relu=False, out_dtype=jnp.float32)
    return logits


# ----------------------------- Parameter init ------------------------------

def init_params(key, width_multipliers, num_blocks_per_stage, num_classes):
    keys = iter(jax.random.split(key, 512))

    def conv_w(cout, cin_per_group, k):
        fan_in = cin_per_group * k * k
        w = jax.random.normal(next(keys), (cout, cin_per_group, k, k), jnp.float32)
        return w * (2.0 / fan_in) ** 0.5

    def bias(cout):
        return jax.random.normal(next(keys), (cout,), jnp.float32) * 0.01

    def pw(cin, cout):           # 1x1 conv weight (Cout,Cin,1,1) -> (Cin, Cout)
        return (conv_w(cout, cin, 1)[:, :, 0, 0].T, bias(cout))

    def dw(c):                   # depthwise 3x3 weight (C,1,3,3) -> (9, C)
        return (conv_w(c, 1, 3)[:, 0].reshape(c, 9).T, bias(c))

    params = {}
    in_planes = int(24 * width_multipliers[0])
    # stage0 dense 3x3: (Cout, Cin, kh, kw) -> (kh, kw, Cin, Cout) -> (9*Cin, Cout)
    w0 = conv_w(in_planes, 3, 3)
    params["stage0"] = (w0.transpose(2, 3, 1, 0).reshape(9 * 3, in_planes), bias(in_planes))

    plane_list = [int(24 * width_multipliers[0]), int(48 * width_multipliers[1]),
                  int(96 * width_multipliers[2]), int(192 * width_multipliers[3])]
    stages = []
    for planes, nblocks in zip(plane_list, num_blocks_per_stage):
        units = []
        for stride in [2] + [1] * (nblocks - 1):
            u = {"stride": stride,
                 "p": {"res0": pw(planes, planes),
                       "res1": dw(planes),
                       "res2": pw(planes, planes)}}
            if stride == 2:
                u["p"]["sc0"] = dw(planes)
                u["p"]["sc1"] = pw(planes, planes)
            units.append(u)
        stages.append(units)
    params["stages"] = stages
    params["planes"] = plane_list

    params["conv5"] = pw(int(192 * width_multipliers[3]) * 2, 1024)
    wl = jax.random.normal(next(keys), (num_classes, 1024), jnp.float32) * (1.0 / 1024) ** 0.5
    params["linear"] = (wl.T, bias(num_classes))
    return params


# ---------------------------------- main ------------------------------------

if __name__ == "__main__":
    width_multipliers = [1.0, 1.0, 1.0, 1.0]
    num_blocks_per_stage = [2, 2, 1, 1]   # small config (exercises stride-2 and stride-1 units)
    num_classes = 16

    params = init_params(jax.random.PRNGKey(42), width_multipliers,
                         num_blocks_per_stage, num_classes)

    # input is NCHW, matching the PyTorch reference (3-channel image, 32x32)
    x = jax.random.normal(jax.random.PRNGKey(0), (2, 3, 32, 32), jnp.float32)

    fwd = jax.jit(lambda inp: mobileshuffle_forward(params, inp))
    out = fwd(x)
    jax.block_until_ready(out)

    assert out.shape == (2, num_classes)
    assert bool(jnp.all(jnp.isfinite(out)))
    print("KERNEL_OK")
</pallas_src>

<mosaic_0001>
module attributes {stable_mosaic.version = 11 : i64} {
  func.func @_matmul_bias_kernel(%arg0: i32, %arg1: i32, %arg2: memref<256x27xbf16, #tpu.memory_space<vmem>>, %arg3: memref<27x24xbf16, #tpu.memory_space<vmem>>, %arg4: memref<1x24xf32, #tpu.memory_space<vmem>>, %arg5: memref<256x24xbf16, #tpu.memory_space<vmem>>) attributes {dimension_semantics = [#tpu.dimension_semantics<parallel>, #tpu.dimension_semantics<parallel>], iteration_bounds = array<i64: 2, 1>, scalar_prefetch = 0 : i64, scratch_operands = 0 : i64, tpu.core_type = #tpu.core_type<tc>, window_params = [{transform_indices = @transform_0, window_bounds = array<i64: 256, 27>}, {transform_indices = @transform_1, window_bounds = array<i64: 27, 24>}, {transform_indices = @transform_2, window_bounds = array<i64: 1, 24>}, {transform_indices = @transform_3, window_bounds = array<i64: 256, 24>}]} {
    %c0 = arith.constant 0 : index
    %c0_0 = arith.constant 0 : index
    %0 = vector.load %arg2[%c0, %c0_0] : memref<256x27xbf16, #tpu.memory_space<vmem>>, vector<256x27xbf16>
    %c0_1 = arith.constant 0 : index
    %c0_2 = arith.constant 0 : index
    %1 = vector.load %arg3[%c0_1, %c0_2] : memref<27x24xbf16, #tpu.memory_space<vmem>>, vector<27x24xbf16>
    %cst = arith.constant dense<0.000000e+00> : vector<256x24xf32>
    %2 = tpu.matmul %0, %1, %cst {dimension_numbers = #tpu.dot_dimension_numbers<[1], [0], [0], [1], [0, 0, 1, 1], [], []>} : vector<256x27xbf16>, vector<27x24xbf16>, vector<256x24xf32> -> vector<256x24xf32>
    %c0_3 = arith.constant 0 : index
    %c0_4 = arith.constant 0 : index
    %3 = vector.load %arg4[%c0_3, %c0_4] : memref<1x24xf32, #tpu.memory_space<vmem>>, vector<1x24xf32>
    %4 = vector.broadcast %3 : vector<1x24xf32> to vector<256x24xf32>
    %5 = arith.addf %2, %4 : vector<256x24xf32>
    %cst_5 = arith.constant 0.000000e+00 : f32
    %6 = vector.broadcast %cst_5 : f32 to vector<256x24xf32>
    %7 = arith.maximumf %5, %6 : vector<256x24xf32>
    %8 = arith.truncf %7 : vector<256x24xf32> to vector<256x24xbf16>
    %c0_6 = arith.constant 0 : index
    %c0_7 = arith.constant 0 : index
    %9 = vector.load %arg5[%c0_6, %c0_7] : memref<256x24xbf16, #tpu.memory_space<vmem>>, vector<256x24xbf16>
    tpu.vector_store %arg5[%c0_6, %c0_7], %8 {strides = array<i32>} : memref<256x24xbf16, #tpu.memory_space<vmem>>, vector<256x24xbf16>,
    return
  }
  func.func @transform_0(%arg0: i32, %arg1: i32) -> (i32, i32) {
    %c0_i32 = arith.constant 0 : i32
    %c0_i32_0 = arith.constant 0 : i32
    return %arg0, %c0_i32 : i32, i32
  }
  func.func @transform_1(%arg0: i32, %arg1: i32) -> (i32, i32) {
    %c0_i32 = arith.constant 0 : i32
    %c0_i32_0 = arith.constant 0 : i32
    return %c0_i32, %arg1 : i32, i32
  }
  func.func @transform_2(%arg0: i32, %arg1: i32) -> (i32, i32) {
    %c0_i32 = arith.constant 0 : i32
    %c0_i32_0 = arith.constant 0 : i32
    return %c0_i32, %arg1 : i32, i32
  }
  func.func @transform_3(%arg0: i32, %arg1: i32) -> (i32, i32) {
    %c0_i32 = arith.constant 0 : i32
    return %arg0, %arg1 : i32, i32
  }
}

module attributes {stable_mosaic.version = 11 : i64} {
  func.func @_matmul_bias_kernel(%arg0: i32, %arg1: i32, %arg2: memref<256x24xbf16, #tpu.memory_space<vmem>>, %arg3: memref<24x24xbf16, #tpu.memory_space<vmem>>, %arg4: memref<1x24xf32, #tpu.memory_space<vmem>>, %arg5: memref<256x24xbf16, #tpu.memory_space<vmem>>) attributes {dimension_semantics = [#tpu.dimension_semantics<parallel>, #tpu.dimension_semantics<parallel>], iteration_bounds = array<i64: 2, 1>, scalar_prefetch = 0 : i64, scratch_operands = 0 : i64, tpu.core_type = #tpu.core_type<tc>, window_params = [{transform_indices = @transform_0, window_bounds = array<i64: 256, 24>}, {transform_indices = @transform_1, window_bounds = array<i64: 24, 24>}, {transform_indices = @transform_2, window_bounds = array<i64: 1, 24>}, {transform_indices = @transform_3, window_bounds = array<i64: 256, 24>}]} {
    %c0 = arith.constant 0 : index
    %c0_0 = arith.constant 0 : index
    %0 = vector.load %arg2[%c0, %c0_0] : memref<256x24xbf16, #tpu.memory_space<vmem>>, vector<256x24xbf16>
    %c0_1 = arith.constant 0 : index
    %c0_2 = arith.constant 0 : index
    %1 = vector.load %arg3[%c0_1, %c0_2] : memref<24x24xbf16, #tpu.memory_space<vmem>>, vector<24x24xbf16>
    %cst = arith.constant dense<0.000000e+00> : vector<256x24xf32>
    %2 = tpu.matmul %0, %1, %cst {dimension_numbers = #tpu.dot_dimension_numbers<[1], [0], [0], [1], [0, 0, 1, 1], [], []>} : vector<256x24xbf16>, vector<24x24xbf16>, vector<256x24xf32> -> vector<256x24xf32>
    %c0_3 = arith.constant 0 : index
    %c0_4 = arith.constant 0 : index
    %3 = vector.load %arg4[%c0_3, %c0_4] : memref<1x24xf32, #tpu.memory_space<vmem>>, vector<1x24xf32>
    %4 = vector.broadcast %3 : vector<1x24xf32> to vector<256x24xf32>
    %5 = arith.addf %2, %4 : vector<256x24xf32>
    %cst_5 = arith.constant 0.000000e+00 : f32
    %6 = vector.broadcast %cst_5 : f32 to vector<256x24xf32>
    %7 = arith.maximumf %5, %6 : vector<256x24xf32>
    %8 = arith.truncf %7 : vector<256x24xf32> to vector<256x24xbf16>
    %c0_6 = arith.constant 0 : index
    %c0_7 = arith.constant 0 : index
    %9 = vector.load %arg5[%c0_6, %c0_7] : memref<256x24xbf16, #tpu.memory_space<vmem>>, vector<256x24xbf16>
    tpu.vector_store %arg5[%c0_6, %c0_7], %8 {strides = array<i32>} : memref<256x24xbf16, #tpu.memory_space<vmem>>, vector<256x24xbf16>,
    return
  }
  func.func @transform_0(%arg0: i32, %arg1: i32) -> (i32, i32) {
    %c0_i32 = arith.constant 0 : i32
    %c0_i32_0 = arith.constant 0 : i32
    return %arg0, %c0_i32 : i32, i32
  }
  func.func @transform_1(%arg0: i32, %arg1: i32) -> (i32, i32) {
    %c0_i32 = arith.constant 0 : i32
    %c0_i32_0 = arith.constant 0 : i32
    return %c0_i32, %arg1 : i32, i32
  }
  func.func @transform_2(%arg0: i32, %arg1: i32) -> (i32, i32) {
    %c0_i32 = arith.constant 0 : i32
    %c0_i32_0 = arith.constant 0 : i32
    return %c0_i32, %arg1 : i32, i32
  }
  func.func @transform_3(%arg0: i32, %arg1: i32) -> (i32, i32) {
    %c0_i32 = arith.constant 0 : i32
    return %arg0, %arg1 : i32, i32
  }
}

module attributes {stable_mosaic.version = 11 : i64} {
  func.func @_dwpw_s2_kernel(%arg0: i32, %arg1: memref<1x9x9x24xbf16, #tpu.memory_space<vmem>>, %arg2: memref<1x9x9x24xbf16, #tpu.memory_space<vmem>>, %arg3: memref<1x9x9x24xbf16, #tpu.memory_space<vmem>>, %arg4: memref<1x9x9x24xbf16, #tpu.memory_space<vmem>>, %arg5: memref<9x1x1x24xf32, #tpu.memory_space<vmem>>, %arg6: memref<1x1x24xf32, #tpu.memory_space<vmem>>, %arg7: memref<24x24xbf16, #tpu.memory_space<vmem>>, %arg8: memref<1x24xf32, #tpu.memory_space<vmem>>, %arg9: memref<1x64x24xbf16, #tpu.memory_space<vmem>>, %arg10: memref<64x24xf32, #tpu.memory_space<vmem>>) attributes {dimension_semantics = [#tpu.dimension_semantics<parallel>], iteration_bounds = array<i64: 2>, scalar_prefetch = 0 : i64, scratch_operands = 1 : i64, tpu.core_type = #tpu.core_type<tc>, window_params = [{transform_indices = @transform_0, window_bounds = array<i64: 1, 9, 9, 24>}, {transform_indices = @transform_1, window_bounds = array<i64: 1, 9, 9, 24>}, {transform_indices = @transform_2, window_bounds = array<i64: 1, 9, 9, 24>}, {transform_indices = @transform_3, window_bounds = array<i64: 1, 9, 9, 24>}, {pipeline_mode = #tpu.pipeline_mode<synchronous>, transform_indices = @transform_4, window_bounds = array<i64: 9, 1, 1, 24>}, {pipeline_mode = #tpu.pipeline_mode<synchronous>, transform_indices = @transform_5, window_bounds = array<i64: 1, 1, 24>}, {pipeline_mode = #tpu.pipeline_mode<synchronous>, transform_indices = @transform_6, window_bounds = array<i64: 24, 24>}, {pipeline_mode = #tpu.pipeline_mode<synchronous>, transform_indices = @transform_7, window_bounds = array<i64: 1, 24>}, {transform_indices = @transform_8, window_bounds = array<i64: 1, 64, 24>}]} {
    %cst = arith.constant 0.000000e+00 : f32
    %0 = vector.broadcast %cst : f32 to vector<8x8x24xf32>
    %c0 = arith.constant 0 : index
    %c0_0 = arith.constant 0 : index
    %c0_1 = arith.constant 0 : index
    %c0_2 = arith.constant 0 : index
    %1 = vector.load %arg1[%c0, %c0_0, %c0_1, %c0_2] : memref<1x9x9x24xbf16, #tpu.memory_space<vmem>>, vector<1x8x8x24xbf16>
    %2 = vector.shape_cast %1 : vector<1x8x8x24xbf16> to vector<8x8x24xbf16>
    %3 = arith.extf %2 : vector<8x8x24xbf16> to vector<8x8x24xf32>
    %c0_3 = arith.constant 0 : index
    %c0_4 = arith.constant 0 : index
    %c0_5 = arith.constant 0 : index
    %c0_6 = arith.constant 0 : index
    %4 = vector.load %arg5[%c0_3, %c0_4, %c0_5, %c0_6] : memref<9x1x1x24xf32, #tpu.memory_space<vmem>>, vector<1x1x1x24xf32>
    %5 = vector.shape_cast %4 : vector<1x1x1x24xf32> to vector<1x1x24xf32>
    %6 = vector.broadcast %5 : vector<1x1x24xf32> to vector<8x8x24xf32>
    %7 = arith.mulf %3, %6 : vector<8x8x24xf32>
    %8 = arith.addf %0, %7 : vector<8x8x24xf32>
    %c0_7 = arith.constant 0 : index
    %c0_8 = arith.constant 0 : index
    %c0_9 = arith.constant 0 : index
    %c0_10 = arith.constant 0 : index
    %9 = vector.load %arg2[%c0_7, %c0_8, %c0_9, %c0_10] : memref<1x9x9x24xbf16, #tpu.memory_space<vmem>>, vector<1x8x8x24xbf16>
    %10 = vector.shape_cast %9 : vector<1x8x8x24xbf16> to vector<8x8x24xbf16>
    %11 = arith.extf %10 : vector<8x8x24xbf16> to vector<8x8x24xf32>
    %c1 = arith.constant 1 : index
    %c0_11 = arith.constant 0 : index
    %c0_12 = arith.constant 0 : index
    %c0_13 = arith.constant 0 : index
    %12 = vector.load %arg5[%c1, %c0_11, %c0_12, %c0_13] : memref<9x1x1x24xf32, #tpu.memory_space<vmem>>, vector<1x1x1x24xf32>
    %13 = vector.shape_cast %12 : vector<1x1x1x24xf32> to vector<1x1x24xf32>
    %14 = vector.broadcast %13 : vector<1x1x24xf32> to vector<8x8x24xf32>
    %15 = arith.mulf %11, %14 : vector<8x8x24xf32>
    %16 = arith.addf %8, %15 : vector<8x8x24xf32>
    %c0_14 = arith.constant 0 : index
    %c0_15 = arith.constant 0 : index
    %c1_16 = arith.constant 1 : index
    %c0_17 = arith.constant 0 : index
    %17 = vector.load %arg1[%c0_14, %c0_15, %c1_16, %c0_17] : memref<1x9x9x24xbf16, #tpu.memory_space<vmem>>, vector<1x8x8x24xbf16>
    %18 = vector.shape_cast %17 : vector<1x8x8x24xbf16> to vector<8x8x24xbf16>
    %19 = arith.extf %18 : vector<8x8x24xbf16> to vector<8x8x24xf32>
    %c2 = arith.constant 2 : index
    %c0_18 = arith.constant 0 : index
    %c0_19 = arith.constant 0 : index
    %c0_20 = arith.constant 0 : index
    %20 = vector.load %arg5[%c2, %c0_18, %c0_19, %c0_20] : memref<9x1x1x24xf32, #tpu.memory_space<vmem>>, vector<1x1x1x24xf32>
    %21 = vector.shape_cast %20 : vector<1x1x1x24xf32> to vector<1x1x24xf32>
    %22 = vector.broadcast %21 : vector<1x1x24xf32> to vector<8x8x24xf32>
    %23 = arith.mulf %19, %22 : vector<8x8x24xf32>
    %24 = arith.addf %16, %23 : vector<8x8x24xf32>
    %c0_21 = arith.constant 0 : index
    %c0_22 = arith.constant 0 : index
    %c0_23 = arith.constant 0 : index
    %c0_24 = arith.constant 0 : index
    %25 = vector.load %arg3[%c0_21, %c0_22, %c0_23, %c0_24] : memref<1x9x9x24xbf16, #tpu.memory_space<vmem>>, vector<1x8x8x24xbf16>
    %26 = vector.shape_cast %25 : vector<1x8x8x24xbf16> to vector<8x8x24xbf16>
    %27 = arith.extf %26 : vector<8x8x24xbf16> to vector<8x8x24xf32>
    %c3 = arith.constant 3 : index
    %c0_25 = arith.constant 0 : index
    %c0_26 = arith.constant 0 : index
    %c0_27 = arith.constant 0 : index
    %28 = vector.load %arg5[%c3, %c0_25, %c0_26, %c0_27] : memref<9x1x1x24xf32, #tpu.memory_space<vmem>>, vector<1x1x1x24xf32>
    %29 = vector.shape_cast %28 : vector<1x1x1x24xf32> to vector<1x1x24xf32>
    %30 = vector.broadcast %29 : vector<1x1x24xf32> to vector<8x8x24xf32>
    %31 = arith.mulf %27, %30 : vector<8x8x24xf32>
    %32 = arith.addf %24, %31 : vector<8x8x24xf32>
    %c0_28 = arith.constant 0 : index
    %c0_29 = arith.constant 0 : index
    %c0_30 = arith.constant 0 : index
    %c0_31 = arith.constant 0 : index
    %33 = vector.load %arg4[%c0_28, %c0_29, %c0_30, %c0_31] : memref<1x9x9x24xbf16, #tpu.memory_space<vmem>>, vector<1x8x8x24xbf16>
    %34 = vector.shape_cast %33 : vector<1x8x8x24xbf16> to vector<8x8x24xbf16>
    %35 = arith.extf %34 : vector<8x8x24xbf16> to vector<8x8x24xf32>
    %c4 = arith.constant 4 : index
    %c0_32 = arith.constant 0 : index
    %c0_33 = arith.constant 0 : index
    %c0_34 = arith.constant 0 : index
    %36 = vector.load %arg5[%c4, %c0_32, %c0_33, %c0_34] : memref<9x1x1x24xf32, #tpu.memory_space<vmem>>, vector<1x1x1x24xf32>
    %37 = vector.shape_cast %36 : vector<1x1x1x24xf32> to vector<1x1x24xf32>
    %38 = vector.broadcast %37 : vector<1x1x24xf32> to vector<8x8x24xf32>
    %39 = arith.mulf %35, %38 : vector<8x8x24xf32>
    %40 = arith.addf %32, %39 : vector<8x8x24xf32>
    %c0_35 = arith.constant 0 : index
    %c0_36 = arith.constant 0 : index
    %c1_37 = arith.constant 1 : index
    %c0_38 = arith.constant 0 : index
    %41 = vector.load %arg3[%c0_35, %c0_36, %c1_37, %c0_38] : memref<1x9x9x24xbf16, #tpu.memory_space<vmem>>, vector<1x8x8x24xbf16>
    %42 = vector.shape_cast %41 : vector<1x8x8x24xbf16> to vector<8x8x24xbf16>
    %43 = arith.extf %42 : vector<8x8x24xbf16> to vector<8x8x24xf32>
    %c5 = arith.constant 5 : index
    %c0_39 = arith.constant 0 : index
    %c0_40 = arith.constant 0 : index
    %c0_41 = arith.constant 0 : index
    %44 = vector.load %arg5[%c5, %c0_39, %c0_40, %c0_41] : memref<9x1x1x24xf32, #tpu.memory_space<vmem>>, vector<1x1x1x24xf32>
    %45 = vector.shape_cast %44 : vector<1x1x1x24xf32> to vector<1x1x24xf32>
    %46 = vector.broadcast %45 : vector<1x1x24xf32> to vector<8x8x24xf32>
    %47 = arith.mulf %43, %46 : vector<8x8x24xf32>
    %48 = arith.addf %40, %47 : vector<8x8x24xf32>
    %c0_42 = arith.constant 0 : index
    %c1_43 = arith.constant 1 : index
    %c0_44 = arith.constant 0 : index
    %c0_45 = arith.constant 0 : index
    %49 = vector.load %arg1[%c0_42, %c1_43, %c0_44, %c0_45] : memref<1x9x9x24xbf16, #tpu.memory_space<vmem>>, vector<1x8x8x24xbf16>
    %50 = vector.shape_cast %49 : vector<1x8x8x24xbf16> to vector<8x8x24xbf16>
    %51 = arith.extf %50 : vector<8x8x24xbf16> to vector<8x8x24xf32>
    %c6 = arith.constant 6 : index
    %c0_46 = arith.constant 0 : index
    %c0_47 = arith.constant 0 : index
    %c0_48 = arith.constant 0 : index
    %52 = vector.load %arg5[%c6, %c0_46, %c0_47, %c0_48] : memref<9x1x1x24xf32, #tpu.memory_space<vmem>>, vector<1x1x1x24xf32>
    %53 = vector.shape_cast %52 : vector<1x1x1x24xf32> to vector<1x1x24xf32>
    %54 = vector.broadcast %53 : vector<1x1x24xf32> to vector<8x8x24xf32>
    %55 = arith.mulf %51, %54 : vector<8x8x24xf32>
    %56 = arith.addf %48, %55 : vector<8x8x24xf32>
    %c0_49 = arith.constant 0 : index
    %c1_50 = arith.constant 1 : index
    %c0_51 = arith.constant 0 : index
    %c0_52 = arith.constant 0 : index
    %57 = vector.load %arg2[%c0_49, %c1_50, %c0_51, %c0_52] : memref<1x9x9x24xbf16, #tpu.memory_space<vmem>>, vector<1x8x8x24xbf16>
    %58 = vector.shape_cast %57 : vector<1x8x8x24xbf16> to vector<8x8x24xbf16>
    %59 = arith.extf %58 : vector<8x8x24xbf16> to vector<8x8x24xf32>
    %c7 = arith.constant 7 : index
    %c0_53 = arith.constant 0 : index
    %c0_54 = arith.constant 0 : index
    %c0_55 = arith.constant 0 : index
    %60 = vector.load %arg5[%c7, %c0_53, %c0_54, %c0_55] : memref<9x1x1x24xf32, #tpu.memory_space<vmem>>, vector<1x1x1x24xf32>
    %61 = vector.shape_cast %60 : vector<1x1x1x24xf32> to vector<1x1x24xf32>
    %62 = vector.broadcast %61 : vector<1x1x24xf32> to vector<8x8x24xf32>
    %63 = arith.mulf %59, %62 : vector<8x8x24xf32>
    %64 = arith.addf %56, %63 : vector<8x8x24xf32>
    %c0_56 = arith.constant 0 : index
    %c1_57 = arith.constant 1 : index
    %c1_58 = arith.constant 1 : index
    %c0_59 = arith.constant 0 : index
    %65 = vector.load %arg1[%c0_56, %c1_57, %c1_58, %c0_59] : memref<1x9x9x24xbf16, #tpu.memory_space<vmem>>, vector<1x8x8x24xbf16>
    %66 = vector.shape_cast %65 : vector<1x8x8x24xbf16> to vector<8x8x24xbf16>
    %67 = arith.extf %66 : vector<8x8x24xbf16> to vector<8x8x24xf32>
    %c8 = arith.constant 8 : index
    %c0_60 = arith.constant 0 : index
    %c0_61 = arith.constant 0 : index
    %c0_62 = arith.constant 0 : index
    %68 = vector.load %arg5[%c8, %c0_60, %c0_61, %c0_62] : memref<9x1x1x24xf32, #tpu.memory_space<vmem>>, vector<1x1x1x24xf32>
    %69 = vector.shape_cast %68 : vector<1x1x1x24xf32> to vector<1x1x24xf32>
    %70 = vector.broadcast %69 : vector<1x1x24xf32> to vector<8x8x24xf32>
    %71 = arith.mulf %67, %70 : vector<8x8x24xf32>
    %72 = arith.addf %64, %71 : vector<8x8x24xf32>
    %c0_63 = arith.constant 0 : index
    %c0_64 = arith.constant 0 : index
    %c0_65 = arith.constant 0 : index
    %73 = vector.load %arg6[%c0_63, %c0_64, %c0_65] : memref<1x1x24xf32, #tpu.memory_space<vmem>>, vector<1x1x24xf32>
    %74 = vector.broadcast %73 : vector<1x1x24xf32> to vector<8x8x24xf32>
    %75 = arith.addf %72, %74 : vector<8x8x24xf32>
    %cst_66 = arith.constant 0.000000e+00 : f32
    %76 = vector.broadcast %cst_66 : f32 to vector<8x8x24xf32>
    %77 = arith.maximumf %75, %76 : vector<8x8x24xf32>
    %78 = vector.extract_strided_slice %77 {offsets = [0, 0, 0], sizes = [1, 8, 24], strides = [1, 1, 1]} : vector<8x8x24xf32> to vector<1x8x24xf32>
    %79 = vector.shape_cast %78 : vector<1x8x24xf32> to vector<8x24xf32>
    %c0_67 = arith.constant 0 : index
    %c0_68 = arith.constant 0 : index
    %80 = vector.load %arg10[%c0_67, %c0_68] : memref<64x24xf32, #tpu.memory_space<vmem>>, vector<8x24xf32>
    tpu.vector_store %arg10[%c0_67, %c0_68], %79 {strides = array<i32>} : memref<64x24xf32, #tpu.memory_space<vmem>>, vector<8x24xf32>,
    %81 = vector.extract_strided_slice %77 {offsets = [1, 0, 0], sizes = [1, 8, 24], strides = [1, 1, 1]} : vector<8x8x24xf32> to vector<1x8x24xf32>
    %82 = vector.shape_cast %81 : vector<1x8x24xf32> to vector<8x24xf32>
    %c8_69 = arith.constant 8 : index
    %c0_70 = arith.constant 0 : index
    %83 = vector.load %arg10[%c8_69, %c0_70] : memref<64x24xf32, #tpu.memory_space<vmem>>, vector<8x24xf32>
    tpu.vector_store %arg10[%c8_69, %c0_70], %82 {strides = array<i32>} : memref<64x24xf32, #tpu.memory_space<vmem>>, vector<8x24xf32>,
    %84 = vector.extract_strided_slice %77 {offsets = [2, 0, 0], sizes = [1, 8, 24], strides = [1, 1, 1]} : vector<8x8x24xf32> to vector<1x8x24xf32>
    %85 = vector.shape_cast %84 : vector<1x8x24xf32> to vector<8x24xf32>
    %c16 = arith.constant 16 : index
    %c0_71 = arith.constant 0 : index
    %86 = vector.load %arg10[%c16, %c0_71] : memref<64x24xf32, #tpu.memory_space<vmem>>, vector<8x24xf32>
    tpu.vector_store %arg10[%c16, %c0_71], %85 {strides = array<i32>} : memref<64x24xf32, #tpu.memory_space<vmem>>, vector<8x24xf32>,
    %87 = vector.extract_strided_slice %77 {offsets = [3, 0, 0], sizes = [1, 8, 24], strides = [1, 1, 1]} : vector<8x8x24xf32> to vector<1x8x24xf32>
    %88 = vector.shape_cast %87 : vector<1x8x24xf32> to vector<8x24xf32>
    %c24 = arith.constant 24 : index
    %c0_72 = arith.constant 0 : index
    %89 = vector.load %arg10[%c24, %c0_72] : memref<64x24xf32, #tpu.memory_space<vmem>>, vector<8x24xf32>
    tpu.vector_store %arg10[%c24, %c0_72], %88 {strides = array<i32>} : memref<64x24xf32, #tpu.memory_space<vmem>>, vector<8x24xf32>,
    %90 = vector.extract_strided_slice %77 {offsets = [4, 0, 0], sizes = [1, 8, 24], strides = [1, 1, 1]} : vector<8x8x24xf32> to vector<1x8x24xf32>
    %91 = vector.shape_cast %90 : vector<1x8x24xf32> to vector<8x24xf32>
    %c32 = arith.constant 32 : index
    %c0_73 = arith.constant 0 : index
    %92 = vector.load %arg10[%c32, %c0_73] : memref<64x24xf32, #tpu.memory_space<vmem>>, vector<8x24xf32>
    tpu.vector_store %arg10[%c32, %c0_73], %91 {strides = array<i32>} : memref<64x24xf32, #tpu.memory_space<vmem>>, vector<8x24xf32>,
    %93 = vector.extract_strided_slice %77 {offsets = [5, 0, 0], sizes = [1, 8, 24], strides = [1, 1, 1]} : vector<8x8x24xf32> to vector<1x8x24xf32>
    %94 = vector.shape_cast %93 : vector<1x8x24xf32> to vector<8x24xf32>
    %c40 = arith.constant 40 : index
    %c0_74 = arith.constant 0 : index
    %95 = vector.load %arg10[%c40, %c0_74] : memref<64x24xf32, #tpu.memory_space<vmem>>, vector<8x24xf32>
    tpu.vector_store %arg10[%c40, %c0_74], %94 {strides = array<i32>} : memref<64x24xf32, #tpu.memory_space<vmem>>, vector<8x24xf32>,
    %96 = vector.extract_strided_slice %77 {offsets = [6, 0, 0], sizes = [1, 8, 24], strides = [1, 1, 1]} : vector<8x8x24xf32> to vector<1x8x24xf32>
    %97 = vector.shape_cast %96 : vector<1x8x24xf32> to vector<8x24xf32>
    %c48 = arith.constant 48 : index
    %c0_75 = arith.constant 0 : index
    %98 = vector.load %arg10[%c48, %c0_75] : memref<64x24xf32, #tpu.memory_space<vmem>>, vector<8x24xf32>
    tpu.vector_store %arg10[%c48, %c0_75], %97 {strides = array<i32>} : memref<64x24xf32, #tpu.memory_space<vmem>>, vector<8x24xf32>,
    %99 = vector.extract_strided_slice %77 {offsets = [7, 0, 0], sizes = [1, 8, 24], strides = [1, 1, 1]} : vector<8x8x24xf32> to vector<1x8x24xf32>
    %100 = vector.shape_cast %99 : vector<1x8x24xf32> to vector<8x24xf32>
    %c56 = arith.constant 56 : index
    %c0_76 = arith.constant 0 : index
    %101 = vector.load %arg10[%c56, %c0_76] : memref<64x24xf32, #tpu.memory_space<vmem>>, vector<8x24xf32>
    tpu.vector_store %arg10[%c56, %c0_76], %100 {strides = array<i32>} : memref<64x24xf32, #tpu.memory_space<vmem>>, vector<8x24xf32>,
    %c0_77 = arith.constant 0 : index
    %c0_78 = arith.constant 0 : index
    %102 = vector.load %arg10[%c0_77, %c0_78] : memref<64x24xf32, #tpu.memory_space<vmem>>, vector<64x24xf32>
    %103 = arith.truncf %102 : vector<64x24xf32> to vector<64x24xbf16>
    %c0_79 = arith.constant 0 : index
    %c0_80 = arith.constant 0 : index
    %104 = vector.load %arg7[%c0_79, %c0_80] : memref<24x24xbf16, #tpu.memory_space<vmem>>, vector<24x24xbf16>
    %cst_81 = arith.constant dense<0.000000e+00> : vector<64x24xf32>
    %105 = tpu.matmul %103, %104, %cst_81 {dimension_numbers = #tpu.dot_dimension_numbers<[1], [0], [0], [1], [0, 0, 1, 1], [], []>} : vector<64x24xbf16>, vector<24x24xbf16>, vector<64x24xf32> -> vector<64x24xf32>
    %c0_82 = arith.constant 0 : index
    %c0_83 = arith.constant 0 : index
    %106 = vector.load %arg8[%c0_82, %c0_83] : memref<1x24xf32, #tpu.memory_space<vmem>>, vector<1x24xf32>
    %107 = vector.broadcast %106 : vector<1x24xf32> to vector<64x24xf32>
    %108 = arith.addf %105, %107 : vector<64x24xf32>
    %cst_84 = arith.constant 0.000000e+00 : f32
    %109 = vector.broadcast %cst_84 : f32 to vector<64x24xf32>
    %110 = arith.maximumf %108, %109 : vector<64x24xf32>
    %111 = arith.truncf %110 : vector<64x24xf32> to vector<64x24xbf16>
    %c0_85 = arith.constant 0 : index
    %c0_86 = arith.constant 0 : index
    %c0_87 = arith.constant 0 : index
    %112 = vector.load %arg9[%c0_85, %c0_86, %c0_87] : memref<1x64x24xbf16, #tpu.memory_space<vmem>>, vector<1x64x24xbf16>
    %113 = vector.shape_cast %112 : vector<1x64x24xbf16> to vector<64x24xbf16>
    %114 = vector.shape_cast %111 : vector<64x24xbf16> to vector<1x64x24xbf16>
    tpu.vector_store %arg9[%c0_85, %c0_86, %c0_87], %114 {strides = array<i32>} : memref<1x64x24xbf16, #tpu.memory_space<vmem>>, vector<1x64x24xbf16>,
    return
  }
  func.func @transform_0(%arg0: i32) -> (i32, i32, i32, i32) {
    %c0_i32 = arith.constant 0 : i32
    %c0_i32_0 = arith.constant 0 : i32
    %c0_i32_1 = arith.constant 0 : i32
    %c0_i32_2 = arith.constant 0 : i32
    return %arg0, %c0_i32, %c0_i32_0, %c0_i32_1 : i32, i32, i32, i32
  }
  func.func @transform_1(%arg0: i32) -> (i32, i32, i32, i32) {
    %c0_i32 = arith.constant 0 : i32
    %c0_i32_0 = arith.constant 0 : i32
    %c0_i32_1 = arith.constant 0 : i32
    %c0_i32_2 = arith.constant 0 : i32
    return %arg0, %c0_i32, %c0_i32_0, %c0_i32_1 : i32, i32, i32, i32
  }
  func.func @transform_2(%arg0: i32) -> (i32, i32, i32, i32) {
    %c0_i32 = arith.constant 0 : i32
    %c0_i32_0 = arith.constant 0 : i32
    %c0_i32_1 = arith.constant 0 : i32
    %c0_i32_2 = arith.constant 0 : i32
    return %arg0, %c0_i32, %c0_i32_0, %c0_i32_1 : i32, i32, i32, i32
  }
  func.func @transform_3(%arg0: i32) -> (i32, i32, i32, i32) {
    %c0_i32 = arith.constant 0 : i32
    %c0_i32_0 = arith.constant 0 : i32
    %c0_i32_1 = arith.constant 0 : i32
    %c0_i32_2 = arith.constant 0 : i32
    return %arg0, %c0_i32, %c0_i32_0, %c0_i32_1 : i32, i32, i32, i32
  }
  func.func @transform_4(%arg0: i32) -> (i32, i32, i32, i32) {
    %c0_i32 = arith.constant 0 : i32
    %c0_i32_0 = arith.constant 0 : i32
    %c0_i32_1 = arith.constant 0 : i32
    %c0_i32_2 = arith.constant 0 : i32
    %c0_i32_3 = arith.constant 0 : i32
    return %c0_i32, %c0_i32_0, %c0_i32_1, %c0_i32_2 : i32, i32, i32, i32
  }
  func.func @transform_5(%arg0: i32) -> (i32, i32, i32) {
    %c0_i32 = arith.constant 0 : i32
    %c0_i32_0 = arith.constant 0 : i32
    %c0_i32_1 = arith.constant 0 : i32
    %c0_i32_2 = arith.constant 0 : i32
    return %c0_i32, %c0_i32_0, %c0_i32_1 : i32, i32, i32
  }
  func.func @transform_6(%arg0: i32) -> (i32, i32) {
    %c0_i32 = arith.constant 0 : i32
    %c0_i32_0 = arith.constant 0 : i32
    %c0_i32_1 = arith.constant 0 : i32
    return %c0_i32, %c0_i32_0 : i32, i32
  }
  func.func @transform_7(%arg0: i32) -> (i32, i32) {
    %c0_i32 = arith.constant 0 : i32
    %c0_i32_0 = arith.constant 0 : i32
    %c0_i32_1 = arith.constant 0 : i32
    return %c0_i32, %c0_i32_0 : i32, i32
  }
  func.func @transform_8(%arg0: i32) -> (i32, i32, i32) {
    %c0_i32 = arith.constant 0 : i32
    %c0_i32_0 = arith.constant 0 : i32
    %c0_i32_1 = arith.constant 0 : i32
    return %arg0, %c0_i32, %c0_i32_0 : i32, i32, i32
  }
}

module attributes {stable_mosaic.version = 11 : i64} {
  func.func @_matmul_bias_kernel(%arg0: i32, %arg1: i32, %arg2: memref<64x24xbf16, #tpu.memory_space<vmem>>, %arg3: memref<24x24xbf16, #tpu.memory_space<vmem>>, %arg4: memref<1x24xf32, #tpu.memory_space<vmem>>, %arg5: memref<64x24xbf16, #tpu.memory_space<vmem>>) attributes {dimension_semantics = [#tpu.dimension_semantics<parallel>, #tpu.dimension_semantics<parallel>], iteration_bounds = array<i64: 2, 1>, scalar_prefetch = 0 : i64, scratch_operands = 0 : i64, tpu.core_type = #tpu.core_type<tc>, window_params = [{transform_indices = @transform_0, window_bounds = array<i64: 64, 24>}, {transform_indices = @transform_1, window_bounds = array<i64: 24, 24>}, {transform_indices = @transform_2, window_bounds = array<i64: 1, 24>}, {transform_indices = @transform_3, window_bounds = array<i64: 64, 24>}]} {
    %c0 = arith.constant 0 : index
    %c0_0 = arith.constant 0 : index
    %0 = vector.load %arg2[%c0, %c0_0] : memref<64x24xbf16, #tpu.memory_space<vmem>>, vector<64x24xbf16>
    %c0_1 = arith.constant 0 : index
    %c0_2 = arith.constant 0 : index
    %1 = vector.load %arg3[%c0_1, %c0_2] : memref<24x24xbf16, #tpu.memory_space<vmem>>, vector<24x24xbf16>
    %cst = arith.constant dense<0.000000e+00> : vector<64x24xf32>
    %2 = tpu.matmul %0, %1, %cst {dimension_numbers = #tpu.dot_dimension_numbers<[1], [0], [0], [1], [0, 0, 1, 1], [], []>} : vector<64x24xbf16>, vector<24x24xbf16>, vector<64x24xf32> -> vector<64x24xf32>
    %c0_3 = arith.constant 0 : index
    %c0_4 = arith.constant 0 : index
    %3 = vector.load %arg4[%c0_3, %c0_4] : memref<1x24xf32, #tpu.memory_space<vmem>>, vector<1x24xf32>
    %4 = vector.broadcast %3 : vector<1x24xf32> to vector<64x24xf32>
    %5 = arith.addf %2, %4 : vector<64x24xf32>
    %cst_5 = arith.constant 0.000000e+00 : f32
    %6 = vector.broadcast %cst_5 : f32 to vector<64x24xf32>
    %7 = arith.maximumf %5, %6 : vector<64x24xf32>
    %8 = arith.truncf %7 : vector<64x24xf32> to vector<64x24xbf16>
    %c0_6 = arith.constant 0 : index
    %c0_7 = arith.constant 0 : index
    %9 = vector.load %arg5[%c0_6, %c0_7] : memref<64x24xbf16, #tpu.memory_space<vmem>>, vector<64x24xbf16>
    tpu.vector_store %arg5[%c0_6, %c0_7], %8 {strides = array<i32>} : memref<64x24xbf16, #tpu.memory_space<vmem>>, vector<64x24xbf16>,
    return
  }
  func.func @transform_0(%arg0: i32, %arg1: i32) -> (i32, i32) {
    %c0_i32 = arith.constant 0 : i32
    %c0_i32_0 = arith.constant 0 : i32
    return %arg0, %c0_i32 : i32, i32
  }
  func.func @transform_1(%arg0: i32, %arg1: i32) -> (i32, i32) {
    %c0_i32 = arith.constant 0 : i32
    %c0_i32_0 = arith.constant 0 : i32
    return %c0_i32, %arg1 : i32, i32
  }
  func.func @transform_2(%arg0: i32, %arg1: i32) -> (i32, i32) {
    %c0_i32 = arith.constant 0 : i32
    %c0_i32_0 = arith.constant 0 : i32
    return %c0_i32, %arg1 : i32, i32
  }
  func.func @transform_3(%arg0: i32, %arg1: i32) -> (i32, i32) {
    %c0_i32 = arith.constant 0 : i32
    return %arg0, %arg1 : i32, i32
  }
}

module attributes {stable_mosaic.version = 11 : i64} {
  func.func @_dwpw_s1_kernel(%arg0: i32, %arg1: memref<1x10x10x24xbf16, #tpu.memory_space<vmem>>, %arg2: memref<9x1x1x24xf32, #tpu.memory_space<vmem>>, %arg3: memref<1x1x24xf32, #tpu.memory_space<vmem>>, %arg4: memref<24x24xbf16, #tpu.memory_space<vmem>>, %arg5: memref<1x24xf32, #tpu.memory_space<vmem>>, %arg6: memref<1x64x24xbf16, #tpu.memory_space<vmem>>, %arg7: memref<64x24xf32, #tpu.memory_space<vmem>>) attributes {dimension_semantics = [#tpu.dimension_semantics<parallel>], iteration_bounds = array<i64: 2>, scalar_prefetch = 0 : i64, scratch_operands = 1 : i64, tpu.core_type = #tpu.core_type<tc>, window_params = [{transform_indices = @transform_0, window_bounds = array<i64: 1, 10, 10, 24>}, {pipeline_mode = #tpu.pipeline_mode<synchronous>, transform_indices = @transform_1, window_bounds = array<i64: 9, 1, 1, 24>}, {pipeline_mode = #tpu.pipeline_mode<synchronous>, transform_indices = @transform_2, window_bounds = array<i64: 1, 1, 24>}, {pipeline_mode = #tpu.pipeline_mode<synchronous>, transform_indices = @transform_3, window_bounds = array<i64: 24, 24>}, {pipeline_mode = #tpu.pipeline_mode<synchronous>, transform_indices = @transform_4, window_bounds = array<i64: 1, 24>}, {transform_indices = @transform_5, window_bounds = array<i64: 1, 64, 24>}]} {
    %cst = arith.constant 0.000000e+00 : f32
    %0 = vector.broadcast %cst : f32 to vector<8x8x24xf32>
    %c0 = arith.constant 0 : index
    %c0_0 = arith.constant 0 : index
    %c0_1 = arith.constant 0 : index
    %c0_2 = arith.constant 0 : index
    %1 = vector.load %arg1[%c0, %c0_0, %c0_1, %c0_2] : memref<1x10x10x24xbf16, #tpu.memory_space<vmem>>, vector<1x8x8x24xbf16>
    %2 = vector.shape_cast %1 : vector<1x8x8x24xbf16> to vector<8x8x24xbf16>
    %3 = arith.extf %2 : vector<8x8x24xbf16> to vector<8x8x24xf32>
    %c0_3 = arith.constant 0 : index
    %c0_4 = arith.constant 0 : index
    %c0_5 = arith.constant 0 : index
    %c0_6 = arith.constant 0 : index
    %4 = vector.load %arg2[%c0_3, %c0_4, %c0_5, %c0_6] : memref<9x1x1x24xf32, #tpu.memory_space<vmem>>, vector<1x1x1x24xf32>
    %5 = vector.shape_cast %4 : vector<1x1x1x24xf32> to vector<1x1x24xf32>
    %6 = vector.broadcast %5 : vector<1x1x24xf32> to vector<8x8x24xf32>
    %7 = arith.mulf %3, %6 : vector<8x8x24xf32>
    %8 = arith.addf %0, %7 : vector<8x8x24xf32>
    %c0_7 = arith.constant 0 : index
    %c0_8 = arith.constant 0 : index
    %c1 = arith.constant 1 : index
    %c0_9 = arith.constant 0 : index
    %9 = vector.load %arg1[%c0_7, %c0_8, %c1, %c0_9] : memref<1x10x10x24xbf16, #tpu.memory_space<vmem>>, vector<1x8x8x24xbf16>
    %10 = vector.shape_cast %9 : vector<1x8x8x24xbf16> to vector<8x8x24xbf16>
    %11 = arith.extf %10 : vector<8x8x24xbf16> to vector<8x8x24xf32>
    %c1_10 = arith.constant 1 : index
    %c0_11 = arith.constant 0 : index
    %c0_12 = arith.constant 0 : index
    %c0_13 = arith.constant 0 : index
    %12 = vector.load %arg2[%c1_10, %c0_11, %c0_12, %c0_13] : memref<9x1x1x24xf32, #tpu.memory_space<vmem>>, vector<1x1x1x24xf32>
    %13 = vector.shape_cast %12 : vector<1x1x1x24xf32> to vector<1x1x24xf32>
    %14 = vector.broadcast %13 : vector<1x1x24xf32> to vector<8x8x24xf32>
    %15 = arith.mulf %11, %14 : vector<8x8x24xf32>
    %16 = arith.addf %8, %15 : vector<8x8x24xf32>
    %c0_14 = arith.constant 0 : index
    %c0_15 = arith.constant 0 : index
    %c2 = arith.constant 2 : index
    %c0_16 = arith.constant 0 : index
    %17 = vector.load %arg1[%c0_14, %c0_15, %c2, %c0_16] : memref<1x10x10x24xbf16, #tpu.memory_space<vmem>>, vector<1x8x8x24xbf16>
    %18 = vector.shape_cast %17 : vector<1x8x8x24xbf16> to vector<8x8x24xbf16>
    %19 = arith.extf %18 : vector<8x8x24xbf16> to vector<8x8x24xf32>
    %c2_17 = arith.constant 2 : index
    %c0_18 = arith.constant 0 : index
    %c0_19 = arith.constant 0 : index
    %c0_20 = arith.constant 0 : index
    %20 = vector.load %arg2[%c2_17, %c0_18, %c0_19, %c0_20] : memref<9x1x1x24xf32, #tpu.memory_space<vmem>>, vector<1x1x1x24xf32>
    %21 = vector.shape_cast %20 : vector<1x1x1x24xf32> to vector<1x1x24xf32>
    %22 = vector.broadcast %21 : vector<1x1x24xf32> to vector<8x8x24xf32>
    %23 = arith.mulf %19, %22 : vector<8x8x24xf32>
    %24 = arith.addf %16, %23 : vector<8x8x24xf32>
    %c0_21 = arith.constant 0 : index
    %c1_22 = arith.constant 1 : index
    %c0_23 = arith.constant 0 : index
    %c0_24 = arith.constant 0 : index
    %25 = vector.load %arg1[%c0_21, %c1_22, %c0_23, %c0_24] : memref<1x10x10x24xbf16, #tpu.memory_space<vmem>>, vector<1x8x8x24xbf16>
    %26 = vector.shape_cast %25 : vector<1x8x8x24xbf16> to vector<8x8x24xbf16>
    %27 = arith.extf %26 : vector<8x8x24xbf16> to vector<8x8x24xf32>
    %c3 = arith.constant 3 : index
    %c0_25 = arith.constant 0 : index
    %c0_26 = arith.constant 0 : index
    %c0_27 = arith.constant 0 : index
    %28 = vector.load %arg2[%c3, %c0_25, %c0_26, %c0_27] : memref<9x1x1x24xf32, #tpu.memory_space<vmem>>, vector<1x1x1x24xf32>
    %29 = vector.shape_cast %28 : vector<1x1x1x24xf32> to vector<1x1x24xf32>
    %30 = vector.broadcast %29 : vector<1x1x24xf32> to vector<8x8x24xf32>
    %31 = arith.mulf %27, %30 : vector<8x8x24xf32>
    %32 = arith.addf %24, %31 : vector<8x8x24xf32>
    %c0_28 = arith.constant 0 : index
    %c1_29 = arith.constant 1 : index
    %c1_30 = arith.constant 1 : index
    %c0_31 = arith.constant 0 : index
    %33 = vector.load %arg1[%c0_28, %c1_29, %c1_30, %c0_31] : memref<1x10x10x24xbf16, #tpu.memory_space<vmem>>, vector<1x8x8x24xbf16>
    %34 = vector.shape_cast %33 : vector<1x8x8x24xbf16> to vector<8x8x24xbf16>
    %35 = arith.extf %34 : vector<8x8x24xbf16> to vector<8x8x24xf32>
    %c4 = arith.constant 4 : index
    %c0_32 = arith.constant 0 : index
    %c0_33 = arith.constant 0 : index
    %c0_34 = arith.constant 0 : index
    %36 = vector.load %arg2[%c4, %c0_32, %c0_33, %c0_34] : memref<9x1x1x24xf32, #tpu.memory_space<vmem>>, vector<1x1x1x24xf32>
    %37 = vector.shape_cast %36 : vector<1x1x1x24xf32> to vector<1x1x24xf32>
    %38 = vector.broadcast %37 : vector<1x1x24xf32> to vector<8x8x24xf32>
    %39 = arith.mulf %35, %38 : vector<8x8x24xf32>
    %40 = arith.addf %32, %39 : vector<8x8x24xf32>
    %c0_35 = arith.constant 0 : index
    %c1_36 = arith.constant 1 : index
    %c2_37 = arith.constant 2 : index
    %c0_38 = arith.constant 0 : index
    %41 = vector.load %arg1[%c0_35, %c1_36, %c2_37, %c0_38] : memref<1x10x10x24xbf16, #tpu.memory_space<vmem>>, vector<1x8x8x24xbf16>
    %42 = vector.shape_cast %41 : vector<1x8x8x24xbf16> to vector<8x8x24xbf16>
    %43 = arith.extf %42 : vector<8x8x24xbf16> to vector<8x8x24xf32>
    %c5 = arith.constant 5 : index
    %c0_39 = arith.constant 0 : index
    %c0_40 = arith.constant 0 : index
    %c0_41 = arith.constant 0 : index
    %44 = vector.load %arg2[%c5, %c0_39, %c0_40, %c0_41] : memref<9x1x1x24xf32, #tpu.memory_space<vmem>>, vector<1x1x1x24xf32>
    %45 = vector.shape_cast %44 : vector<1x1x1x24xf32> to vector<1x1x24xf32>
    %46 = vector.broadcast %45 : vector<1x1x24xf32> to vector<8x8x24xf32>
    %47 = arith.mulf %43, %46 : vector<8x8x24xf32>
    %48 = arith.addf %40, %47 : vector<8x8x24xf32>
    %c0_42 = arith.constant 0 : index
    %c2_43 = arith.constant 2 : index
    %c0_44 = arith.constant 0 : index
    %c0_45 = arith.constant 0 : index
    %49 = vector.load %arg1[%c0_42, %c2_43, %c0_44, %c0_45] : memref<1x10x10x24xbf16, #tpu.memory_space<vmem>>, vector<1x8x8x24xbf16>
    %50 = vector.shape_cast %49 : vector<1x8x8x24xbf16> to vector<8x8x24xbf16>
    %51 = arith.extf %50 : vector<8x8x24xbf16> to vector<8x8x24xf32>
    %c6 = arith.constant 6 : index
    %c0_46 = arith.constant 0 : index
    %c0_47 = arith.constant 0 : index
    %c0_48 = arith.constant 0 : index
    %52 = vector.load %arg2[%c6, %c0_46, %c0_47, %c0_48] : memref<9x1x1x24xf32, #tpu.memory_space<vmem>>, vector<1x1x1x24xf32>
    %53 = vector.shape_cast %52 : vector<1x1x1x24xf32> to vector<1x1x24xf32>
    %54 = vector.broadcast %53 : vector<1x1x24xf32> to vector<8x8x24xf32>
    %55 = arith.mulf %51, %54 : vector<8x8x24xf32>
    %56 = arith.addf %48, %55 : vector<8x8x24xf32>
    %c0_49 = arith.constant 0 : index
    %c2_50 = arith.constant 2 : index
    %c1_51 = arith.constant 1 : index
    %c0_52 = arith.constant 0 : index
    %57 = vector.load %arg1[%c0_49, %c2_50, %c1_51, %c0_52] : memref<1x10x10x24xbf16, #tpu.memory_space<vmem>>, vector<1x8x8x24xbf16>
    %58 = vector.shape_cast %57 : vector<1x8x8x24xbf16> to vector<8x8x24xbf16>
    %59 = arith.extf %58 : vector<8x8x24xbf16> to vector<8x8x24xf32>
    %c7 = arith.constant 7 : index
    %c0_53 = arith.constant 0 : index
    %c0_54 = arith.constant 0 : index
    %c0_55 = arith.constant 0 : index
    %60 = vector.load %arg2[%c7, %c0_53, %c0_54, %c0_55] : memref<9x1x1x24xf32, #tpu.memory_space<vmem>>, vector<1x1x1x24xf32>
    %61 = vector.shape_cast %60 : vector<1x1x1x24xf32> to vector<1x1x24xf32>
    %62 = vector.broadcast %61 : vector<1x1x24xf32> to vector<8x8x24xf32>
    %63 = arith.mulf %59, %62 : vector<8x8x24xf32>
    %64 = arith.addf %56, %63 : vector<8x8x24xf32>
    %c0_56 = arith.constant 0 : index
    %c2_57 = arith.constant 2 : index
    %c2_58 = arith.constant 2 : index
    %c0_59 = arith.constant 0 : index
    %65 = vector.load %arg1[%c0_56, %c2_57, %c2_58, %c0_59] : memref<1x10x10x24xbf16, #tpu.memory_space<vmem>>, vector<1x8x8x24xbf16>
    %66 = vector.shape_cast %65 : vector<1x8x8x24xbf16> to vector<8x8x24xbf16>
    %67 = arith.extf %66 : vector<8x8x24xbf16> to vector<8x8x24xf32>
    %c8 = arith.constant 8 : index
    %c0_60 = arith.constant 0 : index
    %c0_61 = arith.constant 0 : index
    %c0_62 = arith.constant 0 : index
    %68 = vector.load %arg2[%c8, %c0_60, %c0_61, %c0_62] : memref<9x1x1x24xf32, #tpu.memory_space<vmem>>, vector<1x1x1x24xf32>
    %69 = vector.shape_cast %68 : vector<1x1x1x24xf32> to vector<1x1x24xf32>
    %70 = vector.broadcast %69 : vector<1x1x24xf32> to vector<8x8x24xf32>
    %71 = arith.mulf %67, %70 : vector<8x8x24xf32>
    %72 = arith.addf %64, %71 : vector<8x8x24xf32>
    %c0_63 = arith.constant 0 : index
    %c0_64 = arith.constant 0 : index
    %c0_65 = arith.constant 0 : index
    %73 = vector.load %arg3[%c0_63, %c0_64, %c0_65] : memref<1x1x24xf32, #tpu.memory_space<vmem>>, vector<1x1x24xf32>
    %74 = vector.broadcast %73 : vector<1x1x24xf32> to vector<8x8x24xf32>
    %75 = arith.addf %72, %74 : vector<8x8x24xf32>
    %cst_66 = arith.constant 0.000000e+00 : f32
    %76 = vector.broadcast %cst_66 : f32 to vector<8x8x24xf32>
    %77 = arith.maximumf %75, %76 : vector<8x8x24xf32>
    %78 = vector.extract_strided_slice %77 {offsets = [0, 0, 0], sizes = [1, 8, 24], strides = [1, 1, 1]} : vector<8x8x24xf32> to vector<1x8x24xf32>
    %79 = vector.shape_cast %78 : vector<1x8x24xf32> to vector<8x24xf32>
    %c0_67 = arith.constant 0 : index
    %c0_68 = arith.constant 0 : index
    %80 = vector.load %arg7[%c0_67, %c0_68] : memref<64x24xf32, #tpu.memory_space<vmem>>, vector<8x24xf32>
    tpu.vector_store %arg7[%c0_67, %c0_68], %79 {strides = array<i32>} : memref<64x24xf32, #tpu.memory_space<vmem>>, vector<8x24xf32>,
    %81 = vector.extract_strided_slice %77 {offsets = [1, 0, 0], sizes = [1, 8, 24], strides = [1, 1, 1]} : vector<8x8x24xf32> to vector<1x8x24xf32>
    %82 = vector.shape_cast %81 : vector<1x8x24xf32> to vector<8x24xf32>
    %c8_69 = arith.constant 8 : index
    %c0_70 = arith.constant 0 : index
    %83 = vector.load %arg7[%c8_69, %c0_70] : memref<64x24xf32, #tpu.memory_space<vmem>>, vector<8x24xf32>
    tpu.vector_store %arg7[%c8_69, %c0_70], %82 {strides = array<i32>} : memref<64x24xf32, #tpu.memory_space<vmem>>, vector<8x24xf32>,
    %84 = vector.extract_strided_slice %77 {offsets = [2, 0, 0], sizes = [1, 8, 24], strides = [1, 1, 1]} : vector<8x8x24xf32> to vector<1x8x24xf32>
    %85 = vector.shape_cast %84 : vector<1x8x24xf32> to vector<8x24xf32>
    %c16 = arith.constant 16 : index
    %c0_71 = arith.constant 0 : index
    %86 = vector.load %arg7[%c16, %c0_71] : memref<64x24xf32, #tpu.memory_space<vmem>>, vector<8x24xf32>
    tpu.vector_store %arg7[%c16, %c0_71], %85 {strides = array<i32>} : memref<64x24xf32, #tpu.memory_space<vmem>>, vector<8x24xf32>,
    %87 = vector.extract_strided_slice %77 {offsets = [3, 0, 0], sizes = [1, 8, 24], strides = [1, 1, 1]} : vector<8x8x24xf32> to vector<1x8x24xf32>
    %88 = vector.shape_cast %87 : vector<1x8x24xf32> to vector<8x24xf32>
    %c24 = arith.constant 24 : index
    %c0_72 = arith.constant 0 : index
    %89 = vector.load %arg7[%c24, %c0_72] : memref<64x24xf32, #tpu.memory_space<vmem>>, vector<8x24xf32>
    tpu.vector_store %arg7[%c24, %c0_72], %88 {strides = array<i32>} : memref<64x24xf32, #tpu.memory_space<vmem>>, vector<8x24xf32>,
    %90 = vector.extract_strided_slice %77 {offsets = [4, 0, 0], sizes = [1, 8, 24], strides = [1, 1, 1]} : vector<8x8x24xf32> to vector<1x8x24xf32>
    %91 = vector.shape_cast %90 : vector<1x8x24xf32> to vector<8x24xf32>
    %c32 = arith.constant 32 : index
    %c0_73 = arith.constant 0 : index
    %92 = vector.load %arg7[%c32, %c0_73] : memref<64x24xf32, #tpu.memory_space<vmem>>, vector<8x24xf32>
    tpu.vector_store %arg7[%c32, %c0_73], %91 {strides = array<i32>} : memref<64x24xf32, #tpu.memory_space<vmem>>, vector<8x24xf32>,
    %93 = vector.extract_strided_slice %77 {offsets = [5, 0, 0], sizes = [1, 8, 24], strides = [1, 1, 1]} : vector<8x8x24xf32> to vector<1x8x24xf32>
    %94 = vector.shape_cast %93 : vector<1x8x24xf32> to vector<8x24xf32>
    %c40 = arith.constant 40 : index
    %c0_74 = arith.constant 0 : index
    %95 = vector.load %arg7[%c40, %c0_74] : memref<64x24xf32, #tpu.memory_space<vmem>>, vector<8x24xf32>
    tpu.vector_store %arg7[%c40, %c0_74], %94 {strides = array<i32>} : memref<64x24xf32, #tpu.memory_space<vmem>>, vector<8x24xf32>,
    %96 = vector.extract_strided_slice %77 {offsets = [6, 0, 0], sizes = [1, 8, 24], strides = [1, 1, 1]} : vector<8x8x24xf32> to vector<1x8x24xf32>
    %97 = vector.shape_cast %96 : vector<1x8x24xf32> to vector<8x24xf32>
    %c48 = arith.constant 48 : index
    %c0_75 = arith.constant 0 : index
    %98 = vector.load %arg7[%c48, %c0_75] : memref<64x24xf32, #tpu.memory_space<vmem>>, vector<8x24xf32>
    tpu.vector_store %arg7[%c48, %c0_75], %97 {strides = array<i32>} : memref<64x24xf32, #tpu.memory_space<vmem>>, vector<8x24xf32>,
    %99 = vector.extract_strided_slice %77 {offsets = [7, 0, 0], sizes = [1, 8, 24], strides = [1, 1, 1]} : vector<8x8x24xf32> to vector<1x8x24xf32>
    %100 = vector.shape_cast %99 : vector<1x8x24xf32> to vector<8x24xf32>
    %c56 = arith.constant 56 : index
    %c0_76 = arith.constant 0 : index
    %101 = vector.load %arg7[%c56, %c0_76] : memref<64x24xf32, #tpu.memory_space<vmem>>, vector<8x24xf32>
    tpu.vector_store %arg7[%c56, %c0_76], %100 {strides = array<i32>} : memref<64x24xf32, #tpu.memory_space<vmem>>, vector<8x24xf32>,
    %c0_77 = arith.constant 0 : index
    %c0_78 = arith.constant 0 : index
    %102 = vector.load %arg7[%c0_77, %c0_78] : memref<64x24xf32, #tpu.memory_space<vmem>>, vector<64x24xf32>
    %103 = arith.truncf %102 : vector<64x24xf32> to vector<64x24xbf16>
    %c0_79 = arith.constant 0 : index
    %c0_80 = arith.constant 0 : index
    %104 = vector.load %arg4[%c0_79, %c0_80] : memref<24x24xbf16, #tpu.memory_space<vmem>>, vector<24x24xbf16>
    %cst_81 = arith.constant dense<0.000000e+00> : vector<64x24xf32>
    %105 = tpu.matmul %103, %104, %cst_81 {dimension_numbers = #tpu.dot_dimension_numbers<[1], [0], [0], [1], [0, 0, 1, 1], [], []>} : vector<64x24xbf16>, vector<24x24xbf16>, vector<64x24xf32> -> vector<64x24xf32>
    %c0_82 = arith.constant 0 : index
    %c0_83 = arith.constant 0 : index
    %106 = vector.load %arg5[%c0_82, %c0_83] : memref<1x24xf32, #tpu.memory_space<vmem>>, vector<1x24xf32>
    %107 = vector.broadcast %106 : vector<1x24xf32> to vector<64x24xf32>
    %108 = arith.addf %105, %107 : vector<64x24xf32>
    %cst_84 = arith.constant 0.000000e+00 : f32
    %109 = vector.broadcast %cst_84 : f32 to vector<64x24xf32>
    %110 = arith.maximumf %108, %109 : vector<64x24xf32>
    %111 = arith.truncf %110 : vector<64x24xf32> to vector<64x24xbf16>
    %c0_85 = arith.constant 0 : index
    %c0_86 = arith.constant 0 : index
    %c0_87 = arith.constant 0 : index
    %112 = vector.load %arg6[%c0_85, %c0_86, %c0_87] : memref<1x64x24xbf16, #tpu.memory_space<vmem>>, vector<1x64x24xbf16>
    %113 = vector.shape_cast %112 : vector<1x64x24xbf16> to vector<64x24xbf16>
    %114 = vector.shape_cast %111 : vector<64x24xbf16> to vector<1x64x24xbf16>
    tpu.vector_store %arg6[%c0_85, %c0_86, %c0_87], %114 {strides = array<i32>} : memref<1x64x24xbf16, #tpu.memory_space<vmem>>, vector<1x64x24xbf16>,
    return
  }
  func.func @transform_0(%arg0: i32) -> (i32, i32, i32, i32) {
    %c0_i32 = arith.constant 0 : i32
    %c0_i32_0 = arith.constant 0 : i32
    %c0_i32_1 = arith.constant 0 : i32
    %c0_i32_2 = arith.constant 0 : i32
    return %arg0, %c0_i32, %c0_i32_0, %c0_i32_1 : i32, i32, i32, i32
  }
  func.func @transform_1(%arg0: i32) -> (i32, i32, i32, i32) {
    %c0_i32 = arith.constant 0 : i32
    %c0_i32_0 = arith.constant 0 : i32
    %c0_i32_1 = arith.constant 0 : i32
    %c0_i32_2 = arith.constant 0 : i32
    %c0_i32_3 = arith.constant 0 : i32
    return %c0_i32, %c0_i32_0, %c0_i32_1, %c0_i32_2 : i32, i32, i32, i32
  }
  func.func @transform_2(%arg0: i32) -> (i32, i32, i32) {
    %c0_i32 = arith.constant 0 : i32
    %c0_i32_0 = arith.constant 0 : i32
    %c0_i32_1 = arith.constant 0 : i32
    %c0_i32_2 = arith.constant 0 : i32
    return %c0_i32, %c0_i32_0, %c0_i32_1 : i32, i32, i32
  }
  func.func @transform_3(%arg0: i32) -> (i32, i32) {
    %c0_i32 = arith.constant 0 : i32
    %c0_i32_0 = arith.constant 0 : i32
    %c0_i32_1 = arith.constant 0 : i32
    return %c0_i32, %c0_i32_0 : i32, i32
  }
  func.func @transform_4(%arg0: i32) -> (i32, i32) {
    %c0_i32 = arith.constant 0 : i32
    %c0_i32_0 = arith.constant 0 : i32
    %c0_i32_1 = arith.constant 0 : i32
    return %c0_i32, %c0_i32_0 : i32, i32
  }
  func.func @transform_5(%arg0: i32) -> (i32, i32, i32) {
    %c0_i32 = arith.constant 0 : i32
    %c0_i32_0 = arith.constant 0 : i32
    %c0_i32_1 = arith.constant 0 : i32
    return %arg0, %c0_i32, %c0_i32_0 : i32, i32, i32
  }
}

module attributes {stable_mosaic.version = 11 : i64} {
  func.func @_matmul_bias_kernel(%arg0: i32, %arg1: i32, %arg2: memref<64x48xbf16, #tpu.memory_space<vmem>>, %arg3: memref<48x48xbf16, #tpu.memory_space<vmem>>, %arg4: memref<1x48xf32, #tpu.memory_space<vmem>>, %arg5: memref<64x48xbf16, #tpu.memory_space<vmem>>) attributes {dimension_semantics = [#tpu.dimension_semantics<parallel>, #tpu.dimension_semantics<parallel>], iteration_bounds = array<i64: 2, 1>, scalar_prefetch = 0 : i64, scratch_operands = 0 : i64, tpu.core_type = #tpu.core_type<tc>, window_params = [{transform_indices = @transform_0, window_bounds = array<i64: 64, 48>}, {transform_indices = @transform_1, window_bounds = array<i64: 48, 48>}, {transform_indices = @transform_2, window_bounds = array<i64: 1, 48>}, {transform_indices = @transform_3, window_bounds = array<i64: 64, 48>}]} {
    %c0 = arith.constant 0 : index
    %c0_0 = arith.constant 0 : index
    %0 = vector.load %arg2[%c0, %c0_0] : memref<64x48xbf16, #tpu.memory_space<vmem>>, vector<64x48xbf16>
    %c0_1 = arith.constant 0 : index
    %c0_2 = arith.constant 0 : index
    %1 = vector.load %arg3[%c0_1, %c0_2] : memref<48x48xbf16, #tpu.memory_space<vmem>>, vector<48x48xbf16>
    %cst = arith.constant dense<0.000000e+00> : vector<64x48xf32>
    %2 = tpu.matmul %0, %1, %cst {dimension_numbers = #tpu.dot_dimension_numbers<[1], [0], [0], [1], [0, 0, 1, 1], [], []>} : vector<64x48xbf16>, vector<48x48xbf16>, vector<64x48xf32> -> vector<64x48xf32>
    %c0_3 = arith.constant 0 : index
    %c0_4 = arith.constant 0 : index
    %3 = vector.load %arg4[%c0_3, %c0_4] : memref<1x48xf32, #tpu.memory_space<vmem>>, vector<1x48xf32>
    %4 = vector.broadcast %3 : vector<1x48xf32> to vector<64x48xf32>
    %5 = arith.addf %2, %4 : vector<64x48xf32>
    %cst_5 = arith.constant 0.000000e+00 : f32
    %6 = vector.broadcast %cst_5 : f32 to vector<64x48xf32>
    %7 = arith.maximumf %5, %6 : vector<64x48xf32>
    %8 = arith.truncf %7 : vector<64x48xf32> to vector<64x48xbf16>
    %c0_6 = arith.constant 0 : index
    %c0_7 = arith.constant 0 : index
    %9 = vector.load %arg5[%c0_6, %c0_7] : memref<64x48xbf16, #tpu.memory_space<vmem>>, vector<64x48xbf16>
    tpu.vector_store %arg5[%c0_6, %c0_7], %8 {strides = array<i32>} : memref<64x48xbf16, #tpu.memory_space<vmem>>, vector<64x48xbf16>,
    return
  }
  func.func @transform_0(%arg0: i32, %arg1: i32) -> (i32, i32) {
    %c0_i32 = arith.constant 0 : i32
    %c0_i32_0 = arith.constant 0 : i32
    return %arg0, %c0_i32 : i32, i32
  }
  func.func @transform_1(%arg0: i32, %arg1: i32) -> (i32, i32) {
    %c0_i32 = arith.constant 0 : i32
    %c0_i32_0 = arith.constant 0 : i32
    return %c0_i32, %arg1 : i32, i32
  }
  func.func @transform_2(%arg0: i32, %arg1: i32) -> (i32, i32) {
    %c0_i32 = arith.constant 0 : i32
    %c0_i32_0 = arith.constant 0 : i32
    return %c0_i32, %arg1 : i32, i32
  }
  func.func @transform_3(%arg0: i32, %arg1: i32) -> (i32, i32) {
    %c0_i32 = arith.constant 0 : i32
    return %arg0, %arg1 : i32, i32
  }
}

module attributes {stable_mosaic.version = 11 : i64} {
  func.func @_dwpw_s2_kernel(%arg0: i32, %arg1: memref<1x5x5x48xbf16, #tpu.memory_space<vmem>>, %arg2: memref<1x5x5x48xbf16, #tpu.memory_space<vmem>>, %arg3: memref<1x5x5x48xbf16, #tpu.memory_space<vmem>>, %arg4: memref<1x5x5x48xbf16, #tpu.memory_space<vmem>>, %arg5: memref<9x1x1x48xf32, #tpu.memory_space<vmem>>, %arg6: memref<1x1x48xf32, #tpu.memory_space<vmem>>, %arg7: memref<48x48xbf16, #tpu.memory_space<vmem>>, %arg8: memref<1x48xf32, #tpu.memory_space<vmem>>, %arg9: memref<1x16x48xbf16, #tpu.memory_space<vmem>>, %arg10: memref<16x48xf32, #tpu.memory_space<vmem>>) attributes {dimension_semantics = [#tpu.dimension_semantics<parallel>], iteration_bounds = array<i64: 2>, scalar_prefetch = 0 : i64, scratch_operands = 1 : i64, tpu.core_type = #tpu.core_type<tc>, window_params = [{transform_indices = @transform_0, window_bounds = array<i64: 1, 5, 5, 48>}, {transform_indices = @transform_1, window_bounds = array<i64: 1, 5, 5, 48>}, {transform_indices = @transform_2, window_bounds = array<i64: 1, 5, 5, 48>}, {transform_indices = @transform_3, window_bounds = array<i64: 1, 5, 5, 48>}, {pipeline_mode = #tpu.pipeline_mode<synchronous>, transform_indices = @transform_4, window_bounds = array<i64: 9, 1, 1, 48>}, {pipeline_mode = #tpu.pipeline_mode<synchronous>, transform_indices = @transform_5, window_bounds = array<i64: 1, 1, 48>}, {pipeline_mode = #tpu.pipeline_mode<synchronous>, transform_indices = @transform_6, window_bounds = array<i64: 48, 48>}, {pipeline_mode = #tpu.pipeline_mode<synchronous>, transform_indices = @transform_7, window_bounds = array<i64: 1, 48>}, {transform_indices = @transform_8, window_bounds = array<i64: 1, 16, 48>}]} {
    %cst = arith.constant 0.000000e+00 : f32
    %0 = vector.broadcast %cst : f32 to vector<4x4x48xf32>
    %c0 = arith.constant 0 : index
    %c0_0 = arith.constant 0 : index
    %c0_1 = arith.constant 0 : index
    %c0_2 = arith.constant 0 : index
    %1 = vector.load %arg1[%c0, %c0_0, %c0_1, %c0_2] : memref<1x5x5x48xbf16, #tpu.memory_space<vmem>>, vector<1x4x4x48xbf16>
    %2 = vector.shape_cast %1 : vector<1x4x4x48xbf16> to vector<4x4x48xbf16>
    %3 = arith.extf %2 : vector<4x4x48xbf16> to vector<4x4x48xf32>
    %c0_3 = arith.constant 0 : index
    %c0_4 = arith.constant 0 : index
    %c0_5 = arith.constant 0 : index
    %c0_6 = arith.constant 0 : index
    %4 = vector.load %arg5[%c0_3, %c0_4, %c0_5, %c0_6] : memref<9x1x1x48xf32, #tpu.memory_space<vmem>>, vector<1x1x1x48xf32>
    %5 = vector.shape_cast %4 : vector<1x1x1x48xf32> to vector<1x1x48xf32>
    %6 = vector.broadcast %5 : vector<1x1x48xf32> to vector<4x4x48xf32>
    %7 = arith.mulf %3, %6 : vector<4x4x48xf32>
    %8 = arith.addf %0, %7 : vector<4x4x48xf32>
    %c0_7 = arith.constant 0 : index
    %c0_8 = arith.constant 0 : index
    %c0_9 = arith.constant 0 : index
    %c0_10 = arith.constant 0 : index
    %9 = vector.load %arg2[%c0_7, %c0_8, %c0_9, %c0_10] : memref<1x5x5x48xbf16, #tpu.memory_space<vmem>>, vector<1x4x4x48xbf16>
    %10 = vector.shape_cast %9 : vector<1x4x4x48xbf16> to vector<4x4x48xbf16>
    %11 = arith.extf %10 : vector<4x4x48xbf16> to vector<4x4x48xf32>
    %c1 = arith.constant 1 : index
    %c0_11 = arith.constant 0 : index
    %c0_12 = arith.constant 0 : index
    %c0_13 = arith.constant 0 : index
    %12 = vector.load %arg5[%c1, %c0_11, %c0_12, %c0_13] : memref<9x1x1x48xf32, #tpu.memory_space<vmem>>, vector<1x1x1x48xf32>
    %13 = vector.shape_cast %12 : vector<1x1x1x48xf32> to vector<1x1x48xf32>
    %14 = vector.broadcast %13 : vector<1x1x48xf32> to vector<4x4x48xf32>
    %15 = arith.mulf %11, %14 : vector<4x4x48xf32>
    %16 = arith.addf %8, %15 : vector<4x4x48xf32>
    %c0_14 = arith.constant 0 : index
    %c0_15 = arith.constant 0 : index
    %c1_16 = arith.constant 1 : index
    %c0_17 = arith.constant 0 : index
    %17 = vector.load %arg1[%c0_14, %c0_15, %c1_16, %c0_17] : memref<1x5x5x48xbf16, #tpu.memory_space<vmem>>, vector<1x4x4x48xbf16>
    %18 = vector.shape_cast %17 : vector<1x4x4x48xbf16> to vector<4x4x48xbf16>
    %19 = arith.extf %18 : vector<4x4x48xbf16> to vector<4x4x48xf32>
    %c2 = arith.constant 2 : index
    %c0_18 = arith.constant 0 : index
    %c0_19 = arith.constant 0 : index
    %c0_20 = arith.constant 0 : index
    %20 = vector.load %arg5[%c2, %c0_18, %c0_19, %c0_20] : memref<9x1x1x48xf32, #tpu.memory_space<vmem>>, vector<1x1x1x48xf32>
    %21 = vector.shape_cast %20 : vector<1x1x1x48xf32> to vector<1x1x48xf32>
    %22 = vector.broadcast %21 : vector<1x1x48xf32> to vector<4x4x48xf32>
    %23 = arith.mulf %19, %22 : vector<4x4x48xf32>
    %24 = arith.addf %16, %23 : vector<4x4x48xf32>
    %c0_21 = arith.constant 0 : index
    %c0_22 = arith.constant 0 : index
    %c0_23 = arith.constant 0 : index
    %c0_24 = arith.constant 0 : index
    %25 = vector.load %arg3[%c0_21, %c0_22, %c0_23, %c0_24] : memref<1x5x5x48xbf16, #tpu.memory_space<vmem>>, vector<1x4x4x48xbf16>
    %26 = vector.shape_cast %25 : vector<1x4x4x48xbf16> to vector<4x4x48xbf16>
    %27 = arith.extf %26 : vector<4x4x48xbf16> to vector<4x4x48xf32>
    %c3 = arith.constant 3 : index
    %c0_25 = arith.constant 0 : index
    %c0_26 = arith.constant 0 : index
    %c0_27 = arith.constant 0 : index
    %28 = vector.load %arg5[%c3, %c0_25, %c0_26, %c0_27] : memref<9x1x1x48xf32, #tpu.memory_space<vmem>>, vector<1x1x1x48xf32>
    %29 = vector.shape_cast %28 : vector<1x1x1x48xf32> to vector<1x1x48xf32>
    %30 = vector.broadcast %29 : vector<1x1x48xf32> to vector<4x4x48xf32>
    %31 = arith.mulf %27, %30 : vector<4x4x48xf32>
    %32 = arith.addf %24, %31 : vector<4x4x48xf32>
    %c0_28 = arith.constant 0 : index
    %c0_29 = arith.constant 0 : index
    %c0_30 = arith.constant 0 : index
    %c0_31 = arith.constant 0 : index
    %33 = vector.load %arg4[%c0_28, %c0_29, %c0_30, %c0_31] : memref<1x5x5x48xbf16, #tpu.memory_space<vmem>>, vector<1x4x4x48xbf16>
    %34 = vector.shape_cast %33 : vector<1x4x4x48xbf16> to vector<4x4x48xbf16>
    %35 = arith.extf %34 : vector<4x4x48xbf16> to vector<4x4x48xf32>
    %c4 = arith.constant 4 : index
    %c0_32 = arith.constant 0 : index
    %c0_33 = arith.constant 0 : index
    %c0_34 = arith.constant 0 : index
    %36 = vector.load %arg5[%c4, %c0_32, %c0_33, %c0_34] : memref<9x1x1x48xf32, #tpu.memory_space<vmem>>, vector<1x1x1x48xf32>
    %37 = vector.shape_cast %36 : vector<1x1x1x48xf32> to vector<1x1x48xf32>
    %38 = vector.broadcast %37 : vector<1x1x48xf32> to vector<4x4x48xf32>
    %39 = arith.mulf %35, %38 : vector<4x4x48xf32>
    %40 = arith.addf %32, %39 : vector<4x4x48xf32>
    %c0_35 = arith.constant 0 : index
    %c0_36 = arith.constant 0 : index
    %c1_37 = arith.constant 1 : index
    %c0_38 = arith.constant 0 : index
    %41 = vector.load %arg3[%c0_35, %c0_36, %c1_37, %c0_38] : memref<1x5x5x48xbf16, #tpu.memory_space<vmem>>, vector<1x4x4x48xbf16>
    %42 = vector.shape_cast %41 : vector<1x4x4x48xbf16> to vector<4x4x48xbf16>
    %43 = arith.extf %42 : vector<4x4x48xbf16> to vector<4x4x48xf32>
    %c5 = arith.constant 5 : index
    %c0_39 = arith.constant 0 : index
    %c0_40 = arith.constant 0 : index
    %c0_41 = arith.constant 0 : index
    %44 = vector.load %arg5[%c5, %c0_39, %c0_40, %c0_41] : memref<9x1x1x48xf32, #tpu.memory_space<vmem>>, vector<1x1x1x48xf32>
    %45 = vector.shape_cast %44 : vector<1x1x1x48xf32> to vector<1x1x48xf32>
    %46 = vector.broadcast %45 : vector<1x1x48xf32> to vector<4x4x48xf32>
    %47 = arith.mulf %43, %46 : vector<4x4x48xf32>
    %48 = arith.addf %40, %47 : vector<4x4x48xf32>
    %c0_42 = arith.constant 0 : index
    %c1_43 = arith.constant 1 : index
    %c0_44 = arith.constant 0 : index
    %c0_45 = arith.constant 0 : index
    %49 = vector.load %arg1[%c0_42, %c1_43, %c0_44, %c0_45] : memref<1x5x5x48xbf16, #tpu.memory_space<vmem>>, vector<1x4x4x48xbf16>
    %50 = vector.shape_cast %49 : vector<1x4x4x48xbf16> to vector<4x4x48xbf16>
    %51 = arith.extf %50 : vector<4x4x48xbf16> to vector<4x4x48xf32>
    %c6 = arith.constant 6 : index
    %c0_46 = arith.constant 0 : index
    %c0_47 = arith.constant 0 : index
    %c0_48 = arith.constant 0 : index
    %52 = vector.load %arg5[%c6, %c0_46, %c0_47, %c0_48] : memref<9x1x1x48xf32, #tpu.memory_space<vmem>>, vector<1x1x1x48xf32>
    %53 = vector.shape_cast %52 : vector<1x1x1x48xf32> to vector<1x1x48xf32>
    %54 = vector.broadcast %53 : vector<1x1x48xf32> to vector<4x4x48xf32>
    %55 = arith.mulf %51, %54 : vector<4x4x48xf32>
    %56 = arith.addf %48, %55 : vector<4x4x48xf32>
    %c0_49 = arith.constant 0 : index
    %c1_50 = arith.constant 1 : index
    %c0_51 = arith.constant 0 : index
    %c0_52 = arith.constant 0 : index
    %57 = vector.load %arg2[%c0_49, %c1_50, %c0_51, %c0_52] : memref<1x5x5x48xbf16, #tpu.memory_space<vmem>>, vector<1x4x4x48xbf16>
    %58 = vector.shape_cast %57 : vector<1x4x4x48xbf16> to vector<4x4x48xbf16>
    %59 = arith.extf %58 : vector<4x4x48xbf16> to vector<4x4x48xf32>
    %c7 = arith.constant 7 : index
    %c0_53 = arith.constant 0 : index
    %c0_54 = arith.constant 0 : index
    %c0_55 = arith.constant 0 : index
    %60 = vector.load %arg5[%c7, %c0_53, %c0_54, %c0_55] : memref<9x1x1x48xf32, #tpu.memory_space<vmem>>, vector<1x1x1x48xf32>
    %61 = vector.shape_cast %60 : vector<1x1x1x48xf32> to vector<1x1x48xf32>
    %62 = vector.broadcast %61 : vector<1x1x48xf32> to vector<4x4x48xf32>
    %63 = arith.mulf %59, %62 : vector<4x4x48xf32>
    %64 = arith.addf %56, %63 : vector<4x4x48xf32>
    %c0_56 = arith.constant 0 : index
    %c1_57 = arith.constant 1 : index
    %c1_58 = arith.constant 1 : index
    %c0_59 = arith.constant 0 : index
    %65 = vector.load %arg1[%c0_56, %c1_57, %c1_58, %c0_59] : memref<1x5x5x48xbf16, #tpu.memory_space<vmem>>, vector<1x4x4x48xbf16>
    %66 = vector.shape_cast %65 : vector<1x4x4x48xbf16> to vector<4x4x48xbf16>
    %67 = arith.extf %66 : vector<4x4x48xbf16> to vector<4x4x48xf32>
    %c8 = arith.constant 8 : index
    %c0_60 = arith.constant 0 : index
    %c0_61 = arith.constant 0 : index
    %c0_62 = arith.constant 0 : index
    %68 = vector.load %arg5[%c8, %c0_60, %c0_61, %c0_62] : memref<9x1x1x48xf32, #tpu.memory_space<vmem>>, vector<1x1x1x48xf32>
    %69 = vector.shape_cast %68 : vector<1x1x1x48xf32> to vector<1x1x48xf32>
    %70 = vector.broadcast %69 : vector<1x1x48xf32> to vector<4x4x48xf32>
    %71 = arith.mulf %67, %70 : vector<4x4x48xf32>
    %72 = arith.addf %64, %71 : vector<4x4x48xf32>
    %c0_63 = arith.constant 0 : index
    %c0_64 = arith.constant 0 : index
    %c0_65 = arith.constant 0 : index
    %73 = vector.load %arg6[%c0_63, %c0_64, %c0_65] : memref<1x1x48xf32, #tpu.memory_space<vmem>>, vector<1x1x48xf32>
    %74 = vector.broadcast %73 : vector<1x1x48xf32> to vector<4x4x48xf32>
    %75 = arith.addf %72, %74 : vector<4x4x48xf32>
    %cst_66 = arith.constant 0.000000e+00 : f32
    %76 = vector.broadcast %cst_66 : f32 to vector<4x4x48xf32>
    %77 = arith.maximumf %75, %76 : vector<4x4x48xf32>
    %78 = vector.extract_strided_slice %77 {offsets = [0, 0, 0], sizes = [1, 4, 48], strides = [1, 1, 1]} : vector<4x4x48xf32> to vector<1x4x48xf32>
    %79 = vector.shape_cast %78 : vector<1x4x48xf32> to vector<4x48xf32>
    %c0_67 = arith.constant 0 : index
    %c0_68 = arith.constant 0 : index
    %80 = vector.load %arg10[%c0_67, %c0_68] : memref<16x48xf32, #tpu.memory_space<vmem>>, vector<4x48xf32>
    tpu.vector_store %arg10[%c0_67, %c0_68], %79 {strides = array<i32>} : memref<16x48xf32, #tpu.memory_space<vmem>>, vector<4x48xf32>,
    %81 = vector.extract_strided_slice %77 {offsets = [1, 0, 0], sizes = [1, 4, 48], strides = [1, 1, 1]} : vector<4x4x48xf32> to vector<1x4x48xf32>
    %82 = vector.shape_cast %81 : vector<1x4x48xf32> to vector<4x48xf32>
    %c4_69 = arith.constant 4 : index
    %c0_70 = arith.constant 0 : index
    %83 = vector.load %arg10[%c4_69, %c0_70] : memref<16x48xf32, #tpu.memory_space<vmem>>, vector<4x48xf32>
    tpu.vector_store %arg10[%c4_69, %c0_70], %82 {strides = array<i32>} : memref<16x48xf32, #tpu.memory_space<vmem>>, vector<4x48xf32>,
    %84 = vector.extract_strided_slice %77 {offsets = [2, 0, 0], sizes = [1, 4, 48], strides = [1, 1, 1]} : vector<4x4x48xf32> to vector<1x4x48xf32>
    %85 = vector.shape_cast %84 : vector<1x4x48xf32> to vector<4x48xf32>
    %c8_71 = arith.constant 8 : index
    %c0_72 = arith.constant 0 : index
    %86 = vector.load %arg10[%c8_71, %c0_72] : memref<16x48xf32, #tpu.memory_space<vmem>>, vector<4x48xf32>
    tpu.vector_store %arg10[%c8_71, %c0_72], %85 {strides = array<i32>} : memref<16x48xf32, #tpu.memory_space<vmem>>, vector<4x48xf32>,
    %87 = vector.extract_strided_slice %77 {offsets = [3, 0, 0], sizes = [1, 4, 48], strides = [1, 1, 1]} : vector<4x4x48xf32> to vector<1x4x48xf32>
    %88 = vector.shape_cast %87 : vector<1x4x48xf32> to vector<4x48xf32>
    %c12 = arith.constant 12 : index
    %c0_73 = arith.constant 0 : index
    %89 = vector.load %arg10[%c12, %c0_73] : memref<16x48xf32, #tpu.memory_space<vmem>>, vector<4x48xf32>
    tpu.vector_store %arg10[%c12, %c0_73], %88 {strides = array<i32>} : memref<16x48xf32, #tpu.memory_space<vmem>>, vector<4x48xf32>,
    %c0_74 = arith.constant 0 : index
    %c0_75 = arith.constant 0 : index
    %90 = vector.load %arg10[%c0_74, %c0_75] : memref<16x48xf32, #tpu.memory_space<vmem>>, vector<16x48xf32>
    %91 = arith.truncf %90 : vector<16x48xf32> to vector<16x48xbf16>
    %c0_76 = arith.constant 0 : index
    %c0_77 = arith.constant 0 : index
    %92 = vector.load %arg7[%c0_76, %c0_77] : memref<48x48xbf16, #tpu.memory_space<vmem>>, vector<48x48xbf16>
    %cst_78 = arith.constant dense<0.000000e+00> : vector<16x48xf32>
    %93 = tpu.matmul %91, %92, %cst_78 {dimension_numbers = #tpu.dot_dimension_numbers<[1], [0], [0], [1], [0, 0, 1, 1], [], []>} : vector<16x48xbf16>, vector<48x48xbf16>, vector<16x48xf32> -> vector<16x48xf32>
    %c0_79 = arith.constant 0 : index
    %c0_80 = arith.constant 0 : index
    %94 = vector.load %arg8[%c0_79, %c0_80] : memref<1x48xf32, #tpu.memory_space<vmem>>, vector<1x48xf32>
    %95 = vector.broadcast %94 : vector<1x48xf32> to vector<16x48xf32>
    %96 = arith.addf %93, %95 : vector<16x48xf32>
    %cst_81 = arith.constant 0.000000e+00 : f32
    %97 = vector.broadcast %cst_81 : f32 to vector<16x48xf32>
    %98 = arith.maximumf %96, %97 : vector<16x48xf32>
    %99 = arith.truncf %98 : vector<16x48xf32> to vector<16x48xbf16>
    %c0_82 = arith.constant 0 : index
    %c0_83 = arith.constant 0 : index
    %c0_84 = arith.constant 0 : index
    %100 = vector.load %arg9[%c0_82, %c0_83, %c0_84] : memref<1x16x48xbf16, #tpu.memory_space<vmem>>, vector<1x16x48xbf16>
    %101 = vector.shape_cast %100 : vector<1x16x48xbf16> to vector<16x48xbf16>
    %102 = vector.shape_cast %99 : vector<16x48xbf16> to vector<1x16x48xbf16>
    tpu.vector_store %arg9[%c0_82, %c0_83, %c0_84], %102 {strides = array<i32>} : memref<1x16x48xbf16, #tpu.memory_space<vmem>>, vector<1x16x48xbf16>,
    return
  }
  func.func @transform_0(%arg0: i32) -> (i32, i32, i32, i32) {
    %c0_i32 = arith.constant 0 : i32
    %c0_i32_0 = arith.constant 0 : i32
    %c0_i32_1 = arith.constant 0 : i32
    %c0_i32_2 = arith.constant 0 : i32
    return %arg0, %c0_i32, %c0_i32_0, %c0_i32_1 : i32, i32, i32, i32
  }
  func.func @transform_1(%arg0: i32) -> (i32, i32, i32, i32) {
    %c0_i32 = arith.constant 0 : i32
    %c0_i32_0 = arith.constant 0 : i32
    %c0_i32_1 = arith.constant 0 : i32
    %c0_i32_2 = arith.constant 0 : i32
    return %arg0, %c0_i32, %c0_i32_0, %c0_i32_1 : i32, i32, i32, i32
  }
  func.func @transform_2(%arg0: i32) -> (i32, i32, i32, i32) {
    %c0_i32 = arith.constant 0 : i32
    %c0_i32_0 = arith.constant 0 : i32
    %c0_i32_1 = arith.constant 0 : i32
    %c0_i32_2 = arith.constant 0 : i32
    return %arg0, %c0_i32, %c0_i32_0, %c0_i32_1 : i32, i32, i32, i32
  }
  func.func @transform_3(%arg0: i32) -> (i32, i32, i32, i32) {
    %c0_i32 = arith.constant 0 : i32
    %c0_i32_0 = arith.constant 0 : i32
    %c0_i32_1 = arith.constant 0 : i32
    %c0_i32_2 = arith.constant 0 : i32
    return %arg0, %c0_i32, %c0_i32_0, %c0_i32_1 : i32, i32, i32, i32
  }
  func.func @transform_4(%arg0: i32) -> (i32, i32, i32, i32) {
    %c0_i32 = arith.constant 0 : i32
    %c0_i32_0 = arith.constant 0 : i32
    %c0_i32_1 = arith.constant 0 : i32
    %c0_i32_2 = arith.constant 0 : i32
    %c0_i32_3 = arith.constant 0 : i32
    return %c0_i32, %c0_i32_0, %c0_i32_1, %c0_i32_2 : i32, i32, i32, i32
  }
  func.func @transform_5(%arg0: i32) -> (i32, i32, i32) {
    %c0_i32 = arith.constant 0 : i32
    %c0_i32_0 = arith.constant 0 : i32
    %c0_i32_1 = arith.constant 0 : i32
    %c0_i32_2 = arith.constant 0 : i32
    return %c0_i32, %c0_i32_0, %c0_i32_1 : i32, i32, i32
  }
  func.func @transform_6(%arg0: i32) -> (i32, i32) {
    %c0_i32 = arith.constant 0 : i32
    %c0_i32_0 = arith.constant 0 : i32
    %c0_i32_1 = arith.constant 0 : i32
    return %c0_i32, %c0_i32_0 : i32, i32
  }
  func.func @transform_7(%arg0: i32) -> (i32, i32) {
    %c0_i32 = arith.constant 0 : i32
    %c0_i32_0 = arith.constant 0 : i32
    %c0_i32_1 = arith.constant 0 : i32
    return %c0_i32, %c0_i32_0 : i32, i32
  }
  func.func @transform_8(%arg0: i32) -> (i32, i32, i32) {
    %c0_i32 = arith.constant 0 : i32
    %c0_i32_0 = arith.constant 0 : i32
    %c0_i32_1 = arith.constant 0 : i32
    return %arg0, %c0_i32, %c0_i32_0 : i32, i32, i32
  }
}

module attributes {stable_mosaic.version = 11 : i64} {
  func.func @_matmul_bias_kernel(%arg0: i32, %arg1: i32, %arg2: memref<32x48xbf16, #tpu.memory_space<vmem>>, %arg3: memref<48x48xbf16, #tpu.memory_space<vmem>>, %arg4: memref<1x48xf32, #tpu.memory_space<vmem>>, %arg5: memref<32x48xbf16, #tpu.memory_space<vmem>>) attributes {dimension_semantics = [#tpu.dimension_semantics<parallel>, #tpu.dimension_semantics<parallel>], iteration_bounds = array<i64: 1, 1>, scalar_prefetch = 0 : i64, scratch_operands = 0 : i64, tpu.core_type = #tpu.core_type<tc>, window_params = [{transform_indices = @transform_0, window_bounds = array<i64: 32, 48>}, {transform_indices = @transform_1, window_bounds = array<i64: 48, 48>}, {transform_indices = @transform_2, window_bounds = array<i64: 1, 48>}, {transform_indices = @transform_3, window_bounds = array<i64: 32, 48>}]} {
    %c0 = arith.constant 0 : index
    %c0_0 = arith.constant 0 : index
    %0 = vector.load %arg2[%c0, %c0_0] : memref<32x48xbf16, #tpu.memory_space<vmem>>, vector<32x48xbf16>
    %c0_1 = arith.constant 0 : index
    %c0_2 = arith.constant 0 : index
    %1 = vector.load %arg3[%c0_1, %c0_2] : memref<48x48xbf16, #tpu.memory_space<vmem>>, vector<48x48xbf16>
    %cst = arith.constant dense<0.000000e+00> : vector<32x48xf32>
    %2 = tpu.matmul %0, %1, %cst {dimension_numbers = #tpu.dot_dimension_numbers<[1], [0], [0], [1], [0, 0, 1, 1], [], []>} : vector<32x48xbf16>, vector<48x48xbf16>, vector<32x48xf32> -> vector<32x48xf32>
    %c0_3 = arith.constant 0 : index
    %c0_4 = arith.constant 0 : index
    %3 = vector.load %arg4[%c0_3, %c0_4] : memref<1x48xf32, #tpu.memory_space<vmem>>, vector<1x48xf32>
    %4 = vector.broadcast %3 : vector<1x48xf32> to vector<32x48xf32>
    %5 = arith.addf %2, %4 : vector<32x48xf32>
    %cst_5 = arith.constant 0.000000e+00 : f32
    %6 = vector.broadcast %cst_5 : f32 to vector<32x48xf32>
    %7 = arith.maximumf %5, %6 : vector<32x48xf32>
    %8 = arith.truncf %7 : vector<32x48xf32> to vector<32x48xbf16>
    %c0_6 = arith.constant 0 : index
    %c0_7 = arith.constant 0 : index
    %9 = vector.load %arg5[%c0_6, %c0_7] : memref<32x48xbf16, #tpu.memory_space<vmem>>, vector<32x48xbf16>
    tpu.vector_store %arg5[%c0_6, %c0_7], %8 {strides = array<i32>} : memref<32x48xbf16, #tpu.memory_space<vmem>>, vector<32x48xbf16>,
    return
  }
  func.func @transform_0(%arg0: i32, %arg1: i32) -> (i32, i32) {
    %c0_i32 = arith.constant 0 : i32
    %c0_i32_0 = arith.constant 0 : i32
    return %arg0, %c0_i32 : i32, i32
  }
  func.func @transform_1(%arg0: i32, %arg1: i32) -> (i32, i32) {
    %c0_i32 = arith.constant 0 : i32
    %c0_i32_0 = arith.constant 0 : i32
    return %c0_i32, %arg1 : i32, i32
  }
  func.func @transform_2(%arg0: i32, %arg1: i32) -> (i32, i32) {
    %c0_i32 = arith.constant 0 : i32
    %c0_i32_0 = arith.constant 0 : i32
    return %c0_i32, %arg1 : i32, i32
  }
  func.func @transform_3(%arg0: i32, %arg1: i32) -> (i32, i32) {
    %c0_i32 = arith.constant 0 : i32
    return %arg0, %arg1 : i32, i32
  }
}

module attributes {stable_mosaic.version = 11 : i64} {
  func.func @_dwpw_s1_kernel(%arg0: i32, %arg1: memref<1x6x6x48xbf16, #tpu.memory_space<vmem>>, %arg2: memref<9x1x1x48xf32, #tpu.memory_space<vmem>>, %arg3: memref<1x1x48xf32, #tpu.memory_space<vmem>>, %arg4: memref<48x48xbf16, #tpu.memory_space<vmem>>, %arg5: memref<1x48xf32, #tpu.memory_space<vmem>>, %arg6: memref<1x16x48xbf16, #tpu.memory_space<vmem>>, %arg7: memref<16x48xf32, #tpu.memory_space<vmem>>) attributes {dimension_semantics = [#tpu.dimension_semantics<parallel>], iteration_bounds = array<i64: 2>, scalar_prefetch = 0 : i64, scratch_operands = 1 : i64, tpu.core_type = #tpu.core_type<tc>, window_params = [{transform_indices = @transform_0, window_bounds = array<i64: 1, 6, 6, 48>}, {pipeline_mode = #tpu.pipeline_mode<synchronous>, transform_indices = @transform_1, window_bounds = array<i64: 9, 1, 1, 48>}, {pipeline_mode = #tpu.pipeline_mode<synchronous>, transform_indices = @transform_2, window_bounds = array<i64: 1, 1, 48>}, {pipeline_mode = #tpu.pipeline_mode<synchronous>, transform_indices = @transform_3, window_bounds = array<i64: 48, 48>}, {pipeline_mode = #tpu.pipeline_mode<synchronous>, transform_indices = @transform_4, window_bounds = array<i64: 1, 48>}, {transform_indices = @transform_5, window_bounds = array<i64: 1, 16, 48>}]} {
    %cst = arith.constant 0.000000e+00 : f32
    %0 = vector.broadcast %cst : f32 to vector<4x4x48xf32>
    %c0 = arith.constant 0 : index
    %c0_0 = arith.constant 0 : index
    %c0_1 = arith.constant 0 : index
    %c0_2 = arith.constant 0 : index
    %1 = vector.load %arg1[%c0, %c0_0, %c0_1, %c0_2] : memref<1x6x6x48xbf16, #tpu.memory_space<vmem>>, vector<1x4x4x48xbf16>
    %2 = vector.shape_cast %1 : vector<1x4x4x48xbf16> to vector<4x4x48xbf16>
    %3 = arith.extf %2 : vector<4x4x48xbf16> to vector<4x4x48xf32>
    %c0_3 = arith.constant 0 : index
    %c0_4 = arith.constant 0 : index
    %c0_5 = arith.constant 0 : index
    %c0_6 = arith.constant 0 : index
    %4 = vector.load %arg2[%c0_3, %c0_4, %c0_5, %c0_6] : memref<9x1x1x48xf32, #tpu.memory_space<vmem>>, vector<1x1x1x48xf32>
    %5 = vector.shape_cast %4 : vector<1x1x1x48xf32> to vector<1x1x48xf32>
    %6 = vector.broadcast %5 : vector<1x1x48xf32> to vector<4x4x48xf32>
    %7 = arith.mulf %3, %6 : vector<4x4x48xf32>
    %8 = arith.addf %0, %7 : vector<4x4x48xf32>
    %c0_7 = arith.constant 0 : index
    %c0_8 = arith.constant 0 : index
    %c1 = arith.constant 1 : index
    %c0_9 = arith.constant 0 : index
    %9 = vector.load %arg1[%c0_7, %c0_8, %c1, %c0_9] : memref<1x6x6x48xbf16, #tpu.memory_space<vmem>>, vector<1x4x4x48xbf16>
    %10 = vector.shape_cast %9 : vector<1x4x4x48xbf16> to vector<4x4x48xbf16>
    %11 = arith.extf %10 : vector<4x4x48xbf16> to vector<4x4x48xf32>
    %c1_10 = arith.constant 1 : index
    %c0_11 = arith.constant 0 : index
    %c0_12 = arith.constant 0 : index
    %c0_13 = arith.constant 0 : index
    %12 = vector.load %arg2[%c1_10, %c0_11, %c0_12, %c0_13] : memref<9x1x1x48xf32, #tpu.memory_space<vmem>>, vector<1x1x1x48xf32>
    %13 = vector.shape_cast %12 : vector<1x1x1x48xf32> to vector<1x1x48xf32>
    %14 = vector.broadcast %13 : vector<1x1x48xf32> to vector<4x4x48xf32>
    %15 = arith.mulf %11, %14 : vector<4x4x48xf32>
    %16 = arith.addf %8, %15 : vector<4x4x48xf32>
    %c0_14 = arith.constant 0 : index
    %c0_15 = arith.constant 0 : index
    %c2 = arith.constant 2 : index
    %c0_16 = arith.constant 0 : index
    %17 = vector.load %arg1[%c0_14, %c0_15, %c2, %c0_16] : memref<1x6x6x48xbf16, #tpu.memory_space<vmem>>, vector<1x4x4x48xbf16>
    %18 = vector.shape_cast %17 : vector<1x4x4x48xbf16> to vector<4x4x48xbf16>
    %19 = arith.extf %18 : vector<4x4x48xbf16> to vector<4x4x48xf32>
    %c2_17 = arith.constant 2 : index
    %c0_18 = arith.constant 0 : index
    %c0_19 = arith.constant 0 : index
    %c0_20 = arith.constant 0 : index
    %20 = vector.load %arg2[%c2_17, %c0_18, %c0_19, %c0_20] : memref<9x1x1x48xf32, #tpu.memory_space<vmem>>, vector<1x1x1x48xf32>
    %21 = vector.shape_cast %20 : vector<1x1x1x48xf32> to vector<1x1x48xf32>
    %22 = vector.broadcast %21 : vector<1x1x48xf32> to vector<4x4x48xf32>
    %23 = arith.mulf %19, %22 : vector<4x4x48xf32>
    %24 = arith.addf %16, %23 : vector<4x4x48xf32>
    %c0_21 = arith.constant 0 : index
    %c1_22 = arith.constant 1 : index
    %c0_23 = arith.constant 0 : index
    %c0_24 = arith.constant 0 : index
    %25 = vector.load %arg1[%c0_21, %c1_22, %c0_23, %c0_24] : memref<1x6x6x48xbf16, #tpu.memory_space<vmem>>, vector<1x4x4x48xbf16>
    %26 = vector.shape_cast %25 : vector<1x4x4x48xbf16> to vector<4x4x48xbf16>
    %27 = arith.extf %26 : vector<4x4x48xbf16> to vector<4x4x48xf32>
    %c3 = arith.constant 3 : index
    %c0_25 = arith.constant 0 : index
    %c0_26 = arith.constant 0 : index
    %c0_27 = arith.constant 0 : index
    %28 = vector.load %arg2[%c3, %c0_25, %c0_26, %c0_27] : memref<9x1x1x48xf32, #tpu.memory_space<vmem>>, vector<1x1x1x48xf32>
    %29 = vector.shape_cast %28 : vector<1x1x1x48xf32> to vector<1x1x48xf32>
    %30 = vector.broadcast %29 : vector<1x1x48xf32> to vector<4x4x48xf32>
    %31 = arith.mulf %27, %30 : vector<4x4x48xf32>
    %32 = arith.addf %24, %31 : vector<4x4x48xf32>
    %c0_28 = arith.constant 0 : index
    %c1_29 = arith.constant 1 : index
    %c1_30 = arith.constant 1 : index
    %c0_31 = arith.constant 0 : index
    %33 = vector.load %arg1[%c0_28, %c1_29, %c1_30, %c0_31] : memref<1x6x6x48xbf16, #tpu.memory_space<vmem>>, vector<1x4x4x48xbf16>
    %34 = vector.shape_cast %33 : vector<1x4x4x48xbf16> to vector<4x4x48xbf16>
    %35 = arith.extf %34 : vector<4x4x48xbf16> to vector<4x4x48xf32>
    %c4 = arith.constant 4 : index
    %c0_32 = arith.constant 0 : index
    %c0_33 = arith.constant 0 : index
    %c0_34 = arith.constant 0 : index
    %36 = vector.load %arg2[%c4, %c0_32, %c0_33, %c0_34] : memref<9x1x1x48xf32, #tpu.memory_space<vmem>>, vector<1x1x1x48xf32>
    %37 = vector.shape_cast %36 : vector<1x1x1x48xf32> to vector<1x1x48xf32>
    %38 = vector.broadcast %37 : vector<1x1x48xf32> to vector<4x4x48xf32>
    %39 = arith.mulf %35, %38 : vector<4x4x48xf32>
    %40 = arith.addf %32, %39 : vector<4x4x48xf32>
    %c0_35 = arith.constant 0 : index
    %c1_36 = arith.constant 1 : index
    %c2_37 = arith.constant 2 : index
    %c0_38 = arith.constant 0 : index
    %41 = vector.load %arg1[%c0_35, %c1_36, %c2_37, %c0_38] : memref<1x6x6x48xbf16, #tpu.memory_space<vmem>>, vector<1x4x4x48xbf16>
    %42 = vector.shape_cast %41 : vector<1x4x4x48xbf16> to vector<4x4x48xbf16>
    %43 = arith.extf %42 : vector<4x4x48xbf16> to vector<4x4x48xf32>
    %c5 = arith.constant 5 : index
    %c0_39 = arith.constant 0 : index
    %c0_40 = arith.constant 0 : index
    %c0_41 = arith.constant 0 : index
    %44 = vector.load %arg2[%c5, %c0_39, %c0_40, %c0_41] : memref<9x1x1x48xf32, #tpu.memory_space<vmem>>, vector<1x1x1x48xf32>
    %45 = vector.shape_cast %44 : vector<1x1x1x48xf32> to vector<1x1x48xf32>
    %46 = vector.broadcast %45 : vector<1x1x48xf32> to vector<4x4x48xf32>
    %47 = arith.mulf %43, %46 : vector<4x4x48xf32>
    %48 = arith.addf %40, %47 : vector<4x4x48xf32>
    %c0_42 = arith.constant 0 : index
    %c2_43 = arith.constant 2 : index
    %c0_44 = arith.constant 0 : index
    %c0_45 = arith.constant 0 : index
    %49 = vector.load %arg1[%c0_42, %c2_43, %c0_44, %c0_45] : memref<1x6x6x48xbf16, #tpu.memory_space<vmem>>, vector<1x4x4x48xbf16>
    %50 = vector.shape_cast %49 : vector<1x4x4x48xbf16> to vector<4x4x48xbf16>
    %51 = arith.extf %50 : vector<4x4x48xbf16> to vector<4x4x48xf32>
    %c6 = arith.constant 6 : index
    %c0_46 = arith.constant 0 : index
    %c0_47 = arith.constant 0 : index
    %c0_48 = arith.constant 0 : index
    %52 = vector.load %arg2[%c6, %c0_46, %c0_47, %c0_48] : memref<9x1x1x48xf32, #tpu.memory_space<vmem>>, vector<1x1x1x48xf32>
    %53 = vector.shape_cast %52 : vector<1x1x1x48xf32> to vector<1x1x48xf32>
    %54 = vector.broadcast %53 : vector<1x1x48xf32> to vector<4x4x48xf32>
    %55 = arith.mulf %51, %54 : vector<4x4x48xf32>
    %56 = arith.addf %48, %55 : vector<4x4x48xf32>
    %c0_49 = arith.constant 0 : index
    %c2_50 = arith.constant 2 : index
    %c1_51 = arith.constant 1 : index
    %c0_52 = arith.constant 0 : index
    %57 = vector.load %arg1[%c0_49, %c2_50, %c1_51, %c0_52] : memref<1x6x6x48xbf16, #tpu.memory_space<vmem>>, vector<1x4x4x48xbf16>
    %58 = vector.shape_cast %57 : vector<1x4x4x48xbf16> to vector<4x4x48xbf16>
    %59 = arith.extf %58 : vector<4x4x48xbf16> to vector<4x4x48xf32>
    %c7 = arith.constant 7 : index
    %c0_53 = arith.constant 0 : index
    %c0_54 = arith.constant 0 : index
    %c0_55 = arith.constant 0 : index
    %60 = vector.load %arg2[%c7, %c0_53, %c0_54, %c0_55] : memref<9x1x1x48xf32, #tpu.memory_space<vmem>>, vector<1x1x1x48xf32>
    %61 = vector.shape_cast %60 : vector<1x1x1x48xf32> to vector<1x1x48xf32>
    %62 = vector.broadcast %61 : vector<1x1x48xf32> to vector<4x4x48xf32>
    %63 = arith.mulf %59, %62 : vector<4x4x48xf32>
    %64 = arith.addf %56, %63 : vector<4x4x48xf32>
    %c0_56 = arith.constant 0 : index
    %c2_57 = arith.constant 2 : index
    %c2_58 = arith.constant 2 : index
    %c0_59 = arith.constant 0 : index
    %65 = vector.load %arg1[%c0_56, %c2_57, %c2_58, %c0_59] : memref<1x6x6x48xbf16, #tpu.memory_space<vmem>>, vector<1x4x4x48xbf16>
    %66 = vector.shape_cast %65 : vector<1x4x4x48xbf16> to vector<4x4x48xbf16>
    %67 = arith.extf %66 : vector<4x4x48xbf16> to vector<4x4x48xf32>
    %c8 = arith.constant 8 : index
    %c0_60 = arith.constant 0 : index
    %c0_61 = arith.constant 0 : index
    %c0_62 = arith.constant 0 : index
    %68 = vector.load %arg2[%c8, %c0_60, %c0_61, %c0_62] : memref<9x1x1x48xf32, #tpu.memory_space<vmem>>, vector<1x1x1x48xf32>
    %69 = vector.shape_cast %68 : vector<1x1x1x48xf32> to vector<1x1x48xf32>
    %70 = vector.broadcast %69 : vector<1x1x48xf32> to vector<4x4x48xf32>
    %71 = arith.mulf %67, %70 : vector<4x4x48xf32>
    %72 = arith.addf %64, %71 : vector<4x4x48xf32>
    %c0_63 = arith.constant 0 : index
    %c0_64 = arith.constant 0 : index
    %c0_65 = arith.constant 0 : index
    %73 = vector.load %arg3[%c0_63, %c0_64, %c0_65] : memref<1x1x48xf32, #tpu.memory_space<vmem>>, vector<1x1x48xf32>
    %74 = vector.broadcast %73 : vector<1x1x48xf32> to vector<4x4x48xf32>
    %75 = arith.addf %72, %74 : vector<4x4x48xf32>
    %cst_66 = arith.constant 0.000000e+00 : f32
    %76 = vector.broadcast %cst_66 : f32 to vector<4x4x48xf32>
    %77 = arith.maximumf %75, %76 : vector<4x4x48xf32>
    %78 = vector.extract_strided_slice %77 {offsets = [0, 0, 0], sizes = [1, 4, 48], strides = [1, 1, 1]} : vector<4x4x48xf32> to vector<1x4x48xf32>
    %79 = vector.shape_cast %78 : vector<1x4x48xf32> to vector<4x48xf32>
    %c0_67 = arith.constant 0 : index
    %c0_68 = arith.constant 0 : index
    %80 = vector.load %arg7[%c0_67, %c0_68] : memref<16x48xf32, #tpu.memory_space<vmem>>, vector<4x48xf32>
    tpu.vector_store %arg7[%c0_67, %c0_68], %79 {strides = array<i32>} : memref<16x48xf32, #tpu.memory_space<vmem>>, vector<4x48xf32>,
    %81 = vector.extract_strided_slice %77 {offsets = [1, 0, 0], sizes = [1, 4, 48], strides = [1, 1, 1]} : vector<4x4x48xf32> to vector<1x4x48xf32>
    %82 = vector.shape_cast %81 : vector<1x4x48xf32> to vector<4x48xf32>
    %c4_69 = arith.constant 4 : index
    %c0_70 = arith.constant 0 : index
    %83 = vector.load %arg7[%c4_69, %c0_70] : memref<16x48xf32, #tpu.memory_space<vmem>>, vector<4x48xf32>
    tpu.vector_store %arg7[%c4_69, %c0_70], %82 {strides = array<i32>} : memref<16x48xf32, #tpu.memory_space<vmem>>, vector<4x48xf32>,
    %84 = vector.extract_strided_slice %77 {offsets = [2, 0, 0], sizes = [1, 4, 48], strides = [1, 1, 1]} : vector<4x4x48xf32> to vector<1x4x48xf32>
    %85 = vector.shape_cast %84 : vector<1x4x48xf32> to vector<4x48xf32>
    %c8_71 = arith.constant 8 : index
    %c0_72 = arith.constant 0 : index
    %86 = vector.load %arg7[%c8_71, %c0_72] : memref<16x48xf32, #tpu.memory_space<vmem>>, vector<4x48xf32>
    tpu.vector_store %arg7[%c8_71, %c0_72], %85 {strides = array<i32>} : memref<16x48xf32, #tpu.memory_space<vmem>>, vector<4x48xf32>,
    %87 = vector.extract_strided_slice %77 {offsets = [3, 0, 0], sizes = [1, 4, 48], strides = [1, 1, 1]} : vector<4x4x48xf32> to vector<1x4x48xf32>
    %88 = vector.shape_cast %87 : vector<1x4x48xf32> to vector<4x48xf32>
    %c12 = arith.constant 12 : index
    %c0_73 = arith.constant 0 : index
    %89 = vector.load %arg7[%c12, %c0_73] : memref<16x48xf32, #tpu.memory_space<vmem>>, vector<4x48xf32>
    tpu.vector_store %arg7[%c12, %c0_73], %88 {strides = array<i32>} : memref<16x48xf32, #tpu.memory_space<vmem>>, vector<4x48xf32>,
    %c0_74 = arith.constant 0 : index
    %c0_75 = arith.constant 0 : index
    %90 = vector.load %arg7[%c0_74, %c0_75] : memref<16x48xf32, #tpu.memory_space<vmem>>, vector<16x48xf32>
    %91 = arith.truncf %90 : vector<16x48xf32> to vector<16x48xbf16>
    %c0_76 = arith.constant 0 : index
    %c0_77 = arith.constant 0 : index
    %92 = vector.load %arg4[%c0_76, %c0_77] : memref<48x48xbf16, #tpu.memory_space<vmem>>, vector<48x48xbf16>
    %cst_78 = arith.constant dense<0.000000e+00> : vector<16x48xf32>
    %93 = tpu.matmul %91, %92, %cst_78 {dimension_numbers = #tpu.dot_dimension_numbers<[1], [0], [0], [1], [0, 0, 1, 1], [], []>} : vector<16x48xbf16>, vector<48x48xbf16>, vector<16x48xf32> -> vector<16x48xf32>
    %c0_79 = arith.constant 0 : index
    %c0_80 = arith.constant 0 : index
    %94 = vector.load %arg5[%c0_79, %c0_80] : memref<1x48xf32, #tpu.memory_space<vmem>>, vector<1x48xf32>
    %95 = vector.broadcast %94 : vector<1x48xf32> to vector<16x48xf32>
    %96 = arith.addf %93, %95 : vector<16x48xf32>
    %cst_81 = arith.constant 0.000000e+00 : f32
    %97 = vector.broadcast %cst_81 : f32 to vector<16x48xf32>
    %98 = arith.maximumf %96, %97 : vector<16x48xf32>
    %99 = arith.truncf %98 : vector<16x48xf32> to vector<16x48xbf16>
    %c0_82 = arith.constant 0 : index
    %c0_83 = arith.constant 0 : index
    %c0_84 = arith.constant 0 : index
    %100 = vector.load %arg6[%c0_82, %c0_83, %c0_84] : memref<1x16x48xbf16, #tpu.memory_space<vmem>>, vector<1x16x48xbf16>
    %101 = vector.shape_cast %100 : vector<1x16x48xbf16> to vector<16x48xbf16>
    %102 = vector.shape_cast %99 : vector<16x48xbf16> to vector<1x16x48xbf16>
    tpu.vector_store %arg6[%c0_82, %c0_83, %c0_84], %102 {strides = array<i32>} : memref<1x16x48xbf16, #tpu.memory_space<vmem>>, vector<1x16x48xbf16>,
    return
  }
  func.func @transform_0(%arg0: i32) -> (i32, i32, i32, i32) {
    %c0_i32 = arith.constant 0 : i32
    %c0_i32_0 = arith.constant 0 : i32
    %c0_i32_1 = arith.constant 0 : i32
    %c0_i32_2 = arith.constant 0 : i32
    return %arg0, %c0_i32, %c0_i32_0, %c0_i32_1 : i32, i32, i32, i32
  }
  func.func @transform_1(%arg0: i32) -> (i32, i32, i32, i32) {
    %c0_i32 = arith.constant 0 : i32
    %c0_i32_0 = arith.constant 0 : i32
    %c0_i32_1 = arith.constant 0 : i32
    %c0_i32_2 = arith.constant 0 : i32
    %c0_i32_3 = arith.constant 0 : i32
    return %c0_i32, %c0_i32_0, %c0_i32_1, %c0_i32_2 : i32, i32, i32, i32
  }
  func.func @transform_2(%arg0: i32) -> (i32, i32, i32) {
    %c0_i32 = arith.constant 0 : i32
    %c0_i32_0 = arith.constant 0 : i32
    %c0_i32_1 = arith.constant 0 : i32
    %c0_i32_2 = arith.constant 0 : i32
    return %c0_i32, %c0_i32_0, %c0_i32_1 : i32, i32, i32
  }
  func.func @transform_3(%arg0: i32) -> (i32, i32) {
    %c0_i32 = arith.constant 0 : i32
    %c0_i32_0 = arith.constant 0 : i32
    %c0_i32_1 = arith.constant 0 : i32
    return %c0_i32, %c0_i32_0 : i32, i32
  }
  func.func @transform_4(%arg0: i32) -> (i32, i32) {
    %c0_i32 = arith.constant 0 : i32
    %c0_i32_0 = arith.constant 0 : i32
    %c0_i32_1 = arith.constant 0 : i32
    return %c0_i32, %c0_i32_0 : i32, i32
  }
  func.func @transform_5(%arg0: i32) -> (i32, i32, i32) {
    %c0_i32 = arith.constant 0 : i32
    %c0_i32_0 = arith.constant 0 : i32
    %c0_i32_1 = arith.constant 0 : i32
    return %arg0, %c0_i32, %c0_i32_0 : i32, i32, i32
  }
}

module attributes {stable_mosaic.version = 11 : i64} {
  func.func @_matmul_bias_kernel(%arg0: i32, %arg1: i32, %arg2: memref<32x96xbf16, #tpu.memory_space<vmem>>, %arg3: memref<96x96xbf16, #tpu.memory_space<vmem>>, %arg4: memref<1x96xf32, #tpu.memory_space<vmem>>, %arg5: memref<32x96xbf16, #tpu.memory_space<vmem>>) attributes {dimension_semantics = [#tpu.dimension_semantics<parallel>, #tpu.dimension_semantics<parallel>], iteration_bounds = array<i64: 1, 1>, scalar_prefetch = 0 : i64, scratch_operands = 0 : i64, tpu.core_type = #tpu.core_type<tc>, window_params = [{transform_indices = @transform_0, window_bounds = array<i64: 32, 96>}, {transform_indices = @transform_1, window_bounds = array<i64: 96, 96>}, {transform_indices = @transform_2, window_bounds = array<i64: 1, 96>}, {transform_indices = @transform_3, window_bounds = array<i64: 32, 96>}]} {
    %c0 = arith.constant 0 : index
    %c0_0 = arith.constant 0 : index
    %0 = vector.load %arg2[%c0, %c0_0] : memref<32x96xbf16, #tpu.memory_space<vmem>>, vector<32x96xbf16>
    %c0_1 = arith.constant 0 : index
    %c0_2 = arith.constant 0 : index
    %1 = vector.load %arg3[%c0_1, %c0_2] : memref<96x96xbf16, #tpu.memory_space<vmem>>, vector<96x96xbf16>
    %cst = arith.constant dense<0.000000e+00> : vector<32x96xf32>
    %2 = tpu.matmul %0, %1, %cst {dimension_numbers = #tpu.dot_dimension_numbers<[1], [0], [0], [1], [0, 0, 1, 1], [], []>} : vector<32x96xbf16>, vector<96x96xbf16>, vector<32x96xf32> -> vector<32x96xf32>
    %c0_3 = arith.constant 0 : index
    %c0_4 = arith.constant 0 : index
    %3 = vector.load %arg4[%c0_3, %c0_4] : memref<1x96xf32, #tpu.memory_space<vmem>>, vector<1x96xf32>
    %4 = vector.broadcast %3 : vector<1x96xf32> to vector<32x96xf32>
    %5 = arith.addf %2, %4 : vector<32x96xf32>
    %cst_5 = arith.constant 0.000000e+00 : f32
    %6 = vector.broadcast %cst_5 : f32 to vector<32x96xf32>
    %7 = arith.maximumf %5, %6 : vector<32x96xf32>
    %8 = arith.truncf %7 : vector<32x96xf32> to vector<32x96xbf16>
    %c0_6 = arith.constant 0 : index
    %c0_7 = arith.constant 0 : index
    %9 = vector.load %arg5[%c0_6, %c0_7] : memref<32x96xbf16, #tpu.memory_space<vmem>>, vector<32x96xbf16>
    tpu.vector_store %arg5[%c0_6, %c0_7], %8 {strides = array<i32>} : memref<32x96xbf16, #tpu.memory_space<vmem>>, vector<32x96xbf16>,
    return
  }
  func.func @transform_0(%arg0: i32, %arg1: i32) -> (i32, i32) {
    %c0_i32 = arith.constant 0 : i32
    %c0_i32_0 = arith.constant 0 : i32
    return %arg0, %c0_i32 : i32, i32
  }
  func.func @transform_1(%arg0: i32, %arg1: i32) -> (i32, i32) {
    %c0_i32 = arith.constant 0 : i32
    %c0_i32_0 = arith.constant 0 : i32
    return %c0_i32, %arg1 : i32, i32
  }
  func.func @transform_2(%arg0: i32, %arg1: i32) -> (i32, i32) {
    %c0_i32 = arith.constant 0 : i32
    %c0_i32_0 = arith.constant 0 : i32
    return %c0_i32, %arg1 : i32, i32
  }
  func.func @transform_3(%arg0: i32, %arg1: i32) -> (i32, i32) {
    %c0_i32 = arith.constant 0 : i32
    return %arg0, %arg1 : i32, i32
  }
}

module attributes {stable_mosaic.version = 11 : i64} {
  func.func @_dwpw_s2_kernel(%arg0: i32, %arg1: memref<1x3x3x96xbf16, #tpu.memory_space<vmem>>, %arg2: memref<1x3x3x96xbf16, #tpu.memory_space<vmem>>, %arg3: memref<1x3x3x96xbf16, #tpu.memory_space<vmem>>, %arg4: memref<1x3x3x96xbf16, #tpu.memory_space<vmem>>, %arg5: memref<9x1x1x96xf32, #tpu.memory_space<vmem>>, %arg6: memref<1x1x96xf32, #tpu.memory_space<vmem>>, %arg7: memref<96x96xbf16, #tpu.memory_space<vmem>>, %arg8: memref<1x96xf32, #tpu.memory_space<vmem>>, %arg9: memref<1x4x96xbf16, #tpu.memory_space<vmem>>, %arg10: memref<4x96xf32, #tpu.memory_space<vmem>>) attributes {dimension_semantics = [#tpu.dimension_semantics<parallel>], iteration_bounds = array<i64: 2>, scalar_prefetch = 0 : i64, scratch_operands = 1 : i64, tpu.core_type = #tpu.core_type<tc>, window_params = [{transform_indices = @transform_0, window_bounds = array<i64: 1, 3, 3, 96>}, {transform_indices = @transform_1, window_bounds = array<i64: 1, 3, 3, 96>}, {transform_indices = @transform_2, window_bounds = array<i64: 1, 3, 3, 96>}, {transform_indices = @transform_3, window_bounds = array<i64: 1, 3, 3, 96>}, {pipeline_mode = #tpu.pipeline_mode<synchronous>, transform_indices = @transform_4, window_bounds = array<i64: 9, 1, 1, 96>}, {pipeline_mode = #tpu.pipeline_mode<synchronous>, transform_indices = @transform_5, window_bounds = array<i64: 1, 1, 96>}, {pipeline_mode = #tpu.pipeline_mode<synchronous>, transform_indices = @transform_6, window_bounds = array<i64: 96, 96>}, {pipeline_mode = #tpu.pipeline_mode<synchronous>, transform_indices = @transform_7, window_bounds = array<i64: 1, 96>}, {transform_indices = @transform_8, window_bounds = array<i64: 1, 4, 96>}]} {
    %cst = arith.constant 0.000000e+00 : f32
    %0 = vector.broadcast %cst : f32 to vector<2x2x96xf32>
    %c0 = arith.constant 0 : index
    %c0_0 = arith.constant 0 : index
    %c0_1 = arith.constant 0 : index
    %c0_2 = arith.constant 0 : index
    %1 = vector.load %arg1[%c0, %c0_0, %c0_1, %c0_2] : memref<1x3x3x96xbf16, #tpu.memory_space<vmem>>, vector<1x2x2x96xbf16>
    %2 = vector.shape_cast %1 : vector<1x2x2x96xbf16> to vector<2x2x96xbf16>
    %3 = arith.extf %2 : vector<2x2x96xbf16> to vector<2x2x96xf32>
    %c0_3 = arith.constant 0 : index
    %c0_4 = arith.constant 0 : index
    %c0_5 = arith.constant 0 : index
    %c0_6 = arith.constant 0 : index
    %4 = vector.load %arg5[%c0_3, %c0_4, %c0_5, %c0_6] : memref<9x1x1x96xf32, #tpu.memory_space<vmem>>, vector<1x1x1x96xf32>
    %5 = vector.shape_cast %4 : vector<1x1x1x96xf32> to vector<1x1x96xf32>
    %6 = vector.broadcast %5 : vector<1x1x96xf32> to vector<2x2x96xf32>
    %7 = arith.mulf %3, %6 : vector<2x2x96xf32>
    %8 = arith.addf %0, %7 : vector<2x2x96xf32>
    %c0_7 = arith.constant 0 : index
    %c0_8 = arith.constant 0 : index
    %c0_9 = arith.constant 0 : index
    %c0_10 = arith.constant 0 : index
    %9 = vector.load %arg2[%c0_7, %c0_8, %c0_9, %c0_10] : memref<1x3x3x96xbf16, #tpu.memory_space<vmem>>, vector<1x2x2x96xbf16>
    %10 = vector.shape_cast %9 : vector<1x2x2x96xbf16> to vector<2x2x96xbf16>
    %11 = arith.extf %10 : vector<2x2x96xbf16> to vector<2x2x96xf32>
    %c1 = arith.constant 1 : index
    %c0_11 = arith.constant 0 : index
    %c0_12 = arith.constant 0 : index
    %c0_13 = arith.constant 0 : index
    %12 = vector.load %arg5[%c1, %c0_11, %c0_12, %c0_13] : memref<9x1x1x96xf32, #tpu.memory_space<vmem>>, vector<1x1x1x96xf32>
    %13 = vector.shape_cast %12 : vector<1x1x1x96xf32> to vector<1x1x96xf32>
    %14 = vector.broadcast %13 : vector<1x1x96xf32> to vector<2x2x96xf32>
    %15 = arith.mulf %11, %14 : vector<2x2x96xf32>
    %16 = arith.addf %8, %15 : vector<2x2x96xf32>
    %c0_14 = arith.constant 0 : index
    %c0_15 = arith.constant 0 : index
    %c1_16 = arith.constant 1 : index
    %c0_17 = arith.constant 0 : index
    %17 = vector.load %arg1[%c0_14, %c0_15, %c1_16, %c0_17] : memref<1x3x3x96xbf16, #tpu.memory_space<vmem>>, vector<1x2x2x96xbf16>
    %18 = vector.shape_cast %17 : vector<1x2x2x96xbf16> to vector<2x2x96xbf16>
    %19 = arith.extf %18 : vector<2x2x96xbf16> to vector<2x2x96xf32>
    %c2 = arith.constant 2 : index
    %c0_18 = arith.constant 0 : index
    %c0_19 = arith.constant 0 : index
    %c0_20 = arith.constant 0 : index
    %20 = vector.load %arg5[%c2, %c0_18, %c0_19, %c0_20] : memref<9x1x1x96xf32, #tpu.memory_space<vmem>>, vector<1x1x1x96xf32>
    %21 = vector.shape_cast %20 : vector<1x1x1x96xf32> to vector<1x1x96xf32>
    %22 = vector.broadcast %21 : vector<1x1x96xf32> to vector<2x2x96xf32>
    %23 = arith.mulf %19, %22 : vector<2x2x96xf32>
    %24 = arith.addf %16, %23 : vector<2x2x96xf32>
    %c0_21 = arith.constant 0 : index
    %c0_22 = arith.constant 0 : index
    %c0_23 = arith.constant 0 : index
    %c0_24 = arith.constant 0 : index
    %25 = vector.load %arg3[%c0_21, %c0_22, %c0_23, %c0_24] : memref<1x3x3x96xbf16, #tpu.memory_space<vmem>>, vector<1x2x2x96xbf16>
    %26 = vector.shape_cast %25 : vector<1x2x2x96xbf16> to vector<2x2x96xbf16>
    %27 = arith.extf %26 : vector<2x2x96xbf16> to vector<2x2x96xf32>
    %c3 = arith.constant 3 : index
    %c0_25 = arith.constant 0 : index
    %c0_26 = arith.constant 0 : index
    %c0_27 = arith.constant 0 : index
    %28 = vector.load %arg5[%c3, %c0_25, %c0_26, %c0_27] : memref<9x1x1x96xf32, #tpu.memory_space<vmem>>, vector<1x1x1x96xf32>
    %29 = vector.shape_cast %28 : vector<1x1x1x96xf32> to vector<1x1x96xf32>
    %30 = vector.broadcast %29 : vector<1x1x96xf32> to vector<2x2x96xf32>
    %31 = arith.mulf %27, %30 : vector<2x2x96xf32>
    %32 = arith.addf %24, %31 : vector<2x2x96xf32>
    %c0_28 = arith.constant 0 : index
    %c0_29 = arith.constant 0 : index
    %c0_30 = arith.constant 0 : index
    %c0_31 = arith.constant 0 : index
    %33 = vector.load %arg4[%c0_28, %c0_29, %c0_30, %c0_31] : memref<1x3x3x96xbf16, #tpu.memory_space<vmem>>, vector<1x2x2x96xbf16>
    %34 = vector.shape_cast %33 : vector<1x2x2x96xbf16> to vector<2x2x96xbf16>
    %35 = arith.extf %34 : vector<2x2x96xbf16> to vector<2x2x96xf32>
    %c4 = arith.constant 4 : index
    %c0_32 = arith.constant 0 : index
    %c0_33 = arith.constant 0 : index
    %c0_34 = arith.constant 0 : index
    %36 = vector.load %arg5[%c4, %c0_32, %c0_33, %c0_34] : memref<9x1x1x96xf32, #tpu.memory_space<vmem>>, vector<1x1x1x96xf32>
    %37 = vector.shape_cast %36 : vector<1x1x1x96xf32> to vector<1x1x96xf32>
    %38 = vector.broadcast %37 : vector<1x1x96xf32> to vector<2x2x96xf32>
    %39 = arith.mulf %35, %38 : vector<2x2x96xf32>
    %40 = arith.addf %32, %39 : vector<2x2x96xf32>
    %c0_35 = arith.constant 0 : index
    %c0_36 = arith.constant 0 : index
    %c1_37 = arith.constant 1 : index
    %c0_38 = arith.constant 0 : index
    %41 = vector.load %arg3[%c0_35, %c0_36, %c1_37, %c0_38] : memref<1x3x3x96xbf16, #tpu.memory_space<vmem>>, vector<1x2x2x96xbf16>
    %42 = vector.shape_cast %41 : vector<1x2x2x96xbf16> to vector<2x2x96xbf16>
    %43 = arith.extf %42 : vector<2x2x96xbf16> to vector<2x2x96xf32>
    %c5 = arith.constant 5 : index
    %c0_39 = arith.constant 0 : index
    %c0_40 = arith.constant 0 : index
    %c0_41 = arith.constant 0 : index
    %44 = vector.load %arg5[%c5, %c0_39, %c0_40, %c0_41] : memref<9x1x1x96xf32, #tpu.memory_space<vmem>>, vector<1x1x1x96xf32>
    %45 = vector.shape_cast %44 : vector<1x1x1x96xf32> to vector<1x1x96xf32>
    %46 = vector.broadcast %45 : vector<1x1x96xf32> to vector<2x2x96xf32>
    %47 = arith.mulf %43, %46 : vector<2x2x96xf32>
    %48 = arith.addf %40, %47 : vector<2x2x96xf32>
    %c0_42 = arith.constant 0 : index
    %c1_43 = arith.constant 1 : index
    %c0_44 = arith.constant 0 : index
    %c0_45 = arith.constant 0 : index
    %49 = vector.load %arg1[%c0_42, %c1_43, %c0_44, %c0_45] : memref<1x3x3x96xbf16, #tpu.memory_space<vmem>>, vector<1x2x2x96xbf16>
    %50 = vector.shape_cast %49 : vector<1x2x2x96xbf16> to vector<2x2x96xbf16>
    %51 = arith.extf %50 : vector<2x2x96xbf16> to vector<2x2x96xf32>
    %c6 = arith.constant 6 : index
    %c0_46 = arith.constant 0 : index
    %c0_47 = arith.constant 0 : index
    %c0_48 = arith.constant 0 : index
    %52 = vector.load %arg5[%c6, %c0_46, %c0_47, %c0_48] : memref<9x1x1x96xf32, #tpu.memory_space<vmem>>, vector<1x1x1x96xf32>
    %53 = vector.shape_cast %52 : vector<1x1x1x96xf32> to vector<1x1x96xf32>
    %54 = vector.broadcast %53 : vector<1x1x96xf32> to vector<2x2x96xf32>
    %55 = arith.mulf %51, %54 : vector<2x2x96xf32>
    %56 = arith.addf %48, %55 : vector<2x2x96xf32>
    %c0_49 = arith.constant 0 : index
    %c1_50 = arith.constant 1 : index
    %c0_51 = arith.constant 0 : index
    %c0_52 = arith.constant 0 : index
    %57 = vector.load %arg2[%c0_49, %c1_50, %c0_51, %c0_52] : memref<1x3x3x96xbf16, #tpu.memory_space<vmem>>, vector<1x2x2x96xbf16>
    %58 = vector.shape_cast %57 : vector<1x2x2x96xbf16> to vector<2x2x96xbf16>
    %59 = arith.extf %58 : vector<2x2x96xbf16> to vector<2x2x96xf32>
    %c7 = arith.constant 7 : index
    %c0_53 = arith.constant 0 : index
    %c0_54 = arith.constant 0 : index
    %c0_55 = arith.constant 0 : index
    %60 = vector.load %arg5[%c7, %c0_53, %c0_54, %c0_55] : memref<9x1x1x96xf32, #tpu.memory_space<vmem>>, vector<1x1x1x96xf32>
    %61 = vector.shape_cast %60 : vector<1x1x1x96xf32> to vector<1x1x96xf32>
    %62 = vector.broadcast %61 : vector<1x1x96xf32> to vector<2x2x96xf32>
    %63 = arith.mulf %59, %62 : vector<2x2x96xf32>
    %64 = arith.addf %56, %63 : vector<2x2x96xf32>
    %c0_56 = arith.constant 0 : index
    %c1_57 = arith.constant 1 : index
    %c1_58 = arith.constant 1 : index
    %c0_59 = arith.constant 0 : index
    %65 = vector.load %arg1[%c0_56, %c1_57, %c1_58, %c0_59] : memref<1x3x3x96xbf16, #tpu.memory_space<vmem>>, vector<1x2x2x96xbf16>
    %66 = vector.shape_cast %65 : vector<1x2x2x96xbf16> to vector<2x2x96xbf16>
    %67 = arith.extf %66 : vector<2x2x96xbf16> to vector<2x2x96xf32>
    %c8 = arith.constant 8 : index
    %c0_60 = arith.constant 0 : index
    %c0_61 = arith.constant 0 : index
    %c0_62 = arith.constant 0 : index
    %68 = vector.load %arg5[%c8, %c0_60, %c0_61, %c0_62] : memref<9x1x1x96xf32, #tpu.memory_space<vmem>>, vector<1x1x1x96xf32>
    %69 = vector.shape_cast %68 : vector<1x1x1x96xf32> to vector<1x1x96xf32>
    %70 = vector.broadcast %69 : vector<1x1x96xf32> to vector<2x2x96xf32>
    %71 = arith.mulf %67, %70 : vector<2x2x96xf32>
    %72 = arith.addf %64, %71 : vector<2x2x96xf32>
    %c0_63 = arith.constant 0 : index
    %c0_64 = arith.constant 0 : index
    %c0_65 = arith.constant 0 : index
    %73 = vector.load %arg6[%c0_63, %c0_64, %c0_65] : memref<1x1x96xf32, #tpu.memory_space<vmem>>, vector<1x1x96xf32>
    %74 = vector.broadcast %73 : vector<1x1x96xf32> to vector<2x2x96xf32>
    %75 = arith.addf %72, %74 : vector<2x2x96xf32>
    %cst_66 = arith.constant 0.000000e+00 : f32
    %76 = vector.broadcast %cst_66 : f32 to vector<2x2x96xf32>
    %77 = arith.maximumf %75, %76 : vector<2x2x96xf32>
    %78 = vector.extract_strided_slice %77 {offsets = [0, 0, 0], sizes = [1, 2, 96], strides = [1, 1, 1]} : vector<2x2x96xf32> to vector<1x2x96xf32>
    %79 = vector.shape_cast %78 : vector<1x2x96xf32> to vector<2x96xf32>
    %c0_67 = arith.constant 0 : index
    %c0_68 = arith.constant 0 : index
    %80 = vector.load %arg10[%c0_67, %c0_68] : memref<4x96xf32, #tpu.memory_space<vmem>>, vector<2x96xf32>
    tpu.vector_store %arg10[%c0_67, %c0_68], %79 {strides = array<i32>} : memref<4x96xf32, #tpu.memory_space<vmem>>, vector<2x96xf32>,
    %81 = vector.extract_strided_slice %77 {offsets = [1, 0, 0], sizes = [1, 2, 96], strides = [1, 1, 1]} : vector<2x2x96xf32> to vector<1x2x96xf32>
    %82 = vector.shape_cast %81 : vector<1x2x96xf32> to vector<2x96xf32>
    %c2_69 = arith.constant 2 : index
    %c0_70 = arith.constant 0 : index
    %83 = vector.load %arg10[%c2_69, %c0_70] : memref<4x96xf32, #tpu.memory_space<vmem>>, vector<2x96xf32>
    tpu.vector_store %arg10[%c2_69, %c0_70], %82 {strides = array<i32>} : memref<4x96xf32, #tpu.memory_space<vmem>>, vector<2x96xf32>,
    %c0_71 = arith.constant 0 : index
    %c0_72 = arith.constant 0 : index
    %84 = vector.load %arg10[%c0_71, %c0_72] : memref<4x96xf32, #tpu.memory_space<vmem>>, vector<4x96xf32>
    %85 = arith.truncf %84 : vector<4x96xf32> to vector<4x96xbf16>
    %c0_73 = arith.constant 0 : index
    %c0_74 = arith.constant 0 : index
    %86 = vector.load %arg7[%c0_73, %c0_74] : memref<96x96xbf16, #tpu.memory_space<vmem>>, vector<96x96xbf16>
    %cst_75 = arith.constant dense<0.000000e+00> : vector<4x96xf32>
    %87 = tpu.matmul %85, %86, %cst_75 {dimension_numbers = #tpu.dot_dimension_numbers<[1], [0], [0], [1], [0, 0, 1, 1], [], []>} : vector<4x96xbf16>, vector<96x96xbf16>, vector<4x96xf32> -> vector<4x96xf32>
    %c0_76 = arith.constant 0 : index
    %c0_77 = arith.constant 0 : index
    %88 = vector.load %arg8[%c0_76, %c0_77] : memref<1x96xf32, #tpu.memory_space<vmem>>, vector<1x96xf32>
    %89 = vector.broadcast %88 : vector<1x96xf32> to vector<4x96xf32>
    %90 = arith.addf %87, %89 : vector<4x96xf32>
    %cst_78 = arith.constant 0.000000e+00 : f32
    %91 = vector.broadcast %cst_78 : f32 to vector<4x96xf32>
    %92 = arith.maximumf %90, %91 : vector<4x96xf32>
    %93 = arith.truncf %92 : vector<4x96xf32> to vector<4x96xbf16>
    %c0_79 = arith.constant 0 : index
    %c0_80 = arith.constant 0 : index
    %c0_81 = arith.constant 0 : index
    %94 = vector.load %arg9[%c0_79, %c0_80, %c0_81] : memref<1x4x96xbf16, #tpu.memory_space<vmem>>, vector<1x4x96xbf16>
    %95 = vector.shape_cast %94 : vector<1x4x96xbf16> to vector<4x96xbf16>
    %96 = vector.shape_cast %93 : vector<4x96xbf16> to vector<1x4x96xbf16>
    tpu.vector_store %arg9[%c0_79, %c0_80, %c0_81], %96 {strides = array<i32>} : memref<1x4x96xbf16, #tpu.memory_space<vmem>>, vector<1x4x96xbf16>,
    return
  }
  func.func @transform_0(%arg0: i32) -> (i32, i32, i32, i32) {
    %c0_i32 = arith.constant 0 : i32
    %c0_i32_0 = arith.constant 0 : i32
    %c0_i32_1 = arith.constant 0 : i32
    %c0_i32_2 = arith.constant 0 : i32
    return %arg0, %c0_i32, %c0_i32_0, %c0_i32_1 : i32, i32, i32, i32
  }
  func.func @transform_1(%arg0: i32) -> (i32, i32, i32, i32) {
    %c0_i32 = arith.constant 0 : i32
    %c0_i32_0 = arith.constant 0 : i32
    %c0_i32_1 = arith.constant 0 : i32
    %c0_i32_2 = arith.constant 0 : i32
    return %arg0, %c0_i32, %c0_i32_0, %c0_i32_1 : i32, i32, i32, i32
  }
  func.func @transform_2(%arg0: i32) -> (i32, i32, i32, i32) {
    %c0_i32 = arith.constant 0 : i32
    %c0_i32_0 = arith.constant 0 : i32
    %c0_i32_1 = arith.constant 0 : i32
    %c0_i32_2 = arith.constant 0 : i32
    return %arg0, %c0_i32, %c0_i32_0, %c0_i32_1 : i32, i32, i32, i32
  }
  func.func @transform_3(%arg0: i32) -> (i32, i32, i32, i32) {
    %c0_i32 = arith.constant 0 : i32
    %c0_i32_0 = arith.constant 0 : i32
    %c0_i32_1 = arith.constant 0 : i32
    %c0_i32_2 = arith.constant 0 : i32
    return %arg0, %c0_i32, %c0_i32_0, %c0_i32_1 : i32, i32, i32, i32
  }
  func.func @transform_4(%arg0: i32) -> (i32, i32, i32, i32) {
    %c0_i32 = arith.constant 0 : i32
    %c0_i32_0 = arith.constant 0 : i32
    %c0_i32_1 = arith.constant 0 : i32
    %c0_i32_2 = arith.constant 0 : i32
    %c0_i32_3 = arith.constant 0 : i32
    return %c0_i32, %c0_i32_0, %c0_i32_1, %c0_i32_2 : i32, i32, i32, i32
  }
  func.func @transform_5(%arg0: i32) -> (i32, i32, i32) {
    %c0_i32 = arith.constant 0 : i32
    %c0_i32_0 = arith.constant 0 : i32
    %c0_i32_1 = arith.constant 0 : i32
    %c0_i32_2 = arith.constant 0 : i32
    return %c0_i32, %c0_i32_0, %c0_i32_1 : i32, i32, i32
  }
  func.func @transform_6(%arg0: i32) -> (i32, i32) {
    %c0_i32 = arith.constant 0 : i32
    %c0_i32_0 = arith.constant 0 : i32
    %c0_i32_1 = arith.constant 0 : i32
    return %c0_i32, %c0_i32_0 : i32, i32
  }
  func.func @transform_7(%arg0: i32) -> (i32, i32) {
    %c0_i32 = arith.constant 0 : i32
    %c0_i32_0 = arith.constant 0 : i32
    %c0_i32_1 = arith.constant 0 : i32
    return %c0_i32, %c0_i32_0 : i32, i32
  }
  func.func @transform_8(%arg0: i32) -> (i32, i32, i32) {
    %c0_i32 = arith.constant 0 : i32
    %c0_i32_0 = arith.constant 0 : i32
    %c0_i32_1 = arith.constant 0 : i32
    return %arg0, %c0_i32, %c0_i32_0 : i32, i32, i32
  }
}

module attributes {stable_mosaic.version = 11 : i64} {
  func.func @_matmul_bias_kernel(%arg0: i32, %arg1: i32, %arg2: memref<8x192xbf16, #tpu.memory_space<vmem>>, %arg3: memref<192x192xbf16, #tpu.memory_space<vmem>>, %arg4: memref<1x192xf32, #tpu.memory_space<vmem>>, %arg5: memref<8x192xbf16, #tpu.memory_space<vmem>>) attributes {dimension_semantics = [#tpu.dimension_semantics<parallel>, #tpu.dimension_semantics<parallel>], iteration_bounds = array<i64: 1, 1>, scalar_prefetch = 0 : i64, scratch_operands = 0 : i64, tpu.core_type = #tpu.core_type<tc>, window_params = [{transform_indices = @transform_0, window_bounds = array<i64: 8, 192>}, {transform_indices = @transform_1, window_bounds = array<i64: 192, 192>}, {transform_indices = @transform_2, window_bounds = array<i64: 1, 192>}, {transform_indices = @transform_3, window_bounds = array<i64: 8, 192>}]} {
    %c0 = arith.constant 0 : index
    %c0_0 = arith.constant 0 : index
    %0 = vector.load %arg2[%c0, %c0_0] : memref<8x192xbf16, #tpu.memory_space<vmem>>, vector<8x192xbf16>
    %c0_1 = arith.constant 0 : index
    %c0_2 = arith.constant 0 : index
    %1 = vector.load %arg3[%c0_1, %c0_2] : memref<192x192xbf16, #tpu.memory_space<vmem>>, vector<192x192xbf16>
    %cst = arith.constant dense<0.000000e+00> : vector<8x192xf32>
    %2 = tpu.matmul %0, %1, %cst {dimension_numbers = #tpu.dot_dimension_numbers<[1], [0], [0], [1], [0, 0, 1, 1], [], []>} : vector<8x192xbf16>, vector<192x192xbf16>, vector<8x192xf32> -> vector<8x192xf32>
    %c0_3 = arith.constant 0 : index
    %c0_4 = arith.constant 0 : index
    %3 = vector.load %arg4[%c0_3, %c0_4] : memref<1x192xf32, #tpu.memory_space<vmem>>, vector<1x192xf32>
    %4 = vector.broadcast %3 : vector<1x192xf32> to vector<8x192xf32>
    %5 = arith.addf %2, %4 : vector<8x192xf32>
    %cst_5 = arith.constant 0.000000e+00 : f32
    %6 = vector.broadcast %cst_5 : f32 to vector<8x192xf32>
    %7 = arith.maximumf %5, %6 : vector<8x192xf32>
    %8 = arith.truncf %7 : vector<8x192xf32> to vector<8x192xbf16>
    %c0_6 = arith.constant 0 : index
    %c0_7 = arith.constant 0 : index
    %9 = vector.load %arg5[%c0_6, %c0_7] : memref<8x192xbf16, #tpu.memory_space<vmem>>, vector<8x192xbf16>
    tpu.vector_store %arg5[%c0_6, %c0_7], %8 {strides = array<i32>} : memref<8x192xbf16, #tpu.memory_space<vmem>>, vector<8x192xbf16>,
    return
  }
  func.func @transform_0(%arg0: i32, %arg1: i32) -> (i32, i32) {
    %c0_i32 = arith.constant 0 : i32
    %c0_i32_0 = arith.constant 0 : i32
    return %arg0, %c0_i32 : i32, i32
  }
  func.func @transform_1(%arg0: i32, %arg1: i32) -> (i32, i32) {
    %c0_i32 = arith.constant 0 : i32
    %c0_i32_0 = arith.constant 0 : i32
    return %c0_i32, %arg1 : i32, i32
  }
  func.func @transform_2(%arg0: i32, %arg1: i32) -> (i32, i32) {
    %c0_i32 = arith.constant 0 : i32
    %c0_i32_0 = arith.constant 0 : i32
    return %c0_i32, %arg1 : i32, i32
  }
  func.func @transform_3(%arg0: i32, %arg1: i32) -> (i32, i32) {
    %c0_i32 = arith.constant 0 : i32
    return %arg0, %arg1 : i32, i32
  }
}

module attributes {stable_mosaic.version = 11 : i64} {
  func.func @_dwpw_s2_kernel(%arg0: i32, %arg1: memref<1x2x2x192xbf16, #tpu.memory_space<vmem>>, %arg2: memref<1x2x2x192xbf16, #tpu.memory_space<vmem>>, %arg3: memref<1x2x2x192xbf16, #tpu.memory_space<vmem>>, %arg4: memref<1x2x2x192xbf16, #tpu.memory_space<vmem>>, %arg5: memref<9x1x1x192xf32, #tpu.memory_space<vmem>>, %arg6: memref<1x1x192xf32, #tpu.memory_space<vmem>>, %arg7: memref<192x192xbf16, #tpu.memory_space<vmem>>, %arg8: memref<1x192xf32, #tpu.memory_space<vmem>>, %arg9: memref<1x1x192xbf16, #tpu.memory_space<vmem>>, %arg10: memref<1x192xf32, #tpu.memory_space<vmem>>) attributes {dimension_semantics = [#tpu.dimension_semantics<parallel>], iteration_bounds = array<i64: 2>, scalar_prefetch = 0 : i64, scratch_operands = 1 : i64, tpu.core_type = #tpu.core_type<tc>, window_params = [{transform_indices = @transform_0, window_bounds = array<i64: 1, 2, 2, 192>}, {transform_indices = @transform_1, window_bounds = array<i64: 1, 2, 2, 192>}, {transform_indices = @transform_2, window_bounds = array<i64: 1, 2, 2, 192>}, {transform_indices = @transform_3, window_bounds = array<i64: 1, 2, 2, 192>}, {pipeline_mode = #tpu.pipeline_mode<synchronous>, transform_indices = @transform_4, window_bounds = array<i64: 9, 1, 1, 192>}, {pipeline_mode = #tpu.pipeline_mode<synchronous>, transform_indices = @transform_5, window_bounds = array<i64: 1, 1, 192>}, {pipeline_mode = #tpu.pipeline_mode<synchronous>, transform_indices = @transform_6, window_bounds = array<i64: 192, 192>}, {pipeline_mode = #tpu.pipeline_mode<synchronous>, transform_indices = @transform_7, window_bounds = array<i64: 1, 192>}, {transform_indices = @transform_8, window_bounds = array<i64: 1, 1, 192>}]} {
    %cst = arith.constant 0.000000e+00 : f32
    %0 = vector.broadcast %cst : f32 to vector<1x1x192xf32>
    %c0 = arith.constant 0 : index
    %c0_0 = arith.constant 0 : index
    %c0_1 = arith.constant 0 : index
    %c0_2 = arith.constant 0 : index
    %1 = vector.load %arg1[%c0, %c0_0, %c0_1, %c0_2] : memref<1x2x2x192xbf16, #tpu.memory_space<vmem>>, vector<1x1x1x192xbf16>
    %2 = vector.shape_cast %1 : vector<1x1x1x192xbf16> to vector<1x1x192xbf16>
    %3 = arith.extf %2 : vector<1x1x192xbf16> to vector<1x1x192xf32>
    %c0_3 = arith.constant 0 : index
    %c0_4 = arith.constant 0 : index
    %c0_5 = arith.constant 0 : index
    %c0_6 = arith.constant 0 : index
    %4 = vector.load %arg5[%c0_3, %c0_4, %c0_5, %c0_6] : memref<9x1x1x192xf32, #tpu.memory_space<vmem>>, vector<1x1x1x192xf32>
    %5 = vector.shape_cast %4 : vector<1x1x1x192xf32> to vector<1x1x192xf32>
    %6 = arith.mulf %3, %5 : vector<1x1x192xf32>
    %7 = arith.addf %0, %6 : vector<1x1x192xf32>
    %c0_7 = arith.constant 0 : index
    %c0_8 = arith.constant 0 : index
    %c0_9 = arith.constant 0 : index
    %c0_10 = arith.constant 0 : index
    %8 = vector.load %arg2[%c0_7, %c0_8, %c0_9, %c0_10] : memref<1x2x2x192xbf16, #tpu.memory_space<vmem>>, vector<1x1x1x192xbf16>
    %9 = vector.shape_cast %8 : vector<1x1x1x192xbf16> to vector<1x1x192xbf16>
    %10 = arith.extf %9 : vector<1x1x192xbf16> to vector<1x1x192xf32>
    %c1 = arith.constant 1 : index
    %c0_11 = arith.constant 0 : index
    %c0_12 = arith.constant 0 : index
    %c0_13 = arith.constant 0 : index
    %11 = vector.load %arg5[%c1, %c0_11, %c0_12, %c0_13] : memref<9x1x1x192xf32, #tpu.memory_space<vmem>>, vector<1x1x1x192xf32>
    %12 = vector.shape_cast %11 : vector<1x1x1x192xf32> to vector<1x1x192xf32>
    %13 = arith.mulf %10, %12 : vector<1x1x192xf32>
    %14 = arith.addf %7, %13 : vector<1x1x192xf32>
    %c0_14 = arith.constant 0 : index
    %c0_15 = arith.constant 0 : index
    %c1_16 = arith.constant 1 : index
    %c0_17 = arith.constant 0 : index
    %15 = vector.load %arg1[%c0_14, %c0_15, %c1_16, %c0_17] : memref<1x2x2x192xbf16, #tpu.memory_space<vmem>>, vector<1x1x1x192xbf16>
    %16 = vector.shape_cast %15 : vector<1x1x1x192xbf16> to vector<1x1x192xbf16>
    %17 = arith.extf %16 : vector<1x1x192xbf16> to vector<1x1x192xf32>
    %c2 = arith.constant 2 : index
    %c0_18 = arith.constant 0 : index
    %c0_19 = arith.constant 0 : index
    %c0_20 = arith.constant 0 : index
    %18 = vector.load %arg5[%c2, %c0_18, %c0_19, %c0_20] : memref<9x1x1x192xf32, #tpu.memory_space<vmem>>, vector<1x1x1x192xf32>
    %19 = vector.shape_cast %18 : vector<1x1x1x192xf32> to vector<1x1x192xf32>
    %20 = arith.mulf %17, %19 : vector<1x1x192xf32>
    %21 = arith.addf %14, %20 : vector<1x1x192xf32>
    %c0_21 = arith.constant 0 : index
    %c0_22 = arith.constant 0 : index
    %c0_23 = arith.constant 0 : index
    %c0_24 = arith.constant 0 : index
    %22 = vector.load %arg3[%c0_21, %c0_22, %c0_23, %c0_24] : memref<1x2x2x192xbf16, #tpu.memory_space<vmem>>, vector<1x1x1x192xbf16>
    %23 = vector.shape_cast %22 : vector<1x1x1x192xbf16> to vector<1x1x192xbf16>
    %24 = arith.extf %23 : vector<1x1x192xbf16> to vector<1x1x192xf32>
    %c3 = arith.constant 3 : index
    %c0_25 = arith.constant 0 : index
    %c0_26 = arith.constant 0 : index
    %c0_27 = arith.constant 0 : index
    %25 = vector.load %arg5[%c3, %c0_25, %c0_26, %c0_27] : memref<9x1x1x192xf32, #tpu.memory_space<vmem>>, vector<1x1x1x192xf32>
    %26 = vector.shape_cast %25 : vector<1x1x1x192xf32> to vector<1x1x192xf32>
    %27 = arith.mulf %24, %26 : vector<1x1x192xf32>
    %28 = arith.addf %21, %27 : vector<1x1x192xf32>
    %c0_28 = arith.constant 0 : index
    %c0_29 = arith.constant 0 : index
    %c0_30 = arith.constant 0 : index
    %c0_31 = arith.constant 0 : index
    %29 = vector.load %arg4[%c0_28, %c0_29, %c0_30, %c0_31] : memref<1x2x2x192xbf16, #tpu.memory_space<vmem>>, vector<1x1x1x192xbf16>
    %30 = vector.shape_cast %29 : vector<1x1x1x192xbf16> to vector<1x1x192xbf16>
    %31 = arith.extf %30 : vector<1x1x192xbf16> to vector<1x1x192xf32>
    %c4 = arith.constant 4 : index
    %c0_32 = arith.constant 0 : index
    %c0_33 = arith.constant 0 : index
    %c0_34 = arith.constant 0 : index
    %32 = vector.load %arg5[%c4, %c0_32, %c0_33, %c0_34] : memref<9x1x1x192xf32, #tpu.memory_space<vmem>>, vector<1x1x1x192xf32>
    %33 = vector.shape_cast %32 : vector<1x1x1x192xf32> to vector<1x1x192xf32>
    %34 = arith.mulf %31, %33 : vector<1x1x192xf32>
    %35 = arith.addf %28, %34 : vector<1x1x192xf32>
    %c0_35 = arith.constant 0 : index
    %c0_36 = arith.constant 0 : index
    %c1_37 = arith.constant 1 : index
    %c0_38 = arith.constant 0 : index
    %36 = vector.load %arg3[%c0_35, %c0_36, %c1_37, %c0_38] : memref<1x2x2x192xbf16, #tpu.memory_space<vmem>>, vector<1x1x1x192xbf16>
    %37 = vector.shape_cast %36 : vector<1x1x1x192xbf16> to vector<1x1x192xbf16>
    %38 = arith.extf %37 : vector<1x1x192xbf16> to vector<1x1x192xf32>
    %c5 = arith.constant 5 : index
    %c0_39 = arith.constant 0 : index
    %c0_40 = arith.constant 0 : index
    %c0_41 = arith.constant 0 : index
    %39 = vector.load %arg5[%c5, %c0_39, %c0_40, %c0_41] : memref<9x1x1x192xf32, #tpu.memory_space<vmem>>, vector<1x1x1x192xf32>
    %40 = vector.shape_cast %39 : vector<1x1x1x192xf32> to vector<1x1x192xf32>
    %41 = arith.mulf %38, %40 : vector<1x1x192xf32>
    %42 = arith.addf %35, %41 : vector<1x1x192xf32>
    %c0_42 = arith.constant 0 : index
    %c1_43 = arith.constant 1 : index
    %c0_44 = arith.constant 0 : index
    %c0_45 = arith.constant 0 : index
    %43 = vector.load %arg1[%c0_42, %c1_43, %c0_44, %c0_45] : memref<1x2x2x192xbf16, #tpu.memory_space<vmem>>, vector<1x1x1x192xbf16>
    %44 = vector.shape_cast %43 : vector<1x1x1x192xbf16> to vector<1x1x192xbf16>
    %45 = arith.extf %44 : vector<1x1x192xbf16> to vector<1x1x192xf32>
    %c6 = arith.constant 6 : index
    %c0_46 = arith.constant 0 : index
    %c0_47 = arith.constant 0 : index
    %c0_48 = arith.constant 0 : index
    %46 = vector.load %arg5[%c6, %c0_46, %c0_47, %c0_48] : memref<9x1x1x192xf32, #tpu.memory_space<vmem>>, vector<1x1x1x192xf32>
    %47 = vector.shape_cast %46 : vector<1x1x1x192xf32> to vector<1x1x192xf32>
    %48 = arith.mulf %45, %47 : vector<1x1x192xf32>
    %49 = arith.addf %42, %48 : vector<1x1x192xf32>
    %c0_49 = arith.constant 0 : index
    %c1_50 = arith.constant 1 : index
    %c0_51 = arith.constant 0 : index
    %c0_52 = arith.constant 0 : index
    %50 = vector.load %arg2[%c0_49, %c1_50, %c0_51, %c0_52] : memref<1x2x2x192xbf16, #tpu.memory_space<vmem>>, vector<1x1x1x192xbf16>
    %51 = vector.shape_cast %50 : vector<1x1x1x192xbf16> to vector<1x1x192xbf16>
    %52 = arith.extf %51 : vector<1x1x192xbf16> to vector<1x1x192xf32>
    %c7 = arith.constant 7 : index
    %c0_53 = arith.constant 0 : index
    %c0_54 = arith.constant 0 : index
    %c0_55 = arith.constant 0 : index
    %53 = vector.load %arg5[%c7, %c0_53, %c0_54, %c0_55] : memref<9x1x1x192xf32, #tpu.memory_space<vmem>>, vector<1x1x1x192xf32>
    %54 = vector.shape_cast %53 : vector<1x1x1x192xf32> to vector<1x1x192xf32>
    %55 = arith.mulf %52, %54 : vector<1x1x192xf32>
    %56 = arith.addf %49, %55 : vector<1x1x192xf32>
    %c0_56 = arith.constant 0 : index
    %c1_57 = arith.constant 1 : index
    %c1_58 = arith.constant 1 : index
    %c0_59 = arith.constant 0 : index
    %57 = vector.load %arg1[%c0_56, %c1_57, %c1_58, %c0_59] : memref<1x2x2x192xbf16, #tpu.memory_space<vmem>>, vector<1x1x1x192xbf16>
    %58 = vector.shape_cast %57 : vector<1x1x1x192xbf16> to vector<1x1x192xbf16>
    %59 = arith.extf %58 : vector<1x1x192xbf16> to vector<1x1x192xf32>
    %c8 = arith.constant 8 : index
    %c0_60 = arith.constant 0 : index
    %c0_61 = arith.constant 0 : index
    %c0_62 = arith.constant 0 : index
    %60 = vector.load %arg5[%c8, %c0_60, %c0_61, %c0_62] : memref<9x1x1x192xf32, #tpu.memory_space<vmem>>, vector<1x1x1x192xf32>
    %61 = vector.shape_cast %60 : vector<1x1x1x192xf32> to vector<1x1x192xf32>
    %62 = arith.mulf %59, %61 : vector<1x1x192xf32>
    %63 = arith.addf %56, %62 : vector<1x1x192xf32>
    %c0_63 = arith.constant 0 : index
    %c0_64 = arith.constant 0 : index
    %c0_65 = arith.constant 0 : index
    %64 = vector.load %arg6[%c0_63, %c0_64, %c0_65] : memref<1x1x192xf32, #tpu.memory_space<vmem>>, vector<1x1x192xf32>
    %65 = arith.addf %63, %64 : vector<1x1x192xf32>
    %cst_66 = arith.constant 0.000000e+00 : f32
    %66 = vector.broadcast %cst_66 : f32 to vector<1x1x192xf32>
    %67 = arith.maximumf %65, %66 : vector<1x1x192xf32>
    %68 = vector.shape_cast %67 : vector<1x1x192xf32> to vector<1x192xf32>
    %c0_67 = arith.constant 0 : index
    %c0_68 = arith.constant 0 : index
    %69 = vector.load %arg10[%c0_67, %c0_68] : memref<1x192xf32, #tpu.memory_space<vmem>>, vector<1x192xf32>
    tpu.vector_store %arg10[%c0_67, %c0_68], %68 {strides = array<i32>} : memref<1x192xf32, #tpu.memory_space<vmem>>, vector<1x192xf32>,
    %c0_69 = arith.constant 0 : index
    %c0_70 = arith.constant 0 : index
    %70 = vector.load %arg10[%c0_69, %c0_70] : memref<1x192xf32, #tpu.memory_space<vmem>>, vector<1x192xf32>
    %71 = arith.truncf %70 : vector<1x192xf32> to vector<1x192xbf16>
    %c0_71 = arith.constant 0 : index
    %c0_72 = arith.constant 0 : index
    %72 = vector.load %arg7[%c0_71, %c0_72] : memref<192x192xbf16, #tpu.memory_space<vmem>>, vector<192x192xbf16>
    %cst_73 = arith.constant dense<0.000000e+00> : vector<1x192xf32>
    %73 = tpu.matmul %71, %72, %cst_73 {dimension_numbers = #tpu.dot_dimension_numbers<[1], [0], [0], [1], [0, 0, 1, 1], [], []>} : vector<1x192xbf16>, vector<192x192xbf16>, vector<1x192xf32> -> vector<1x192xf32>
    %c0_74 = arith.constant 0 : index
    %c0_75 = arith.constant 0 : index
    %74 = vector.load %arg8[%c0_74, %c0_75] : memref<1x192xf32, #tpu.memory_space<vmem>>, vector<1x192xf32>
    %75 = arith.addf %73, %74 : vector<1x192xf32>
    %cst_76 = arith.constant 0.000000e+00 : f32
    %76 = vector.broadcast %cst_76 : f32 to vector<1x192xf32>
    %77 = arith.maximumf %75, %76 : vector<1x192xf32>
    %78 = arith.truncf %77 : vector<1x192xf32> to vector<1x192xbf16>
    %c0_77 = arith.constant 0 : index
    %c0_78 = arith.constant 0 : index
    %c0_79 = arith.constant 0 : index
    %79 = vector.load %arg9[%c0_77, %c0_78, %c0_79] : memref<1x1x192xbf16, #tpu.memory_space<vmem>>, vector<1x1x192xbf16>
    %80 = vector.shape_cast %79 : vector<1x1x192xbf16> to vector<1x192xbf16>
    %81 = vector.shape_cast %78 : vector<1x192xbf16> to vector<1x1x192xbf16>
    tpu.vector_store %arg9[%c0_77, %c0_78, %c0_79], %81 {strides = array<i32>} : memref<1x1x192xbf16, #tpu.memory_space<vmem>>, vector<1x1x192xbf16>,
    return
  }
  func.func @transform_0(%arg0: i32) -> (i32, i32, i32, i32) {
    %c0_i32 = arith.constant 0 : i32
    %c0_i32_0 = arith.constant 0 : i32
    %c0_i32_1 = arith.constant 0 : i32
    %c0_i32_2 = arith.constant 0 : i32
    return %arg0, %c0_i32, %c0_i32_0, %c0_i32_1 : i32, i32, i32, i32
  }
  func.func @transform_1(%arg0: i32) -> (i32, i32, i32, i32) {
    %c0_i32 = arith.constant 0 : i32
    %c0_i32_0 = arith.constant 0 : i32
    %c0_i32_1 = arith.constant 0 : i32
    %c0_i32_2 = arith.constant 0 : i32
    return %arg0, %c0_i32, %c0_i32_0, %c0_i32_1 : i32, i32, i32, i32
  }
  func.func @transform_2(%arg0: i32) -> (i32, i32, i32, i32) {
    %c0_i32 = arith.constant 0 : i32
    %c0_i32_0 = arith.constant 0 : i32
    %c0_i32_1 = arith.constant 0 : i32
    %c0_i32_2 = arith.constant 0 : i32
    return %arg0, %c0_i32, %c0_i32_0, %c0_i32_1 : i32, i32, i32, i32
  }
  func.func @transform_3(%arg0: i32) -> (i32, i32, i32, i32) {
    %c0_i32 = arith.constant 0 : i32
    %c0_i32_0 = arith.constant 0 : i32
    %c0_i32_1 = arith.constant 0 : i32
    %c0_i32_2 = arith.constant 0 : i32
    return %arg0, %c0_i32, %c0_i32_0, %c0_i32_1 : i32, i32, i32, i32
  }
  func.func @transform_4(%arg0: i32) -> (i32, i32, i32, i32) {
    %c0_i32 = arith.constant 0 : i32
    %c0_i32_0 = arith.constant 0 : i32
    %c0_i32_1 = arith.constant 0 : i32
    %c0_i32_2 = arith.constant 0 : i32
    %c0_i32_3 = arith.constant 0 : i32
    return %c0_i32, %c0_i32_0, %c0_i32_1, %c0_i32_2 : i32, i32, i32, i32
  }
  func.func @transform_5(%arg0: i32) -> (i32, i32, i32) {
    %c0_i32 = arith.constant 0 : i32
    %c0_i32_0 = arith.constant 0 : i32
    %c0_i32_1 = arith.constant 0 : i32
    %c0_i32_2 = arith.constant 0 : i32
    return %c0_i32, %c0_i32_0, %c0_i32_1 : i32, i32, i32
  }
  func.func @transform_6(%arg0: i32) -> (i32, i32) {
    %c0_i32 = arith.constant 0 : i32
    %c0_i32_0 = arith.constant 0 : i32
    %c0_i32_1 = arith.constant 0 : i32
    return %c0_i32, %c0_i32_0 : i32, i32
  }
  func.func @transform_7(%arg0: i32) -> (i32, i32) {
    %c0_i32 = arith.constant 0 : i32
    %c0_i32_0 = arith.constant 0 : i32
    %c0_i32_1 = arith.constant 0 : i32
    return %c0_i32, %c0_i32_0 : i32, i32
  }
  func.func @transform_8(%arg0: i32) -> (i32, i32, i32) {
    %c0_i32 = arith.constant 0 : i32
    %c0_i32_0 = arith.constant 0 : i32
    %c0_i32_1 = arith.constant 0 : i32
    return %arg0, %c0_i32, %c0_i32_0 : i32, i32, i32
  }
}

module attributes {stable_mosaic.version = 11 : i64} {
  func.func @_matmul_bias_kernel(%arg0: i32, %arg1: i32, %arg2: memref<8x1024xbf16, #tpu.memory_space<vmem>>, %arg3: memref<1024x16xbf16, #tpu.memory_space<vmem>>, %arg4: memref<1x16xf32, #tpu.memory_space<vmem>>, %arg5: memref<8x16xf32, #tpu.memory_space<vmem>>) attributes {dimension_semantics = [#tpu.dimension_semantics<parallel>, #tpu.dimension_semantics<parallel>], iteration_bounds = array<i64: 1, 1>, scalar_prefetch = 0 : i64, scratch_operands = 0 : i64, tpu.core_type = #tpu.core_type<tc>, window_params = [{transform_indices = @transform_0, window_bounds = array<i64: 8, 1024>}, {transform_indices = @transform_1, window_bounds = array<i64: 1024, 16>}, {transform_indices = @transform_2, window_bounds = array<i64: 1, 16>}, {transform_indices = @transform_3, window_bounds = array<i64: 8, 16>}]} {
    %c0 = arith.constant 0 : index
    %c0_0 = arith.constant 0 : index
    %0 = vector.load %arg2[%c0, %c0_0] : memref<8x1024xbf16, #tpu.memory_space<vmem>>, vector<8x1024xbf16>
    %c0_1 = arith.constant 0 : index
    %c0_2 = arith.constant 0 : index
    %1 = vector.load %arg3[%c0_1, %c0_2] : memref<1024x16xbf16, #tpu.memory_space<vmem>>, vector<1024x16xbf16>
    %cst = arith.constant dense<0.000000e+00> : vector<8x16xf32>
    %2 = tpu.matmul %0, %1, %cst {dimension_numbers = #tpu.dot_dimension_numbers<[1], [0], [0], [1], [0, 0, 1, 1], [], []>} : vector<8x1024xbf16>, vector<1024x16xbf16>, vector<8x16xf32> -> vector<8x16xf32>
    %c0_3 = arith.constant 0 : index
    %c0_4 = arith.constant 0 : index
    %3 = vector.load %arg4[%c0_3, %c0_4] : memref<1x16xf32, #tpu.memory_space<vmem>>, vector<1x16xf32>
    %4 = vector.broadcast %3 : vector<1x16xf32> to vector<8x16xf32>
    %5 = arith.addf %2, %4 : vector<8x16xf32>
    %c0_5 = arith.constant 0 : index
    %c0_6 = arith.constant 0 : index
    %6 = vector.load %arg5[%c0_5, %c0_6] : memref<8x16xf32, #tpu.memory_space<vmem>>, vector<8x16xf32>
    tpu.vector_store %arg5[%c0_5, %c0_6], %5 {strides = array<i32>} : memref<8x16xf32, #tpu.memory_space<vmem>>, vector<8x16xf32>,
    return
  }
  func.func @transform_0(%arg0: i32, %arg1: i32) -> (i32, i32) {
    %c0_i32 = arith.constant 0 : i32
    %c0_i32_0 = arith.constant 0 : i32
    return %arg0, %c0_i32 : i32, i32
  }
  func.func @transform_1(%arg0: i32, %arg1: i32) -> (i32, i32) {
    %c0_i32 = arith.constant 0 : i32
    %c0_i32_0 = arith.constant 0 : i32
    return %c0_i32, %arg1 : i32, i32
  }
  func.func @transform_2(%arg0: i32, %arg1: i32) -> (i32, i32) {
    %c0_i32 = arith.constant 0 : i32
    %c0_i32_0 = arith.constant 0 : i32
    return %c0_i32, %arg1 : i32, i32
  }
  func.func @transform_3(%arg0: i32, %arg1: i32) -> (i32, i32) {
    %c0_i32 = arith.constant 0 : i32
    return %arg0, %arg1 : i32, i32
  }
}

module attributes {stable_mosaic.version = 11 : i64} {
  func.func @_matmul_bias_kernel(%arg0: i32, %arg1: i32, %arg2: memref<8x384xbf16, #tpu.memory_space<vmem>>, %arg3: memref<384x512xbf16, #tpu.memory_space<vmem>>, %arg4: memref<1x512xf32, #tpu.memory_space<vmem>>, %arg5: memref<8x512xbf16, #tpu.memory_space<vmem>>) attributes {dimension_semantics = [#tpu.dimension_semantics<parallel>, #tpu.dimension_semantics<parallel>], iteration_bounds = array<i64: 1, 2>, scalar_prefetch = 0 : i64, scratch_operands = 0 : i64, tpu.core_type = #tpu.core_type<tc>, window_params = [{transform_indices = @transform_0, window_bounds = array<i64: 8, 384>}, {transform_indices = @transform_1, window_bounds = array<i64: 384, 512>}, {transform_indices = @transform_2, window_bounds = array<i64: 1, 512>}, {transform_indices = @transform_3, window_bounds = array<i64: 8, 512>}]} {
    %c0 = arith.constant 0 : index
    %c0_0 = arith.constant 0 : index
    %0 = vector.load %arg2[%c0, %c0_0] : memref<8x384xbf16, #tpu.memory_space<vmem>>, vector<8x384xbf16>
    %c0_1 = arith.constant 0 : index
    %c0_2 = arith.constant 0 : index
    %1 = vector.load %arg3[%c0_1, %c0_2] : memref<384x512xbf16, #tpu.memory_space<vmem>>, vector<384x512xbf16>
    %cst = arith.constant dense<0.000000e+00> : vector<8x512xf32>
    %2 = tpu.matmul %0, %1, %cst {dimension_numbers = #tpu.dot_dimension_numbers<[1], [0], [0], [1], [0, 0, 1, 1], [], []>} : vector<8x384xbf16>, vector<384x512xbf16>, vector<8x512xf32> -> vector<8x512xf32>
    %c0_3 = arith.constant 0 : index
    %c0_4 = arith.constant 0 : index
    %3 = vector.load %arg4[%c0_3, %c0_4] : memref<1x512xf32, #tpu.memory_space<vmem>>, vector<1x512xf32>
    %4 = vector.broadcast %3 : vector<1x512xf32> to vector<8x512xf32>
    %5 = arith.addf %2, %4 : vector<8x512xf32>
    %cst_5 = arith.constant 0.000000e+00 : f32
    %6 = vector.broadcast %cst_5 : f32 to vector<8x512xf32>
    %7 = arith.maximumf %5, %6 : vector<8x512xf32>
    %8 = arith.truncf %7 : vector<8x512xf32> to vector<8x512xbf16>
    %c0_6 = arith.constant 0 : index
    %c0_7 = arith.constant 0 : index
    %9 = vector.load %arg5[%c0_6, %c0_7] : memref<8x512xbf16, #tpu.memory_space<vmem>>, vector<8x512xbf16>
    tpu.vector_store %arg5[%c0_6, %c0_7], %8 {strides = array<i32>} : memref<8x512xbf16, #tpu.memory_space<vmem>>, vector<8x512xbf16>,
    return
  }
  func.func @transform_0(%arg0: i32, %arg1: i32) -> (i32, i32) {
    %c0_i32 = arith.constant 0 : i32
    %c0_i32_0 = arith.constant 0 : i32
    return %arg0, %c0_i32 : i32, i32
  }
  func.func @transform_1(%arg0: i32, %arg1: i32) -> (i32, i32) {
    %c0_i32 = arith.constant 0 : i32
    %c0_i32_0 = arith.constant 0 : i32
    return %c0_i32, %arg1 : i32, i32
  }
  func.func @transform_2(%arg0: i32, %arg1: i32) -> (i32, i32) {
    %c0_i32 = arith.constant 0 : i32
    %c0_i32_0 = arith.constant 0 : i32
    return %c0_i32, %arg1 : i32, i32
  }
  func.func @transform_3(%arg0: i32, %arg1: i32) -> (i32, i32) {
    %c0_i32 = arith.constant 0 : i32
    return %arg0, %arg1 : i32, i32
  }
}

</mosaic_0001>

<bundles_post_ra>
// kernel: _lambda_.20
= control target key start
LH: loop header
LB: loop body
LE: loop exit
PB: predicated region body
PF: predicated region fallthrough
CT: control target
= control target key end

     0   :  { %s1124_s12 = smov 0   ;;  %s1126_s13 = smov 0   ;;  %s1307_s0 = inlined_call_operand.vmem [shape: bf16[512,24], index: 0, kind: input, shape index: {}]   ;;  %s1308_s1 = inlined_call_operand.vmem [shape: bf16[24,24], index: 1, kind: input, shape index: {}]   ;;  %s1309_s2 = inlined_call_operand.vmem [shape: f32[1,24], index: 2, kind: input, shape index: {}]   ;;  %s1310_s3 = inlined_call_operand.vmem [shape: bf16[512,24], index: 3, kind: output, shape index: {}]  }
   0x1   :  { %s1128_s14 = smov 0  }
   0x2 LB: > { %s25_s15 = sadd.s32 1, %s1098_s13  ;;  %p872_p0 = scmp.ge.s32.totalorder %s1102_s14, 1  ;;  %s1102_s14 = sphi %s1128_s14, %s13_s14   ;;  %s1098_s13 = sphi %s1126_s13, %s1312_s13   ;;  %s1094_s12 = sphi %s1124_s12, %s1311_s12  }
   0x3   : > { %p27_p1 = scmp.ge.s32.totalorder %s25_s15, 2  ;;  %p169_p2 = scmp.lt.s32.totalorder %s1102_s14, 3 }
   0x5   : > { %s1314_s15 = smov (%p27_p1, %s25_s15), 0  ;;  %p170_p3 = pnand %p872_p0, %p169_p2 }
   0x6   : > { %s873_s20 = sshll.u32 (!%p170_p3), %s1094_s12, 5 }
   0x7   : > { %173 = sbr.rel (%p170_p3) target bundleno = 251 (0xfb), region = 32  ;;  %p204_p4 = scmp.lt.s32.totalorder (!%p170_p3), %s873_s20, 63 }
   0xc   : > { %v1062_v0 = vld [vmem:[%s1308_s1 + $0x8] ss:$0 sps:$4 sm:$0xff]   ;;  %vm406_vm0 = vcmask 1043456   ;;  %v1063_v1 = vld [vmem:[%s1308_s1] sm:$0xff]   ;;  %s1316_s20 = smov (!%p204_p4, %s873_s20), 63  ;;  %vm357_vm1 = vcmask 195584  }
   0xd   : > { %1036 = vmatprep.subr.msk.bf16.mxu0 %vm406_vm0, %v1062_v0  ;;  %1037 = vmatprep.subr.msk.bf16.mxu1 %vm406_vm0, %v1062_v0  ;;  %v408_v2 = vsel %vm406_vm0, %v1062_v0, 0  ;;  %s874_s21 = sshll.u32 %s1316_s20, 2  ;;  %v1193_v19 = vld [vmem:[%s1309_s2] ss:$0 sm:$0xff]  ;;  %vm731_vm2 = vcmask 191488  }
   0xe   : > { %997 = vmatpush3.bf16.msra.mxu0 %v408_v2  ;;  %1034 = vmatpush3.bf16.msra.mxu1 %v408_v2  ;;  %s1156_s24 = scalar_lea.vmem %s1307_s0, %s874_s21  ;;  %s1203_s29 = scalar_lea.vmem %s1310_s3, %s874_s21 }
   0xf   : > { %998 = vmatprep.subr.bf16.mxu0 %v1063_v1  ;;  %1033 = vmatprep.subr.bf16.mxu1 %v1063_v1  ;;  %v1064_v3 = vld [vmem:[%s1156_s24] sm:$0xff]   ;;  %v1066_v5 = vld [vmem:[%s1156_s24 + $0x8] sm:$0xff]   ;;  %v1068_v7 = vld [vmem:[%s1156_s24 + $0x10] sm:$0xff]  }
  0x10   : > { %v1065_v4 = vld [vmem:[%s1156_s24 + $0x40] sm:$0xff]   ;;  %1000 = vmatprep.mubr.msk.bf16.mxu0 %vm357_vm1, %v1064_v3  ;;  %v1067_v6 = vld [vmem:[%s1156_s24 + $0x48] sm:$0xff]   ;;  %v1069_v8 = vld [vmem:[%s1156_s24 + $0x50] sm:$0xff]  }
  0x11   : > { %1016 = vmatprep.mubr.msk.bf16.mxu1 %vm357_vm1, %v1065_v4  ;;  %v1070_v9 = vld [vmem:[%s1156_s24 + $0x18] sm:$0xff]   ;;  %v1072_v11 = vld [vmem:[%s1156_s24 + $0x20] sm:$0xff]   ;;  %v1074_v13 = vld [vmem:[%s1156_s24 + $0x28] sm:$0xff]  }
  0x12   : > { %999 = vmatpush3.bf16.msra.mxu0 %v1063_v1  ;;  %1035 = vmatpush3.bf16.msra.mxu1 %v1063_v1  ;;  %v1071_v10 = vld [vmem:[%s1156_s24 + $0x58] sm:$0xff]   ;;  %v1073_v12 = vld [vmem:[%s1156_s24 + $0x60] sm:$0xff]   ;;  %v1075_v14 = vld [vmem:[%s1156_s24 + $0x68] sm:$0xff]  }
  0x13   : > { %v1076_v15 = vld [vmem:[%s1156_s24 + $0x30] sm:$0xff]   ;;  %v1078_v17 = vld [vmem:[%s1156_s24 + $0x38] sm:$0xff]  }
  0x14   : > { %v1077_v16 = vld [vmem:[%s1156_s24 + $0x70] sm:$0xff]   ;;  %v1079_v18 = vld [vmem:[%s1156_s24 + $0x78] sm:$0xff]  }
  0x15   : > { %1001 = vmatmul.mubr.msk.bf16.vlgmr.msra.gmra.mxu0 %vm357_vm1, %v1066_v5  ;;  %1017 = vmatmul.mubr.msk.bf16.vlgmr.msra.gmra.mxu1 %vm357_vm1, %v1067_v6 }
  0x16   : > { %1004 = vmatprep.mubr.msk.bf16.mxu0 %vm357_vm1, %v1068_v7  ;;  %1020 = vmatprep.mubr.msk.bf16.mxu1 %vm357_vm1, %v1069_v8 }
  0x1d   : > { %1005 = vmatmul.mubr.msk.bf16.gmra.mxu0 %vm357_vm1, %v1070_v9  ;;  %1021 = vmatmul.mubr.msk.bf16.gmra.mxu1 %vm357_vm1, %v1071_v10 }
  0x1e   : > { %1008 = vmatprep.mubr.msk.bf16.mxu0 %vm357_vm1, %v1072_v11  ;;  %1024 = vmatprep.mubr.msk.bf16.mxu1 %vm357_vm1, %v1073_v12 }
  0x25   : > { %1009 = vmatmul.mubr.msk.bf16.gmra.mxu0 %vm357_vm1, %v1074_v13  ;;  %1025 = vmatmul.mubr.msk.bf16.gmra.mxu1 %vm357_vm1, %v1075_v14 }
  0x26   : > { %1012 = vmatprep.mubr.msk.bf16.mxu0 %vm357_vm1, %v1076_v15  ;;  %1028 = vmatprep.mubr.msk.bf16.mxu1 %vm357_vm1, %v1077_v16 }
  0x2d   : > { %1013 = vmatmul.mubr.msk.bf16.gmra.mxu0 %vm357_vm1, %v1078_v17  ;;  %1029 = vmatmul.mubr.msk.bf16.gmra.mxu1 %vm357_vm1, %v1079_v18 }
  0xd5   : > { %v1002_v20 = vpop.f32.mrf.mxu0  ;;  %v1018_v22 = vpop.f32.mrf.mxu1 }
  0xd6   : > { %v453_v21 = vadd.f32 %v1002_v20, %v1193_v19  ;;  %v517_v23 = vadd.f32 %v1018_v22, %v1193_v19 }
  0xd7   : > { %v444_v24 = vpop.f32.mrf.mxu0  ;;  %v508_v27 = vpop.f32.mrf.mxu1 }
  0xd8   : > { %v573_v25 = vmax.f32 %v453_v21, 0.0  ;;  %v445_v26 = vadd.f32 %v1193_v19, %v444_v24  ;;  %v589_v28 = vmax.f32 %v517_v23, 0.0  ;;  %v509_v29 = vadd.f32 %v1193_v19, %v508_v27 }
  0xd9   : > { %v1003_v30 = vpop.f32.mrf.mxu0  ;;  %v1019_v34 = vpop.f32.mrf.mxu1 }
  0xda   : > { %v948_v31 = vpack.c.bf16 %v573_v25, %v573_v25  ;;  %v571_v32 = vmax.f32 %v445_v26, 0.0  ;;  %v456_v33 = vadd.f32 %v1003_v30, %v1193_v19  ;;  %v964_v35 = vpack.c.bf16 %v589_v28, %v589_v28 }
  0xdb   : > { %v587_v36 = vmax.f32 %v509_v29, 0.0  ;;  %v520_v37 = vadd.f32 %v1019_v34, %v1193_v19  ;;  %v447_v38 = vpop.f32.mrf.mxu0  ;;  %v511_v42 = vpop.f32.mrf.mxu1 }
  0xdc   : > { %734 = vst.msk [vmem:[%s1203_s29 + $0x8] sm:$0xf] %vm731_vm2, %v948_v31  ;;  %v946_v39 = vpack.c.bf16 %v571_v32, %v571_v32  ;;  %v574_v40 = vmax.f32 %v456_v33, 0.0  ;;  %v448_v41 = vadd.f32 %v1193_v19, %v447_v38  ;;  %750 = vst.msk [vmem:[%s1203_s29 + $0x48] sm:$0xf] %vm731_vm2, %v964_v35  ;;  %v512_v45 = vadd.f32 %v1193_v19, %v511_v42 }
  0xdd   : > { %v962_v43 = vpack.c.bf16 %v587_v36, %v587_v36  ;;  %v590_v44 = vmax.f32 %v520_v37, 0.0  ;;  %v1006_v46 = vpop.f32.mrf.mxu0  ;;  %v1022_v50 = vpop.f32.mrf.mxu1 }
  0xde   : > { %732 = vst.msk [vmem:[%s1203_s29] sm:$0xf] %vm731_vm2, %v946_v39  ;;  %v949_v47 = vpack.c.bf16 %v574_v40, %v574_v40  ;;  %v572_v48 = vmax.f32 %v448_v41, 0.0  ;;  %v469_v49 = vadd.f32 %v1006_v46, %v1193_v19  ;;  %v588_v52 = vmax.f32 %v512_v45, 0.0 }
  0xdf   : > { %748 = vst.msk [vmem:[%s1203_s29 + $0x40] sm:$0xf] %vm731_vm2, %v962_v43  ;;  %v965_v51 = vpack.c.bf16 %v590_v44, %v590_v44  ;;  %v533_v53 = vadd.f32 %v1022_v50, %v1193_v19  ;;  %v460_v54 = vpop.f32.mrf.mxu0  ;;  %v524_v58 = vpop.f32.mrf.mxu1 }
  0xe0   : > { %735 = vst.msk [vmem:[%s1203_s29 + $0xc] sm:$0xf] %vm731_vm2, %v949_v47  ;;  %v947_v55 = vpack.c.bf16 %v572_v48, %v572_v48  ;;  %v577_v56 = vmax.f32 %v469_v49, 0.0  ;;  %v461_v57 = vadd.f32 %v1193_v19, %v460_v54  ;;  %v963_v59 = vpack.c.bf16 %v588_v52, %v588_v52 }
  0xe1   : > { %751 = vst.msk [vmem:[%s1203_s29 + $0x4c] sm:$0xf] %vm731_vm2, %v965_v51  ;;  %v593_v60 = vmax.f32 %v533_v53, 0.0  ;;  %v525_v61 = vadd.f32 %v1193_v19, %v524_v58  ;;  %v1007_v62 = vpop.f32.mrf.mxu0  ;;  %v1023_v2 = vpop.f32.mrf.mxu1 }
  0xe2   : > { %733 = vst.msk [vmem:[%s1203_s29 + $0x4] sm:$0xf] %vm731_vm2, %v947_v55  ;;  %v952_v63 = vpack.c.bf16 %v577_v56, %v577_v56  ;;  %v575_v0 = vmax.f32 %v461_v57, 0.0  ;;  %v472_v1 = vadd.f32 %v1007_v62, %v1193_v19  ;;  %749 = vst.msk [vmem:[%s1203_s29 + $0x44] sm:$0xf] %vm731_vm2, %v963_v59  ;;  %v536_v5 = vadd.f32 %v1023_v2, %v1193_v19 }
  0xe3   : > { %v968_v3 = vpack.c.bf16 %v593_v60, %v593_v60  ;;  %v591_v4 = vmax.f32 %v525_v61, 0.0  ;;  %v463_v6 = vpop.f32.mrf.mxu0  ;;  %v527_v10 = vpop.f32.mrf.mxu1 }
  0xe4   : > { %738 = vst.msk [vmem:[%s1203_s29 + $0x18] sm:$0xf] %vm731_vm2, %v952_v63  ;;  %v950_v7 = vpack.c.bf16 %v575_v0, %v575_v0  ;;  %v578_v8 = vmax.f32 %v472_v1, 0.0  ;;  %v464_v9 = vadd.f32 %v1193_v19, %v463_v6  ;;  %v594_v12 = vmax.f32 %v536_v5, 0.0 }
  0xe5   : > { %754 = vst.msk [vmem:[%s1203_s29 + $0x58] sm:$0xf] %vm731_vm2, %v968_v3  ;;  %v966_v11 = vpack.c.bf16 %v591_v4, %v591_v4  ;;  %v528_v13 = vadd.f32 %v1193_v19, %v527_v10  ;;  %v1010_v14 = vpop.f32.mrf.mxu0  ;;  %v1026_v18 = vpop.f32.mrf.mxu1 }
  0xe6   : > { %736 = vst.msk [vmem:[%s1203_s29 + $0x10] sm:$0xf] %vm731_vm2, %v950_v7  ;;  %v953_v15 = vpack.c.bf16 %v578_v8, %v578_v8  ;;  %v576_v16 = vmax.f32 %v464_v9, 0.0  ;;  %v485_v17 = vadd.f32 %v1010_v14, %v1193_v19  ;;  %v969_v20 = vpack.c.bf16 %v594_v12, %v594_v12 }
  0xe7   : > { %752 = vst.msk [vmem:[%s1203_s29 + $0x50] sm:$0xf] %vm731_vm2, %v966_v11  ;;  %v592_v21 = vmax.f32 %v528_v13, 0.0  ;;  %v549_v22 = vadd.f32 %v1026_v18, %v1193_v19  ;;  %v476_v23 = vpop.f32.mrf.mxu0  ;;  %v540_v27 = vpop.f32.mrf.mxu1 }
  0xe8   : > { %739 = vst.msk [vmem:[%s1203_s29 + $0x1c] sm:$0xf] %vm731_vm2, %v953_v15  ;;  %v951_v24 = vpack.c.bf16 %v576_v16, %v576_v16  ;;  %v581_v25 = vmax.f32 %v485_v17, 0.0  ;;  %v477_v26 = vadd.f32 %v1193_v19, %v476_v23  ;;  %755 = vst.msk [vmem:[%s1203_s29 + $0x5c] sm:$0xf] %vm731_vm2, %v969_v20  ;;  %v541_v30 = vadd.f32 %v1193_v19, %v540_v27 }
  0xe9   : > { %v967_v28 = vpack.c.bf16 %v592_v21, %v592_v21  ;;  %v597_v29 = vmax.f32 %v549_v22, 0.0  ;;  %v1011_v31 = vpop.f32.mrf.mxu0  ;;  %v1027_v35 = vpop.f32.mrf.mxu1 }
  0xea   : > { %737 = vst.msk [vmem:[%s1203_s29 + $0x14] sm:$0xf] %vm731_vm2, %v951_v24  ;;  %v956_v32 = vpack.c.bf16 %v581_v25, %v581_v25  ;;  %v579_v33 = vmax.f32 %v477_v26, 0.0  ;;  %v488_v34 = vadd.f32 %v1011_v31, %v1193_v19  ;;  %v595_v37 = vmax.f32 %v541_v30, 0.0 }
  0xeb   : > { %753 = vst.msk [vmem:[%s1203_s29 + $0x54] sm:$0xf] %vm731_vm2, %v967_v28  ;;  %v972_v36 = vpack.c.bf16 %v597_v29, %v597_v29  ;;  %v552_v38 = vadd.f32 %v1027_v35, %v1193_v19  ;;  %v479_v39 = vpop.f32.mrf.mxu0  ;;  %v543_v43 = vpop.f32.mrf.mxu1 }
  0xec   : > { %742 = vst.msk [vmem:[%s1203_s29 + $0x28] sm:$0xf] %vm731_vm2, %v956_v32  ;;  %v954_v40 = vpack.c.bf16 %v579_v33, %v579_v33  ;;  %v582_v41 = vmax.f32 %v488_v34, 0.0  ;;  %v480_v42 = vadd.f32 %v1193_v19, %v479_v39  ;;  %v970_v44 = vpack.c.bf16 %v595_v37, %v595_v37 }
  0xed   : > { %758 = vst.msk [vmem:[%s1203_s29 + $0x68] sm:$0xf] %vm731_vm2, %v972_v36  ;;  %v598_v45 = vmax.f32 %v552_v38, 0.0  ;;  %v544_v46 = vadd.f32 %v1193_v19, %v543_v43  ;;  %v1014_v47 = vpop.f32.mrf.mxu0  ;;  %v1030_v51 = vpop.f32.mrf.mxu1 }
  0xee   : > { %740 = vst.msk [vmem:[%s1203_s29 + $0x20] sm:$0xf] %vm731_vm2, %v954_v40  ;;  %v957_v48 = vpack.c.bf16 %v582_v41, %v582_v41  ;;  %v580_v49 = vmax.f32 %v480_v42, 0.0  ;;  %v501_v50 = vadd.f32 %v1014_v47, %v1193_v19  ;;  %756 = vst.msk [vmem:[%s1203_s29 + $0x60] sm:$0xf] %vm731_vm2, %v970_v44  ;;  %v565_v54 = vadd.f32 %v1030_v51, %v1193_v19 }
  0xef   : > { %v973_v52 = vpack.c.bf16 %v598_v45, %v598_v45  ;;  %v596_v53 = vmax.f32 %v544_v46, 0.0  ;;  %v492_v55 = vpop.f32.mrf.mxu0  ;;  %v556_v59 = vpop.f32.mrf.mxu1 }
  0xf0   : > { %743 = vst.msk [vmem:[%s1203_s29 + $0x2c] sm:$0xf] %vm731_vm2, %v957_v48  ;;  %v955_v56 = vpack.c.bf16 %v580_v49, %v580_v49  ;;  %v585_v57 = vmax.f32 %v501_v50, 0.0  ;;  %v493_v58 = vadd.f32 %v1193_v19, %v492_v55  ;;  %v601_v61 = vmax.f32 %v565_v54, 0.0 }
  0xf1   : > { %759 = vst.msk [vmem:[%s1203_s29 + $0x6c] sm:$0xf] %vm731_vm2, %v973_v52  ;;  %v971_v60 = vpack.c.bf16 %v596_v53, %v596_v53  ;;  %v557_v62 = vadd.f32 %v1193_v19, %v556_v59  ;;  %v1015_v63 = vpop.f32.mrf.mxu0  ;;  %v1031_v3 = vpop.f32.mrf.mxu1 }
  0xf2   : > { %741 = vst.msk [vmem:[%s1203_s29 + $0x24] sm:$0xf] %vm731_vm2, %v955_v56  ;;  %v960_v0 = vpack.c.bf16 %v585_v57, %v585_v57  ;;  %v583_v1 = vmax.f32 %v493_v58, 0.0  ;;  %v504_v2 = vadd.f32 %v1015_v63, %v1193_v19  ;;  %v976_v4 = vpack.c.bf16 %v601_v61, %v601_v61 }
  0xf3   : > { %757 = vst.msk [vmem:[%s1203_s29 + $0x64] sm:$0xf] %vm731_vm2, %v971_v60  ;;  %v599_v5 = vmax.f32 %v557_v62, 0.0  ;;  %v568_v6 = vadd.f32 %v1031_v3, %v1193_v19  ;;  %v495_v7 = vpop.f32.mrf.mxu0  ;;  %v559_v11 = vpop.f32.mrf.mxu1 }
  0xf4   : > { %746 = vst.msk [vmem:[%s1203_s29 + $0x38] sm:$0xf] %vm731_vm2, %v960_v0  ;;  %v958_v8 = vpack.c.bf16 %v583_v1, %v583_v1  ;;  %v586_v9 = vmax.f32 %v504_v2, 0.0  ;;  %v496_v10 = vadd.f32 %v1193_v19, %v495_v7  ;;  %762 = vst.msk [vmem:[%s1203_s29 + $0x78] sm:$0xf] %vm731_vm2, %v976_v4  ;;  %v560_v14 = vadd.f32 %v1193_v19, %v559_v11 }
  0xf5   : > { %v974_v12 = vpack.c.bf16 %v599_v5, %v599_v5  ;;  %v602_v13 = vmax.f32 %v568_v6, 0.0 }
  0xf6   : > { %744 = vst.msk [vmem:[%s1203_s29 + $0x30] sm:$0xf] %vm731_vm2, %v958_v8  ;;  %v961_v15 = vpack.c.bf16 %v586_v9, %v586_v9  ;;  %v584_v16 = vmax.f32 %v496_v10, 0.0  ;;  %v600_v18 = vmax.f32 %v560_v14, 0.0 }
  0xf7   : > { %760 = vst.msk [vmem:[%s1203_s29 + $0x70] sm:$0xf] %vm731_vm2, %v974_v12  ;;  %v977_v17 = vpack.c.bf16 %v602_v13, %v602_v13 }
  0xf8   : > { %747 = vst.msk [vmem:[%s1203_s29 + $0x3c] sm:$0xf] %vm731_vm2, %v961_v15  ;;  %v959_v20 = vpack.c.bf16 %v584_v16, %v584_v16  ;;  %v975_v21 = vpack.c.bf16 %v600_v18, %v600_v18 }
  0xf9   : > { %763 = vst.msk [vmem:[%s1203_s29 + $0x7c] sm:$0xf] %vm731_vm2, %v977_v17 }
  0xfa   : > { %745 = vst.msk [vmem:[%s1203_s29 + $0x34] sm:$0xf] %vm731_vm2, %v959_v20  ;;  %761 = vst.msk [vmem:[%s1203_s29 + $0x74] sm:$0xf] %vm731_vm2, %v975_v21 }
  0xfb PF: > { %s13_s14 = sadd.s32 1, %s1102_s14   ;;  %s1311_s12 = smov %s1098_s13 }
  0xfc   : > { %p10_p5 = scmp.ge.s32.totalorder %s13_s14, 4   ;;  %s1312_s13 = smov %s1314_s15 }
  0xfe   :  { %12 = sbr.rel (!%p10_p5) target bundleno = 2 (0x2), region = 68 }

// kernel: _lambda_.19
= control target key start
LH: loop header
LB: loop body
LE: loop exit
PB: predicated region body
PF: predicated region fallthrough
CT: control target
= control target key end

     0   :  { %s1130_s12 = smov 0   ;;  %s1132_s13 = smov 0   ;;  %s1313_s0 = inlined_call_operand.vmem [shape: bf16[512,27], index: 0, kind: input, shape index: {}]   ;;  %s1314_s1 = inlined_call_operand.vmem [shape: bf16[27,24], index: 1, kind: input, shape index: {}]   ;;  %s1315_s2 = inlined_call_operand.vmem [shape: f32[1,24], index: 2, kind: input, shape index: {}]   ;;  %s1316_s3 = inlined_call_operand.vmem [shape: bf16[512,24], index: 3, kind: output, shape index: {}]  }
   0x1   :  { %s1134_s14 = smov 0  }
   0x2 LB: > { %s25_s15 = sadd.s32 1, %s1103_s13  ;;  %p878_p0 = scmp.ge.s32.totalorder %s1107_s14, 1  ;;  %s1107_s14 = sphi %s1134_s14, %s13_s14   ;;  %s1103_s13 = sphi %s1132_s13, %s1318_s13   ;;  %s1099_s12 = sphi %s1130_s12, %s1317_s12  }
   0x3   : > { %p27_p1 = scmp.ge.s32.totalorder %s25_s15, 2  ;;  %p169_p2 = scmp.lt.s32.totalorder %s1107_s14, 3 }
   0x5   : > { %s1320_s15 = smov (%p27_p1, %s25_s15), 0  ;;  %p170_p3 = pnand %p878_p0, %p169_p2 }
   0x6   : > { %s879_s18 = sshll.u32 (!%p170_p3), %s1099_s12, 5 }
   0x7   : > { %173 = sbr.rel (%p170_p3) target bundleno = 256 (0x100), region = 32  ;;  %p204_p4 = scmp.lt.s32.totalorder (!%p170_p3), %s879_s18, 63 }
   0xc   : > { %v1067_v0 = vld [vmem:[%s1314_s1 + $0x8] sm:$0x3f]   ;;  %vm409_vm0 = vcmask 1044480   ;;  %vm410_vm1 = vcmask 1045504   ;;  %v1109_v1 = vmov 65535   ;;  %v1068_v5 = vld [vmem:[%s1314_s1] sm:$0xff]  }
   0xd   : > { %v411_v2 = vsel %vm409_vm0, 4294967295, %v1109_v1  ;;  %s1322_s18 = smov (!%p204_p4, %s879_s18), 63  ;;  %vm360_vm2 = vcmask 220160   ;;  %v1199_v22 = vld [vmem:[%s1315_s2] ss:$0 sm:$0xff]  ;;  %vm737_vm3 = vcmask 191488  }
   0xe   : > { %v412_v3 = vsel %vm410_vm1, %v411_v2, 0  ;;  %s880_s21 = sshll.u32 %s1322_s18, 2 }
   0xf   : > { %v414_v4 = vand.u32 %v1067_v0, %v412_v3  ;;  %s1162_s24 = scalar_lea.vmem %s1313_s0, %s880_s21  ;;  %s1210_s29 = scalar_lea.vmem %s1316_s3, %s880_s21 }
  0x10   : > { %v1069_v6 = vld [vmem:[%s1162_s24] sm:$0xff]   ;;  %v1071_v8 = vld [vmem:[%s1162_s24 + $0x8] sm:$0xff]   ;;  %v1073_v10 = vld [vmem:[%s1162_s24 + $0x10] sm:$0xff]  }
  0x11   : > { %1002 = vmatprep.subr.bf16.mxu0 %v414_v4  ;;  %1038 = vmatprep.subr.bf16.mxu1 %v414_v4  ;;  %v1070_v7 = vld [vmem:[%s1162_s24 + $0x40] sm:$0xff]   ;;  %v1072_v9 = vld [vmem:[%s1162_s24 + $0x48] sm:$0xff]   ;;  %v1074_v11 = vld [vmem:[%s1162_s24 + $0x50] sm:$0xff]  }
  0x12   : > { %1003 = vmatpush3.bf16.msra.mxu0 %v414_v4  ;;  %1040 = vmatpush3.bf16.msra.mxu1 %v414_v4  ;;  %v1075_v12 = vld [vmem:[%s1162_s24 + $0x18] sm:$0xff]   ;;  %v1077_v14 = vld [vmem:[%s1162_s24 + $0x20] sm:$0xff]   ;;  %v1079_v16 = vld [vmem:[%s1162_s24 + $0x28] sm:$0xff]  }
  0x13   : > { %1004 = vmatprep.subr.bf16.mxu0 %v1068_v5  ;;  %1039 = vmatprep.subr.bf16.mxu1 %v1068_v5  ;;  %v1076_v13 = vld [vmem:[%s1162_s24 + $0x58] sm:$0xff]   ;;  %v1078_v15 = vld [vmem:[%s1162_s24 + $0x60] sm:$0xff]   ;;  %v1080_v17 = vld [vmem:[%s1162_s24 + $0x68] sm:$0xff]  }
  0x14   : > { %1006 = vmatprep.mubr.msk.bf16.mxu0 %vm360_vm2, %v1069_v6  ;;  %1022 = vmatprep.mubr.msk.bf16.mxu1 %vm360_vm2, %v1070_v7  ;;  %v1081_v18 = vld [vmem:[%s1162_s24 + $0x30] sm:$0xff]   ;;  %v1083_v20 = vld [vmem:[%s1162_s24 + $0x38] sm:$0xff]  }
  0x15   : > { %v1082_v19 = vld [vmem:[%s1162_s24 + $0x70] sm:$0xff]   ;;  %v1084_v21 = vld [vmem:[%s1162_s24 + $0x78] sm:$0xff]  }
  0x16   : > { %1005 = vmatpush3.bf16.msra.mxu0 %v1068_v5  ;;  %1041 = vmatpush3.bf16.msra.mxu1 %v1068_v5 }
  0x19   : > { %1007 = vmatmul.mubr.msk.bf16.vlgmr.msra.gmra.mxu0 %vm360_vm2, %v1071_v8  ;;  %1023 = vmatmul.mubr.msk.bf16.vlgmr.msra.gmra.mxu1 %vm360_vm2, %v1072_v9 }
  0x1a   : > { %1010 = vmatprep.mubr.msk.bf16.mxu0 %vm360_vm2, %v1073_v10  ;;  %1026 = vmatprep.mubr.msk.bf16.mxu1 %vm360_vm2, %v1074_v11 }
  0x21   : > { %1011 = vmatmul.mubr.msk.bf16.gmra.mxu0 %vm360_vm2, %v1075_v12  ;;  %1027 = vmatmul.mubr.msk.bf16.gmra.mxu1 %vm360_vm2, %v1076_v13 }
  0x22   : > { %1014 = vmatprep.mubr.msk.bf16.mxu0 %vm360_vm2, %v1077_v14  ;;  %1030 = vmatprep.mubr.msk.bf16.mxu1 %vm360_vm2, %v1078_v15 }
  0x29   : > { %1015 = vmatmul.mubr.msk.bf16.gmra.mxu0 %vm360_vm2, %v1079_v16  ;;  %1031 = vmatmul.mubr.msk.bf16.gmra.mxu1 %vm360_vm2, %v1080_v17 }
  0x2a   : > { %1018 = vmatprep.mubr.msk.bf16.mxu0 %vm360_vm2, %v1081_v18  ;;  %1034 = vmatprep.mubr.msk.bf16.mxu1 %vm360_vm2, %v1082_v19 }
  0x31   : > { %1019 = vmatmul.mubr.msk.bf16.gmra.mxu0 %vm360_vm2, %v1083_v20  ;;  %1035 = vmatmul.mubr.msk.bf16.gmra.mxu1 %vm360_vm2, %v1084_v21 }
  0xd9   : > { %v1008_v23 = vpop.f32.mrf.mxu0  ;;  %v1024_v24 = vpop.f32.mrf.mxu1 }
  0xda   : > { %v459_v25 = vadd.f32 %v1008_v23, %v1199_v22  ;;  %v523_v26 = vadd.f32 %v1024_v24, %v1199_v22 }
  0xdb   : > { %v450_v27 = vpop.f32.mrf.mxu0  ;;  %v514_v28 = vpop.f32.mrf.mxu1 }
  0xdc   : > { %v579_v29 = vmax.f32 %v459_v25, 0.0  ;;  %v595_v30 = vmax.f32 %v523_v26, 0.0  ;;  %v451_v31 = vadd.f32 %v1199_v22, %v450_v27  ;;  %v515_v32 = vadd.f32 %v1199_v22, %v514_v28 }
  0xdd   : > { %v1009_v33 = vpop.f32.mrf.mxu0  ;;  %v1025_v34 = vpop.f32.mrf.mxu1 }
  0xde   : > { %v954_v35 = vpack.c.bf16 %v579_v29, %v579_v29  ;;  %v970_v36 = vpack.c.bf16 %v595_v30, %v595_v30  ;;  %v577_v37 = vmax.f32 %v451_v31, 0.0  ;;  %v593_v38 = vmax.f32 %v515_v32, 0.0 }
  0xdf   : > { %v462_v39 = vadd.f32 %v1009_v33, %v1199_v22  ;;  %v526_v40 = vadd.f32 %v1025_v34, %v1199_v22  ;;  %v453_v41 = vpop.f32.mrf.mxu0  ;;  %v517_v42 = vpop.f32.mrf.mxu1 }
  0xe0   : > { %740 = vst.msk [vmem:[%s1210_s29 + $0x8] sm:$0xf] %vm737_vm3, %v954_v35  ;;  %756 = vst.msk [vmem:[%s1210_s29 + $0x48] sm:$0xf] %vm737_vm3, %v970_v36  ;;  %v952_v43 = vpack.c.bf16 %v577_v37, %v577_v37  ;;  %v968_v44 = vpack.c.bf16 %v593_v38, %v593_v38  ;;  %v454_v45 = vadd.f32 %v1199_v22, %v453_v41 }
  0xe1   : > { %v518_v46 = vadd.f32 %v1199_v22, %v517_v42  ;;  %v580_v47 = vmax.f32 %v462_v39, 0.0  ;;  %v596_v48 = vmax.f32 %v526_v40, 0.0  ;;  %v1012_v49 = vpop.f32.mrf.mxu0  ;;  %v1028_v50 = vpop.f32.mrf.mxu1 }
  0xe2   : > { %738 = vst.msk [vmem:[%s1210_s29] sm:$0xf] %vm737_vm3, %v952_v43  ;;  %754 = vst.msk [vmem:[%s1210_s29 + $0x40] sm:$0xf] %vm737_vm3, %v968_v44  ;;  %v578_v51 = vmax.f32 %v454_v45, 0.0  ;;  %v475_v53 = vadd.f32 %v1012_v49, %v1199_v22  ;;  %v539_v54 = vadd.f32 %v1028_v50, %v1199_v22 }
  0xe3   : > { %v594_v52 = vmax.f32 %v518_v46, 0.0  ;;  %v955_v55 = vpack.c.bf16 %v580_v47, %v580_v47  ;;  %v971_v56 = vpack.c.bf16 %v596_v48, %v596_v48  ;;  %v466_v57 = vpop.f32.mrf.mxu0  ;;  %v530_v58 = vpop.f32.mrf.mxu1 }
  0xe4   : > { %v953_v59 = vpack.c.bf16 %v578_v51, %v578_v51  ;;  %v583_v61 = vmax.f32 %v475_v53, 0.0  ;;  %v599_v62 = vmax.f32 %v539_v54, 0.0  ;;  %v467_v63 = vadd.f32 %v1199_v22, %v466_v57 }
  0xe5   : > { %v969_v60 = vpack.c.bf16 %v594_v52, %v594_v52  ;;  %741 = vst.msk [vmem:[%s1210_s29 + $0xc] sm:$0xf] %vm737_vm3, %v955_v55  ;;  %757 = vst.msk [vmem:[%s1210_s29 + $0x4c] sm:$0xf] %vm737_vm3, %v971_v56  ;;  %v531_v0 = vadd.f32 %v1199_v22, %v530_v58  ;;  %v1013_v1 = vpop.f32.mrf.mxu0  ;;  %v1029_v2 = vpop.f32.mrf.mxu1 }
  0xe6   : > { %739 = vst.msk [vmem:[%s1210_s29 + $0x4] sm:$0xf] %vm737_vm3, %v953_v59  ;;  %v958_v3 = vpack.c.bf16 %v583_v61, %v583_v61  ;;  %v974_v4 = vpack.c.bf16 %v599_v62, %v599_v62  ;;  %v478_v5 = vadd.f32 %v1013_v1, %v1199_v22  ;;  %v542_v6 = vadd.f32 %v1029_v2, %v1199_v22 }
  0xe7   : > { %755 = vst.msk [vmem:[%s1210_s29 + $0x44] sm:$0xf] %vm737_vm3, %v969_v60  ;;  %v581_v7 = vmax.f32 %v467_v63, 0.0  ;;  %v597_v8 = vmax.f32 %v531_v0, 0.0  ;;  %v469_v9 = vpop.f32.mrf.mxu0  ;;  %v533_v10 = vpop.f32.mrf.mxu1 }
  0xe8   : > { %744 = vst.msk [vmem:[%s1210_s29 + $0x18] sm:$0xf] %vm737_vm3, %v958_v3  ;;  %760 = vst.msk [vmem:[%s1210_s29 + $0x58] sm:$0xf] %vm737_vm3, %v974_v4  ;;  %v584_v11 = vmax.f32 %v478_v5, 0.0  ;;  %v600_v12 = vmax.f32 %v542_v6, 0.0  ;;  %v470_v13 = vadd.f32 %v1199_v22, %v469_v9  ;;  %v534_v14 = vadd.f32 %v1199_v22, %v533_v10 }
  0xe9   : > { %v956_v15 = vpack.c.bf16 %v581_v7, %v581_v7  ;;  %v972_v16 = vpack.c.bf16 %v597_v8, %v597_v8  ;;  %v1016_v17 = vpop.f32.mrf.mxu0  ;;  %v1032_v18 = vpop.f32.mrf.mxu1 }
  0xea   : > { %v959_v19 = vpack.c.bf16 %v584_v11, %v584_v11  ;;  %v975_v20 = vpack.c.bf16 %v600_v12, %v600_v12  ;;  %v582_v21 = vmax.f32 %v470_v13, 0.0  ;;  %v598_v23 = vmax.f32 %v534_v14, 0.0 }
  0xeb   : > { %742 = vst.msk [vmem:[%s1210_s29 + $0x10] sm:$0xf] %vm737_vm3, %v956_v15  ;;  %758 = vst.msk [vmem:[%s1210_s29 + $0x50] sm:$0xf] %vm737_vm3, %v972_v16  ;;  %v491_v24 = vadd.f32 %v1016_v17, %v1199_v22  ;;  %v555_v25 = vadd.f32 %v1032_v18, %v1199_v22  ;;  %v482_v26 = vpop.f32.mrf.mxu0  ;;  %v546_v27 = vpop.f32.mrf.mxu1 }
  0xec   : > { %745 = vst.msk [vmem:[%s1210_s29 + $0x1c] sm:$0xf] %vm737_vm3, %v959_v19  ;;  %761 = vst.msk [vmem:[%s1210_s29 + $0x5c] sm:$0xf] %vm737_vm3, %v975_v20  ;;  %v957_v28 = vpack.c.bf16 %v582_v21, %v582_v21  ;;  %v973_v29 = vpack.c.bf16 %v598_v23, %v598_v23  ;;  %v483_v30 = vadd.f32 %v1199_v22, %v482_v26 }
  0xed   : > { %v547_v31 = vadd.f32 %v1199_v22, %v546_v27  ;;  %v587_v32 = vmax.f32 %v491_v24, 0.0  ;;  %v603_v33 = vmax.f32 %v555_v25, 0.0  ;;  %v1017_v34 = vpop.f32.mrf.mxu0  ;;  %v1033_v35 = vpop.f32.mrf.mxu1 }
  0xee   : > { %743 = vst.msk [vmem:[%s1210_s29 + $0x14] sm:$0xf] %vm737_vm3, %v957_v28  ;;  %759 = vst.msk [vmem:[%s1210_s29 + $0x54] sm:$0xf] %vm737_vm3, %v973_v29  ;;  %v585_v36 = vmax.f32 %v483_v30, 0.0  ;;  %v494_v38 = vadd.f32 %v1017_v34, %v1199_v22  ;;  %v558_v39 = vadd.f32 %v1033_v35, %v1199_v22 }
  0xef   : > { %v601_v37 = vmax.f32 %v547_v31, 0.0  ;;  %v962_v40 = vpack.c.bf16 %v587_v32, %v587_v32  ;;  %v978_v41 = vpack.c.bf16 %v603_v33, %v603_v33  ;;  %v485_v42 = vpop.f32.mrf.mxu0  ;;  %v549_v43 = vpop.f32.mrf.mxu1 }
  0xf0   : > { %v960_v44 = vpack.c.bf16 %v585_v36, %v585_v36  ;;  %v588_v46 = vmax.f32 %v494_v38, 0.0  ;;  %v604_v47 = vmax.f32 %v558_v39, 0.0  ;;  %v486_v48 = vadd.f32 %v1199_v22, %v485_v42 }
  0xf1   : > { %v976_v45 = vpack.c.bf16 %v601_v37, %v601_v37  ;;  %748 = vst.msk [vmem:[%s1210_s29 + $0x28] sm:$0xf] %vm737_vm3, %v962_v40  ;;  %764 = vst.msk [vmem:[%s1210_s29 + $0x68] sm:$0xf] %vm737_vm3, %v978_v41  ;;  %v550_v49 = vadd.f32 %v1199_v22, %v549_v43  ;;  %v1020_v50 = vpop.f32.mrf.mxu0  ;;  %v1036_v51 = vpop.f32.mrf.mxu1 }
  0xf2   : > { %746 = vst.msk [vmem:[%s1210_s29 + $0x20] sm:$0xf] %vm737_vm3, %v960_v44  ;;  %v963_v52 = vpack.c.bf16 %v588_v46, %v588_v46  ;;  %v979_v53 = vpack.c.bf16 %v604_v47, %v604_v47  ;;  %v507_v54 = vadd.f32 %v1020_v50, %v1199_v22  ;;  %v571_v55 = vadd.f32 %v1036_v51, %v1199_v22 }
  0xf3   : > { %762 = vst.msk [vmem:[%s1210_s29 + $0x60] sm:$0xf] %vm737_vm3, %v976_v45  ;;  %v586_v56 = vmax.f32 %v486_v48, 0.0  ;;  %v602_v57 = vmax.f32 %v550_v49, 0.0  ;;  %v498_v58 = vpop.f32.mrf.mxu0  ;;  %v562_v59 = vpop.f32.mrf.mxu1 }
  0xf4   : > { %749 = vst.msk [vmem:[%s1210_s29 + $0x2c] sm:$0xf] %vm737_vm3, %v963_v52  ;;  %765 = vst.msk [vmem:[%s1210_s29 + $0x6c] sm:$0xf] %vm737_vm3, %v979_v53  ;;  %v591_v60 = vmax.f32 %v507_v54, 0.0  ;;  %v607_v61 = vmax.f32 %v571_v55, 0.0  ;;  %v499_v62 = vadd.f32 %v1199_v22, %v498_v58  ;;  %v563_v63 = vadd.f32 %v1199_v22, %v562_v59 }
  0xf5   : > { %v961_v0 = vpack.c.bf16 %v586_v56, %v586_v56  ;;  %v977_v1 = vpack.c.bf16 %v602_v57, %v602_v57  ;;  %v1021_v2 = vpop.f32.mrf.mxu0  ;;  %v1037_v3 = vpop.f32.mrf.mxu1 }
  0xf6   : > { %v966_v4 = vpack.c.bf16 %v591_v60, %v591_v60  ;;  %v982_v5 = vpack.c.bf16 %v607_v61, %v607_v61  ;;  %v589_v6 = vmax.f32 %v499_v62, 0.0  ;;  %v605_v7 = vmax.f32 %v563_v63, 0.0 }
  0xf7   : > { %747 = vst.msk [vmem:[%s1210_s29 + $0x24] sm:$0xf] %vm737_vm3, %v961_v0  ;;  %763 = vst.msk [vmem:[%s1210_s29 + $0x64] sm:$0xf] %vm737_vm3, %v977_v1  ;;  %v510_v8 = vadd.f32 %v1021_v2, %v1199_v22  ;;  %v574_v9 = vadd.f32 %v1037_v3, %v1199_v22  ;;  %v501_v10 = vpop.f32.mrf.mxu0  ;;  %v565_v11 = vpop.f32.mrf.mxu1 }
  0xf8   : > { %752 = vst.msk [vmem:[%s1210_s29 + $0x38] sm:$0xf] %vm737_vm3, %v966_v4  ;;  %768 = vst.msk [vmem:[%s1210_s29 + $0x78] sm:$0xf] %vm737_vm3, %v982_v5  ;;  %v964_v12 = vpack.c.bf16 %v589_v6, %v589_v6  ;;  %v980_v13 = vpack.c.bf16 %v605_v7, %v605_v7  ;;  %v502_v14 = vadd.f32 %v1199_v22, %v501_v10 }
  0xf9   : > { %v566_v15 = vadd.f32 %v1199_v22, %v565_v11  ;;  %v592_v16 = vmax.f32 %v510_v8, 0.0  ;;  %v608_v17 = vmax.f32 %v574_v9, 0.0 }
  0xfa   : > { %750 = vst.msk [vmem:[%s1210_s29 + $0x30] sm:$0xf] %vm737_vm3, %v964_v12  ;;  %766 = vst.msk [vmem:[%s1210_s29 + $0x70] sm:$0xf] %vm737_vm3, %v980_v13  ;;  %v590_v18 = vmax.f32 %v502_v14, 0.0 }
  0xfb   : > { %v606_v19 = vmax.f32 %v566_v15, 0.0  ;;  %v967_v20 = vpack.c.bf16 %v592_v16, %v592_v16  ;;  %v983_v21 = vpack.c.bf16 %v608_v17, %v608_v17 }
  0xfc   : > { %v965_v23 = vpack.c.bf16 %v590_v18, %v590_v18 }
  0xfd   : > { %v981_v24 = vpack.c.bf16 %v606_v19, %v606_v19  ;;  %753 = vst.msk [vmem:[%s1210_s29 + $0x3c] sm:$0xf] %vm737_vm3, %v967_v20  ;;  %769 = vst.msk [vmem:[%s1210_s29 + $0x7c] sm:$0xf] %vm737_vm3, %v983_v21 }
  0xfe   : > { %751 = vst.msk [vmem:[%s1210_s29 + $0x34] sm:$0xf] %vm737_vm3, %v965_v23 }
  0xff   : > { %767 = vst.msk [vmem:[%s1210_s29 + $0x74] sm:$0xf] %vm737_vm3, %v981_v24 }
 0x100 PF: > { %s13_s14 = sadd.s32 1, %s1107_s14   ;;  %s1317_s12 = smov %s1103_s13 }
 0x101   : > { %p10_p5 = scmp.ge.s32.totalorder %s13_s14, 4   ;;  %s1318_s13 = smov %s1320_s15 }
 0x103   :  { %12 = sbr.rel (!%p10_p5) target bundleno = 2 (0x2), region = 68 }

// kernel: _lambda_.21
= control target key start
LH: loop header
LB: loop body
LE: loop exit
PB: predicated region body
PF: predicated region fallthrough
CT: control target
= control target key end

     0   :  { %s1348_s27 = smov 0   ;;  %s1651_s0 = inlined_call_operand.vmem [shape: bf16[2,9,9,24], index: 0, kind: input, shape index: {}]   ;;  %s1652_s1 = inlined_call_operand.vmem [shape: bf16[2,9,9,24], index: 1, kind: input, shape index: {}]   ;;  %s1653_s2 = inlined_call_operand.vmem [shape: bf16[2,9,9,24], index: 2, kind: input, shape index: {}]   ;;  %s1654_s3 = inlined_call_operand.vmem [shape: bf16[2,9,9,24], index: 3, kind: input, shape index: {}]   ;;  %s1655_s4 = inlined_call_operand.vmem [shape: f32[9,1,1,24], index: 4, kind: input, shape index: {}]   ;;  %s1656_s5 = inlined_call_operand.vmem [shape: f32[1,1,24], index: 5, kind: input, shape index: {}]   ;;  %s1657_s6 = inlined_call_operand.vmem [shape: bf16[24,24], index: 6, kind: input, shape index: {}]   ;;  %s1658_s7 = inlined_call_operand.vmem [shape: f32[1,24], index: 7, kind: input, shape index: {}]   ;;  %s1659_s8 = inlined_call_operand.vmem [shape: bf16[2,64,24], index: 8, kind: output, shape index: {}]  }
   0x1 LB: > { %s1181_s28 = sadd.s32 4294967295, %s1301_s27   ;;  %p1185_p0 = scmp.ge.s32.totalorder %s1301_s27, 1  ;;  %s1301_s27 = sphi %s1348_s27, %s18_s27  }
   0x2   : > { %p292_p1 = scmp.lt.s32.totalorder %s1301_s27, 3 }
   0x4   : > { %p293_p2 = pnand %p1185_p0, %p292_p1 }
   0x5   : > { %p341_p3 = scmp.lt.s32.totalorder (!%p293_p2), %s1181_s28, 1 }
   0x6   : > { %296 = sbr.rel (%p293_p2) target bundleno = 320 (0x140), region = 52 }
   0xb   : > { %v1293_v0 = vld [vmem:[%s1657_s6 + $0x8] ss:$0 sps:$4 sm:$0xff]   ;;  %vm972_vm0 = vcmask 1043456   ;;  %v1294_v1 = vld [vmem:[%s1657_s6] sm:$0xff]   ;;  %s1661_s28 = smov (!%p341_p3, %s1181_s28), 1  ;;  %vm502_vm1 = vcmask 1046528  }
   0xc   : > { %1282 = vmatprep.subr.msk.bf16.mxu0 %vm972_vm0, %v1293_v0  ;;  %1283 = vmatprep.subr.msk.bf16.mxu1 %vm972_vm0, %v1293_v0  ;;  %v974_v2 = vsel %vm972_vm0, %v1293_v0, 0  ;;  %s1284_s11 = smul.u32 72, %s1661_s28  ;;  %v1378_v3 = vld [vmem:[%s1655_s4] ss:$0 sm:$0xff]  ;;  %v1383_v4 = vld [vmem:[%s1655_s4 + $0x1] ss:$0 sm:$0xff] }
   0xd   : > { %1267 = vmatpush3.bf16.msra.mxu0 %v974_v2  ;;  %1280 = vmatpush3.bf16.msra.mxu1 %v974_v2  ;;  %v1402_v13 = vld [vmem:[%s1655_s4 + $0x2] ss:$0 sm:$0xff]  ;;  %v1408_v19 = vld [vmem:[%s1655_s4 + $0x3] ss:$0 sm:$0xff]  ;;  %v1426_v35 = vld [vmem:[%s1655_s4 + $0x5] ss:$0 sm:$0xff] }
   0xe   : > { %1268 = vmatprep.subr.bf16.mxu0 %v1294_v1  ;;  %1279 = vmatprep.subr.bf16.mxu1 %v1294_v1  ;;  %s1368_s14 = scalar_lea.vmem %s1651_s0, %s1284_s11  ;;  %s1373_s17 = scalar_lea.vmem %s1652_s1, %s1284_s11  ;;  %v1431_v40 = vld [vmem:[%s1655_s4 + $0x4] ss:$0 sm:$0xff]  ;;  %v1446_v59 = vld [vmem:[%s1655_s4 + $0x6] ss:$0 sm:$0xff]  ;;  %v1451_v0 = vld [vmem:[%s1655_s4 + $0x7] ss:$0 sm:$0xff] }
   0xf   : > { %s1388_s24 = scalar_lea.vmem %s1653_s2, %s1284_s11  ;;  %v367_v5 = vld [vmem:[%s1368_s14] ss:$8 sps:$4 sm:$0xff]   ;;  %v446_v7 = vld [vmem:[%s1368_s14 + $0x4] sm:$0x1]  ;;  %s1396_s29 = scalar_lea.vmem %s1654_s3, %s1284_s11  ;;  %v447_v12 = vld [vmem:[%s1368_s14 + $0xc] sm:$0x1] }
  0x10   : > { %v406_v6 = vld [vmem:[%s1373_s17] ss:$8 sps:$4 sm:$0xff]   ;;  %v375_v8 = vunpack.c.l.bf16 %v367_v5  ;;  %v376_v9 = vunpack.c.h.bf16 %v367_v5  ;;  %v454_v15 = vunpack.c.l.bf16 %v446_v7  ;;  %v455_v16 = vunpack.c.l.bf16 %v447_v12  ;;  %v623_v29 = vld [vmem:[%s1388_s24 + $0x4] sm:$0x1]  ;;  %v624_v30 = vld [vmem:[%s1388_s24 + $0xc] sm:$0x1] }
  0x11   : > { %1269 = vmatpush3.bf16.msra.mxu0 %v1294_v1  ;;  %1281 = vmatpush3.bf16.msra.mxu1 %v1294_v1  ;;  %v414_v10 = vunpack.c.l.bf16 %v406_v6  ;;  %v415_v11 = vunpack.c.h.bf16 %v406_v6  ;;  %v543_v14 = vld [vmem:[%s1388_s24] ss:$8 sps:$4 sm:$0xff]   ;;  %v631_v43 = vunpack.c.l.bf16 %v623_v29  ;;  %v632_v44 = vunpack.c.l.bf16 %v624_v30  ;;  %v1223_v7 = vld [vmem:[%s1368_s14 + $0xc] sm:$0x1] }
  0x12   : > { %v551_v17 = vunpack.c.l.bf16 %v543_v14  ;;  %v552_v18 = vunpack.c.h.bf16 %v543_v14  ;;  %v390_v20 = vmul.f32 %v1378_v3, %v375_v8  ;;  %v391_v21 = vmul.f32 %v1378_v3, %v376_v9  ;;  %v583_v28 = vld [vmem:[%s1396_s29] ss:$8 sps:$4 sm:$0xff]  }
  0x13   : > { %v430_v22 = vmul.f32 %v1383_v4, %v414_v10  ;;  %v431_v23 = vmul.f32 %v1383_v4, %v415_v11  ;;  %v470_v24 = vmul.f32 %v1402_v13, %v375_v8  ;;  %v471_v25 = vmul.f32 %v1402_v13, %v454_v15  ;;  %v1203_v49 = vld [vmem:[%s1368_s14 + $0x8] ss:$8 sps:$4 sm:$0xff]   ;;  %v1224_v8 = vld [vmem:[%s1368_s14 + $0x14] sm:$0x1] }
  0x14   : > { %v472_v26 = vmul.f32 %v1402_v13, %v376_v9  ;;  %v473_v27 = vmul.f32 %v1402_v13, %v455_v16  ;;  %v567_v33 = vmul.f32 %v1408_v19, %v551_v17  ;;  %v568_v34 = vmul.f32 %v1408_v19, %v552_v18  ;;  %v1213_v54 = vld [vmem:[%s1373_s17 + $0x8] ss:$8 sps:$4 sm:$0xff]  }
  0x15   : > { %v438_v31 = vadd.f32 %v430_v22, %v390_v20  ;;  %v439_v32 = vadd.f32 %v431_v23, %v391_v21  ;;  %v503_v36 = vrot.slane %v470_v24, 1  ;;  %v504_v37 = vrot.slane %v471_v25, 1  ;;  %v1460_v14 = vld [vmem:[%s1655_s4 + $0x8] ss:$0 sm:$0xff] }
  0x16   : > { %v506_v38 = vrot.slane %v472_v26, 1  ;;  %v507_v39 = vrot.slane %v473_v27, 1  ;;  %v591_v41 = vunpack.c.l.bf16 %v583_v28  ;;  %v592_v42 = vunpack.c.h.bf16 %v583_v28  ;;  %v371_v15 = vld [vmem:[%s1368_s14 + $0x20] ss:$8 sps:$4 sm:$0xff]  }
  0x17   : > { %v505_v45 = vsel %vm502_vm1, %v503_v36, %v504_v37  ;;  %v647_v47 = vmul.f32 %v1426_v35, %v551_v17  ;;  %v649_v48 = vmul.f32 %v1426_v35, %v552_v18  ;;  %v648_v55 = vmul.f32 %v1426_v35, %v631_v43  ;;  %v451_v36 = vld [vmem:[%s1368_s14 + $0x2c] sm:$0x1] }
  0x18   : > { %v508_v46 = vsel %vm502_vm1, %v506_v38, %v507_v39  ;;  %v535_v50 = vadd.f32 %v505_v45, %v438_v31  ;;  %v607_v52 = vmul.f32 %v1431_v40, %v591_v41  ;;  %v608_v53 = vmul.f32 %v1431_v40, %v592_v42 }
  0x19   : > { %v536_v51 = vadd.f32 %v508_v46, %v439_v32  ;;  %v650_v56 = vmul.f32 %v1426_v35, %v632_v44  ;;  %v679_v57 = vrot.slane %v647_v47, 1  ;;  %v682_v58 = vrot.slane %v649_v48, 1 }
  0x1a   : > { %v575_v60 = vadd.f32 %v567_v33, %v535_v50  ;;  %v728_v62 = vunpack.c.l.bf16 %v1203_v49  ;;  %v729_v63 = vunpack.c.h.bf16 %v1203_v49  ;;  %v680_v1 = vrot.slane %v648_v55, 1  ;;  %v410_v33 = vld [vmem:[%s1373_s17 + $0x20] ss:$8 sps:$4 sm:$0xff]  }
  0x1b   : > { %v576_v61 = vadd.f32 %v568_v34, %v536_v51  ;;  %v683_v2 = vrot.slane %v650_v56, 1  ;;  %v769_v5 = vunpack.c.l.bf16 %v1213_v54  ;;  %v770_v6 = vunpack.c.h.bf16 %v1213_v54  ;;  %v450_v34 = vld [vmem:[%s1368_s14 + $0x24] sm:$0x1] }
  0x1c   : > { %v615_v9 = vadd.f32 %v607_v52, %v575_v60  ;;  %v744_v11 = vmul.f32 %v1446_v59, %v728_v62  ;;  %v745_v12 = vmul.f32 %v1446_v59, %v729_v63  ;;  %v681_v16 = vsel %vm502_vm1, %v679_v57, %v680_v1  ;;  %v1481_v52 = vld [vmem:[%s1656_s5] ss:$0 sm:$0xff] }
  0x1d   : > { %v616_v10 = vadd.f32 %v608_v53, %v576_v61  ;;  %v684_v17 = vsel %vm502_vm1, %v682_v58, %v683_v2  ;;  %v785_v18 = vmul.f32 %v1451_v0, %v769_v5  ;;  %v786_v20 = vmul.f32 %v1451_v0, %v770_v6  ;;  %v547_v60 = vld [vmem:[%s1388_s24 + $0x20] ss:$8 sps:$4 sm:$0xff]  }
  0x1e   : > { %v711_v21 = vadd.f32 %v681_v16, %v615_v9  ;;  %v809_v23 = vunpack.c.l.bf16 %v1223_v7  ;;  %v810_v24 = vunpack.c.l.bf16 %v1224_v8  ;;  %v825_v25 = vmul.f32 %v1460_v14, %v728_v62  ;;  %v587_v2 = vld [vmem:[%s1396_s29 + $0x20] ss:$8 sps:$4 sm:$0xff]  }
  0x1f   : > { %v712_v22 = vadd.f32 %v684_v17, %v616_v10  ;;  %v827_v26 = vmul.f32 %v1460_v14, %v729_v63  ;;  %v379_v27 = vunpack.c.l.bf16 %v371_v15  ;;  %v380_v28 = vunpack.c.h.bf16 %v371_v15 }
  0x20   : > { %v752_v29 = vadd.f32 %v744_v11, %v711_v21  ;;  %v826_v31 = vmul.f32 %v1460_v14, %v809_v23  ;;  %v828_v32 = vmul.f32 %v1460_v14, %v810_v24  ;;  %vm920_vm2 = vcmask 195584   ;;  %v628_v21 = vld [vmem:[%s1388_s24 + $0x2c] sm:$0x1] }
  0x21   : > { %v753_v30 = vadd.f32 %v745_v12, %v712_v22  ;;  %v857_v37 = vrot.slane %v825_v25, 1  ;;  %v860_v38 = vrot.slane %v827_v26, 1  ;;  %v394_v39 = vmul.f32 %v1378_v3, %v379_v27  ;;  %v1207_v26 = vld [vmem:[%s1368_s14 + $0x28] ss:$8 sps:$4 sm:$0xff]  }
  0x22   : > { %v395_v41 = vmul.f32 %v1378_v3, %v380_v28  ;;  %v793_v42 = vadd.f32 %v785_v18, %v752_v29  ;;  %v858_v44 = vrot.slane %v826_v31, 1  ;;  %v861_v45 = vrot.slane %v828_v32, 1 }
  0x23   : > { %v794_v43 = vadd.f32 %v786_v20, %v753_v30  ;;  %v418_v46 = vunpack.c.l.bf16 %v410_v33  ;;  %v419_v47 = vunpack.c.h.bf16 %v410_v33  ;;  %v458_v48 = vunpack.c.l.bf16 %v450_v34  ;;  %v627_v20 = vld [vmem:[%s1388_s24 + $0x24] sm:$0x1] }
  0x24   : > { %v459_v49 = vunpack.c.l.bf16 %v451_v36  ;;  %v859_v50 = vsel %vm502_vm1, %v857_v37, %v858_v44  ;;  %v862_v51 = vsel %vm502_vm1, %v860_v38, %v861_v45  ;;  %v478_v53 = vmul.f32 %v1402_v13, %v379_v27 }
  0x25   : > { %v480_v54 = vmul.f32 %v1402_v13, %v380_v28  ;;  %v889_v55 = vadd.f32 %v859_v50, %v793_v42  ;;  %v890_v56 = vadd.f32 %v862_v51, %v794_v43  ;;  %v434_v57 = vmul.f32 %v1383_v4, %v418_v46  ;;  %v1227_v46 = vld [vmem:[%s1368_s14 + $0x2c] sm:$0x1] }
  0x26   : > { %v435_v58 = vmul.f32 %v1383_v4, %v419_v47  ;;  %v479_v61 = vmul.f32 %v1402_v13, %v458_v48  ;;  %v481_v62 = vmul.f32 %v1402_v13, %v459_v49  ;;  %v515_v63 = vrot.slane %v478_v53, 1  ;;  %v1228_v47 = vld [vmem:[%s1368_s14 + $0x34] sm:$0x1] }
  0x27   : > { %v518_v1 = vrot.slane %v480_v54, 1  ;;  %v904_v5 = vadd.f32 %v1481_v52, %v889_v55  ;;  %v905_v6 = vadd.f32 %v1481_v52, %v890_v56  ;;  %v442_v7 = vadd.f32 %v434_v57, %v394_v39 }
  0x28   : > { %v443_v8 = vadd.f32 %v435_v58, %v395_v41  ;;  %v516_v9 = vrot.slane %v479_v61, 1  ;;  %v519_v10 = vrot.slane %v481_v62, 1  ;;  %v555_v11 = vunpack.c.l.bf16 %v547_v60  ;;  %v1217_v41 = vld [vmem:[%s1373_s17 + $0x28] ss:$8 sps:$4 sm:$0xff]  }
  0x29   : > { %v556_v12 = vunpack.c.h.bf16 %v547_v60  ;;  %v912_v15 = vmax.f32 %v904_v5, 0.0  ;;  %v913_v16 = vmax.f32 %v905_v6, 0.0  ;;  %v595_v17 = vunpack.c.l.bf16 %v587_v2  ;;  %v369_v62 = vld [vmem:[%s1368_s14 + $0x10] ss:$8 sps:$4 sm:$0xff]  }
  0x2a   : > { %v596_v18 = vunpack.c.h.bf16 %v587_v2  ;;  %v517_v22 = vsel %vm502_vm1, %v515_v63, %v516_v9  ;;  %v520_v23 = vsel %vm502_vm1, %v518_v1, %v519_v10  ;;  %v571_v24 = vmul.f32 %v1408_v19, %v555_v11 }
  0x2b   : > { %v572_v25 = vmul.f32 %v1408_v19, %v556_v12  ;;  %921 = vst.msk [vmem:[#allocation2] sm:$0xff] %vm920_vm2, %v912_v15  ;;  %922 = vst.msk [vmem:[#allocation2 + $0x8] sm:$0xff] %vm920_vm2, %v913_v16  ;;  %v539_v27 = vadd.f32 %v517_v22, %v442_v7  ;;  %v540_v28 = vadd.f32 %v520_v23, %v443_v8  ;;  %v635_v31 = vunpack.c.l.bf16 %v627_v20 }
  0x2c   : > { %v611_v29 = vmul.f32 %v1431_v40, %v595_v17  ;;  %v612_v30 = vmul.f32 %v1431_v40, %v596_v18  ;;  %v636_v32 = vunpack.c.l.bf16 %v628_v21  ;;  %v655_v33 = vmul.f32 %v1426_v35, %v555_v11 }
  0x2d   : > { %v657_v34 = vmul.f32 %v1426_v35, %v556_v12  ;;  %v579_v36 = vadd.f32 %v571_v24, %v539_v27  ;;  %v580_v37 = vadd.f32 %v572_v25, %v540_v28  ;;  %v732_v38 = vunpack.c.l.bf16 %v1207_v26  ;;  %v408_v12 = vld [vmem:[%s1373_s17 + $0x10] ss:$8 sps:$4 sm:$0xff]   ;;  %v448_v24 = vld [vmem:[%s1368_s14 + $0x14] sm:$0x1] }
  0x2e   : > { %v733_v39 = vunpack.c.h.bf16 %v1207_v26  ;;  %v656_v42 = vmul.f32 %v1426_v35, %v635_v31  ;;  %v658_v43 = vmul.f32 %v1426_v35, %v636_v32  ;;  %v691_v44 = vrot.slane %v655_v33, 1 }
  0x2f   : > { %v694_v45 = vrot.slane %v657_v34, 1  ;;  %v619_v48 = vadd.f32 %v611_v29, %v579_v36  ;;  %v620_v49 = vadd.f32 %v612_v30, %v580_v37  ;;  %v748_v50 = vmul.f32 %v1446_v59, %v732_v38  ;;  %v449_v29 = vld [vmem:[%s1368_s14 + $0x1c] sm:$0x1] }
  0x30   : > { %v749_v51 = vmul.f32 %v1446_v59, %v733_v39  ;;  %v692_v53 = vrot.slane %v656_v42, 1  ;;  %v695_v54 = vrot.slane %v658_v43, 1  ;;  %v773_v55 = vunpack.c.l.bf16 %v1217_v41 }
  0x31   : > { %v774_v56 = vunpack.c.h.bf16 %v1217_v41  ;;  %v813_v57 = vunpack.c.l.bf16 %v1227_v46  ;;  %v814_v58 = vunpack.c.l.bf16 %v1228_v47  ;;  %v833_v60 = vmul.f32 %v1460_v14, %v732_v38 }
  0x32   : > { %v835_v61 = vmul.f32 %v1460_v14, %v733_v39  ;;  %v929_v63 = vld [vmem:[#allocation2] sm:$0xff]  ;;  %v930_v1 = vld [vmem:[#allocation2 + $0x8] sm:$0xff]  ;;  %v693_v2 = vsel %vm502_vm1, %v691_v44, %v692_v53  ;;  %v696_v5 = vsel %vm502_vm1, %v694_v45, %v695_v54  ;;  %v789_v6 = vmul.f32 %v1451_v0, %v773_v55  ;;  %v545_v44 = vld [vmem:[%s1388_s24 + $0x10] ss:$8 sps:$4 sm:$0xff]  }
  0x33   : > { %v790_v7 = vmul.f32 %v1451_v0, %v774_v56  ;;  %v937_v8 = vpack.c.bf16 %v930_v1, %v929_v63  ;;  %v715_v9 = vadd.f32 %v693_v2, %v619_v48  ;;  %v716_v10 = vadd.f32 %v696_v5, %v620_v49  ;;  %v585_v49 = vld [vmem:[%s1396_s29 + $0x10] ss:$8 sps:$4 sm:$0xff]   ;;  %v626_v2 = vld [vmem:[%s1388_s24 + $0x1c] sm:$0x1] }
  0x34   : > { %v834_v11 = vmul.f32 %v1460_v14, %v813_v57  ;;  %v836_v15 = vmul.f32 %v1460_v14, %v814_v58  ;;  %v869_v16 = vrot.slane %v833_v60, 1  ;;  %v872_v17 = vrot.slane %v835_v61, 1  ;;  %v625_v60 = vld [vmem:[%s1388_s24 + $0x14] sm:$0x1] }
  0x35   : > { %v377_v18 = vunpack.c.l.bf16 %v369_v62  ;;  %1270 = vmatprep.mubr.msk.bf16.mxu0 %vm920_vm2, %v937_v8  ;;  %v756_v20 = vadd.f32 %v748_v50, %v715_v9  ;;  %v757_v21 = vadd.f32 %v749_v51, %v716_v10  ;;  %v378_v23 = vunpack.c.h.bf16 %v369_v62  ;;  %v1205_v9 = vld [vmem:[%s1368_s14 + $0x18] ss:$8 sps:$4 sm:$0xff]  }
  0x36   : > { %v870_v22 = vrot.slane %v834_v11, 1  ;;  %v873_v25 = vrot.slane %v836_v15, 1  ;;  %v416_v27 = vunpack.c.l.bf16 %v408_v12  ;;  %v417_v28 = vunpack.c.h.bf16 %v408_v12 }
  0x37   : > { %v392_v26 = vmul.f32 %v1378_v3, %v377_v18  ;;  %v797_v30 = vadd.f32 %v789_v6, %v756_v20  ;;  %v798_v31 = vadd.f32 %v790_v7, %v757_v21  ;;  %v393_v33 = vmul.f32 %v1378_v3, %v378_v23 }
  0x38   : > { %v871_v32 = vsel %vm502_vm1, %v869_v16, %v870_v22  ;;  %v874_v34 = vsel %vm502_vm1, %v872_v17, %v873_v25  ;;  %v432_v36 = vmul.f32 %v1383_v4, %v416_v27  ;;  %v433_v37 = vmul.f32 %v1383_v4, %v417_v28  ;;  %v1215_v25 = vld [vmem:[%s1373_s17 + $0x18] ss:$8 sps:$4 sm:$0xff]  }
  0x39   : > { %v456_v38 = vunpack.c.l.bf16 %v448_v24  ;;  %v893_v39 = vadd.f32 %v871_v32, %v797_v30  ;;  %v894_v41 = vadd.f32 %v874_v34, %v798_v31  ;;  %v457_v42 = vunpack.c.l.bf16 %v449_v29  ;;  %v1225_v30 = vld [vmem:[%s1368_s14 + $0x1c] sm:$0x1]  ;;  %v1226_v31 = vld [vmem:[%s1368_s14 + $0x24] sm:$0x1] }
  0x3a   : > { %v474_v43 = vmul.f32 %v1402_v13, %v377_v18  ;;  %v440_v45 = vadd.f32 %v432_v36, %v392_v26  ;;  %v441_v46 = vadd.f32 %v433_v37, %v393_v33  ;;  %v476_v48 = vmul.f32 %v1402_v13, %v378_v23 }
  0x3b   : > { %v475_v47 = vmul.f32 %v1402_v13, %v456_v38  ;;  %v908_v50 = vadd.f32 %v1481_v52, %v893_v39  ;;  %v909_v51 = vadd.f32 %v1481_v52, %v894_v41  ;;  %v477_v53 = vmul.f32 %v1402_v13, %v457_v42 }
  0x3c   : > { %v509_v54 = vrot.slane %v474_v43, 1  ;;  %v512_v56 = vrot.slane %v476_v48, 1  ;;  %v553_v57 = vunpack.c.l.bf16 %v545_v44  ;;  %v554_v58 = vunpack.c.h.bf16 %v545_v44 }
  0x3d   : > { %v510_v55 = vrot.slane %v475_v47, 1  ;;  %v916_v61 = vmax.f32 %v908_v50, 0.0  ;;  %v917_v62 = vmax.f32 %v909_v51, 0.0  ;;  %v513_v63 = vrot.slane %v477_v53, 1  ;;  %v373_v53 = vld [vmem:[%s1368_s14 + $0x30] ss:$8 sps:$4 sm:$0xff]  }
  0x3e   : > { %v593_v1 = vunpack.c.l.bf16 %v585_v49  ;;  %v569_v6 = vmul.f32 %v1408_v19, %v553_v57  ;;  %v570_v7 = vmul.f32 %v1408_v19, %v554_v58  ;;  %v594_v8 = vunpack.c.h.bf16 %v585_v49 }
  0x3f   : > { %v511_v5 = vsel %vm502_vm1, %v509_v54, %v510_v55  ;;  %925 = vst.msk [vmem:[#allocation2 + $0x20] sm:$0xff] %vm920_vm2, %v916_v61  ;;  %926 = vst.msk [vmem:[#allocation2 + $0x28] sm:$0xff] %vm920_vm2, %v917_v62  ;;  %v514_v10 = vsel %vm502_vm1, %v512_v56, %v513_v63  ;;  %v633_v15 = vunpack.c.l.bf16 %v625_v60  ;;  %v634_v18 = vunpack.c.l.bf16 %v626_v2 }
  0x40   : > { %v537_v11 = vadd.f32 %v511_v5, %v440_v45  ;;  %v609_v12 = vmul.f32 %v1431_v40, %v593_v1  ;;  %v538_v16 = vadd.f32 %v514_v10, %v441_v46  ;;  %v610_v17 = vmul.f32 %v1431_v40, %v594_v8 }
  0x41   : > { %v651_v20 = vmul.f32 %v1426_v35, %v553_v57  ;;  %v652_v22 = vmul.f32 %v1426_v35, %v633_v15  ;;  %v653_v23 = vmul.f32 %v1426_v35, %v554_v58  ;;  %v730_v24 = vunpack.c.l.bf16 %v1205_v9  ;;  %v412_v58 = vld [vmem:[%s1373_s17 + $0x30] ss:$8 sps:$4 sm:$0xff]  }
  0x42   : > { %v577_v21 = vadd.f32 %v569_v6, %v537_v11  ;;  %v578_v26 = vadd.f32 %v570_v7, %v538_v16  ;;  %v654_v27 = vmul.f32 %v1426_v35, %v634_v18  ;;  %v731_v29 = vunpack.c.h.bf16 %v1205_v9  ;;  %v452_v11 = vld [vmem:[%s1368_s14 + $0x34] sm:$0x1] }
  0x43   : > { %v685_v28 = vrot.slane %v651_v20, 1  ;;  %v686_v33 = vrot.slane %v652_v22, 1  ;;  %v688_v34 = vrot.slane %v653_v23, 1  ;;  %v746_v36 = vmul.f32 %v1446_v59, %v730_v24 }
  0x44   : > { %v617_v32 = vadd.f32 %v609_v12, %v577_v21  ;;  %v618_v37 = vadd.f32 %v610_v17, %v578_v26  ;;  %v689_v38 = vrot.slane %v654_v27, 1  ;;  %v747_v39 = vmul.f32 %v1446_v59, %v731_v29  ;;  %v453_v12 = vld [vmem:[%s1368_s14 + $0x3c] sm:$0x1] }
  0x45   : > { %v771_v41 = vunpack.c.l.bf16 %v1215_v25  ;;  %v687_v42 = vsel %vm502_vm1, %v685_v28, %v686_v33  ;;  %v772_v43 = vunpack.c.h.bf16 %v1215_v25  ;;  %v811_v44 = vunpack.c.l.bf16 %v1225_v30  ;;  %v549_v28 = vld [vmem:[%s1388_s24 + $0x30] ss:$8 sps:$4 sm:$0xff]  }
  0x46   : > { %v812_v45 = vunpack.c.l.bf16 %v1226_v31  ;;  %v933_v46 = vld [vmem:[#allocation2 + $0x20] sm:$0xff]  ;;  %v934_v47 = vld [vmem:[#allocation2 + $0x28] sm:$0xff]  ;;  %v690_v48 = vsel %vm502_vm1, %v688_v34, %v689_v38  ;;  %v713_v49 = vadd.f32 %v687_v42, %v617_v32  ;;  %v829_v51 = vmul.f32 %v1460_v14, %v730_v24  ;;  %v629_v38 = vld [vmem:[%s1388_s24 + $0x34] sm:$0x1] }
  0x47   : > { %v787_v50 = vmul.f32 %v1451_v0, %v771_v41  ;;  %v939_v54 = vpack.c.bf16 %v934_v47, %v933_v46  ;;  %v714_v55 = vadd.f32 %v690_v48, %v618_v37  ;;  %v788_v56 = vmul.f32 %v1451_v0, %v772_v43  ;;  %v589_v37 = vld [vmem:[%s1396_s29 + $0x30] ss:$8 sps:$4 sm:$0xff]  }
  0x48   : > { %v830_v57 = vmul.f32 %v1460_v14, %v811_v44  ;;  %v754_v60 = vadd.f32 %v746_v36, %v713_v49  ;;  %v831_v61 = vmul.f32 %v1460_v14, %v731_v29  ;;  %v832_v62 = vmul.f32 %v1460_v14, %v812_v45  ;;  %v630_v44 = vld [vmem:[%s1388_s24 + $0x3c] sm:$0x1]  ;;  %s1251_s24 = sshll.u32 %s1661_s28, 5 }
  0x49   : > { %v863_v63 = vrot.slane %v829_v51, 1  ;;  %1274 = vmatprep.mubr.msk.bf16.mxu1 %vm920_vm2, %v939_v54  ;;  %v755_v1 = vadd.f32 %v747_v39, %v714_v55  ;;  %v381_v5 = vunpack.c.l.bf16 %v373_v53  ;;  %v382_v6 = vunpack.c.h.bf16 %v373_v53  ;;  %s1630_s9 = scalar_lea.vmem %s1659_s8, %s1251_s24 }
  0x4a   : > { %v864_v2 = vrot.slane %v830_v57, 1  ;;  %v795_v7 = vadd.f32 %v787_v50, %v754_v60  ;;  %v866_v8 = vrot.slane %v831_v61, 1  ;;  %v867_v9 = vrot.slane %v832_v62, 1 }
  0x4b   : > { %v420_v10 = vunpack.c.l.bf16 %v412_v58  ;;  %v796_v15 = vadd.f32 %v788_v56, %v755_v1  ;;  %v396_v17 = vmul.f32 %v1378_v3, %v381_v5  ;;  %v397_v18 = vmul.f32 %v1378_v3, %v382_v6  ;;  %v1209_v56 = vld [vmem:[%s1368_s14 + $0x38] ss:$8 sps:$4 sm:$0xff]  }
  0x4c   : > { %v865_v16 = vsel %vm502_vm1, %v863_v63, %v864_v2  ;;  %v868_v20 = vsel %vm502_vm1, %v866_v8, %v867_v9  ;;  %v421_v22 = vunpack.c.h.bf16 %v412_v58  ;;  %v460_v25 = vunpack.c.l.bf16 %v452_v11  ;;  %v1219_v8 = vld [vmem:[%s1373_s17 + $0x38] ss:$8 sps:$4 sm:$0xff]   ;;  %v1229_v9 = vld [vmem:[%s1368_s14 + $0x3c] sm:$0x1] }
  0x4d   : > { %v891_v21 = vadd.f32 %v865_v16, %v795_v7  ;;  %v436_v23 = vmul.f32 %v1383_v4, %v420_v10  ;;  %v892_v24 = vadd.f32 %v868_v20, %v796_v15  ;;  %v461_v26 = vunpack.c.l.bf16 %v453_v12  ;;  %v1230_v16 = vld [vmem:[%s1368_s14 + $0x44] sm:$0x1] }
  0x4e   : > { %v482_v27 = vmul.f32 %v1402_v13, %v381_v5  ;;  %v437_v30 = vmul.f32 %v1383_v4, %v421_v22  ;;  %v484_v31 = vmul.f32 %v1402_v13, %v382_v6  ;;  %v483_v33 = vmul.f32 %v1402_v13, %v460_v25 }
  0x4f   : > { %v906_v29 = vadd.f32 %v1481_v52, %v891_v21  ;;  %v444_v3 = vadd.f32 %v436_v23, %v396_v17  ;;  %v907_v32 = vadd.f32 %v1481_v52, %v892_v24  ;;  %v485_v34 = vmul.f32 %v1402_v13, %v461_v26 }
  0x50   : > { %v521_v36 = vrot.slane %v482_v27, 1  ;;  %v445_v41 = vadd.f32 %v437_v30, %v397_v18  ;;  %v524_v42 = vrot.slane %v484_v31, 1  ;;  %v557_v43 = vunpack.c.l.bf16 %v549_v28 }
  0x51   : > { %v914_v39 = vmax.f32 %v906_v29, 0.0  ;;  %v915_v45 = vmax.f32 %v907_v32, 0.0  ;;  %v522_v4 = vrot.slane %v483_v33, 1  ;;  %v525_v46 = vrot.slane %v485_v34, 1 }
  0x52   : > { %v558_v47 = vunpack.c.h.bf16 %v549_v28  ;;  %v573_v48 = vmul.f32 %v1408_v19, %v557_v43  ;;  %v597_v49 = vunpack.c.l.bf16 %v589_v37  ;;  %v598_v50 = vunpack.c.h.bf16 %v589_v37 }
  0x53   : > { %923 = vst.msk [vmem:[#allocation2 + $0x10] sm:$0xff] %vm920_vm2, %v914_v39  ;;  %v637_v13 = vunpack.c.l.bf16 %v629_v38  ;;  %924 = vst.msk [vmem:[#allocation2 + $0x18] sm:$0xff] %vm920_vm2, %v915_v45  ;;  %v523_v51 = vsel %vm502_vm1, %v521_v36, %v522_v4  ;;  %v526_v53 = vsel %vm502_vm1, %v524_v42, %v525_v46  ;;  %v638_v55 = vunpack.c.l.bf16 %v630_v44 }
  0x54   : > { %v574_v54 = vmul.f32 %v1408_v19, %v558_v47  ;;  %v541_v57 = vadd.f32 %v523_v51, %v444_v3  ;;  %v542_v58 = vadd.f32 %v526_v53, %v445_v41  ;;  %v613_v60 = vmul.f32 %v1431_v40, %v597_v49  ;;  %v1234_v53 = vld [vmem:[%s1658_s7] ss:$0 sm:$0xff] }
  0x55   : > { %v614_v61 = vmul.f32 %v1431_v40, %v598_v50  ;;  %v659_v62 = vmul.f32 %v1426_v35, %v557_v43  ;;  %v660_v63 = vmul.f32 %v1426_v35, %v637_v13  ;;  %v661_v1 = vmul.f32 %v1426_v35, %v558_v47 }
  0x56   : > { %v662_v2 = vmul.f32 %v1426_v35, %v638_v55  ;;  %v581_v5 = vadd.f32 %v573_v48, %v541_v57  ;;  %v582_v19 = vadd.f32 %v574_v54, %v542_v58  ;;  %v734_v6 = vunpack.c.l.bf16 %v1209_v56 }
  0x57   : > { %v735_v7 = vunpack.c.h.bf16 %v1209_v56  ;;  %v697_v10 = vrot.slane %v659_v62, 1  ;;  %v698_v11 = vrot.slane %v660_v63, 1  ;;  %v700_v12 = vrot.slane %v661_v1, 1 }
  0x58   : > { %v701_v15 = vrot.slane %v662_v2, 1  ;;  %v621_v40 = vadd.f32 %v613_v60, %v581_v5  ;;  %v622_v17 = vadd.f32 %v614_v61, %v582_v19  ;;  %v750_v18 = vmul.f32 %v1446_v59, %v734_v6 }
  0x59   : > { %v751_v20 = vmul.f32 %v1446_v59, %v735_v7  ;;  %v699_v35 = vsel %vm502_vm1, %v697_v10, %v698_v11  ;;  %v775_v23 = vunpack.c.l.bf16 %v1219_v8  ;;  %v776_v24 = vunpack.c.h.bf16 %v1219_v8 }
  0x5a   : > { %v931_v21 = vld [vmem:[#allocation2 + $0x10] sm:$0xff]  ;;  %v702_v22 = vsel %vm502_vm1, %v700_v12, %v701_v15  ;;  %v932_v25 = vld [vmem:[#allocation2 + $0x18] sm:$0xff]  ;;  %v717_v26 = vadd.f32 %v699_v35, %v621_v40  ;;  %v815_v28 = vunpack.c.l.bf16 %v1229_v9  ;;  %v816_v29 = vunpack.c.l.bf16 %v1230_v16 }
  0x5b   : > { %v718_v27 = vadd.f32 %v702_v22, %v622_v17  ;;  %v938_v30 = vpack.c.bf16 %v932_v25, %v931_v21  ;;  %v791_v3 = vmul.f32 %v1451_v0, %v775_v23  ;;  %v792_v31 = vmul.f32 %v1451_v0, %v776_v24 }
  0x5c   : > { %v837_v32 = vmul.f32 %v1460_v14, %v734_v6  ;;  %v758_v59 = vadd.f32 %v750_v18, %v717_v26  ;;  %v838_v34 = vmul.f32 %v1460_v14, %v815_v28  ;;  %v839_v36 = vmul.f32 %v1460_v14, %v735_v7 }
  0x5d   : > { %v759_v33 = vadd.f32 %v751_v20, %v718_v27  ;;  %1271 = vmatmul.mubr.msk.bf16.vlgmr.msra.gmra.mxu0 %vm920_vm2, %v938_v30  ;;  %v840_v37 = vmul.f32 %v1460_v14, %v816_v29  ;;  %vm1081_vm3 = vcmask 191488  }
  0x5e   : > { %v875_v38 = vrot.slane %v837_v32, 1  ;;  %v799_v39 = vadd.f32 %v791_v3, %v758_v59  ;;  %v876_v42 = vrot.slane %v838_v34, 1  ;;  %v878_v43 = vrot.slane %v839_v36, 1 }
  0x5f   : > { %v800_v41 = vadd.f32 %v792_v31, %v759_v33  ;;  %v879_v44 = vrot.slane %v840_v37, 1 }
  0x60   : > { %v877_v0 = vsel %vm502_vm1, %v875_v38, %v876_v42 }
  0x61   : > { %v880_v45 = vsel %vm502_vm1, %v878_v43, %v879_v44  ;;  %v895_v4 = vadd.f32 %v877_v0, %v799_v39 }
  0x62   : > { %v896_v46 = vadd.f32 %v880_v45, %v800_v41 }
  0x63   : > { %v910_v47 = vadd.f32 %v1481_v52, %v895_v4 }
  0x64   : > { %v911_v48 = vadd.f32 %v1481_v52, %v896_v46 }
  0x65   : > { %v918_v49 = vmax.f32 %v910_v47, 0.0 }
  0x66   : > { %v919_v50 = vmax.f32 %v911_v48, 0.0 }
  0x67   : > { %927 = vst.msk [vmem:[#allocation2 + $0x30] sm:$0xff] %vm920_vm2, %v918_v49 }
  0x68   : > { %928 = vst.msk [vmem:[#allocation2 + $0x38] sm:$0xff] %vm920_vm2, %v919_v50 }
  0x6e   : > { %v935_v14 = vld [vmem:[#allocation2 + $0x30] sm:$0xff] }
  0x6f   : > { %v936_v13 = vld [vmem:[#allocation2 + $0x38] sm:$0xff] }
  0x70   : > { %v940_v51 = vpack.c.bf16 %v936_v13, %v935_v14 }
  0x72   : > { %1275 = vmatmul.mubr.msk.bf16.vlgmr.msra.gmra.mxu1 %vm920_vm2, %v940_v51 }
 0x11d   : > { %v1272_v54 = vpop.f32.mrf.mxu0 }
 0x11e   : > { %v1019_v55 = vadd.f32 %v1272_v54, %v1234_v53 }
 0x11f   : > { %v1010_v56 = vpop.f32.mrf.mxu0 }
 0x120   : > { %v1043_v52 = vmax.f32 %v1019_v55, 0.0  ;;  %v1011_v57 = vadd.f32 %v1234_v53, %v1010_v56 }
 0x121   : > { %v1273_v58 = vpop.f32.mrf.mxu0 }
 0x122   : > { %v1254_v60 = vpack.c.bf16 %v1043_v52, %v1043_v52  ;;  %v1041_v61 = vmax.f32 %v1011_v57, 0.0  ;;  %v1022_v62 = vadd.f32 %v1273_v58, %v1234_v53 }
 0x123   : > { %v1013_v63 = vpop.f32.mrf.mxu0 }
 0x124   : > { %1084 = vst.msk [vmem:[%s1630_s9 + $0x8] sm:$0xf] %vm1081_vm3, %v1254_v60  ;;  %v1252_v1 = vpack.c.bf16 %v1041_v61, %v1041_v61  ;;  %v1044_v2 = vmax.f32 %v1022_v62, 0.0  ;;  %v1014_v5 = vadd.f32 %v1234_v53, %v1013_v63 }
 0x126   : > { %1082 = vst.msk [vmem:[%s1630_s9] sm:$0xf] %vm1081_vm3, %v1252_v1  ;;  %v1255_v19 = vpack.c.bf16 %v1044_v2, %v1044_v2  ;;  %v1042_v6 = vmax.f32 %v1014_v5, 0.0 }
 0x128   : > { %1085 = vst.msk [vmem:[%s1630_s9 + $0xc] sm:$0xf] %vm1081_vm3, %v1255_v19  ;;  %v1253_v7 = vpack.c.bf16 %v1042_v6, %v1042_v6 }
 0x12a   : > { %1083 = vst.msk [vmem:[%s1630_s9 + $0x4] sm:$0xf] %vm1081_vm3, %v1253_v7 }
 0x132   : > { %v1276_v8 = vpop.f32.mrf.mxu1 }
 0x133   : > { %v1035_v9 = vadd.f32 %v1276_v8, %v1234_v53 }
 0x134   : > { %v1026_v10 = vpop.f32.mrf.mxu1 }
 0x135   : > { %v1047_v11 = vmax.f32 %v1035_v9, 0.0  ;;  %v1027_v12 = vadd.f32 %v1234_v53, %v1026_v10 }
 0x136   : > { %v1277_v15 = vpop.f32.mrf.mxu1 }
 0x137   : > { %v1258_v16 = vpack.c.bf16 %v1047_v11, %v1047_v11  ;;  %v1045_v40 = vmax.f32 %v1027_v12, 0.0  ;;  %v1038_v17 = vadd.f32 %v1277_v15, %v1234_v53 }
 0x138   : > { %v1029_v18 = vpop.f32.mrf.mxu1 }
 0x139   : > { %1088 = vst.msk [vmem:[%s1630_s9 + $0x18] sm:$0xf] %vm1081_vm3, %v1258_v16  ;;  %v1256_v20 = vpack.c.bf16 %v1045_v40, %v1045_v40  ;;  %v1048_v21 = vmax.f32 %v1038_v17, 0.0  ;;  %v1030_v35 = vadd.f32 %v1234_v53, %v1029_v18 }
 0x13b   : > { %1086 = vst.msk [vmem:[%s1630_s9 + $0x10] sm:$0xf] %vm1081_vm3, %v1256_v20  ;;  %v1259_v22 = vpack.c.bf16 %v1048_v21, %v1048_v21  ;;  %v1046_v23 = vmax.f32 %v1030_v35, 0.0 }
 0x13d   : > { %1089 = vst.msk [vmem:[%s1630_s9 + $0x1c] sm:$0xf] %vm1081_vm3, %v1259_v22  ;;  %v1257_v24 = vpack.c.bf16 %v1046_v23, %v1046_v23 }
 0x13f   : > { %1087 = vst.msk [vmem:[%s1630_s9 + $0x14] sm:$0xf] %vm1081_vm3, %v1257_v24 }
 0x140 PF: > { %s18_s27 = sadd.s32 1, %s1301_s27  }
 0x141   : > { %p15_p4 = scmp.ge.s32.totalorder %s18_s27, 4  }
 0x143   :  { %17 = sbr.rel (!%p15_p4) target bundleno = 1 (0x1), region = 101 }

// kernel: _lambda_.23
= control target key start
LH: loop header
LB: loop body
LE: loop exit
PB: predicated region body
PF: predicated region fallthrough
CT: control target
= control target key end

     0   :  { %s644_s12 = smov 0   ;;  %s646_s13 = smov 0   ;;  %s704_s0 = inlined_call_operand.vmem [shape: bf16[128,24], index: 0, kind: input, shape index: {}]   ;;  %s705_s1 = inlined_call_operand.vmem [shape: bf16[24,24], index: 1, kind: input, shape index: {}]   ;;  %s706_s2 = inlined_call_operand.vmem [shape: f32[1,24], index: 2, kind: input, shape index: {}]   ;;  %s707_s3 = inlined_call_operand.vmem [shape: bf16[128,24], index: 3, kind: output, shape index: {}]  }
   0x1   :  { %s648_s14 = smov 0  }
   0x2 LB: > { %s25_s15 = sadd.s32 1, %s618_s13  ;;  %p512_p0 = scmp.ge.s32.totalorder %s622_s14, 1  ;;  %s622_s14 = sphi %s648_s14, %s13_s14   ;;  %s618_s13 = sphi %s646_s13, %s709_s13   ;;  %s614_s12 = sphi %s644_s12, %s708_s12  }
   0x3   : > { %p27_p1 = scmp.ge.s32.totalorder %s25_s15, 2  ;;  %p169_p2 = scmp.lt.s32.totalorder %s622_s14, 3 }
   0x5   : > { %s711_s15 = smov (%p27_p1, %s25_s15), 0  ;;  %p170_p3 = pnand %p512_p0, %p169_p2 }
   0x6   : > { %s513_s20 = sshll.u32 (!%p170_p3), %s614_s12, 3 }
   0x7   : > { %173 = sbr.rel (%p170_p3) target bundleno = 227 (0xe3), region = 32  ;;  %p204_p4 = scmp.lt.s32.totalorder (!%p170_p3), %s513_s20, 15 }
   0xc   : > { %v594_v0 = vld [vmem:[%s705_s1 + $0x8] ss:$0 sps:$4 sm:$0xff]   ;;  %vm286_vm0 = vcmask 1043456   ;;  %v595_v1 = vld [vmem:[%s705_s1] sm:$0xff]   ;;  %s713_s20 = smov (!%p204_p4, %s513_s20), 15  ;;  %vm273_vm1 = vcmask 195584  }
   0xd   : > { %568 = vmatprep.subr.msk.bf16.mxu0 %vm286_vm0, %v594_v0  ;;  %569 = vmatprep.subr.msk.bf16.mxu1 %vm286_vm0, %v594_v0  ;;  %v288_v2 = vsel %vm286_vm0, %v594_v0, 0  ;;  %s514_s21 = sshll.u32 %s713_s20, 2  ;;  %v517_v7 = vld [vmem:[%s706_s2] ss:$0 sm:$0xff]  ;;  %vm395_vm2 = vcmask 191488  }
   0xe   : > { %553 = vmatpush3.bf16.msra.mxu0 %v288_v2  ;;  %566 = vmatpush3.bf16.msra.mxu1 %v288_v2  ;;  %s207_s24 = scalar_lea.vmem %s704_s0, %s514_s21  ;;  %s677_s29 = scalar_lea.vmem %s707_s3, %s514_s21 }
   0xf   : > { %554 = vmatprep.subr.bf16.mxu0 %v595_v1  ;;  %565 = vmatprep.subr.bf16.mxu1 %v595_v1  ;;  %v596_v3 = vld [vmem:[%s207_s24] sm:$0xff]   ;;  %v597_v4 = vld [vmem:[%s207_s24 + $0x10] sm:$0xff]   ;;  %v598_v5 = vld [vmem:[%s207_s24 + $0x8] sm:$0xff]  }
  0x10   : > { %556 = vmatprep.mubr.msk.bf16.mxu0 %vm273_vm1, %v596_v3  ;;  %560 = vmatprep.mubr.msk.bf16.mxu1 %vm273_vm1, %v597_v4  ;;  %v599_v6 = vld [vmem:[%s207_s24 + $0x18] sm:$0xff]  }
  0x12   : > { %555 = vmatpush3.bf16.msra.mxu0 %v595_v1  ;;  %567 = vmatpush3.bf16.msra.mxu1 %v595_v1 }
  0x15   : > { %557 = vmatmul.mubr.msk.bf16.vlgmr.msra.gmra.mxu0 %vm273_vm1, %v598_v5  ;;  %561 = vmatmul.mubr.msk.bf16.vlgmr.msra.gmra.mxu1 %vm273_vm1, %v599_v6 }
  0xd5   : > { %v558_v8 = vpop.f32.mrf.mxu0  ;;  %v562_v10 = vpop.f32.mrf.mxu1 }
  0xd6   : > { %v333_v9 = vadd.f32 %v558_v8, %v517_v7  ;;  %v349_v11 = vadd.f32 %v562_v10, %v517_v7 }
  0xd7   : > { %v324_v12 = vpop.f32.mrf.mxu0  ;;  %v340_v15 = vpop.f32.mrf.mxu1 }
  0xd8   : > { %v357_v13 = vmax.f32 %v333_v9, 0.0  ;;  %v325_v14 = vadd.f32 %v517_v7, %v324_v12  ;;  %v361_v16 = vmax.f32 %v349_v11, 0.0  ;;  %v341_v17 = vadd.f32 %v517_v7, %v340_v15 }
  0xd9   : > { %v559_v18 = vpop.f32.mrf.mxu0  ;;  %v563_v22 = vpop.f32.mrf.mxu1 }
  0xda   : > { %v540_v19 = vpack.c.bf16 %v357_v13, %v357_v13  ;;  %v355_v20 = vmax.f32 %v325_v14, 0.0  ;;  %v336_v21 = vadd.f32 %v559_v18, %v517_v7  ;;  %v544_v23 = vpack.c.bf16 %v361_v16, %v361_v16 }
  0xdb   : > { %v359_v24 = vmax.f32 %v341_v17, 0.0  ;;  %v352_v25 = vadd.f32 %v563_v22, %v517_v7  ;;  %v327_v26 = vpop.f32.mrf.mxu0  ;;  %v343_v30 = vpop.f32.mrf.mxu1 }
  0xdc   : > { %398 = vst.msk [vmem:[%s677_s29 + $0x8] sm:$0xf] %vm395_vm2, %v540_v19  ;;  %v538_v27 = vpack.c.bf16 %v355_v20, %v355_v20  ;;  %v358_v28 = vmax.f32 %v336_v21, 0.0  ;;  %v328_v29 = vadd.f32 %v517_v7, %v327_v26  ;;  %402 = vst.msk [vmem:[%s677_s29 + $0x18] sm:$0xf] %vm395_vm2, %v544_v23  ;;  %v344_v33 = vadd.f32 %v517_v7, %v343_v30 }
  0xdd   : > { %v542_v31 = vpack.c.bf16 %v359_v24, %v359_v24  ;;  %v362_v32 = vmax.f32 %v352_v25, 0.0 }
  0xde   : > { %396 = vst.msk [vmem:[%s677_s29] sm:$0xf] %vm395_vm2, %v538_v27  ;;  %v541_v34 = vpack.c.bf16 %v358_v28, %v358_v28  ;;  %v356_v35 = vmax.f32 %v328_v29, 0.0  ;;  %v360_v37 = vmax.f32 %v344_v33, 0.0 }
  0xdf   : > { %400 = vst.msk [vmem:[%s677_s29 + $0x10] sm:$0xf] %vm395_vm2, %v542_v31  ;;  %v545_v36 = vpack.c.bf16 %v362_v32, %v362_v32 }
  0xe0   : > { %399 = vst.msk [vmem:[%s677_s29 + $0xc] sm:$0xf] %vm395_vm2, %v541_v34  ;;  %v539_v38 = vpack.c.bf16 %v356_v35, %v356_v35  ;;  %v543_v39 = vpack.c.bf16 %v360_v37, %v360_v37 }
  0xe1   : > { %403 = vst.msk [vmem:[%s677_s29 + $0x1c] sm:$0xf] %vm395_vm2, %v545_v36 }
  0xe2   : > { %397 = vst.msk [vmem:[%s677_s29 + $0x4] sm:$0xf] %vm395_vm2, %v539_v38  ;;  %401 = vst.msk [vmem:[%s677_s29 + $0x14] sm:$0xf] %vm395_vm2, %v543_v39 }
  0xe3 PF: > { %s13_s14 = sadd.s32 1, %s622_s14   ;;  %s708_s12 = smov %s618_s13 }
  0xe4   : > { %p10_p5 = scmp.ge.s32.totalorder %s13_s14, 4   ;;  %s709_s13 = smov %s711_s15 }
  0xe6   :  { %12 = sbr.rel (!%p10_p5) target bundleno = 2 (0x2), region = 68 }

// kernel: _lambda_.24
= control target key start
LH: loop header
LB: loop body
LE: loop exit
PB: predicated region body
PF: predicated region fallthrough
CT: control target
= control target key end

     0   :  { %s1346_s18 = smov 0   ;;  %s1694_s0 = inlined_call_operand.vmem [shape: bf16[2,10,10,24], index: 0, kind: input, shape index: {}]   ;;  %s1695_s1 = inlined_call_operand.vmem [shape: f32[9,1,1,24], index: 1, kind: input, shape index: {}]   ;;  %s1696_s2 = inlined_call_operand.vmem [shape: f32[1,1,24], index: 2, kind: input, shape index: {}]   ;;  %s1697_s3 = inlined_call_operand.vmem [shape: bf16[24,24], index: 3, kind: input, shape index: {}]   ;;  %s1698_s4 = inlined_call_operand.vmem [shape: f32[1,24], index: 4, kind: input, shape index: {}]   ;;  %s1699_s5 = inlined_call_operand.vmem [shape: bf16[2,64,24], index: 5, kind: output, shape index: {}]  }
   0x1 LB: > { %s1173_s19 = sadd.s32 4294967295, %s1314_s18   ;;  %p1177_p0 = scmp.ge.s32.totalorder %s1314_s18, 1  ;;  %s1314_s18 = sphi %s1346_s18, %s15_s18  }
   0x2   : > { %p187_p1 = scmp.lt.s32.totalorder %s1314_s18, 3 }
   0x4   : > { %p188_p2 = pnand %p1177_p0, %p187_p1 }
   0x5   : > { %p215_p3 = scmp.lt.s32.totalorder (!%p188_p2), %s1173_s19, 1 }
   0x6   : > { %191 = sbr.rel (%p188_p2) target bundleno = 344 (0x158), region = 40 }
   0xb   : > { %v1306_v0 = vld [vmem:[%s1697_s3 + $0x8] ss:$0 sps:$4 sm:$0xff]   ;;  %vm1000_vm0 = vcmask 1043456   ;;  %v1307_v1 = vld [vmem:[%s1697_s3] sm:$0xff]   ;;  %s1701_s19 = smov (!%p215_p3, %s1173_s19), 1  ;;  %vm321_vm1 = vcmask 1046528  }
   0xc   : > { %1295 = vmatprep.subr.msk.bf16.mxu0 %vm1000_vm0, %v1306_v0  ;;  %1296 = vmatprep.subr.msk.bf16.mxu1 %vm1000_vm0, %v1306_v0  ;;  %v1002_v2 = vsel %vm1000_vm0, %v1306_v0, 0  ;;  %s1297_s24 = smul.u32 80, %s1701_s19  ;;  %v1366_v3 = vld [vmem:[%s1695_s1] ss:$0 sm:$0xff]  ;;  %v1376_v4 = vld [vmem:[%s1695_s1 + $0x1] ss:$0 sm:$0xff] }
   0xd   : > { %1280 = vmatpush3.bf16.msra.mxu0 %v1002_v2  ;;  %1293 = vmatpush3.bf16.msra.mxu1 %v1002_v2  ;;  %v1381_v5 = vld [vmem:[%s1695_s1 + $0x2] ss:$0 sm:$0xff]  ;;  %vm418_vm2 = vcmask 1045504   ;;  %v1400_v28 = vld [vmem:[%s1695_s1 + $0x3] ss:$0 sm:$0xff]  ;;  %vm948_vm3 = vcmask 195584  }
   0xe   : > { %1281 = vmatprep.subr.bf16.mxu0 %v1307_v1  ;;  %1292 = vmatprep.subr.bf16.mxu1 %v1307_v1  ;;  %s1371_s29 = scalar_lea.vmem %s1694_s0, %s1297_s24  ;;  %v1411_v43 = vld [vmem:[%s1695_s1 + $0x4] ss:$0 sm:$0xff]  ;;  %v1422_v54 = vld [vmem:[%s1695_s1 + $0x5] ss:$0 sm:$0xff]  ;;  %s1264_s27 = sshll.u32 %s1701_s19, 5  ;;  %vm1109_vm4 = vcmask 191488  }
   0xf   : > { %v226_v6 = vld [vmem:[%s1371_s29] ss:$8 sps:$4 sm:$0xff]   ;;  %v265_v7 = vld [vmem:[%s1371_s29 + $0x4] sm:$0x1]  ;;  %v266_v8 = vld [vmem:[%s1371_s29 + $0xc] sm:$0x1]  ;;  %s1673_s30 = scalar_lea.vmem %s1699_s5, %s1264_s27 }
  0x10   : > { %v234_v9 = vunpack.c.l.bf16 %v226_v6  ;;  %v235_v10 = vunpack.c.h.bf16 %v226_v6  ;;  %v273_v11 = vunpack.c.l.bf16 %v265_v7  ;;  %v274_v12 = vunpack.c.l.bf16 %v266_v8  ;;  %v362_v13 = vld [vmem:[%s1371_s29] sm:$0xe]  ;;  %v363_v14 = vld [vmem:[%s1371_s29 + $0x8] sm:$0xe]  ;;  %v1196_v33 = vld [vmem:[%s1371_s29 + $0xc] sm:$0x1] }
  0x11   : > { %1282 = vmatpush3.bf16.msra.mxu0 %v1307_v1  ;;  %1294 = vmatpush3.bf16.msra.mxu1 %v1307_v1  ;;  %v1186_v15 = vld [vmem:[%s1371_s29 + $0x8] ss:$8 sps:$4 sm:$0xff]   ;;  %v370_v16 = vunpack.c.l.bf16 %v362_v13  ;;  %v371_v17 = vunpack.c.l.bf16 %v363_v14  ;;  %v1197_v38 = vld [vmem:[%s1371_s29 + $0x14] sm:$0x1]  ;;  %v508_v52 = vunpack.c.l.bf16 %v1196_v33  ;;  %v1237_v33 = vld [vmem:[%s1371_s29 + $0x18] sm:$0xe] }
  0x12   : > { %v468_v18 = vunpack.c.l.bf16 %v1186_v15  ;;  %v469_v19 = vunpack.c.h.bf16 %v1186_v15  ;;  %v249_v20 = vmul.f32 %v1366_v3, %v234_v9  ;;  %v250_v21 = vmul.f32 %v1366_v3, %v235_v10  ;;  %v1206_v44 = vld [vmem:[%s1371_s29 + $0x8] sm:$0xe]  ;;  %v1207_v49 = vld [vmem:[%s1371_s29 + $0x10] sm:$0xe]  ;;  %v1436_v15 = vld [vmem:[%s1695_s1 + $0x6] ss:$0 sm:$0xff] }
  0x13   : > { %v289_v22 = vmul.f32 %v1376_v4, %v234_v9  ;;  %v290_v23 = vmul.f32 %v1376_v4, %v273_v11  ;;  %v291_v24 = vmul.f32 %v1376_v4, %v235_v10  ;;  %v292_v25 = vmul.f32 %v1376_v4, %v274_v12  ;;  %v1216_v63 = vld [vmem:[%s1371_s29 + $0x10] ss:$8 sps:$4 sm:$0xff]  }
  0x14   : > { %v386_v26 = vmul.f32 %v1381_v5, %v370_v16  ;;  %v387_v27 = vmul.f32 %v1381_v5, %v273_v11  ;;  %v388_v31 = vmul.f32 %v1381_v5, %v371_v17  ;;  %v389_v32 = vmul.f32 %v1381_v5, %v274_v12  ;;  %v1226_v16 = vld [vmem:[%s1371_s29 + $0x14] sm:$0x1] }
  0x15   : > { %v322_v29 = vrot.slane %v289_v22, 1  ;;  %v323_v30 = vrot.slane %v290_v23, 1  ;;  %v325_v34 = vrot.slane %v291_v24, 1  ;;  %v326_v35 = vrot.slane %v292_v25, 1  ;;  %v1445_v22 = vld [vmem:[%s1695_s1 + $0x7] ss:$0 sm:$0xff] }
  0x16   : > { %v419_v36 = vrot.slane %v386_v26, 2  ;;  %v420_v37 = vrot.slane %v387_v27, 2  ;;  %v422_v40 = vrot.slane %v388_v31, 2  ;;  %v423_v41 = vrot.slane %v389_v32, 2  ;;  %v1236_v27 = vld [vmem:[%s1371_s29 + $0x10] sm:$0xe] }
  0x17   : > { %v324_v39 = vsel %vm321_vm1, %v322_v29, %v323_v30  ;;  %v484_v42 = vmul.f32 %v1400_v28, %v468_v18  ;;  %v327_v45 = vsel %vm321_vm1, %v325_v34, %v326_v35  ;;  %v485_v48 = vmul.f32 %v1400_v28, %v469_v19 }
  0x18   : > { %v354_v46 = vadd.f32 %v324_v39, %v249_v20  ;;  %v421_v47 = vsel %vm418_vm2, %v419_v36, %v420_v37  ;;  %v355_v50 = vadd.f32 %v327_v45, %v250_v21  ;;  %v424_v51 = vsel %vm418_vm2, %v422_v40, %v423_v41  ;;  %v1227_v21 = vld [vmem:[%s1371_s29 + $0x1c] sm:$0x1] }
  0x19   : > { %v509_v53 = vunpack.c.l.bf16 %v1197_v38  ;;  %v524_v56 = vmul.f32 %v1411_v43, %v468_v18  ;;  %v526_v57 = vmul.f32 %v1411_v43, %v469_v19  ;;  %v604_v58 = vunpack.c.l.bf16 %v1206_v44  ;;  %v1457_v38 = vld [vmem:[%s1695_s1 + $0x8] ss:$0 sm:$0xff] }
  0x1a   : > { %v451_v55 = vadd.f32 %v421_v47, %v354_v46  ;;  %v452_v59 = vadd.f32 %v424_v51, %v355_v50  ;;  %v525_v60 = vmul.f32 %v1411_v43, %v508_v52  ;;  %v605_v62 = vunpack.c.l.bf16 %v1207_v49 }
  0x1b   : > { %v527_v61 = vmul.f32 %v1411_v43, %v509_v53  ;;  %v556_v1 = vrot.slane %v524_v56, 1  ;;  %v559_v2 = vrot.slane %v526_v57, 1  ;;  %v620_v6 = vmul.f32 %v1422_v54, %v604_v58 }
  0x1c   : > { %v492_v0 = vadd.f32 %v484_v42, %v451_v55  ;;  %v493_v7 = vadd.f32 %v485_v48, %v452_v59  ;;  %v557_v8 = vrot.slane %v525_v60, 1  ;;  %v621_v10 = vmul.f32 %v1422_v54, %v508_v52  ;;  %v230_v48 = vld [vmem:[%s1371_s29 + $0x20] ss:$8 sps:$4 sm:$0xff]  }
  0x1d   : > { %v560_v9 = vrot.slane %v527_v61, 1  ;;  %v622_v11 = vmul.f32 %v1422_v54, %v605_v62  ;;  %v623_v12 = vmul.f32 %v1422_v54, %v509_v53  ;;  %v652_v13 = vrot.slane %v620_v6, 2  ;;  %v269_v62 = vld [vmem:[%s1371_s29 + $0x24] sm:$0x1] }
  0x1e   : > { %v701_v14 = vunpack.c.l.bf16 %v1216_v63  ;;  %v558_v17 = vsel %vm321_vm1, %v556_v1, %v557_v8  ;;  %v653_v19 = vrot.slane %v621_v10, 2  ;;  %v702_v20 = vunpack.c.h.bf16 %v1216_v63  ;;  %v270_v63 = vld [vmem:[%s1371_s29 + $0x2c] sm:$0x1] }
  0x1f   : > { %v561_v18 = vsel %vm321_vm1, %v559_v2, %v560_v9  ;;  %v588_v23 = vadd.f32 %v558_v17, %v492_v0  ;;  %v655_v25 = vrot.slane %v622_v11, 2  ;;  %v656_v26 = vrot.slane %v623_v12, 2 }
  0x20   : > { %v589_v24 = vadd.f32 %v561_v18, %v493_v7  ;;  %v654_v29 = vsel %vm418_vm2, %v652_v13, %v653_v19  ;;  %v717_v30 = vmul.f32 %v1436_v15, %v701_v14  ;;  %v718_v31 = vmul.f32 %v1436_v15, %v702_v20  ;;  %v366_v7 = vld [vmem:[%s1371_s29 + $0x20] sm:$0xe]  ;;  %v1478_v13 = vld [vmem:[%s1696_s2] ss:$0 sm:$0xff]  ;;  %v367_v18 = vld [vmem:[%s1371_s29 + $0x28] sm:$0xe] }
  0x21   : > { %v741_v32 = vunpack.c.l.bf16 %v1226_v16  ;;  %v657_v34 = vsel %vm418_vm2, %v655_v25, %v656_v26  ;;  %v684_v35 = vadd.f32 %v654_v29, %v588_v23  ;;  %v742_v36 = vunpack.c.l.bf16 %v1227_v21 }
  0x22   : > { %v757_v37 = vmul.f32 %v1445_v22, %v701_v14  ;;  %v685_v39 = vadd.f32 %v657_v34, %v589_v24  ;;  %v759_v41 = vmul.f32 %v1445_v22, %v702_v20  ;;  %v837_v42 = vunpack.c.l.bf16 %v1236_v27 }
  0x23   : > { %v758_v40 = vmul.f32 %v1445_v22, %v741_v32  ;;  %v725_v44 = vadd.f32 %v717_v30, %v684_v35  ;;  %v760_v45 = vmul.f32 %v1445_v22, %v742_v36  ;;  %v838_v47 = vunpack.c.l.bf16 %v1237_v33 }
  0x24   : > { %v789_v46 = vrot.slane %v757_v37, 1  ;;  %v726_v49 = vadd.f32 %v718_v31, %v685_v39  ;;  %v792_v51 = vrot.slane %v759_v41, 1  ;;  %v853_v52 = vmul.f32 %v1457_v38, %v837_v42  ;;  %v1190_v42 = vld [vmem:[%s1371_s29 + $0x28] ss:$8 sps:$4 sm:$0xff]  }
  0x25   : > { %v790_v50 = vrot.slane %v758_v40, 1  ;;  %v793_v53 = vrot.slane %v760_v45, 1  ;;  %v854_v55 = vmul.f32 %v1457_v38, %v741_v32  ;;  %v855_v56 = vmul.f32 %v1457_v38, %v838_v47 }
  0x26   : > { %v856_v57 = vmul.f32 %v1457_v38, %v742_v36  ;;  %v885_v59 = vrot.slane %v853_v52, 2  ;;  %v238_v60 = vunpack.c.l.bf16 %v230_v48  ;;  %v239_v61 = vunpack.c.h.bf16 %v230_v48 }
  0x27   : > { %v791_v58 = vsel %vm321_vm1, %v789_v46, %v790_v50  ;;  %v794_v0 = vsel %vm321_vm1, %v792_v51, %v793_v53  ;;  %v886_v2 = vrot.slane %v854_v55, 2  ;;  %v888_v6 = vrot.slane %v855_v56, 2  ;;  %v1210_v50 = vld [vmem:[%s1371_s29 + $0x28] sm:$0xe] }
  0x28   : > { %v821_v1 = vadd.f32 %v791_v58, %v725_v44  ;;  %v822_v8 = vadd.f32 %v794_v0, %v726_v49  ;;  %v889_v9 = vrot.slane %v856_v57, 2  ;;  %v253_v10 = vmul.f32 %v1366_v3, %v238_v60  ;;  %v1200_v44 = vld [vmem:[%s1371_s29 + $0x2c] sm:$0x1]  ;;  %v1201_v49 = vld [vmem:[%s1371_s29 + $0x34] sm:$0x1] }
  0x29   : > { %v254_v11 = vmul.f32 %v1366_v3, %v239_v61  ;;  %v887_v12 = vsel %vm418_vm2, %v885_v59, %v886_v2  ;;  %v277_v14 = vunpack.c.l.bf16 %v269_v62  ;;  %v278_v16 = vunpack.c.l.bf16 %v270_v63 }
  0x2a   : > { %v297_v17 = vmul.f32 %v1376_v4, %v238_v60  ;;  %v890_v19 = vsel %vm418_vm2, %v888_v6, %v889_v9  ;;  %v917_v20 = vadd.f32 %v887_v12, %v821_v1  ;;  %v299_v21 = vmul.f32 %v1376_v4, %v239_v61  ;;  %v1211_v60 = vld [vmem:[%s1371_s29 + $0x30] sm:$0xe] }
  0x2b   : > { %v374_v23 = vunpack.c.l.bf16 %v366_v7  ;;  %v918_v24 = vadd.f32 %v890_v19, %v822_v8  ;;  %v298_v25 = vmul.f32 %v1376_v4, %v277_v14  ;;  %v300_v26 = vmul.f32 %v1376_v4, %v278_v16  ;;  %v1220_v12 = vld [vmem:[%s1371_s29 + $0x30] ss:$8 sps:$4 sm:$0xff]  }
  0x2c   : > { %v334_v27 = vrot.slane %v297_v17, 1  ;;  %v932_v29 = vadd.f32 %v1478_v13, %v917_v20  ;;  %v337_v30 = vrot.slane %v299_v21, 1  ;;  %v375_v31 = vunpack.c.l.bf16 %v367_v18 }
  0x2d   : > { %v394_v32 = vmul.f32 %v1381_v5, %v374_v23  ;;  %v933_v33 = vadd.f32 %v1478_v13, %v918_v24  ;;  %v335_v34 = vrot.slane %v298_v25, 1  ;;  %v338_v35 = vrot.slane %v300_v26, 1 }
  0x2e   : > { %v395_v36 = vmul.f32 %v1381_v5, %v277_v14  ;;  %v940_v37 = vmax.f32 %v932_v29, 0.0  ;;  %v396_v39 = vmul.f32 %v1381_v5, %v375_v31  ;;  %v397_v40 = vmul.f32 %v1381_v5, %v278_v16 }
  0x2f   : > { %v431_v41 = vrot.slane %v394_v32, 2  ;;  %v941_v45 = vmax.f32 %v933_v33, 0.0  ;;  %v336_v46 = vsel %vm321_vm1, %v334_v27, %v335_v34  ;;  %v339_v47 = vsel %vm321_vm1, %v337_v30, %v338_v35  ;;  %v1230_v35 = vld [vmem:[%s1371_s29 + $0x34] sm:$0x1] }
  0x30   : > { %v432_v48 = vrot.slane %v395_v36, 2  ;;  %949 = vst.msk [vmem:[#allocation2] sm:$0xff] %vm948_vm3, %v940_v37  ;;  %v358_v51 = vadd.f32 %v336_v46, %v253_v10  ;;  %v359_v52 = vadd.f32 %v339_v47, %v254_v11  ;;  %v434_v53 = vrot.slane %v396_v39, 2  ;;  %v1231_v36 = vld [vmem:[%s1371_s29 + $0x3c] sm:$0x1] }
  0x31   : > { %v435_v55 = vrot.slane %v397_v40, 2  ;;  %950 = vst.msk [vmem:[#allocation2 + $0x8] sm:$0xff] %vm948_vm3, %v941_v45  ;;  %v472_v57 = vunpack.c.l.bf16 %v1190_v42  ;;  %v473_v58 = vunpack.c.h.bf16 %v1190_v42  ;;  %v512_v59 = vunpack.c.l.bf16 %v1200_v44  ;;  %v1240_v42 = vld [vmem:[%s1371_s29 + $0x30] sm:$0xe]  ;;  %v1241_v44 = vld [vmem:[%s1371_s29 + $0x38] sm:$0xe] }
  0x32   : > { %v433_v56 = vsel %vm418_vm2, %v431_v41, %v432_v48  ;;  %v513_v63 = vunpack.c.l.bf16 %v1201_v49  ;;  %v608_v0 = vunpack.c.l.bf16 %v1210_v50  ;;  %v609_v11 = vunpack.c.l.bf16 %v1211_v60 }
  0x33   : > { %v436_v61 = vsel %vm418_vm2, %v434_v53, %v435_v55  ;;  %v455_v62 = vadd.f32 %v433_v56, %v358_v51  ;;  %v488_v2 = vmul.f32 %v1400_v28, %v472_v57  ;;  %v489_v6 = vmul.f32 %v1400_v28, %v473_v58 }
  0x34   : > { %v456_v1 = vadd.f32 %v436_v61, %v359_v52  ;;  %v532_v7 = vmul.f32 %v1411_v43, %v472_v57  ;;  %v533_v8 = vmul.f32 %v1411_v43, %v512_v59  ;;  %v534_v9 = vmul.f32 %v1411_v43, %v473_v58 }
  0x35   : > { %v535_v10 = vmul.f32 %v1411_v43, %v513_v63  ;;  %v496_v14 = vadd.f32 %v488_v2, %v455_v62  ;;  %v628_v18 = vmul.f32 %v1422_v54, %v608_v0  ;;  %v629_v23 = vmul.f32 %v1422_v54, %v512_v59  ;;  %v228_v62 = vld [vmem:[%s1371_s29 + $0x10] ss:$8 sps:$4 sm:$0xff]  }
  0x36   : > { %v497_v16 = vadd.f32 %v489_v6, %v456_v1  ;;  %v568_v17 = vrot.slane %v532_v7, 1  ;;  %v569_v19 = vrot.slane %v533_v8, 1  ;;  %v571_v20 = vrot.slane %v534_v9, 1 }
  0x37   : > { %v572_v21 = vrot.slane %v535_v10, 1  ;;  %v957_v24 = vld [vmem:[#allocation2] sm:$0xff]  ;;  %v630_v25 = vmul.f32 %v1422_v54, %v609_v11  ;;  %v631_v26 = vmul.f32 %v1422_v54, %v513_v63  ;;  %v664_v27 = vrot.slane %v628_v18, 2 }
  0x38   : > { %v705_v29 = vunpack.c.l.bf16 %v1220_v12  ;;  %v958_v30 = vld [vmem:[#allocation2 + $0x8] sm:$0xff]  ;;  %v570_v31 = vsel %vm321_vm1, %v568_v17, %v569_v19  ;;  %v665_v33 = vrot.slane %v629_v23, 2  ;;  %v706_v34 = vunpack.c.h.bf16 %v1220_v12  ;;  %v268_v17 = vld [vmem:[%s1371_s29 + $0x1c] sm:$0x1] }
  0x39   : > { %v573_v32 = vsel %vm321_vm1, %v571_v20, %v572_v21  ;;  %v965_v37 = vpack.c.bf16 %v958_v30, %v957_v24  ;;  %v592_v39 = vadd.f32 %v570_v31, %v496_v14  ;;  %v667_v41 = vrot.slane %v630_v25, 2 }
  0x3a   : > { %v593_v40 = vadd.f32 %v573_v32, %v497_v16  ;;  %v666_v45 = vsel %vm418_vm2, %v664_v27, %v665_v33  ;;  %v668_v46 = vrot.slane %v631_v26, 2  ;;  %v721_v47 = vmul.f32 %v1436_v15, %v705_v29  ;;  %v267_v16 = vld [vmem:[%s1371_s29 + $0x14] sm:$0x1]  ;;  %v364_v27 = vld [vmem:[%s1371_s29 + $0x10] sm:$0xe] }
  0x3b   : > { %v722_v48 = vmul.f32 %v1436_v15, %v706_v34  ;;  %1283 = vmatprep.mubr.msk.bf16.mxu0 %vm948_vm3, %v965_v37  ;;  %v688_v49 = vadd.f32 %v666_v45, %v592_v39  ;;  %v745_v50 = vunpack.c.l.bf16 %v1230_v35  ;;  %v746_v51 = vunpack.c.l.bf16 %v1231_v36  ;;  %v365_v33 = vld [vmem:[%s1371_s29 + $0x18] sm:$0xe] }
  0x3c   : > { %v765_v52 = vmul.f32 %v1445_v22, %v705_v29  ;;  %v669_v53 = vsel %vm418_vm2, %v667_v41, %v668_v46  ;;  %v767_v55 = vmul.f32 %v1445_v22, %v706_v34  ;;  %v841_v56 = vunpack.c.l.bf16 %v1240_v42 }
  0x3d   : > { %v842_v57 = vunpack.c.l.bf16 %v1241_v44  ;;  %v689_v58 = vadd.f32 %v669_v53, %v593_v40  ;;  %v729_v59 = vadd.f32 %v721_v47, %v688_v49  ;;  %v766_v60 = vmul.f32 %v1445_v22, %v745_v50 }
  0x3e   : > { %v768_v61 = vmul.f32 %v1445_v22, %v746_v51  ;;  %v801_v63 = vrot.slane %v765_v52, 1  ;;  %v804_v0 = vrot.slane %v767_v55, 1  ;;  %v861_v1 = vmul.f32 %v1457_v38, %v841_v56  ;;  %v1188_v52 = vld [vmem:[%s1371_s29 + $0x18] ss:$8 sps:$4 sm:$0xff]  }
  0x3f   : > { %v862_v2 = vmul.f32 %v1457_v38, %v745_v50  ;;  %v730_v6 = vadd.f32 %v722_v48, %v689_v58  ;;  %v802_v7 = vrot.slane %v766_v60, 1  ;;  %v863_v9 = vmul.f32 %v1457_v38, %v842_v57  ;;  %v1198_v58 = vld [vmem:[%s1371_s29 + $0x1c] sm:$0x1] }
  0x40   : > { %v805_v8 = vrot.slane %v768_v61, 1  ;;  %v864_v10 = vmul.f32 %v1457_v38, %v746_v51  ;;  %v897_v11 = vrot.slane %v861_v1, 2  ;;  %v236_v14 = vunpack.c.l.bf16 %v228_v62  ;;  %v1209_v1 = vld [vmem:[%s1371_s29 + $0x20] sm:$0xe] }
  0x41   : > { %v898_v12 = vrot.slane %v862_v2, 2  ;;  %v803_v18 = vsel %vm321_vm1, %v801_v63, %v802_v7  ;;  %v900_v20 = vrot.slane %v863_v9, 2  ;;  %v237_v21 = vunpack.c.h.bf16 %v228_v62 }
  0x42   : > { %v806_v19 = vsel %vm321_vm1, %v804_v0, %v805_v8  ;;  %v825_v23 = vadd.f32 %v803_v18, %v729_v59  ;;  %v901_v26 = vrot.slane %v864_v10, 2  ;;  %v251_v29 = vmul.f32 %v1366_v3, %v236_v14  ;;  %v1199_v59 = vld [vmem:[%s1371_s29 + $0x24] sm:$0x1]  ;;  %v1208_v0 = vld [vmem:[%s1371_s29 + $0x18] sm:$0xe] }
  0x43   : > { %v826_v24 = vadd.f32 %v806_v19, %v730_v6  ;;  %v899_v25 = vsel %vm418_vm2, %v897_v11, %v898_v12  ;;  %v252_v30 = vmul.f32 %v1366_v3, %v237_v21  ;;  %v275_v31 = vunpack.c.l.bf16 %v267_v16 }
  0x44   : > { %v276_v32 = vunpack.c.l.bf16 %v268_v17  ;;  %v902_v34 = vsel %vm418_vm2, %v900_v20, %v901_v26  ;;  %v921_v35 = vadd.f32 %v899_v25, %v825_v23  ;;  %v293_v36 = vmul.f32 %v1376_v4, %v236_v14 }
  0x45   : > { %v295_v37 = vmul.f32 %v1376_v4, %v237_v21  ;;  %v922_v39 = vadd.f32 %v902_v34, %v826_v24  ;;  %v294_v40 = vmul.f32 %v1376_v4, %v275_v31  ;;  %v372_v42 = vunpack.c.l.bf16 %v364_v27 }
  0x46   : > { %v296_v41 = vmul.f32 %v1376_v4, %v276_v32  ;;  %v936_v44 = vadd.f32 %v1478_v13, %v921_v35  ;;  %v328_v45 = vrot.slane %v293_v36, 1  ;;  %v373_v47 = vunpack.c.l.bf16 %v365_v33  ;;  %v1218_v33 = vld [vmem:[%s1371_s29 + $0x20] ss:$8 sps:$4 sm:$0xff]  }
  0x47   : > { %v331_v46 = vrot.slane %v295_v37, 1  ;;  %v937_v48 = vadd.f32 %v1478_v13, %v922_v39  ;;  %v329_v49 = vrot.slane %v294_v40, 1  ;;  %v390_v51 = vmul.f32 %v1381_v5, %v372_v42 }
  0x48   : > { %v332_v50 = vrot.slane %v296_v41, 1  ;;  %v944_v53 = vmax.f32 %v936_v44, 0.0  ;;  %v391_v55 = vmul.f32 %v1381_v5, %v275_v31  ;;  %v392_v56 = vmul.f32 %v1381_v5, %v373_v47 }
  0x49   : > { %v393_v57 = vmul.f32 %v1381_v5, %v276_v32  ;;  %v945_v60 = vmax.f32 %v937_v48, 0.0  ;;  %v330_v61 = vsel %vm321_vm1, %v328_v45, %v329_v49  ;;  %v425_v63 = vrot.slane %v390_v51, 2  ;;  %v1229_v51 = vld [vmem:[%s1371_s29 + $0x2c] sm:$0x1] }
  0x4a   : > { %v333_v62 = vsel %vm321_vm1, %v331_v46, %v332_v50  ;;  %953 = vst.msk [vmem:[#allocation2 + $0x20] sm:$0xff] %vm948_vm3, %v944_v53  ;;  %v356_v2 = vadd.f32 %v330_v61, %v251_v29  ;;  %v426_v7 = vrot.slane %v391_v55, 2  ;;  %v428_v8 = vrot.slane %v392_v56, 2  ;;  %v1228_v50 = vld [vmem:[%s1371_s29 + $0x24] sm:$0x1] }
  0x4b   : > { %v357_v6 = vadd.f32 %v333_v62, %v252_v30  ;;  %954 = vst.msk [vmem:[#allocation2 + $0x28] sm:$0xff] %vm948_vm3, %v945_v60  ;;  %v429_v9 = vrot.slane %v393_v57, 2  ;;  %v470_v10 = vunpack.c.l.bf16 %v1188_v52  ;;  %v471_v11 = vunpack.c.h.bf16 %v1188_v52  ;;  %v1238_v57 = vld [vmem:[%s1371_s29 + $0x20] sm:$0xe] }
  0x4c   : > { %v510_v12 = vunpack.c.l.bf16 %v1198_v58  ;;  %v427_v14 = vsel %vm418_vm2, %v425_v63, %v426_v7  ;;  %v511_v16 = vunpack.c.l.bf16 %v1199_v59  ;;  %v606_v17 = vunpack.c.l.bf16 %v1208_v0 }
  0x4d   : > { %v607_v18 = vunpack.c.l.bf16 %v1209_v1  ;;  %v430_v19 = vsel %vm418_vm2, %v428_v8, %v429_v9  ;;  %v453_v20 = vadd.f32 %v427_v14, %v356_v2  ;;  %v486_v21 = vmul.f32 %v1400_v28, %v470_v10  ;;  %v1239_v2 = vld [vmem:[%s1371_s29 + $0x28] sm:$0xe] }
  0x4e   : > { %v487_v23 = vmul.f32 %v1400_v28, %v471_v11  ;;  %v454_v24 = vadd.f32 %v430_v19, %v357_v6  ;;  %v528_v25 = vmul.f32 %v1411_v43, %v470_v10  ;;  %v529_v26 = vmul.f32 %v1411_v43, %v510_v12 }
  0x4f   : > { %v530_v27 = vmul.f32 %v1411_v43, %v471_v11  ;;  %v494_v29 = vadd.f32 %v486_v21, %v453_v20  ;;  %v531_v30 = vmul.f32 %v1411_v43, %v511_v16  ;;  %v624_v31 = vmul.f32 %v1422_v54, %v606_v17 }
  0x50   : > { %v625_v32 = vmul.f32 %v1422_v54, %v510_v12  ;;  %v495_v34 = vadd.f32 %v487_v23, %v454_v24  ;;  %v562_v35 = vrot.slane %v528_v25, 1  ;;  %v563_v36 = vrot.slane %v529_v26, 1 }
  0x51   : > { %v565_v37 = vrot.slane %v530_v27, 1  ;;  %v961_v39 = vld [vmem:[#allocation2 + $0x20] sm:$0xff]  ;;  %v566_v40 = vrot.slane %v531_v30, 1  ;;  %v626_v41 = vmul.f32 %v1422_v54, %v607_v18  ;;  %v627_v42 = vmul.f32 %v1422_v54, %v511_v16  ;;  %v232_v16 = vld [vmem:[%s1371_s29 + $0x30] ss:$8 sps:$4 sm:$0xff]  }
  0x52   : > { %v658_v44 = vrot.slane %v624_v31, 2  ;;  %v962_v45 = vld [vmem:[#allocation2 + $0x28] sm:$0xff]  ;;  %v564_v46 = vsel %vm321_vm1, %v562_v35, %v563_v36  ;;  %v659_v47 = vrot.slane %v625_v32, 2  ;;  %v703_v48 = vunpack.c.l.bf16 %v1218_v33  ;;  %v271_v31 = vld [vmem:[%s1371_s29 + $0x34] sm:$0x1] }
  0x53   : > { %v704_v49 = vunpack.c.h.bf16 %v1218_v33  ;;  %v967_v52 = vpack.c.bf16 %v962_v45, %v961_v39  ;;  %v567_v53 = vsel %vm321_vm1, %v565_v37, %v566_v40  ;;  %v590_v55 = vadd.f32 %v564_v46, %v494_v29  ;;  %v272_v36 = vld [vmem:[%s1371_s29 + $0x3c] sm:$0x1] }
  0x54   : > { %v661_v56 = vrot.slane %v626_v41, 2  ;;  %v591_v58 = vadd.f32 %v567_v53, %v495_v34  ;;  %v660_v59 = vsel %vm418_vm2, %v658_v44, %v659_v47  ;;  %v662_v60 = vrot.slane %v627_v42, 2  ;;  %v368_v42 = vld [vmem:[%s1371_s29 + $0x30] sm:$0xe] }
  0x55   : > { %v719_v61 = vmul.f32 %v1436_v15, %v703_v48  ;;  %1287 = vmatprep.mubr.msk.bf16.mxu1 %vm948_vm3, %v967_v52  ;;  %v686_v62 = vadd.f32 %v660_v59, %v590_v55  ;;  %v720_v63 = vmul.f32 %v1436_v15, %v704_v49  ;;  %v743_v0 = vunpack.c.l.bf16 %v1228_v50 }
  0x56   : > { %v744_v1 = vunpack.c.l.bf16 %v1229_v51  ;;  %v663_v6 = vsel %vm418_vm2, %v661_v56, %v662_v60  ;;  %v761_v7 = vmul.f32 %v1445_v22, %v703_v48  ;;  %v763_v8 = vmul.f32 %v1445_v22, %v704_v49  ;;  %v369_v48 = vld [vmem:[%s1371_s29 + $0x38] sm:$0xe] }
  0x57   : > { %v839_v9 = vunpack.c.l.bf16 %v1238_v57  ;;  %v687_v10 = vadd.f32 %v663_v6, %v591_v58  ;;  %v727_v11 = vadd.f32 %v719_v61, %v686_v62  ;;  %v762_v12 = vmul.f32 %v1445_v22, %v743_v0 }
  0x58   : > { %v764_v14 = vmul.f32 %v1445_v22, %v744_v1  ;;  %v795_v17 = vrot.slane %v761_v7, 1  ;;  %v798_v18 = vrot.slane %v763_v8, 1  ;;  %v840_v19 = vunpack.c.l.bf16 %v1239_v2  ;;  %v1192_v8 = vld [vmem:[%s1371_s29 + $0x38] ss:$8 sps:$4 sm:$0xff]  }
  0x59   : > { %v857_v20 = vmul.f32 %v1457_v38, %v839_v9  ;;  %v728_v21 = vadd.f32 %v720_v63, %v687_v10  ;;  %v796_v23 = vrot.slane %v762_v12, 1  ;;  %v858_v25 = vmul.f32 %v1457_v38, %v743_v0  ;;  %v1202_v9 = vld [vmem:[%s1371_s29 + $0x3c] sm:$0x1] }
  0x5a   : > { %v799_v24 = vrot.slane %v764_v14, 1  ;;  %v859_v26 = vmul.f32 %v1457_v38, %v840_v19  ;;  %v860_v27 = vmul.f32 %v1457_v38, %v744_v1  ;;  %v240_v30 = vunpack.c.l.bf16 %v232_v16  ;;  %v1203_v14 = vld [vmem:[%s1371_s29 + $0x44] sm:$0x1] }
  0x5b   : > { %v891_v29 = vrot.slane %v857_v20, 2  ;;  %v797_v32 = vsel %vm321_vm1, %v795_v17, %v796_v23  ;;  %v892_v34 = vrot.slane %v858_v25, 2  ;;  %v241_v35 = vunpack.c.h.bf16 %v232_v16  ;;  %v1212_v16 = vld [vmem:[%s1371_s29 + $0x38] sm:$0xe] }
  0x5c   : > { %v800_v33 = vsel %vm321_vm1, %v798_v18, %v799_v24  ;;  %v823_v37 = vadd.f32 %v797_v32, %v727_v11  ;;  %v894_v40 = vrot.slane %v859_v26, 2  ;;  %v895_v41 = vrot.slane %v860_v27, 2 }
  0x5d   : > { %v824_v39 = vadd.f32 %v800_v33, %v728_v21  ;;  %v893_v44 = vsel %vm418_vm2, %v891_v29, %v892_v34  ;;  %v255_v45 = vmul.f32 %v1366_v3, %v240_v30  ;;  %v256_v46 = vmul.f32 %v1366_v3, %v241_v35  ;;  %v1213_v29 = vld [vmem:[%s1371_s29 + $0x40] sm:$0xe] }
  0x5e   : > { %v279_v47 = vunpack.c.l.bf16 %v271_v31  ;;  %v896_v49 = vsel %vm418_vm2, %v894_v40, %v895_v41  ;;  %v919_v50 = vadd.f32 %v893_v44, %v823_v37  ;;  %v280_v51 = vunpack.c.l.bf16 %v272_v36 }
  0x5f   : > { %v301_v52 = vmul.f32 %v1376_v4, %v240_v30  ;;  %v920_v53 = vadd.f32 %v896_v49, %v824_v39  ;;  %v303_v56 = vmul.f32 %v1376_v4, %v241_v35  ;;  %v376_v57 = vunpack.c.l.bf16 %v368_v42 }
  0x60   : > { %v302_v55 = vmul.f32 %v1376_v4, %v279_v47  ;;  %v934_v58 = vadd.f32 %v1478_v13, %v919_v50  ;;  %v304_v3 = vmul.f32 %v1376_v4, %v280_v51  ;;  %v377_v60 = vunpack.c.l.bf16 %v369_v48 }
  0x61   : > { %v340_v59 = vrot.slane %v301_v52, 1  ;;  %v935_v61 = vadd.f32 %v1478_v13, %v920_v53  ;;  %v343_v63 = vrot.slane %v303_v56, 1  ;;  %v398_v0 = vmul.f32 %v1381_v5, %v376_v57 }
  0x62   : > { %v341_v62 = vrot.slane %v302_v55, 1  ;;  %v942_v1 = vmax.f32 %v934_v58, 0.0  ;;  %v344_v2 = vrot.slane %v304_v3, 1  ;;  %v399_v6 = vmul.f32 %v1381_v5, %v279_v47  ;;  %v1232_v3 = vld [vmem:[%s1371_s29 + $0x44] sm:$0x1] }
  0x63   : > { %v400_v7 = vmul.f32 %v1381_v5, %v377_v60  ;;  %v943_v10 = vmax.f32 %v935_v61, 0.0  ;;  %v401_v11 = vmul.f32 %v1381_v5, %v280_v51  ;;  %v437_v12 = vrot.slane %v398_v0, 2 }
  0x64   : > { %v342_v4 = vsel %vm321_vm1, %v340_v59, %v341_v62  ;;  %951 = vst.msk [vmem:[#allocation2 + $0x10] sm:$0xff] %vm948_vm3, %v942_v1  ;;  %v345_v17 = vsel %vm321_vm1, %v343_v63, %v344_v2  ;;  %v438_v19 = vrot.slane %v399_v6, 2  ;;  %v474_v24 = vunpack.c.l.bf16 %v1192_v8  ;;  %v1233_v59 = vld [vmem:[%s1371_s29 + $0x4c] sm:$0x1]  ;;  %v1242_v6 = vld [vmem:[%s1371_s29 + $0x40] sm:$0xe] }
  0x65   : > { %v360_v18 = vadd.f32 %v342_v4, %v255_v45  ;;  %v440_v20 = vrot.slane %v400_v7, 2  ;;  %952 = vst.msk [vmem:[#allocation2 + $0x18] sm:$0xff] %vm948_vm3, %v943_v10  ;;  %v361_v21 = vadd.f32 %v345_v17, %v256_v46  ;;  %v441_v23 = vrot.slane %v401_v11, 2  ;;  %v1222_v45 = vld [vmem:[%s1371_s29 + $0x40] ss:$8 sps:$4 sm:$0xff]  }
  0x66   : > { %v475_v25 = vunpack.c.h.bf16 %v1192_v8  ;;  %v439_v26 = vsel %vm418_vm2, %v437_v12, %v438_v19  ;;  %v514_v5 = vunpack.c.l.bf16 %v1202_v9  ;;  %v515_v27 = vunpack.c.l.bf16 %v1203_v14  ;;  %v1243_v4 = vld [vmem:[%s1371_s29 + $0x48] sm:$0xe] }
  0x67   : > { %v610_v30 = vunpack.c.l.bf16 %v1212_v16  ;;  %v442_v31 = vsel %vm418_vm2, %v440_v20, %v441_v23  ;;  %v457_v32 = vadd.f32 %v439_v26, %v360_v18  ;;  %v490_v33 = vmul.f32 %v1400_v28, %v474_v24 }
  0x68   : > { %v491_v34 = vmul.f32 %v1400_v28, %v475_v25  ;;  %v458_v35 = vadd.f32 %v442_v31, %v361_v21  ;;  %v536_v36 = vmul.f32 %v1411_v43, %v474_v24  ;;  %v537_v37 = vmul.f32 %v1411_v43, %v514_v5 }
  0x69   : > { %v538_v39 = vmul.f32 %v1411_v43, %v475_v25  ;;  %v498_v40 = vadd.f32 %v490_v33, %v457_v32  ;;  %v539_v41 = vmul.f32 %v1411_v43, %v515_v27  ;;  %v611_v42 = vunpack.c.l.bf16 %v1213_v29 }
  0x6a   : > { %v632_v44 = vmul.f32 %v1422_v54, %v610_v30  ;;  %v499_v46 = vadd.f32 %v491_v34, %v458_v35  ;;  %v574_v47 = vrot.slane %v536_v36, 1  ;;  %v575_v48 = vrot.slane %v537_v37, 1 }
  0x6b   : > { %v577_v28 = vrot.slane %v538_v39, 1  ;;  %v959_v49 = vld [vmem:[#allocation2 + $0x10] sm:$0xff]  ;;  %v578_v50 = vrot.slane %v539_v41, 1  ;;  %v633_v51 = vmul.f32 %v1422_v54, %v514_v5  ;;  %v634_v52 = vmul.f32 %v1422_v54, %v611_v42 }
  0x6c   : > { %v635_v53 = vmul.f32 %v1422_v54, %v515_v27  ;;  %v960_v43 = vld [vmem:[#allocation2 + $0x18] sm:$0xff]  ;;  %v576_v55 = vsel %vm321_vm1, %v574_v47, %v575_v48  ;;  %v670_v56 = vrot.slane %v632_v44, 2  ;;  %v707_v57 = vunpack.c.l.bf16 %v1222_v45 }
  0x6d   : > { %v708_v58 = vunpack.c.h.bf16 %v1222_v45  ;;  %v966_v60 = vpack.c.bf16 %v960_v43, %v959_v49  ;;  %v579_v61 = vsel %vm321_vm1, %v577_v28, %v578_v50  ;;  %v594_v62 = vadd.f32 %v576_v55, %v498_v40  ;;  %v1247_v50 = vld [vmem:[%s1698_s4] ss:$0 sm:$0xff] }
  0x6e   : > { %v671_v63 = vrot.slane %v633_v51, 2  ;;  %v595_v0 = vadd.f32 %v579_v61, %v499_v46  ;;  %v673_v1 = vrot.slane %v634_v52, 2  ;;  %v674_v2 = vrot.slane %v635_v53, 2 }
  0x6f   : > { %v723_v54 = vmul.f32 %v1436_v15, %v707_v57  ;;  %1284 = vmatmul.mubr.msk.bf16.vlgmr.msra.gmra.mxu0 %vm948_vm3, %v966_v60  ;;  %v724_v8 = vmul.f32 %v1436_v15, %v708_v58  ;;  %v747_v9 = vunpack.c.l.bf16 %v1232_v3  ;;  %v748_v10 = vunpack.c.l.bf16 %v1233_v59 }
  0x70   : > { %v672_v7 = vsel %vm418_vm2, %v670_v56, %v671_v63  ;;  %v675_v11 = vsel %vm418_vm2, %v673_v1, %v674_v2  ;;  %v769_v14 = vmul.f32 %v1445_v22, %v707_v57  ;;  %v771_v16 = vmul.f32 %v1445_v22, %v708_v58 }
  0x71   : > { %v690_v12 = vadd.f32 %v672_v7, %v594_v62  ;;  %v691_v17 = vadd.f32 %v675_v11, %v595_v0  ;;  %v770_v18 = vmul.f32 %v1445_v22, %v747_v9  ;;  %v772_v19 = vmul.f32 %v1445_v22, %v748_v10 }
  0x72   : > { %v843_v20 = vunpack.c.l.bf16 %v1242_v6  ;;  %v807_v23 = vrot.slane %v769_v14, 1  ;;  %v810_v24 = vrot.slane %v771_v16, 1  ;;  %v844_v15 = vunpack.c.l.bf16 %v1243_v4 }
  0x73   : > { %v731_v21 = vadd.f32 %v723_v54, %v690_v12  ;;  %v732_v25 = vadd.f32 %v724_v8, %v691_v17  ;;  %v808_v26 = vrot.slane %v770_v18, 1  ;;  %v811_v5 = vrot.slane %v772_v19, 1 }
  0x74   : > { %v865_v27 = vmul.f32 %v1457_v38, %v843_v20  ;;  %v866_v29 = vmul.f32 %v1457_v38, %v747_v9  ;;  %v867_v30 = vmul.f32 %v1457_v38, %v844_v15  ;;  %v868_v31 = vmul.f32 %v1457_v38, %v748_v10 }
  0x75   : > { %v809_v32 = vsel %vm321_vm1, %v807_v23, %v808_v26  ;;  %v812_v22 = vsel %vm321_vm1, %v810_v24, %v811_v5 }
  0x76   : > { %v903_v33 = vrot.slane %v865_v27, 2  ;;  %v827_v34 = vadd.f32 %v809_v32, %v731_v21  ;;  %v828_v35 = vadd.f32 %v812_v22, %v732_v25  ;;  %v904_v36 = vrot.slane %v866_v29, 2 }
  0x77   : > { %v906_v37 = vrot.slane %v867_v30, 2  ;;  %v907_v39 = vrot.slane %v868_v31, 2 }
  0x78   : > { %v905_v40 = vsel %vm418_vm2, %v903_v33, %v904_v36 }
  0x79   : > { %v908_v41 = vsel %vm418_vm2, %v906_v37, %v907_v39  ;;  %v923_v42 = vadd.f32 %v905_v40, %v827_v34 }
  0x7a   : > { %v924_v44 = vadd.f32 %v908_v41, %v828_v35 }
  0x7b   : > { %v938_v45 = vadd.f32 %v1478_v13, %v923_v42 }
  0x7c   : > { %v939_v38 = vadd.f32 %v1478_v13, %v924_v44 }
  0x7d   : > { %v946_v46 = vmax.f32 %v938_v45, 0.0 }
  0x7e   : > { %v947_v47 = vmax.f32 %v939_v38, 0.0 }
  0x7f   : > { %955 = vst.msk [vmem:[#allocation2 + $0x30] sm:$0xff] %vm948_vm3, %v946_v46 }
  0x80   : > { %956 = vst.msk [vmem:[#allocation2 + $0x38] sm:$0xff] %vm948_vm3, %v947_v47 }
  0x86   : > { %v963_v48 = vld [vmem:[#allocation2 + $0x30] sm:$0xff] }
  0x87   : > { %v964_v28 = vld [vmem:[#allocation2 + $0x38] sm:$0xff] }
  0x88   : > { %v968_v49 = vpack.c.bf16 %v964_v28, %v963_v48 }
  0x8a   : > { %1288 = vmatmul.mubr.msk.bf16.vlgmr.msra.gmra.mxu1 %vm948_vm3, %v968_v49 }
 0x12f   : > { %v1285_v51 = vpop.f32.mrf.mxu0 }
 0x130   : > { %v1047_v52 = vadd.f32 %v1285_v51, %v1247_v50 }
 0x131   : > { %v1038_v53 = vpop.f32.mrf.mxu0 }
 0x132   : > { %v1071_v13 = vmax.f32 %v1047_v52, 0.0  ;;  %v1039_v43 = vadd.f32 %v1247_v50, %v1038_v53 }
 0x133   : > { %v1286_v55 = vpop.f32.mrf.mxu0 }
 0x134   : > { %v1267_v56 = vpack.c.bf16 %v1071_v13, %v1071_v13  ;;  %v1069_v57 = vmax.f32 %v1039_v43, 0.0  ;;  %v1050_v58 = vadd.f32 %v1286_v55, %v1247_v50 }
 0x135   : > { %v1041_v3 = vpop.f32.mrf.mxu0 }
 0x136   : > { %1112 = vst.msk [vmem:[%s1673_s30 + $0x8] sm:$0xf] %vm1109_vm4, %v1267_v56  ;;  %v1265_v59 = vpack.c.bf16 %v1069_v57, %v1069_v57  ;;  %v1072_v60 = vmax.f32 %v1050_v58, 0.0  ;;  %v1042_v61 = vadd.f32 %v1247_v50, %v1041_v3 }
 0x138   : > { %1110 = vst.msk [vmem:[%s1673_s30] sm:$0xf] %vm1109_vm4, %v1265_v59  ;;  %v1268_v62 = vpack.c.bf16 %v1072_v60, %v1072_v60  ;;  %v1070_v63 = vmax.f32 %v1042_v61, 0.0 }
 0x13a   : > { %1113 = vst.msk [vmem:[%s1673_s30 + $0xc] sm:$0xf] %vm1109_vm4, %v1268_v62  ;;  %v1266_v0 = vpack.c.bf16 %v1070_v63, %v1070_v63 }
 0x13c   : > { %1111 = vst.msk [vmem:[%s1673_s30 + $0x4] sm:$0xf] %vm1109_vm4, %v1266_v0 }
 0x14a   : > { %v1289_v1 = vpop.f32.mrf.mxu1 }
 0x14b   : > { %v1063_v2 = vadd.f32 %v1289_v1, %v1247_v50 }
 0x14c   : > { %v1054_v54 = vpop.f32.mrf.mxu1 }
 0x14d   : > { %v1075_v6 = vmax.f32 %v1063_v2, 0.0  ;;  %v1055_v7 = vadd.f32 %v1247_v50, %v1054_v54 }
 0x14e   : > { %v1290_v8 = vpop.f32.mrf.mxu1 }
 0x14f   : > { %v1271_v9 = vpack.c.bf16 %v1075_v6, %v1075_v6  ;;  %v1073_v10 = vmax.f32 %v1055_v7, 0.0  ;;  %v1066_v4 = vadd.f32 %v1290_v8, %v1247_v50 }
 0x150   : > { %v1057_v11 = vpop.f32.mrf.mxu1 }
 0x151   : > { %1116 = vst.msk [vmem:[%s1673_s30 + $0x18] sm:$0xf] %vm1109_vm4, %v1271_v9  ;;  %v1269_v12 = vpack.c.bf16 %v1073_v10, %v1073_v10  ;;  %v1076_v14 = vmax.f32 %v1066_v4, 0.0  ;;  %v1058_v16 = vadd.f32 %v1247_v50, %v1057_v11 }
 0x153   : > { %1114 = vst.msk [vmem:[%s1673_s30 + $0x10] sm:$0xf] %vm1109_vm4, %v1269_v12  ;;  %v1272_v17 = vpack.c.bf16 %v1076_v14, %v1076_v14  ;;  %v1074_v18 = vmax.f32 %v1058_v16, 0.0 }
 0x155   : > { %1117 = vst.msk [vmem:[%s1673_s30 + $0x1c] sm:$0xf] %vm1109_vm4, %v1272_v17  ;;  %v1270_v19 = vpack.c.bf16 %v1074_v18, %v1074_v18 }
 0x157   : > { %1115 = vst.msk [vmem:[%s1673_s30 + $0x14] sm:$0xf] %vm1109_vm4, %v1270_v19 }
 0x158 PF: > { %s15_s18 = sadd.s32 1, %s1314_s18  }
 0x159   : > { %p12_p4 = scmp.ge.s32.totalorder %s15_s18, 4  }
 0x15b   :  { %14 = sbr.rel (!%p12_p4) target bundleno = 1 (0x1), region = 80 }

// kernel: _lambda_.25
= control target key start
LH: loop header
LB: loop body
LE: loop exit
PB: predicated region body
PF: predicated region fallthrough
CT: control target
= control target key end

     0   :  { %s657_s12 = smov 0   ;;  %s659_s13 = smov 0   ;;  %s723_s0 = inlined_call_operand.vmem [shape: bf16[128,48], index: 0, kind: input, shape index: {}]   ;;  %s724_s1 = inlined_call_operand.vmem [shape: bf16[48,48], index: 1, kind: input, shape index: {}]   ;;  %s725_s2 = inlined_call_operand.vmem [shape: f32[1,48], index: 2, kind: input, shape index: {}]   ;;  %s726_s3 = inlined_call_operand.vmem [shape: bf16[128,48], index: 3, kind: output, shape index: {}]  }
   0x1   :  { %s661_s14 = smov 0  }
   0x2 LB: > { %s25_s15 = sadd.s32 1, %s631_s13  ;;  %p520_p0 = scmp.ge.s32.totalorder %s635_s14, 1  ;;  %s635_s14 = sphi %s661_s14, %s13_s14   ;;  %s631_s13 = sphi %s659_s13, %s728_s13   ;;  %s627_s12 = sphi %s657_s12, %s727_s12  }
   0x3   : > { %p27_p1 = scmp.ge.s32.totalorder %s25_s15, 2  ;;  %p169_p2 = scmp.lt.s32.totalorder %s635_s14, 3 }
   0x5   : > { %s730_s15 = smov (%p27_p1, %s25_s15), 0  ;;  %p170_p3 = pnand %p520_p0, %p169_p2 }
   0x6   : > { %s521_s18 = sshll.u32 (!%p170_p3), %s627_s12, 3 }
   0x7   : > { %173 = sbr.rel (%p170_p3) target bundleno = 232 (0xe8), region = 32  ;;  %p204_p4 = scmp.lt.s32.totalorder (!%p170_p3), %s521_s18, 15 }
   0xc   : > { %v606_v0 = vld [vmem:[%s724_s1 + $0x10] sm:$0xff]   ;;  %v607_v1 = vld [vmem:[%s724_s1 + $0x8] sm:$0xff]   ;;  %s732_s18 = smov (!%p204_p4, %s521_s18), 15  ;;  %v608_v2 = vld [vmem:[%s724_s1] sm:$0xff]   ;;  %vm285_vm0 = vcmask 392192   ;;  %vm403_vm1 = vcmask 388096  }
   0xd   : > { %562 = vmatprep.subr.bf16.mxu0 %v606_v0  ;;  %576 = vmatprep.subr.bf16.mxu1 %v606_v0  ;;  %s522_s23 = sshll.u32 %s732_s18, 2  ;;  %v525_v7 = vld [vmem:[%s725_s2] ss:$0 sm:$0xff] }
   0xe   : > { %563 = vmatpush3.bf16.msra.mxu0 %v606_v0  ;;  %579 = vmatpush3.bf16.msra.mxu1 %v606_v0  ;;  %s207_s26 = scalar_lea.vmem %s723_s0, %s522_s23  ;;  %s696_s4 = scalar_lea.vmem %s726_s3, %s522_s23 }
   0xf   : > { %564 = vmatprep.subr.bf16.mxu0 %v607_v1  ;;  %577 = vmatprep.subr.bf16.mxu1 %v607_v1  ;;  %v609_v3 = vld [vmem:[%s207_s26] sm:$0xff]   ;;  %v610_v4 = vld [vmem:[%s207_s26 + $0x10] sm:$0xff]   ;;  %v611_v5 = vld [vmem:[%s207_s26 + $0x8] sm:$0xff]  }
  0x10   : > { %568 = vmatprep.mubr.msk.bf16.mxu0 %vm285_vm0, %v609_v3  ;;  %572 = vmatprep.mubr.msk.bf16.mxu1 %vm285_vm0, %v610_v4  ;;  %v612_v6 = vld [vmem:[%s207_s26 + $0x18] sm:$0xff]  }
  0x12   : > { %565 = vmatpush3.bf16.msra.mxu0 %v607_v1  ;;  %580 = vmatpush3.bf16.msra.mxu1 %v607_v1 }
  0x13   : > { %566 = vmatprep.subr.bf16.mxu0 %v608_v2  ;;  %578 = vmatprep.subr.bf16.mxu1 %v608_v2 }
  0x16   : > { %567 = vmatpush3.bf16.msra.mxu0 %v608_v2  ;;  %581 = vmatpush3.bf16.msra.mxu1 %v608_v2 }
  0x19   : > { %569 = vmatmul.mubr.msk.bf16.vlgmr.msra.gmra.mxu0 %vm285_vm0, %v611_v5  ;;  %573 = vmatmul.mubr.msk.bf16.vlgmr.msra.gmra.mxu1 %vm285_vm0, %v612_v6 }
  0xd9   : > { %v570_v8 = vpop.f32.mrf.mxu0  ;;  %v574_v9 = vpop.f32.mrf.mxu1 }
  0xda   : > { %v341_v10 = vadd.f32 %v570_v8, %v525_v7  ;;  %v357_v11 = vadd.f32 %v574_v9, %v525_v7 }
  0xdb   : > { %v332_v12 = vpop.f32.mrf.mxu0  ;;  %v348_v13 = vpop.f32.mrf.mxu1 }
  0xdc   : > { %v365_v14 = vmax.f32 %v341_v10, 0.0  ;;  %v369_v15 = vmax.f32 %v357_v11, 0.0  ;;  %v333_v16 = vadd.f32 %v525_v7, %v332_v12  ;;  %v349_v17 = vadd.f32 %v525_v7, %v348_v13 }
  0xdd   : > { %v571_v18 = vpop.f32.mrf.mxu0  ;;  %v575_v19 = vpop.f32.mrf.mxu1 }
  0xde   : > { %v549_v20 = vpack.c.bf16 %v365_v14, %v365_v14  ;;  %v553_v21 = vpack.c.bf16 %v369_v15, %v369_v15  ;;  %v363_v22 = vmax.f32 %v333_v16, 0.0  ;;  %v367_v23 = vmax.f32 %v349_v17, 0.0 }
  0xdf   : > { %v344_v24 = vadd.f32 %v571_v18, %v525_v7  ;;  %v360_v25 = vadd.f32 %v575_v19, %v525_v7  ;;  %v335_v26 = vpop.f32.mrf.mxu0  ;;  %v351_v27 = vpop.f32.mrf.mxu1 }
  0xe0   : > { %406 = vst.msk [vmem:[%s696_s4 + $0x8] sm:$0xf] %vm403_vm1, %v549_v20  ;;  %410 = vst.msk [vmem:[%s696_s4 + $0x18] sm:$0xf] %vm403_vm1, %v553_v21  ;;  %v547_v28 = vpack.c.bf16 %v363_v22, %v363_v22  ;;  %v551_v29 = vpack.c.bf16 %v367_v23, %v367_v23  ;;  %v336_v30 = vadd.f32 %v525_v7, %v335_v26 }
  0xe1   : > { %v352_v31 = vadd.f32 %v525_v7, %v351_v27  ;;  %v366_v32 = vmax.f32 %v344_v24, 0.0  ;;  %v370_v33 = vmax.f32 %v360_v25, 0.0 }
  0xe2   : > { %404 = vst.msk [vmem:[%s696_s4] sm:$0xf] %vm403_vm1, %v547_v28  ;;  %408 = vst.msk [vmem:[%s696_s4 + $0x10] sm:$0xf] %vm403_vm1, %v551_v29  ;;  %v364_v34 = vmax.f32 %v336_v30, 0.0 }
  0xe3   : > { %v368_v35 = vmax.f32 %v352_v31, 0.0  ;;  %v550_v36 = vpack.c.bf16 %v366_v32, %v366_v32  ;;  %v554_v37 = vpack.c.bf16 %v370_v33, %v370_v33 }
  0xe4   : > { %v548_v38 = vpack.c.bf16 %v364_v34, %v364_v34 }
  0xe5   : > { %v552_v39 = vpack.c.bf16 %v368_v35, %v368_v35  ;;  %407 = vst.msk [vmem:[%s696_s4 + $0xc] sm:$0xf] %vm403_vm1, %v550_v36  ;;  %411 = vst.msk [vmem:[%s696_s4 + $0x1c] sm:$0xf] %vm403_vm1, %v554_v37 }
  0xe6   : > { %405 = vst.msk [vmem:[%s696_s4 + $0x4] sm:$0xf] %vm403_vm1, %v548_v38 }
  0xe7   : > { %409 = vst.msk [vmem:[%s696_s4 + $0x14] sm:$0xf] %vm403_vm1, %v552_v39 }
  0xe8 PF: > { %s13_s14 = sadd.s32 1, %s635_s14   ;;  %s727_s12 = smov %s631_s13 }
  0xe9   : > { %p10_p5 = scmp.ge.s32.totalorder %s13_s14, 4   ;;  %s728_s13 = smov %s730_s15 }
  0xeb   :  { %12 = sbr.rel (!%p10_p5) target bundleno = 2 (0x2), region = 68 }

// kernel: _lambda_.26
= control target key start
LH: loop header
LB: loop body
LE: loop exit
PB: predicated region body
PF: predicated region fallthrough
CT: control target
= control target key end

     0   :  { %s958_s27 = smov 0   ;;  %s1086_s0 = inlined_call_operand.vmem [shape: bf16[2,5,5,48], index: 0, kind: input, shape index: {}]   ;;  %s1087_s1 = inlined_call_operand.vmem [shape: bf16[2,5,5,48], index: 1, kind: input, shape index: {}]   ;;  %s1088_s2 = inlined_call_operand.vmem [shape: bf16[2,5,5,48], index: 2, kind: input, shape index: {}]   ;;  %s1089_s3 = inlined_call_operand.vmem [shape: bf16[2,5,5,48], index: 3, kind: input, shape index: {}]   ;;  %s1090_s4 = inlined_call_operand.vmem [shape: f32[9,1,1,48], index: 4, kind: input, shape index: {}]   ;;  %s1091_s5 = inlined_call_operand.vmem [shape: f32[1,1,48], index: 5, kind: input, shape index: {}]   ;;  %s1092_s6 = inlined_call_operand.vmem [shape: bf16[48,48], index: 6, kind: input, shape index: {}]   ;;  %s1093_s7 = inlined_call_operand.vmem [shape: f32[1,48], index: 7, kind: input, shape index: {}]   ;;  %s1094_s8 = inlined_call_operand.vmem [shape: bf16[2,16,48], index: 8, kind: output, shape index: {}]  }
   0x1 LB: > { %s822_s28 = sadd.s32 4294967295, %s909_s27   ;;  %p826_p0 = scmp.ge.s32.totalorder %s909_s27, 1  ;;  %s909_s27 = sphi %s958_s27, %s18_s27  }
   0x2   : > { %p292_p1 = scmp.lt.s32.totalorder %s909_s27, 3 }
   0x4   : > { %p293_p2 = pnand %p826_p0, %p292_p1 }
   0x5   : > { %p341_p3 = scmp.lt.s32.totalorder (!%p293_p2), %s822_s28, 1 }
   0x6   : > { %296 = sbr.rel (%p293_p2) target bundleno = 267 (0x10b), region = 52 }
   0xb   : > { %v900_v0 = vld [vmem:[%s1092_s6 + $0x10] sm:$0xff]   ;;  %v911_v1 = vmov 0.0   ;;  %v901_v2 = vld [vmem:[%s1092_s6 + $0x8] sm:$0xff]   ;;  %vm912_vm0 = vmmov 0   ;;  %s1096_s28 = smov (!%p341_p3, %s822_s28), 1  ;;  %v902_v3 = vld [vmem:[%s1092_s6] sm:$0xff]  }
   0xc   : > { %879 = vmatprep.subr.bf16.mxu0 %v911_v1  ;;  %885 = vmatprep.mubr.msk.bf16.mxu0 %vm912_vm0, %v911_v1  ;;  %s978_s13 = smul.u32 20, %s1096_s28  ;;  %v833_v4 = vld [vmem:[%s1090_s4] ss:$0 sm:$0xff]  ;;  %v835_v5 = vld [vmem:[%s1090_s4 + $0x1] ss:$0 sm:$0xff]  ;;  %vm635_vm1 = vcmask 388096  }
   0xd   : > { %880 = vmatpush3.bf16.msra.mxu0 %v900_v0  ;;  %v837_v32 = vld [vmem:[%s1090_s4 + $0x2] ss:$0 sm:$0xff]  ;;  %v839_v49 = vld [vmem:[%s1090_s4 + $0x3] ss:$0 sm:$0xff]  ;;  %vm674_vm2 = vcmask 392192   ;;  %s872_s30 = sshll.u32 %s1096_s28, 3 }
   0xe   : > { %881 = vmatprep.subr.bf16.mxu0 %v911_v1  ;;  %s984_s16 = scalar_lea.vmem %s1086_s0, %s978_s13  ;;  %s990_s19 = scalar_lea.vmem %s1087_s1, %s978_s13 }
   0xf   : > { %v367_v6 = vld [vmem:[%s984_s16] sm:$0x3]  ;;  %v368_v7 = vld [vmem:[%s984_s16 + $0x4] sm:$0x3]  ;;  %v369_v8 = vld [vmem:[%s984_s16 + $0x8] sm:$0x3]  ;;  %s1008_s26 = scalar_lea.vmem %s1088_s2, %s978_s13  ;;  %s1023_s11 = scalar_lea.vmem %s1089_s3, %s978_s13 }
  0x10   : > { %v370_v9 = vld [vmem:[%s984_s16 + $0xc] sm:$0x3]  ;;  %v371_v10 = vunpack.c.l.bf16 %v367_v6  ;;  %v372_v11 = vunpack.c.l.bf16 %v368_v7  ;;  %v373_v12 = vunpack.c.l.bf16 %v369_v8  ;;  %v390_v13 = vld [vmem:[%s990_s19] sm:$0x3]  ;;  %v391_v14 = vld [vmem:[%s990_s19 + $0x4] sm:$0x3] }
  0x11   : > { %882 = vmatpush3.bf16.msra.mxu0 %v901_v2  ;;  %v374_v15 = vunpack.c.l.bf16 %v370_v9  ;;  %v392_v16 = vld [vmem:[%s990_s19 + $0x8] sm:$0x3]  ;;  %v393_v17 = vld [vmem:[%s990_s19 + $0xc] sm:$0x3]  ;;  %v394_v18 = vunpack.c.l.bf16 %v390_v13  ;;  %v395_v19 = vunpack.c.l.bf16 %v391_v14  ;;  %v414_v20 = vld [vmem:[%s984_s16] sm:$0x7] }
  0x12   : > { %883 = vmatprep.subr.bf16.mxu0 %v911_v1  ;;  %v382_v21 = vmul.f32 %v833_v4, %v371_v10  ;;  %v383_v22 = vmul.f32 %v833_v4, %v372_v11  ;;  %v384_v23 = vmul.f32 %v833_v4, %v373_v12  ;;  %v396_v24 = vunpack.c.l.bf16 %v392_v16  ;;  %v415_v25 = vld [vmem:[%s984_s16 + $0x4] sm:$0x7]  ;;  %v416_v26 = vld [vmem:[%s984_s16 + $0x8] sm:$0x7]  ;;  %v417_v27 = vld [vmem:[%s984_s16 + $0xc] sm:$0x7] }
  0x13   : > { %v385_v28 = vmul.f32 %v833_v4, %v374_v15  ;;  %v397_v29 = vunpack.c.l.bf16 %v393_v17  ;;  %v406_v30 = vmul.f32 %v835_v5, %v394_v18  ;;  %v407_v31 = vmul.f32 %v835_v5, %v395_v19  ;;  %v450_v37 = vld [vmem:[%s1008_s26] sm:$0x3]  ;;  %v451_v38 = vld [vmem:[%s1008_s26 + $0x4] sm:$0x3]  ;;  %v452_v43 = vld [vmem:[%s1008_s26 + $0x8] sm:$0x3] }
  0x14   : > { %v408_v33 = vmul.f32 %v835_v5, %v396_v24  ;;  %v418_v34 = vunpack.c.l.bf16 %v414_v20  ;;  %v419_v35 = vunpack.c.l.bf16 %v415_v25  ;;  %v420_v36 = vunpack.c.l.bf16 %v416_v26  ;;  %v453_v48 = vld [vmem:[%s1008_s26 + $0xc] sm:$0x3]  ;;  %v474_v54 = vld [vmem:[%s1023_s11] sm:$0x3]  ;;  %v475_v59 = vld [vmem:[%s1023_s11 + $0x4] sm:$0x3] }
  0x15   : > { %884 = vmatpush3.bf16.msra.mxu0 %v902_v3  ;;  %v409_v39 = vmul.f32 %v835_v5, %v397_v29  ;;  %v410_v40 = vadd.f32 %v406_v30, %v382_v21  ;;  %v411_v41 = vadd.f32 %v407_v31, %v383_v22  ;;  %v421_v42 = vunpack.c.l.bf16 %v417_v27  ;;  %v476_v0 = vld [vmem:[%s1023_s11 + $0x8] sm:$0x3]  ;;  %v477_v5 = vld [vmem:[%s1023_s11 + $0xc] sm:$0x3]  ;;  %v841_v6 = vld [vmem:[%s1090_s4 + $0x4] ss:$0 sm:$0xff]  ;;  %s365_s11 = scalar_lea.vmem %s1094_s8, %s872_s30 }
  0x16   : > { %v412_v44 = vadd.f32 %v408_v33, %v384_v23  ;;  %v430_v45 = vmul.f32 %v837_v32, %v418_v34  ;;  %v431_v46 = vmul.f32 %v837_v32, %v419_v35  ;;  %v432_v47 = vmul.f32 %v837_v32, %v420_v36  ;;  %v498_v11 = vld [vmem:[%s1008_s26] sm:$0x7]  ;;  %v499_v12 = vld [vmem:[%s1008_s26 + $0x4] sm:$0x7]  ;;  %v500_v13 = vld [vmem:[%s1008_s26 + $0x8] sm:$0x7] }
  0x17   : > { %v413_v50 = vadd.f32 %v409_v39, %v385_v28  ;;  %v433_v51 = vmul.f32 %v837_v32, %v421_v42  ;;  %v454_v52 = vunpack.c.l.bf16 %v450_v37  ;;  %v455_v53 = vunpack.c.l.bf16 %v451_v38  ;;  %v501_v18 = vld [vmem:[%s1008_s26 + $0xc] sm:$0x7]  ;;  %v843_v23 = vld [vmem:[%s1090_s4 + $0x5] ss:$0 sm:$0xff]  ;;  %v845_v29 = vld [vmem:[%s984_s16 + $0x8] sm:$0x3] }
  0x18   : > { %v438_v55 = vrot.slane %v430_v45, 1  ;;  %v439_v56 = vrot.slane %v431_v46, 1  ;;  %v440_v57 = vrot.slane %v432_v47, 1  ;;  %v456_v58 = vunpack.c.l.bf16 %v452_v43  ;;  %v844_v28 = vld [vmem:[%s984_s16 + $0x4] sm:$0x3] }
  0x19   : > { %v441_v60 = vrot.slane %v433_v51, 1  ;;  %v457_v61 = vunpack.c.l.bf16 %v453_v48  ;;  %v466_v62 = vmul.f32 %v839_v49, %v454_v52  ;;  %v467_v63 = vmul.f32 %v839_v49, %v455_v53  ;;  %v846_v34 = vld [vmem:[%s984_s16 + $0xc] sm:$0x3]  ;;  %v847_v39 = vld [vmem:[%s984_s16 + $0x10] sm:$0x3] }
  0x1a   : > { %v446_v1 = vadd.f32 %v438_v55, %v410_v40  ;;  %v447_v2 = vadd.f32 %v439_v56, %v411_v41  ;;  %v448_v3 = vadd.f32 %v440_v57, %v412_v44  ;;  %v468_v4 = vmul.f32 %v839_v49, %v456_v58  ;;  %v849_v40 = vld [vmem:[%s1090_s4 + $0x6] ss:$0 sm:$0xff]  ;;  %v850_v45 = vld [vmem:[%s990_s19 + $0x4] sm:$0x3]  ;;  %v852_v55 = vld [vmem:[%s990_s19 + $0xc] sm:$0x3] }
  0x1b   : > { %v449_v7 = vadd.f32 %v441_v60, %v413_v50  ;;  %v469_v8 = vmul.f32 %v839_v49, %v457_v61  ;;  %v478_v9 = vunpack.c.l.bf16 %v474_v54  ;;  %v479_v10 = vunpack.c.l.bf16 %v475_v59  ;;  %v851_v50 = vld [vmem:[%s990_s19 + $0x8] sm:$0x3]  ;;  %v853_v60 = vld [vmem:[%s990_s19 + $0x10] sm:$0x3]  ;;  %v855_v61 = vld [vmem:[%s1090_s4 + $0x7] ss:$0 sm:$0xff] }
  0x1c   : > { %v470_v14 = vadd.f32 %v466_v62, %v446_v1  ;;  %v471_v15 = vadd.f32 %v467_v63, %v447_v2  ;;  %v472_v16 = vadd.f32 %v468_v4, %v448_v3  ;;  %v480_v17 = vunpack.c.l.bf16 %v476_v0  ;;  %v856_v2 = vld [vmem:[%s984_s16 + $0x4] sm:$0x7]  ;;  %v857_v3 = vld [vmem:[%s984_s16 + $0x8] sm:$0x7]  ;;  %v858_v4 = vld [vmem:[%s984_s16 + $0xc] sm:$0x7] }
  0x1d   : > { %v473_v19 = vadd.f32 %v469_v8, %v449_v7  ;;  %v481_v20 = vunpack.c.l.bf16 %v477_v5  ;;  %v490_v21 = vmul.f32 %v841_v6, %v478_v9  ;;  %v491_v22 = vmul.f32 %v841_v6, %v479_v10  ;;  %v859_v9 = vld [vmem:[%s984_s16 + $0x10] sm:$0x7] }
  0x1e   : > { %v492_v24 = vmul.f32 %v841_v6, %v480_v17  ;;  %v502_v25 = vunpack.c.l.bf16 %v498_v11  ;;  %v503_v26 = vunpack.c.l.bf16 %v499_v12  ;;  %v504_v27 = vunpack.c.l.bf16 %v500_v13 }
  0x1f   : > { %v493_v30 = vmul.f32 %v841_v6, %v481_v20  ;;  %v494_v31 = vadd.f32 %v490_v21, %v470_v14  ;;  %v495_v32 = vadd.f32 %v491_v22, %v471_v15  ;;  %v505_v33 = vunpack.c.l.bf16 %v501_v18  ;;  %v861_v14 = vld [vmem:[%s1090_s4 + $0x8] ss:$0 sm:$0xff] }
  0x20   : > { %v496_v35 = vadd.f32 %v492_v24, %v472_v16  ;;  %v514_v36 = vmul.f32 %v843_v23, %v502_v25  ;;  %v515_v37 = vmul.f32 %v843_v23, %v503_v26  ;;  %v516_v38 = vmul.f32 %v843_v23, %v504_v27 }
  0x21   : > { %v497_v41 = vadd.f32 %v493_v30, %v473_v19  ;;  %v517_v42 = vmul.f32 %v843_v23, %v505_v33  ;;  %v539_v43 = vunpack.c.l.bf16 %v844_v28  ;;  %v540_v44 = vunpack.c.l.bf16 %v845_v29  ;;  %v862_v33 = vld [vmem:[%s1091_s5] ss:$0 sm:$0xff] }
  0x22   : > { %v522_v46 = vrot.slane %v514_v36, 1  ;;  %v523_v47 = vrot.slane %v515_v37, 1  ;;  %v524_v48 = vrot.slane %v516_v38, 1  ;;  %v541_v49 = vunpack.c.l.bf16 %v846_v34 }
  0x23   : > { %v525_v51 = vrot.slane %v517_v42, 1  ;;  %v542_v52 = vunpack.c.l.bf16 %v847_v39  ;;  %v551_v53 = vmul.f32 %v849_v40, %v539_v43  ;;  %v552_v54 = vmul.f32 %v849_v40, %v540_v44 }
  0x24   : > { %v530_v56 = vadd.f32 %v522_v46, %v494_v31  ;;  %v531_v57 = vadd.f32 %v523_v47, %v495_v32  ;;  %v532_v58 = vadd.f32 %v524_v48, %v496_v35  ;;  %v553_v59 = vmul.f32 %v849_v40, %v541_v49  ;;  %v863_v49 = vld [vmem:[%s1093_s7] ss:$0 sm:$0xff] }
  0x25   : > { %v533_v62 = vadd.f32 %v525_v51, %v497_v41  ;;  %v554_v63 = vmul.f32 %v849_v40, %v542_v52  ;;  %v564_v0 = vunpack.c.l.bf16 %v850_v45  ;;  %v565_v1 = vunpack.c.l.bf16 %v851_v50 }
  0x26   : > { %v555_v5 = vadd.f32 %v551_v53, %v530_v56  ;;  %v556_v6 = vadd.f32 %v552_v54, %v531_v57  ;;  %v557_v7 = vadd.f32 %v553_v59, %v532_v58  ;;  %v566_v8 = vunpack.c.l.bf16 %v852_v55 }
  0x27   : > { %v558_v10 = vadd.f32 %v554_v63, %v533_v62  ;;  %v567_v11 = vunpack.c.l.bf16 %v853_v60  ;;  %v576_v12 = vmul.f32 %v855_v61, %v564_v0  ;;  %v577_v13 = vmul.f32 %v855_v61, %v565_v1 }
  0x28   : > { %v578_v15 = vmul.f32 %v855_v61, %v566_v8  ;;  %v588_v16 = vunpack.c.l.bf16 %v856_v2  ;;  %v589_v17 = vunpack.c.l.bf16 %v857_v3  ;;  %v590_v18 = vunpack.c.l.bf16 %v858_v4 }
  0x29   : > { %v579_v19 = vmul.f32 %v855_v61, %v567_v11  ;;  %v580_v20 = vadd.f32 %v576_v12, %v555_v5  ;;  %v581_v21 = vadd.f32 %v577_v13, %v556_v6  ;;  %v591_v22 = vunpack.c.l.bf16 %v859_v9 }
  0x2a   : > { %v582_v23 = vadd.f32 %v578_v15, %v557_v7  ;;  %v600_v24 = vmul.f32 %v861_v14, %v588_v16  ;;  %v601_v25 = vmul.f32 %v861_v14, %v589_v17  ;;  %v602_v26 = vmul.f32 %v861_v14, %v590_v18 }
  0x2b   : > { %v583_v27 = vadd.f32 %v579_v19, %v558_v10  ;;  %v603_v28 = vmul.f32 %v861_v14, %v591_v22 }
  0x2c   : > { %v608_v29 = vrot.slane %v600_v24, 1  ;;  %v609_v30 = vrot.slane %v601_v25, 1  ;;  %v610_v31 = vrot.slane %v602_v26, 1 }
  0x2d   : > { %v611_v32 = vrot.slane %v603_v28, 1 }
  0x2e   : > { %v616_v34 = vadd.f32 %v608_v29, %v580_v20  ;;  %v617_v35 = vadd.f32 %v609_v30, %v581_v21  ;;  %v618_v36 = vadd.f32 %v610_v31, %v582_v23 }
  0x2f   : > { %v619_v37 = vadd.f32 %v611_v32, %v583_v27 }
  0x30   : > { %v627_v38 = vadd.f32 %v862_v33, %v616_v34  ;;  %v628_v39 = vadd.f32 %v862_v33, %v617_v35  ;;  %v629_v40 = vadd.f32 %v862_v33, %v618_v36 }
  0x31   : > { %v630_v41 = vadd.f32 %v862_v33, %v619_v37 }
  0x32   : > { %v631_v42 = vmax.f32 %v627_v38, 0.0  ;;  %v632_v43 = vmax.f32 %v628_v39, 0.0  ;;  %v633_v44 = vmax.f32 %v629_v40, 0.0 }
  0x33   : > { %v634_v45 = vmax.f32 %v630_v41, 0.0 }
  0x34   : > { %636 = vst.msk [vmem:[#allocation2] sm:$0xf] %vm635_vm1, %v631_v42  ;;  %637 = vst.msk [vmem:[#allocation2 + $0x4] sm:$0xf] %vm635_vm1, %v632_v43 }
  0x35   : > { %638 = vst.msk [vmem:[#allocation2 + $0x8] sm:$0xf] %vm635_vm1, %v633_v44  ;;  %639 = vst.msk [vmem:[#allocation2 + $0xc] sm:$0xf] %vm635_vm1, %v634_v45 }
  0x3b   : > { %v640_v46 = vld [vmem:[#allocation2] sm:$0xff] }
  0x3c   : > { %v641_v47 = vld [vmem:[#allocation2 + $0x8] sm:$0xff] }
  0x3d   : > { %v642_v48 = vpack.c.bf16 %v641_v47, %v640_v46 }
  0x3f   : > { %886 = vmatmul.mubr.msk.bf16.vlgmr.msra.gmra.mxu0 %vm674_vm2, %v642_v48 }
  0xff   : > { %v712_v50 = vpop.f32.mrf.mxu0 }
 0x100   : > { %v713_v51 = vadd.f32 %v863_v49, %v712_v50 }
 0x101   : > { %v887_v52 = vpop.f32.mrf.mxu0 }
 0x102   : > { %v719_v53 = vmax.f32 %v713_v51, 0.0 }
 0x103   : > { %v715_v54 = vpop.f32.mrf.mxu0 }
 0x104   : > { %v873_v55 = vpack.c.bf16 %v719_v53, %v719_v53  ;;  %v716_v56 = vadd.f32 %v863_v49, %v715_v54 }
 0x105   : > { %v888_v57 = vpop.f32.mrf.mxu0 }
 0x106   : > { %729 = vst.msk [vmem:[%s365_s11] sm:$0xf] %vm635_vm1, %v873_v55  ;;  %v720_v58 = vmax.f32 %v716_v56, 0.0 }
 0x108   : > { %v874_v59 = vpack.c.bf16 %v720_v58, %v720_v58 }
 0x10a   : > { %730 = vst.msk [vmem:[%s365_s11 + $0x4] sm:$0xf] %vm635_vm1, %v874_v59 }
 0x10b PF: > { %s18_s27 = sadd.s32 1, %s909_s27  }
 0x10c   : > { %p15_p4 = scmp.ge.s32.totalorder %s18_s27, 4  }
 0x10e   :  { %17 = sbr.rel (!%p15_p4) target bundleno = 1 (0x1), region = 101 }

// kernel: _lambda_.28
= control target key start
LH: loop header
LB: loop body
LE: loop exit
PB: predicated region body
PF: predicated region fallthrough
CT: control target
= control target key end

     0   :  { %vm60_vm0 = vcmask 392192   ;;  %vm136_vm1 = vcmask 388096   ;;  %s231_s1 = inlined_call_operand.vmem [shape: bf16[48,48], index: 1, kind: input, shape index: {}]   ;;  %s232_s0 = inlined_call_operand.vmem [shape: bf16[32,48], index: 0, kind: input, shape index: {}]   ;;  %s233_s2 = inlined_call_operand.vmem [shape: f32[1,48], index: 2, kind: input, shape index: {}]   ;;  %s234_s3 = inlined_call_operand.vmem [shape: bf16[32,48], index: 3, kind: output, shape index: {}]  }
   0x1   :  { %v176_v0 = vld [vmem:[%s231_s1 + $0x10] sm:$0xff]   ;;  %v177_v1 = vld [vmem:[%s231_s1 + $0x8] sm:$0xff]   ;;  %v179_v2 = vld [vmem:[%s232_s0] sm:$0xff]  }
   0x2   :  { %166 = vmatprep.subr.bf16.mxu0 %v176_v0  ;;  %v178_v3 = vld [vmem:[%s231_s1] sm:$0xff]   ;;  %172 = vmatprep.mubr.msk.bf16.mxu0 %vm60_vm0, %v179_v2  ;;  %v180_v4 = vld [vmem:[%s232_s0 + $0x8] sm:$0xff]  }
   0x3   :  { %167 = vmatpush3.bf16.msra.mxu0 %v176_v0  ;;  %v145_v5 = vld [vmem:[%s233_s2] ss:$0 sm:$0xff] }
   0x4   :  { %168 = vmatprep.subr.bf16.mxu0 %v177_v1 }
   0x7   :  { %169 = vmatpush3.bf16.msra.mxu0 %v177_v1 }
   0x8   :  { %170 = vmatprep.subr.bf16.mxu0 %v178_v3 }
   0xb   :  { %171 = vmatpush3.bf16.msra.mxu0 %v178_v3 }
   0xe   :  { %173 = vmatmul.mubr.msk.bf16.vlgmr.msra.gmra.mxu0 %vm60_vm0, %v180_v4 }
  0xce   :  { %v174_v6 = vpop.f32.mrf.mxu0 }
  0xcf   :  { %v110_v7 = vadd.f32 %v174_v6, %v145_v5 }
  0xd0   :  { %v101_v8 = vpop.f32.mrf.mxu0 }
  0xd1   :  { %v118_v9 = vmax.f32 %v110_v7, 0.0  ;;  %v102_v10 = vadd.f32 %v145_v5, %v101_v8 }
  0xd2   :  { %v175_v11 = vpop.f32.mrf.mxu0 }
  0xd3   :  { %v159_v12 = vpack.c.bf16 %v118_v9, %v118_v9  ;;  %v116_v13 = vmax.f32 %v102_v10, 0.0  ;;  %v113_v14 = vadd.f32 %v175_v11, %v145_v5 }
  0xd4   :  { %v104_v15 = vpop.f32.mrf.mxu0 }
  0xd5   :  { %139 = vst.msk [vmem:[%s234_s3 + $0x8] sm:$0xf] %vm136_vm1, %v159_v12  ;;  %v157_v16 = vpack.c.bf16 %v116_v13, %v116_v13  ;;  %v119_v17 = vmax.f32 %v113_v14, 0.0  ;;  %v105_v18 = vadd.f32 %v145_v5, %v104_v15 }
  0xd7   :  { %137 = vst.msk [vmem:[%s234_s3] sm:$0xf] %vm136_vm1, %v157_v16  ;;  %v160_v19 = vpack.c.bf16 %v119_v17, %v119_v17  ;;  %v117_v20 = vmax.f32 %v105_v18, 0.0 }
  0xd9   :  { %140 = vst.msk [vmem:[%s234_s3 + $0xc] sm:$0xf] %vm136_vm1, %v160_v19  ;;  %v158_v21 = vpack.c.bf16 %v117_v20, %v117_v20 }
  0xdb   :  { %138 = vst.msk [vmem:[%s234_s3 + $0x4] sm:$0xf] %vm136_vm1, %v158_v21 }

// kernel: _lambda_.29
= control target key start
LH: loop header
LB: loop body
LE: loop exit
PB: predicated region body
PF: predicated region fallthrough
CT: control target
= control target key end

     0   :  { %s811_s18 = smov 0   ;;  %s918_s0 = inlined_call_operand.vmem [shape: bf16[2,6,6,48], index: 0, kind: input, shape index: {}]   ;;  %s919_s1 = inlined_call_operand.vmem [shape: f32[9,1,1,48], index: 1, kind: input, shape index: {}]   ;;  %s920_s2 = inlined_call_operand.vmem [shape: f32[1,1,48], index: 2, kind: input, shape index: {}]   ;;  %s921_s3 = inlined_call_operand.vmem [shape: bf16[48,48], index: 3, kind: input, shape index: {}]   ;;  %s922_s4 = inlined_call_operand.vmem [shape: f32[1,48], index: 4, kind: input, shape index: {}]   ;;  %s923_s5 = inlined_call_operand.vmem [shape: bf16[2,16,48], index: 5, kind: output, shape index: {}]  }
   0x1 LB: > { %s681_s19 = sadd.s32 4294967295, %s777_s18   ;;  %p685_p0 = scmp.ge.s32.totalorder %s777_s18, 1  ;;  %s777_s18 = sphi %s811_s18, %s15_s18  }
   0x2   : > { %p187_p1 = scmp.lt.s32.totalorder %s777_s18, 3 }
   0x4   : > { %p188_p2 = pnand %p685_p0, %p187_p1 }
   0x5   : > { %p215_p3 = scmp.lt.s32.totalorder (!%p188_p2), %s681_s19, 1 }
   0x6   : > { %191 = sbr.rel (%p188_p2) target bundleno = 269 (0x10d), region = 40 }
   0xb   : > { %v768_v0 = vld [vmem:[%s921_s3 + $0x10] sm:$0xff]   ;;  %v779_v1 = vmov 0.0   ;;  %v769_v2 = vld [vmem:[%s921_s3 + $0x8] sm:$0xff]   ;;  %vm780_vm0 = vmmov 0   ;;  %s925_s19 = smov (!%p215_p3, %s681_s19), 1  ;;  %v770_v3 = vld [vmem:[%s921_s3] sm:$0xff]  }
   0xc   : > { %747 = vmatprep.subr.bf16.mxu0 %v779_v1  ;;  %753 = vmatprep.mubr.msk.bf16.mxu0 %vm780_vm0, %v779_v1  ;;  %s757_s26 = smul.u32 24, %s925_s19  ;;  %v689_v4 = vld [vmem:[%s919_s1] ss:$0 sm:$0xff]  ;;  %v691_v5 = vld [vmem:[%s919_s1 + $0x1] ss:$0 sm:$0xff]  ;;  %vm530_vm1 = vcmask 388096  }
   0xd   : > { %748 = vmatpush3.bf16.msra.mxu0 %v768_v0  ;;  %v693_v32 = vld [vmem:[%s919_s1 + $0x2] ss:$0 sm:$0xff]  ;;  %v699_v47 = vld [vmem:[%s919_s1 + $0x3] ss:$0 sm:$0xff]  ;;  %vm569_vm2 = vcmask 392192  }
   0xe   : > { %749 = vmatprep.subr.bf16.mxu0 %v779_v1  ;;  %s834_s29 = scalar_lea.vmem %s918_s0, %s757_s26 }
   0xf   : > { %v226_v6 = vld [vmem:[%s834_s29] sm:$0x3]  ;;  %v227_v7 = vld [vmem:[%s834_s29 + $0x4] sm:$0x3]  ;;  %v228_v8 = vld [vmem:[%s834_s29 + $0x8] sm:$0x3] }
  0x10   : > { %v229_v9 = vld [vmem:[%s834_s29 + $0xc] sm:$0x3]  ;;  %v230_v10 = vunpack.c.l.bf16 %v226_v6  ;;  %v231_v11 = vunpack.c.l.bf16 %v227_v7  ;;  %v232_v12 = vunpack.c.l.bf16 %v228_v8  ;;  %v249_v13 = vld [vmem:[%s834_s29] sm:$0x7]  ;;  %v250_v14 = vld [vmem:[%s834_s29 + $0x4] sm:$0x7] }
  0x11   : > { %750 = vmatpush3.bf16.msra.mxu0 %v769_v2  ;;  %v233_v15 = vunpack.c.l.bf16 %v229_v9  ;;  %v251_v16 = vld [vmem:[%s834_s29 + $0x8] sm:$0x7]  ;;  %v252_v17 = vld [vmem:[%s834_s29 + $0xc] sm:$0x7]  ;;  %v253_v18 = vunpack.c.l.bf16 %v249_v13  ;;  %v254_v19 = vunpack.c.l.bf16 %v250_v14  ;;  %v285_v20 = vld [vmem:[%s834_s29] sm:$0x6] }
  0x12   : > { %751 = vmatprep.subr.bf16.mxu0 %v779_v1  ;;  %v241_v21 = vmul.f32 %v689_v4, %v230_v10  ;;  %v242_v22 = vmul.f32 %v689_v4, %v231_v11  ;;  %v243_v23 = vmul.f32 %v689_v4, %v232_v12  ;;  %v255_v24 = vunpack.c.l.bf16 %v251_v16  ;;  %v286_v25 = vld [vmem:[%s834_s29 + $0x4] sm:$0x6]  ;;  %v287_v26 = vld [vmem:[%s834_s29 + $0x8] sm:$0x6]  ;;  %v288_v27 = vld [vmem:[%s834_s29 + $0xc] sm:$0x6] }
  0x13   : > { %v244_v28 = vmul.f32 %v689_v4, %v233_v15  ;;  %v256_v29 = vunpack.c.l.bf16 %v252_v17  ;;  %v265_v30 = vmul.f32 %v691_v5, %v253_v18  ;;  %v266_v31 = vmul.f32 %v691_v5, %v254_v19  ;;  %v694_v45 = vld [vmem:[%s834_s29 + $0x4] sm:$0x3]  ;;  %v695_v46 = vld [vmem:[%s834_s29 + $0x8] sm:$0x3]  ;;  %v696_v52 = vld [vmem:[%s834_s29 + $0xc] sm:$0x3] }
  0x14   : > { %v267_v33 = vmul.f32 %v691_v5, %v255_v24  ;;  %v289_v34 = vunpack.c.l.bf16 %v285_v20  ;;  %v290_v35 = vunpack.c.l.bf16 %v286_v25  ;;  %v291_v36 = vunpack.c.l.bf16 %v287_v26  ;;  %v697_v53 = vld [vmem:[%s834_s29 + $0x10] sm:$0x3]  ;;  %v700_v58 = vld [vmem:[%s834_s29 + $0x4] sm:$0x7]  ;;  %v701_v63 = vld [vmem:[%s834_s29 + $0x8] sm:$0x7] }
  0x15   : > { %752 = vmatpush3.bf16.msra.mxu0 %v770_v3  ;;  %v268_v37 = vmul.f32 %v691_v5, %v256_v29  ;;  %v273_v38 = vrot.slane %v265_v30, 1  ;;  %v274_v39 = vrot.slane %v266_v31, 1  ;;  %v292_v40 = vunpack.c.l.bf16 %v288_v27  ;;  %v702_v0 = vld [vmem:[%s834_s29 + $0xc] sm:$0x7]  ;;  %v703_v5 = vld [vmem:[%s834_s29 + $0x10] sm:$0x7] }
  0x16   : > { %v275_v41 = vrot.slane %v267_v33, 1  ;;  %v301_v42 = vmul.f32 %v693_v32, %v289_v34  ;;  %v302_v43 = vmul.f32 %v693_v32, %v290_v35  ;;  %v303_v44 = vmul.f32 %v693_v32, %v291_v36  ;;  %v705_v10 = vld [vmem:[%s919_s1 + $0x4] ss:$0 sm:$0xff]  ;;  %v706_v15 = vld [vmem:[%s834_s29 + $0x4] sm:$0x6] }
  0x17   : > { %v276_v48 = vrot.slane %v268_v37, 1  ;;  %v281_v49 = vadd.f32 %v273_v38, %v241_v21  ;;  %v282_v50 = vadd.f32 %v274_v39, %v242_v22  ;;  %v304_v51 = vmul.f32 %v693_v32, %v292_v40  ;;  %v707_v16 = vld [vmem:[%s834_s29 + $0x8] sm:$0x6]  ;;  %v708_v21 = vld [vmem:[%s834_s29 + $0xc] sm:$0x6] }
  0x18   : > { %v283_v54 = vadd.f32 %v275_v41, %v243_v23  ;;  %v309_v55 = vrot.slane %v301_v42, 2  ;;  %v310_v56 = vrot.slane %v302_v43, 2  ;;  %v311_v57 = vrot.slane %v303_v44, 2  ;;  %v709_v26 = vld [vmem:[%s834_s29 + $0x10] sm:$0x6] }
  0x19   : > { %v284_v59 = vadd.f32 %v276_v48, %v244_v28  ;;  %v312_v60 = vrot.slane %v304_v51, 2  ;;  %v326_v61 = vunpack.c.l.bf16 %v694_v45  ;;  %v327_v62 = vunpack.c.l.bf16 %v695_v46  ;;  %v711_v27 = vld [vmem:[%s919_s1 + $0x5] ss:$0 sm:$0xff]  ;;  %v712_v36 = vld [vmem:[%s834_s29 + $0x8] sm:$0x3] }
  0x1a   : > { %v317_v1 = vadd.f32 %v309_v55, %v281_v49  ;;  %v318_v2 = vadd.f32 %v310_v56, %v282_v50  ;;  %v319_v3 = vadd.f32 %v311_v57, %v283_v54  ;;  %v328_v4 = vunpack.c.l.bf16 %v696_v52  ;;  %v713_v41 = vld [vmem:[%s834_s29 + $0xc] sm:$0x3]  ;;  %v714_v42 = vld [vmem:[%s834_s29 + $0x10] sm:$0x3]  ;;  %v717_v52 = vld [vmem:[%s919_s1 + $0x6] ss:$0 sm:$0xff] }
  0x1b   : > { %v320_v6 = vadd.f32 %v312_v60, %v284_v59  ;;  %v329_v7 = vunpack.c.l.bf16 %v697_v53  ;;  %v338_v8 = vmul.f32 %v699_v47, %v326_v61  ;;  %v339_v9 = vmul.f32 %v699_v47, %v327_v62  ;;  %v718_v57 = vld [vmem:[%s834_s29 + $0x8] sm:$0x7] }
  0x1c   : > { %v340_v11 = vmul.f32 %v699_v47, %v328_v4  ;;  %v350_v12 = vunpack.c.l.bf16 %v700_v58  ;;  %v351_v13 = vunpack.c.l.bf16 %v701_v63  ;;  %v352_v14 = vunpack.c.l.bf16 %v702_v0  ;;  %v719_v58 = vld [vmem:[%s834_s29 + $0xc] sm:$0x7]  ;;  %v720_v63 = vld [vmem:[%s834_s29 + $0x10] sm:$0x7]  ;;  %v721_v4 = vld [vmem:[%s834_s29 + $0x14] sm:$0x7] }
  0x1d   : > { %v341_v17 = vmul.f32 %v699_v47, %v329_v7  ;;  %v342_v18 = vadd.f32 %v338_v8, %v317_v1  ;;  %v343_v19 = vadd.f32 %v339_v9, %v318_v2  ;;  %v353_v20 = vunpack.c.l.bf16 %v703_v5  ;;  %v715_v47 = vld [vmem:[%s834_s29 + $0x14] sm:$0x3]  ;;  %v723_v5 = vld [vmem:[%s919_s1 + $0x7] ss:$0 sm:$0xff] }
  0x1e   : > { %v344_v22 = vadd.f32 %v340_v11, %v319_v3  ;;  %v362_v23 = vmul.f32 %v705_v10, %v350_v12  ;;  %v363_v24 = vmul.f32 %v705_v10, %v351_v13  ;;  %v364_v25 = vmul.f32 %v705_v10, %v352_v14  ;;  %v725_v11 = vld [vmem:[%s834_s29 + $0xc] sm:$0x6]  ;;  %v726_v12 = vld [vmem:[%s834_s29 + $0x10] sm:$0x6] }
  0x1f   : > { %v345_v28 = vadd.f32 %v341_v17, %v320_v6  ;;  %v365_v29 = vmul.f32 %v705_v10, %v353_v20  ;;  %v386_v30 = vunpack.c.l.bf16 %v706_v15  ;;  %v387_v31 = vunpack.c.l.bf16 %v707_v16  ;;  %v724_v10 = vld [vmem:[%s834_s29 + $0x8] sm:$0x6]  ;;  %v727_v17 = vld [vmem:[%s834_s29 + $0x14] sm:$0x6]  ;;  %s740_s29 = sshll.u32 %s925_s19, 3 }
  0x20   : > { %v370_v32 = vrot.slane %v362_v23, 1  ;;  %v371_v33 = vrot.slane %v363_v24, 1  ;;  %v372_v34 = vrot.slane %v364_v25, 1  ;;  %v388_v35 = vunpack.c.l.bf16 %v708_v21  ;;  %s224_s7 = scalar_lea.vmem %s923_s5, %s740_s29 }
  0x21   : > { %v373_v37 = vrot.slane %v365_v29, 1  ;;  %v389_v38 = vunpack.c.l.bf16 %v709_v26  ;;  %v398_v39 = vmul.f32 %v711_v27, %v386_v30  ;;  %v399_v40 = vmul.f32 %v711_v27, %v387_v31 }
  0x22   : > { %v378_v43 = vadd.f32 %v370_v32, %v342_v18  ;;  %v379_v44 = vadd.f32 %v371_v33, %v343_v19  ;;  %v380_v45 = vadd.f32 %v372_v34, %v344_v22  ;;  %v400_v46 = vmul.f32 %v711_v27, %v388_v35  ;;  %v729_v22 = vld [vmem:[%s919_s1 + $0x8] ss:$0 sm:$0xff] }
  0x23   : > { %v381_v48 = vadd.f32 %v373_v37, %v345_v28  ;;  %v401_v49 = vmul.f32 %v711_v27, %v389_v38  ;;  %v406_v50 = vrot.slane %v398_v39, 2  ;;  %v407_v51 = vrot.slane %v399_v40, 2 }
  0x24   : > { %v408_v53 = vrot.slane %v400_v46, 2  ;;  %v423_v54 = vunpack.c.l.bf16 %v712_v36  ;;  %v424_v55 = vunpack.c.l.bf16 %v713_v41  ;;  %v425_v56 = vunpack.c.l.bf16 %v714_v42 }
  0x25   : > { %v409_v59 = vrot.slane %v401_v49, 2  ;;  %v414_v60 = vadd.f32 %v406_v50, %v378_v43  ;;  %v415_v61 = vadd.f32 %v407_v51, %v379_v44  ;;  %v426_v62 = vunpack.c.l.bf16 %v715_v47 }
  0x26   : > { %v416_v0 = vadd.f32 %v408_v53, %v380_v45  ;;  %v435_v1 = vmul.f32 %v717_v52, %v423_v54  ;;  %v436_v2 = vmul.f32 %v717_v52, %v424_v55  ;;  %v437_v3 = vmul.f32 %v717_v52, %v425_v56  ;;  %v730_v45 = vld [vmem:[%s920_s2] ss:$0 sm:$0xff] }
  0x27   : > { %v417_v6 = vadd.f32 %v409_v59, %v381_v48  ;;  %v438_v7 = vmul.f32 %v717_v52, %v426_v62  ;;  %v447_v8 = vunpack.c.l.bf16 %v718_v57  ;;  %v448_v9 = vunpack.c.l.bf16 %v719_v58 }
  0x28   : > { %v439_v13 = vadd.f32 %v435_v1, %v414_v60  ;;  %v440_v14 = vadd.f32 %v436_v2, %v415_v61  ;;  %v441_v15 = vadd.f32 %v437_v3, %v416_v0  ;;  %v449_v16 = vunpack.c.l.bf16 %v720_v63  ;;  %v731_v61 = vld [vmem:[%s922_s4] ss:$0 sm:$0xff] }
  0x29   : > { %v442_v18 = vadd.f32 %v438_v7, %v417_v6  ;;  %v450_v19 = vunpack.c.l.bf16 %v721_v4  ;;  %v459_v20 = vmul.f32 %v723_v5, %v447_v8  ;;  %v460_v21 = vmul.f32 %v723_v5, %v448_v9 }
  0x2a   : > { %v461_v23 = vmul.f32 %v723_v5, %v449_v16  ;;  %v483_v24 = vunpack.c.l.bf16 %v724_v10  ;;  %v484_v25 = vunpack.c.l.bf16 %v725_v11  ;;  %v485_v26 = vunpack.c.l.bf16 %v726_v12 }
  0x2b   : > { %v462_v27 = vmul.f32 %v723_v5, %v450_v19  ;;  %v467_v28 = vrot.slane %v459_v20, 1  ;;  %v468_v29 = vrot.slane %v460_v21, 1  ;;  %v486_v30 = vunpack.c.l.bf16 %v727_v17 }
  0x2c   : > { %v469_v31 = vrot.slane %v461_v23, 1  ;;  %v495_v32 = vmul.f32 %v729_v22, %v483_v24  ;;  %v496_v33 = vmul.f32 %v729_v22, %v484_v25  ;;  %v497_v34 = vmul.f32 %v729_v22, %v485_v26 }
  0x2d   : > { %v470_v35 = vrot.slane %v462_v27, 1  ;;  %v475_v36 = vadd.f32 %v467_v28, %v439_v13  ;;  %v476_v37 = vadd.f32 %v468_v29, %v440_v14  ;;  %v498_v38 = vmul.f32 %v729_v22, %v486_v30 }
  0x2e   : > { %v477_v39 = vadd.f32 %v469_v31, %v441_v15  ;;  %v503_v40 = vrot.slane %v495_v32, 2  ;;  %v504_v41 = vrot.slane %v496_v33, 2  ;;  %v505_v42 = vrot.slane %v497_v34, 2 }
  0x2f   : > { %v478_v43 = vadd.f32 %v470_v35, %v442_v18  ;;  %v506_v44 = vrot.slane %v498_v38, 2 }
  0x30   : > { %v511_v46 = vadd.f32 %v503_v40, %v475_v36  ;;  %v512_v47 = vadd.f32 %v504_v41, %v476_v37  ;;  %v513_v48 = vadd.f32 %v505_v42, %v477_v39 }
  0x31   : > { %v514_v49 = vadd.f32 %v506_v44, %v478_v43 }
  0x32   : > { %v522_v50 = vadd.f32 %v730_v45, %v511_v46  ;;  %v523_v51 = vadd.f32 %v730_v45, %v512_v47  ;;  %v524_v52 = vadd.f32 %v730_v45, %v513_v48 }
  0x33   : > { %v525_v53 = vadd.f32 %v730_v45, %v514_v49 }
  0x34   : > { %v526_v54 = vmax.f32 %v522_v50, 0.0  ;;  %v527_v55 = vmax.f32 %v523_v51, 0.0  ;;  %v528_v56 = vmax.f32 %v524_v52, 0.0 }
  0x35   : > { %v529_v57 = vmax.f32 %v525_v53, 0.0 }
  0x36   : > { %531 = vst.msk [vmem:[#allocation2] sm:$0xf] %vm530_vm1, %v526_v54  ;;  %532 = vst.msk [vmem:[#allocation2 + $0x4] sm:$0xf] %vm530_vm1, %v527_v55 }
  0x37   : > { %533 = vst.msk [vmem:[#allocation2 + $0x8] sm:$0xf] %vm530_vm1, %v528_v56  ;;  %534 = vst.msk [vmem:[#allocation2 + $0xc] sm:$0xf] %vm530_vm1, %v529_v57 }
  0x3d   : > { %v535_v58 = vld [vmem:[#allocation2] sm:$0xff] }
  0x3e   : > { %v536_v59 = vld [vmem:[#allocation2 + $0x8] sm:$0xff] }
  0x3f   : > { %v537_v60 = vpack.c.bf16 %v536_v59, %v535_v58 }
  0x41   : > { %754 = vmatmul.mubr.msk.bf16.vlgmr.msra.gmra.mxu0 %vm569_vm2, %v537_v60 }
 0x101   : > { %v607_v62 = vpop.f32.mrf.mxu0 }
 0x102   : > { %v608_v63 = vadd.f32 %v731_v61, %v607_v62 }
 0x103   : > { %v755_v0 = vpop.f32.mrf.mxu0 }
 0x104   : > { %v614_v1 = vmax.f32 %v608_v63, 0.0 }
 0x105   : > { %v610_v2 = vpop.f32.mrf.mxu0 }
 0x106   : > { %v741_v3 = vpack.c.bf16 %v614_v1, %v614_v1  ;;  %v611_v4 = vadd.f32 %v731_v61, %v610_v2 }
 0x107   : > { %v756_v5 = vpop.f32.mrf.mxu0 }
 0x108   : > { %624 = vst.msk [vmem:[%s224_s7] sm:$0xf] %vm530_vm1, %v741_v3  ;;  %v615_v6 = vmax.f32 %v611_v4, 0.0 }
 0x10a   : > { %v742_v7 = vpack.c.bf16 %v615_v6, %v615_v6 }
 0x10c   : > { %625 = vst.msk [vmem:[%s224_s7 + $0x4] sm:$0xf] %vm530_vm1, %v742_v7 }
 0x10d PF: > { %s15_s18 = sadd.s32 1, %s777_s18  }
 0x10e   : > { %p12_p4 = scmp.ge.s32.totalorder %s15_s18, 4  }
 0x110   :  { %14 = sbr.rel (!%p12_p4) target bundleno = 1 (0x1), region = 80 }

// kernel: _lambda_.30
= control target key start
LH: loop header
LB: loop body
LE: loop exit
PB: predicated region body
PF: predicated region fallthrough
CT: control target
= control target key end

     0   :  { %vm84_vm0 = vcmask 785408   ;;  %vm160_vm1 = vcmask 781312   ;;  %s281_s1 = inlined_call_operand.vmem [shape: bf16[96,96], index: 1, kind: input, shape index: {}]   ;;  %s282_s0 = inlined_call_operand.vmem [shape: bf16[32,96], index: 0, kind: input, shape index: {}]   ;;  %s283_s2 = inlined_call_operand.vmem [shape: f32[1,96], index: 2, kind: input, shape index: {}]   ;;  %s284_s3 = inlined_call_operand.vmem [shape: bf16[32,96], index: 3, kind: output, shape index: {}]  }
   0x1   :  { %v212_v0 = vld [vmem:[%s281_s1 + $0x28] sm:$0xff]   ;;  %v213_v1 = vld [vmem:[%s281_s1 + $0x20] sm:$0xff]   ;;  %v214_v2 = vld [vmem:[%s281_s1 + $0x18] sm:$0xff]  }
   0x2   :  { %196 = vmatprep.subr.bf16.mxu0 %v212_v0  ;;  %v218_v3 = vld [vmem:[%s282_s0] sm:$0xff]   ;;  %v215_v4 = vld [vmem:[%s281_s1 + $0x10] sm:$0xff]   ;;  %v216_v5 = vld [vmem:[%s281_s1 + $0x8] sm:$0xff]  }
   0x3   :  { %197 = vmatpush3.bf16.msra.mxu0 %v212_v0  ;;  %208 = vmatprep.mubr.msk.bf16.mxu0 %vm84_vm0, %v218_v3  ;;  %v217_v6 = vld [vmem:[%s281_s1] sm:$0xff]   ;;  %v219_v7 = vld [vmem:[%s282_s0 + $0x8] sm:$0xff]  }
   0x4   :  { %198 = vmatprep.subr.bf16.mxu0 %v213_v1  ;;  %v169_v8 = vld [vmem:[%s283_s2] ss:$0 sm:$0xff] }
   0x7   :  { %199 = vmatpush3.bf16.msra.mxu0 %v213_v1 }
   0x8   :  { %200 = vmatprep.subr.bf16.mxu0 %v214_v2 }
   0xb   :  { %201 = vmatpush3.bf16.msra.mxu0 %v214_v2 }
   0xc   :  { %202 = vmatprep.subr.bf16.mxu0 %v215_v4 }
   0xf   :  { %203 = vmatpush3.bf16.msra.mxu0 %v215_v4 }
  0x10   :  { %204 = vmatprep.subr.bf16.mxu0 %v216_v5 }
  0x13   :  { %205 = vmatpush3.bf16.msra.mxu0 %v216_v5 }
  0x14   :  { %206 = vmatprep.subr.bf16.mxu0 %v217_v6 }
  0x17   :  { %207 = vmatpush3.bf16.msra.mxu0 %v217_v6 }
  0x1a   :  { %209 = vmatmul.mubr.msk.bf16.vlgmr.msra.gmra.mxu0 %vm84_vm0, %v219_v7 }
  0xda   :  { %v210_v9 = vpop.f32.mrf.mxu0 }
  0xdb   :  { %v134_v10 = vadd.f32 %v210_v9, %v169_v8 }
  0xdc   :  { %v125_v11 = vpop.f32.mrf.mxu0 }
  0xdd   :  { %v142_v12 = vmax.f32 %v134_v10, 0.0  ;;  %v126_v13 = vadd.f32 %v169_v8, %v125_v11 }
  0xde   :  { %v211_v14 = vpop.f32.mrf.mxu0 }
  0xdf   :  { %v186_v15 = vpack.c.bf16 %v142_v12, %v142_v12  ;;  %v140_v16 = vmax.f32 %v126_v13, 0.0  ;;  %v137_v17 = vadd.f32 %v211_v14, %v169_v8 }
  0xe0   :  { %v128_v18 = vpop.f32.mrf.mxu0 }
  0xe1   :  { %163 = vst.msk [vmem:[%s284_s3 + $0x8] sm:$0xf] %vm160_vm1, %v186_v15  ;;  %v184_v19 = vpack.c.bf16 %v140_v16, %v140_v16  ;;  %v143_v20 = vmax.f32 %v137_v17, 0.0  ;;  %v129_v21 = vadd.f32 %v169_v8, %v128_v18 }
  0xe3   :  { %161 = vst.msk [vmem:[%s284_s3] sm:$0xf] %vm160_vm1, %v184_v19  ;;  %v187_v22 = vpack.c.bf16 %v143_v20, %v143_v20  ;;  %v141_v23 = vmax.f32 %v129_v21, 0.0 }
  0xe5   :  { %164 = vst.msk [vmem:[%s284_s3 + $0xc] sm:$0xf] %vm160_vm1, %v187_v22  ;;  %v185_v24 = vpack.c.bf16 %v141_v23, %v141_v23 }
  0xe7   :  { %162 = vst.msk [vmem:[%s284_s3 + $0x4] sm:$0xf] %vm160_vm1, %v185_v24 }

// kernel: _lambda_.31
= control target key start
LH: loop header
LB: loop body
LE: loop exit
PB: predicated region body
PF: predicated region fallthrough
CT: control target
= control target key end

     0   :  { %s886_s27 = smov 0   ;;  %s999_s0 = inlined_call_operand.vmem [shape: bf16[2,3,3,96], index: 0, kind: input, shape index: {}]   ;;  %s1000_s1 = inlined_call_operand.vmem [shape: bf16[2,3,3,96], index: 1, kind: input, shape index: {}]   ;;  %s1001_s2 = inlined_call_operand.vmem [shape: bf16[2,3,3,96], index: 2, kind: input, shape index: {}]   ;;  %s1002_s3 = inlined_call_operand.vmem [shape: bf16[2,3,3,96], index: 3, kind: input, shape index: {}]   ;;  %s1003_s4 = inlined_call_operand.vmem [shape: f32[9,1,1,96], index: 4, kind: input, shape index: {}]   ;;  %s1004_s5 = inlined_call_operand.vmem [shape: f32[1,1,96], index: 5, kind: input, shape index: {}]   ;;  %s1005_s6 = inlined_call_operand.vmem [shape: bf16[96,96], index: 6, kind: input, shape index: {}]   ;;  %s1006_s7 = inlined_call_operand.vmem [shape: f32[1,96], index: 7, kind: input, shape index: {}]   ;;  %s1007_s8 = inlined_call_operand.vmem [shape: bf16[2,4,96], index: 8, kind: output, shape index: {}]  }
   0x1 LB: > { %s741_s28 = sadd.s32 4294967295, %s837_s27   ;;  %p745_p0 = scmp.ge.s32.totalorder %s837_s27, 1  ;;  %s837_s27 = sphi %s886_s27, %s18_s27  }
   0x2   : > { %p292_p1 = scmp.lt.s32.totalorder %s837_s27, 3 }
   0x4   : > { %p293_p2 = pnand %p745_p0, %p292_p1 }
   0x5   : > { %p340_p3 = scmp.lt.s32.totalorder (!%p293_p2), %s741_s28, 1 }
   0x6   : > { %296 = sbr.rel (%p293_p2) target bundleno = 252 (0xfc), region = 52 }
   0xb   : > { %v825_v0 = vld [vmem:[%s1005_s6 + $0x28] sm:$0xff]   ;;  %v839_v1 = vmov 0.0   ;;  %v826_v2 = vld [vmem:[%s1005_s6 + $0x20] sm:$0xff]   ;;  %vm840_vm0 = vmmov 0   ;;  %s1009_s28 = smov (!%p340_p3, %s741_s28), 1  ;;  %v827_v3 = vld [vmem:[%s1005_s6 + $0x18] sm:$0xff]  }
   0xc   : > { %798 = vmatprep.subr.bf16.mxu0 %v839_v1  ;;  %810 = vmatprep.mubr.msk.bf16.mxu0 %vm840_vm0, %v839_v1  ;;  %s814_s13 = smul.u32 6, %s1009_s28  ;;  %v828_v4 = vld [vmem:[%s1005_s6 + $0x10] sm:$0xff]   ;;  %v751_v5 = vld [vmem:[%s1003_s4] ss:$0 sm:$0xff]  ;;  %v753_v6 = vld [vmem:[%s1003_s4 + $0x1] ss:$0 sm:$0xff] }
   0xd   : > { %799 = vmatpush3.bf16.msra.mxu0 %v825_v0  ;;  %v755_v7 = vld [vmem:[%s1003_s4 + $0x2] ss:$0 sm:$0xff]  ;;  %v759_v11 = vld [vmem:[%s1003_s4 + $0x3] ss:$0 sm:$0xff]  ;;  %v829_v24 = vld [vmem:[%s1005_s6 + $0x8] sm:$0xff]   ;;  %vm545_vm1 = vcmask 779264  }
   0xe   : > { %800 = vmatprep.subr.bf16.mxu0 %v839_v1  ;;  %s916_s18 = scalar_lea.vmem %s999_s0, %s814_s13  ;;  %s921_s21 = scalar_lea.vmem %s1000_s1, %s814_s13  ;;  %v761_v34 = vld [vmem:[%s1003_s4 + $0x4] ss:$0 sm:$0xff]  ;;  %v763_v41 = vld [vmem:[%s1003_s4 + $0x5] ss:$0 sm:$0xff]  ;;  %v769_v58 = vld [vmem:[%s1003_s4 + $0x6] ss:$0 sm:$0xff] }
   0xf   : > { %s935_s10 = scalar_lea.vmem %s1001_s2, %s814_s13  ;;  %s359_s14 = scalar_lea.vmem %s1002_s3, %s814_s13  ;;  %v365_v8 = vld [vmem:[%s916_s18] sm:$0x1]  ;;  %v366_v9 = vld [vmem:[%s916_s18 + $0x2] sm:$0x1]  ;;  %v767_v43 = vld [vmem:[%s916_s18 + $0x4] sm:$0x1] }
  0x10   : > { %v380_v10 = vld [vmem:[%s921_s21] sm:$0x1]  ;;  %v367_v12 = vunpack.c.l.bf16 %v365_v8  ;;  %v368_v13 = vunpack.c.l.bf16 %v366_v9  ;;  %v381_v14 = vld [vmem:[%s921_s21 + $0x2] sm:$0x1]  ;;  %v771_v49 = vld [vmem:[%s921_s21 + $0x4] sm:$0x1]  ;;  %v480_v57 = vunpack.c.l.bf16 %v767_v43 }
  0x11   : > { %801 = vmatpush3.bf16.msra.mxu0 %v826_v2  ;;  %v382_v15 = vunpack.c.l.bf16 %v380_v10  ;;  %v396_v16 = vld [vmem:[%s916_s18] sm:$0x3]  ;;  %v397_v17 = vld [vmem:[%s916_s18 + $0x2] sm:$0x3]  ;;  %v383_v18 = vunpack.c.l.bf16 %v381_v14  ;;  %v497_v63 = vunpack.c.l.bf16 %v771_v49  ;;  %v775_v2 = vld [vmem:[%s916_s18 + $0x4] sm:$0x3] }
  0x12   : > { %802 = vmatprep.subr.bf16.mxu0 %v839_v1  ;;  %v398_v19 = vunpack.c.l.bf16 %v396_v16  ;;  %v399_v20 = vunpack.c.l.bf16 %v397_v17  ;;  %v420_v21 = vld [vmem:[%s935_s10] sm:$0x1]  ;;  %v421_v22 = vld [vmem:[%s935_s10 + $0x2] sm:$0x1]  ;;  %v376_v25 = vmul.f32 %v751_v5, %v367_v12  ;;  %v377_v26 = vmul.f32 %v751_v5, %v368_v13  ;;  %v773_v5 = vld [vmem:[%s1003_s4 + $0x7] ss:$0 sm:$0xff] }
  0x13   : > { %v436_v23 = vld [vmem:[%s359_s14] sm:$0x1]  ;;  %v392_v27 = vmul.f32 %v753_v6, %v382_v15  ;;  %v422_v28 = vunpack.c.l.bf16 %v420_v21  ;;  %v437_v29 = vld [vmem:[%s359_s14 + $0x2] sm:$0x1]  ;;  %v393_v30 = vmul.f32 %v753_v6, %v383_v18  ;;  %v423_v33 = vunpack.c.l.bf16 %v421_v22  ;;  %v777_v10 = vld [vmem:[%s1003_s4 + $0x8] ss:$0 sm:$0xff] }
  0x14   : > { %v408_v31 = vmul.f32 %v755_v7, %v398_v19  ;;  %v409_v32 = vmul.f32 %v755_v7, %v399_v20  ;;  %v452_v35 = vld [vmem:[%s935_s10] sm:$0x3]  ;;  %v453_v36 = vld [vmem:[%s935_s10 + $0x2] sm:$0x3]  ;;  %v438_v39 = vunpack.c.l.bf16 %v436_v23  ;;  %v439_v40 = vunpack.c.l.bf16 %v437_v29  ;;  %s750_s15 = sshll.u32 %s1009_s28, 1 }
  0x15   : > { %803 = vmatpush3.bf16.msra.mxu0 %v827_v3  ;;  %v394_v37 = vadd.f32 %v392_v27, %v376_v25  ;;  %v432_v38 = vmul.f32 %v759_v11, %v422_v28  ;;  %v766_v42 = vld [vmem:[%s916_s18 + $0x2] sm:$0x1]  ;;  %v395_v44 = vadd.f32 %v393_v30, %v377_v26  ;;  %v433_v47 = vmul.f32 %v759_v11, %v423_v33  ;;  %v780_v26 = vld [vmem:[%s1004_s5] ss:$0 sm:$0xff]  ;;  %s363_s17 = scalar_lea.vmem %s1007_s8, %s750_s15 }
  0x16   : > { %804 = vmatprep.subr.bf16.mxu0 %v839_v1  ;;  %v756_v45 = vrot.slane %v408_v31, 9  ;;  %v757_v46 = vrot.slane %v409_v32, 9  ;;  %v770_v48 = vld [vmem:[%s921_s21 + $0x2] sm:$0x1]  ;;  %v448_v50 = vmul.f32 %v761_v34, %v438_v39  ;;  %v449_v51 = vmul.f32 %v761_v34, %v439_v40 }
  0x17   : > { %v454_v52 = vunpack.c.l.bf16 %v452_v35  ;;  %v455_v53 = vunpack.c.l.bf16 %v453_v36  ;;  %v479_v56 = vunpack.c.l.bf16 %v766_v42  ;;  %v830_v59 = vld [vmem:[%s1005_s6] sm:$0xff]   ;;  %v496_v62 = vunpack.c.l.bf16 %v770_v48 }
  0x18   : > { %v418_v54 = vadd.f32 %v756_v45, %v394_v37  ;;  %v419_v55 = vadd.f32 %v757_v46, %v395_v44  ;;  %v774_v0 = vld [vmem:[%s916_s18 + $0x2] sm:$0x3]  ;;  %v490_v9 = vmul.f32 %v769_v58, %v480_v57  ;;  %v513_v14 = vunpack.c.l.bf16 %v775_v2  ;;  %v781_v35 = vld [vmem:[%s1006_s7] ss:$0 sm:$0xff] }
  0x19   : > { %805 = vmatpush3.bf16.msra.mxu0 %v828_v4  ;;  %v464_v60 = vmul.f32 %v763_v41, %v454_v52  ;;  %v465_v61 = vmul.f32 %v763_v41, %v455_v53  ;;  %v489_v8 = vmul.f32 %v769_v58, %v479_v56  ;;  %v512_v13 = vunpack.c.l.bf16 %v774_v0 }
  0x1a   : > { %806 = vmatprep.subr.bf16.mxu0 %v839_v1  ;;  %v434_v3 = vadd.f32 %v432_v38, %v418_v54  ;;  %v435_v4 = vadd.f32 %v433_v47, %v419_v55  ;;  %v507_v15 = vmul.f32 %v773_v5, %v497_v63  ;;  %v523_v19 = vmul.f32 %v777_v10, %v513_v14 }
  0x1b   : > { %v764_v6 = vrot.slane %v464_v60, 9  ;;  %v765_v7 = vrot.slane %v465_v61, 9  ;;  %v522_v18 = vmul.f32 %v777_v10, %v512_v13  ;;  %vm605_vm2 = vcmask 785408  }
  0x1c   : > { %v450_v11 = vadd.f32 %v448_v50, %v434_v3  ;;  %v451_v12 = vadd.f32 %v449_v51, %v435_v4  ;;  %v779_v23 = vrot.slane %v523_v19, 9 }
  0x1d   : > { %807 = vmatpush3.bf16.msra.mxu0 %v829_v24  ;;  %v778_v22 = vrot.slane %v522_v18, 9 }
  0x1e   : > { %808 = vmatprep.subr.bf16.mxu0 %v839_v1  ;;  %v506_v1 = vmul.f32 %v773_v5, %v496_v62  ;;  %v474_v16 = vadd.f32 %v764_v6, %v450_v11  ;;  %v475_v17 = vadd.f32 %v765_v7, %v451_v12 }
  0x20   : > { %v491_v20 = vadd.f32 %v489_v8, %v474_v16  ;;  %v492_v21 = vadd.f32 %v490_v9, %v475_v17 }
  0x21   : > { %809 = vmatpush3.bf16.msra.mxu0 %v830_v59 }
  0x22   : > { %v508_v24 = vadd.f32 %v506_v1, %v491_v20  ;;  %v509_v25 = vadd.f32 %v507_v15, %v492_v21 }
  0x24   : > { %v532_v27 = vadd.f32 %v778_v22, %v508_v24  ;;  %v533_v28 = vadd.f32 %v779_v23, %v509_v25 }
  0x26   : > { %v541_v29 = vadd.f32 %v780_v26, %v532_v27  ;;  %v542_v30 = vadd.f32 %v780_v26, %v533_v28 }
  0x28   : > { %v543_v31 = vmax.f32 %v541_v29, 0.0  ;;  %v544_v32 = vmax.f32 %v542_v30, 0.0 }
  0x2a   : > { %546 = vst.msk [vmem:[#allocation2] sm:$0x3] %vm545_vm1, %v543_v31  ;;  %547 = vst.msk [vmem:[#allocation2 + $0x2] sm:$0x3] %vm545_vm1, %v544_v32 }
  0x31   : > { %v548_v33 = vld [vmem:[#allocation2] sm:$0xf] }
  0x32   : > { %v549_v34 = vpack.c.bf16 %v548_v33, %v548_v33 }
  0x34   : > { %811 = vmatmul.mubr.msk.bf16.vlgmr.msra.gmra.mxu0 %vm605_vm2, %v549_v34 }
  0xf4   : > { %v643_v36 = vpop.f32.mrf.mxu0 }
  0xf5   : > { %v644_v37 = vadd.f32 %v781_v35, %v643_v36 }
  0xf6   : > { %v812_v38 = vpop.f32.mrf.mxu0 }
  0xf7   : > { %v649_v39 = vmax.f32 %v644_v37, 0.0 }
  0xf8   : > { %v646_v40 = vpop.f32.mrf.mxu0 }
  0xf9   : > { %v650_v41 = vpack.c.bf16 %v649_v39, %v649_v39 }
  0xfa   : > { %v813_v42 = vpop.f32.mrf.mxu0 }
  0xfb   : > { %651 = vst.msk [vmem:[%s363_s17] sm:$0x3] %vm545_vm1, %v650_v41 }
  0xfc PF: > { %s18_s27 = sadd.s32 1, %s837_s27  }
  0xfd   : > { %p15_p4 = scmp.ge.s32.totalorder %s18_s27, 4  }
  0xff   :  { %17 = sbr.rel (!%p15_p4) target bundleno = 1 (0x1), region = 101 }

// kernel: _lambda_.33
= control target key start
LH: loop header
LB: loop body
LE: loop exit
PB: predicated region body
PF: predicated region fallthrough
CT: control target
= control target key end

     0   :  { %vm178_vm0 = vcmask 523264   ;;  %v42_v27 = vlaneseq  ;;  %vm233_vm1 = vcmask 1043456   ;;  %vm234_vm2 = vcmask 523268   ;;  %s409_s1 = inlined_call_operand.vmem [shape: bf16[192,192], index: 1, kind: input, shape index: {}]   ;;  %s410_s0 = inlined_call_operand.vmem [shape: bf16[8,192], index: 0, kind: input, shape index: {}]   ;;  %s411_s2 = inlined_call_operand.vmem [shape: f32[1,192], index: 2, kind: input, shape index: {}]   ;;  %s412_s3 = inlined_call_operand.vmem [shape: bf16[8,192], index: 3, kind: output, shape index: {}]  }
   0x1   :  { %v270_v0 = vld [vmem:[%s409_s1 + $0x74] ss:$8 sps:$4 sm:$0xff]   ;;  %v272_v1 = vld [vmem:[%s409_s1 + $0x70] ss:$8 sps:$4 sm:$0xff]   ;;  %v273_v2 = vld [vmem:[%s409_s1 + $0x64] ss:$8 sps:$4 sm:$0xff]  }
   0x2   :  { %182 = vmatprep.subr.bf16.mxu0 %v270_v0  ;;  %v275_v3 = vld [vmem:[%s409_s1 + $0x60] ss:$8 sps:$4 sm:$0xff]   ;;  %v276_v4 = vld [vmem:[%s409_s1 + $0x54] ss:$8 sps:$4 sm:$0xff]   ;;  %v278_v5 = vld [vmem:[%s409_s1 + $0x50] ss:$8 sps:$4 sm:$0xff]  }
   0x3   :  { %183 = vmatpush1.bf16.msra.mxu0 %v272_v1  ;;  %v279_v6 = vld [vmem:[%s409_s1 + $0x44] ss:$8 sps:$4 sm:$0xff]   ;;  %v281_v7 = vld [vmem:[%s409_s1 + $0x40] ss:$8 sps:$4 sm:$0xff]   ;;  %v282_v8 = vld [vmem:[%s409_s1 + $0x34] ss:$8 sps:$4 sm:$0xff]  }
   0x4   :  { %184 = vmatprep.subr.bf16.mxu0 %v273_v2  ;;  %v284_v9 = vld [vmem:[%s409_s1 + $0x30] ss:$8 sps:$4 sm:$0xff]   ;;  %v285_v10 = vld [vmem:[%s409_s1 + $0x24] ss:$8 sps:$4 sm:$0xff]   ;;  %v287_v13 = vld [vmem:[%s409_s1 + $0x20] ss:$8 sps:$4 sm:$0xff]  }
   0x5   :  { %v15_v11 = vld [vmem:[%s410_s0] sm:$0xff]  ;;  %v288_v14 = vld [vmem:[%s409_s1 + $0x14] ss:$8 sps:$4 sm:$0xff]   ;;  %v290_v15 = vld [vmem:[%s409_s1 + $0x10] ss:$8 sps:$4 sm:$0xff]   ;;  %v43_v28 = vshrl.u32 %v42_v27, 7 }
   0x6   :  { %v242_v12 = vcombine.high %v15_v11, %v15_v11  ;;  %v291_v16 = vld [vmem:[%s409_s1 + $0x4] ss:$8 sps:$4 sm:$0xff]   ;;  %v293_v17 = vld [vmem:[%s409_s1] ss:$8 sps:$4 sm:$0xff]   ;;  %v294_v18 = vld [vmem:[%s409_s1 + $0xb4] ss:$8 sps:$4 sm:$0xff]   ;;  %v241_v26 = vcombine.low %v15_v11, %v15_v11 }
   0x7   :  { %185 = vmatpush1.bf16.msra.mxu0 %v275_v3  ;;  %v296_v19 = vld [vmem:[%s409_s1 + $0xb0] ss:$8 sps:$4 sm:$0xff]   ;;  %v297_v20 = vld [vmem:[%s409_s1 + $0xa4] ss:$8 sps:$4 sm:$0xff]   ;;  %v299_v21 = vld [vmem:[%s409_s1 + $0xa0] ss:$8 sps:$4 sm:$0xff]  }
   0x8   :  { %186 = vmatprep.subr.bf16.mxu0 %v276_v4  ;;  %267 = vmatprep.mubr.msk.bf16.mxu0 %vm178_vm0, %v242_v12  ;;  %v300_v22 = vld [vmem:[%s409_s1 + $0x94] ss:$8 sps:$4 sm:$0xff]   ;;  %v302_v23 = vld [vmem:[%s409_s1 + $0x90] ss:$8 sps:$4 sm:$0xff]   ;;  %v303_v24 = vld [vmem:[%s409_s1 + $0x84] ss:$8 sps:$4 sm:$0xff]  }
   0x9   :  { %v305_v25 = vld [vmem:[%s409_s1 + $0x80] ss:$8 sps:$4 sm:$0xff]   ;;  %v44_v29 = vsub.s32 0, %v43_v28  ;;  %v48_v31 = vsub.s32 1, %v43_v28  ;;  %vm235_vm3 = vmor %vm234_vm2, %vm233_vm1 }
   0xa   :  { %v40_v30 = vld [vmem:[%s411_s2] sm:$0x3] }
   0xb   :  { %187 = vmatpush1.bf16.msra.mxu0 %v278_v5  ;;  %v45_v32 = vrot.slane %v40_v30, %v44_v29  ;;  %v49_v33 = vrot.slane %v40_v30, %v48_v31 }
   0xc   :  { %188 = vmatprep.subr.bf16.mxu0 %v279_v6 }
   0xf   :  { %189 = vmatpush1.bf16.msra.mxu0 %v281_v7 }
  0x10   :  { %190 = vmatprep.subr.bf16.mxu0 %v282_v8 }
  0x13   :  { %191 = vmatpush1.bf16.msra.mxu0 %v284_v9 }
  0x14   :  { %192 = vmatprep.subr.bf16.mxu0 %v285_v10 }
  0x17   :  { %193 = vmatpush1.bf16.msra.mxu0 %v287_v13 }
  0x18   :  { %194 = vmatprep.subr.bf16.mxu0 %v288_v14 }
  0x1b   :  { %195 = vmatpush1.bf16.msra.mxu0 %v290_v15 }
  0x1c   :  { %196 = vmatprep.subr.bf16.mxu0 %v291_v16 }
  0x1f   :  { %197 = vmatpush1.bf16.msra.mxu0 %v293_v17 }
  0x20   :  { %206 = vmatprep.subr.bf16.mxu0 %v294_v18 }
  0x23   :  { %207 = vmatpush2.bf16.msra.mxu0 %v296_v19 }
  0x24   :  { %208 = vmatprep.subr.bf16.mxu0 %v297_v20 }
  0x27   :  { %209 = vmatpush2.bf16.msra.mxu0 %v299_v21 }
  0x28   :  { %210 = vmatprep.subr.bf16.mxu0 %v300_v22 }
  0x2b   :  { %211 = vmatpush2.bf16.msra.mxu0 %v302_v23 }
  0x2c   :  { %212 = vmatprep.subr.bf16.mxu0 %v303_v24 }
  0x2f   :  { %213 = vmatpush2.bf16.msra.mxu0 %v305_v25 }
  0x32   :  { %215 = vmatmul.mubr.bf16.vlgmr.msra.gmra.mxu0 %v241_v26 }
  0xf2   :  { %v216_v34 = vpop.f32.mrf.mxu0 }
  0xf3   :  { %v217_v35 = vadd.f32 %v216_v34, %v45_v32 }
  0xf4   :  { %v218_v36 = vpop.f32.mrf.mxu0 }
  0xf5   :  { %v219_v37 = vadd.f32 %v218_v36, %v49_v33  ;;  %v223_v39 = vmax.f32 %v217_v35, 0.0 }
  0xf6   :  { %v220_v38 = vpop.f32.mrf.mxu0 }
  0xf7   :  { %v224_v40 = vmax.f32 %v219_v37, 0.0 }
  0xf8   :  { %v221_v41 = vpop.f32.mrf.mxu0 }
  0xf9   :  { %v269_v42 = vpack.c.bf16 %v224_v40, %v223_v39 }
  0xfb   :  { %236 = vst.msk [vmem:[%s412_s3] sm:$0xff] %vm235_vm3, %v269_v42 }

// kernel: _lambda_.34
= control target key start
LH: loop header
LB: loop body
LE: loop exit
PB: predicated region body
PF: predicated region fallthrough
CT: control target
= control target key end

     0   :  { %s1009_s27 = smov 0   ;;  %s1172_s0 = inlined_call_operand.vmem [shape: bf16[2,2,2,192], index: 0, kind: input, shape index: {}]   ;;  %s1173_s1 = inlined_call_operand.vmem [shape: bf16[2,2,2,192], index: 1, kind: input, shape index: {}]   ;;  %s1174_s2 = inlined_call_operand.vmem [shape: bf16[2,2,2,192], index: 2, kind: input, shape index: {}]   ;;  %s1175_s3 = inlined_call_operand.vmem [shape: bf16[2,2,2,192], index: 3, kind: input, shape index: {}]   ;;  %s1176_s4 = inlined_call_operand.vmem [shape: f32[9,1,1,192], index: 4, kind: input, shape index: {}]   ;;  %s1177_s5 = inlined_call_operand.vmem [shape: f32[1,1,192], index: 5, kind: input, shape index: {}]   ;;  %s1178_s6 = inlined_call_operand.vmem [shape: bf16[192,192], index: 6, kind: input, shape index: {}]   ;;  %s1179_s7 = inlined_call_operand.vmem [shape: f32[1,192], index: 7, kind: input, shape index: {}]   ;;  %s1180_s8 = inlined_call_operand.vmem [shape: bf16[2,1,192], index: 8, kind: output, shape index: {}]  }
   0x1 LB: > { %s857_s28 = sadd.s32 4294967295, %s960_s27   ;;  %p861_p0 = scmp.ge.s32.totalorder %s960_s27, 1  ;;  %s960_s27 = sphi %s1009_s27, %s18_s27  }
   0x2   : > { %p288_p1 = scmp.lt.s32.totalorder %s960_s27, 3 }
   0x4   : > { %p289_p2 = pnand %p861_p0, %p288_p1 }
   0x5   : > { %p332_p3 = scmp.lt.s32.totalorder (!%p289_p2), %s857_s28, 1 }
   0x6   : > { %292 = sbr.rel (%p289_p2) target bundleno = 267 (0x10b), region = 52 }
   0xb   : > { %v918_v0 = vld [vmem:[%s1178_s6 + $0x74] ss:$8 sps:$4 sm:$0xff]   ;;  %v920_v1 = vld [vmem:[%s1178_s6 + $0x70] ss:$8 sps:$4 sm:$0xff]   ;;  %v921_v2 = vld [vmem:[%s1178_s6 + $0x64] ss:$8 sps:$4 sm:$0xff]   ;;  %v360_v7 = vlaneseq }
   0xc   : > { %695 = vmatprep.subr.bf16.mxu0 %v918_v0  ;;  %v923_v3 = vld [vmem:[%s1178_s6 + $0x60] ss:$8 sps:$4 sm:$0xff]   ;;  %v924_v4 = vld [vmem:[%s1178_s6 + $0x54] ss:$8 sps:$4 sm:$0xff]   ;;  %v962_v5 = vmov 857870592  }
   0xd   : > { %696 = vmatpush1.bf16.msra.mxu0 %v920_v1  ;;  %v358_v6 = vunpack.c.l.s4 %v962_v5  ;;  %s1182_s28 = smov (!%p332_p3, %s857_s28), 1  ;;  %v926_v8 = vld [vmem:[%s1178_s6 + $0x50] ss:$8 sps:$4 sm:$0xff]   ;;  %v927_v9 = vld [vmem:[%s1178_s6 + $0x44] ss:$8 sps:$4 sm:$0xff]   ;;  %v1041_v11 = vshrl.u32 %v360_v7, 7 }
   0xe   : > { %697 = vmatprep.subr.bf16.mxu0 %v921_v2  ;;  %s862_s21 = sshll.u32 %s1182_s28, 2  ;;  %v929_v12 = vld [vmem:[%s1178_s6 + $0x40] ss:$8 sps:$4 sm:$0xff]   ;;  %v930_v13 = vld [vmem:[%s1178_s6 + $0x34] ss:$8 sps:$4 sm:$0xff]   ;;  %vm518_vm0 = vcmp.lt.s32.totalorder %v360_v7, 192 }
   0xf   : > { %v359_v10 = vunpack.c.0.s8 %v358_v6  ;;  %s1053_s30 = scalar_lea.vmem %s1172_s0, %s862_s21  ;;  %s1058_s11 = scalar_lea.vmem %s1173_s1, %s862_s21  ;;  %v932_v15 = vld [vmem:[%s1178_s6 + $0x30] ss:$8 sps:$4 sm:$0xff]   ;;  %v933_v16 = vld [vmem:[%s1178_s6 + $0x24] ss:$8 sps:$4 sm:$0xff]   ;;  %v355_v18 = vld [vmem:[%s1176_s4] sm:$0x3] }
  0x10   : > { %s343_s14 = scalar_lea.vmem %s1174_s2, %s862_s21  ;;  %s347_s22 = scalar_lea.vmem %s1175_s3, %s862_s21  ;;  %v353_v17 = vld [vmem:[%s1053_s30] sm:$0x3]  ;;  %v867_v23 = vld [vmem:[%s1176_s4 + $0x2] sm:$0x3]  ;;  %v868_v24 = vld [vmem:[%s1176_s4 + $0x4] sm:$0x3] }
  0x11   : > { %698 = vmatpush1.bf16.msra.mxu0 %v923_v3  ;;  %v1061_v14 = vsub.s32 %v359_v10, %v1041_v11  ;;  %v367_v19 = vld [vmem:[%s1058_s11] sm:$0x3]  ;;  %v354_v20 = vunpack.c.l.bf16 %v353_v17  ;;  %v870_v29 = vld [vmem:[%s1176_s4 + $0x6] sm:$0x3]  ;;  %v871_v31 = vld [vmem:[%s1176_s4 + $0x8] sm:$0x3] }
  0x12   : > { %699 = vmatprep.subr.bf16.mxu0 %v924_v4  ;;  %v368_v22 = vunpack.c.l.bf16 %v367_v19  ;;  %v399_v25 = vld [vmem:[%s343_s14] sm:$0x3]  ;;  %v872_v36 = vld [vmem:[%s1176_s4 + $0xa] sm:$0x3]  ;;  %v936_v37 = vld [vmem:[%s1178_s6 + $0x14] ss:$8 sps:$4 sm:$0xff]  }
  0x13   : > { %v363_v21 = vrot.slane %v355_v18, %v1061_v14  ;;  %v378_v26 = vrot.slane %v867_v23, %v1061_v14  ;;  %v391_v27 = vrot.slane %v868_v24, %v1061_v14  ;;  %v400_v28 = vunpack.c.l.bf16 %v399_v25  ;;  %v414_v30 = vld [vmem:[%s347_s22] sm:$0x3]  ;;  %v874_v42 = vld [vmem:[%s1053_s30 + $0x2] sm:$0x3]  ;;  %v875_v43 = vld [vmem:[%s1176_s4 + $0xc] sm:$0x3] }
  0x14   : > { %v935_v32 = vld [vmem:[%s1178_s6 + $0x20] ss:$8 sps:$4 sm:$0xff]   ;;  %v410_v34 = vrot.slane %v870_v29, %v1061_v14  ;;  %v415_v35 = vunpack.c.l.bf16 %v414_v30  ;;  %v425_v40 = vrot.slane %v871_v31, %v1061_v14  ;;  %v438_v41 = vrot.slane %v872_v36, %v1061_v14  ;;  %v878_v44 = vld [vmem:[%s1176_s4 + $0x10] sm:$0x3]  ;;  %v877_v52 = vld [vmem:[%s1176_s4 + $0xe] sm:$0x3] }
  0x15   : > { %700 = vmatpush1.bf16.msra.mxu0 %v926_v8  ;;  %v365_v33 = vmul.f32 %v363_v21, %v354_v20  ;;  %v380_v38 = vmul.f32 %v378_v26, %v368_v22  ;;  %v393_v39 = vmul.f32 %v391_v27, %v354_v20  ;;  %v938_v49 = vld [vmem:[%s1178_s6 + $0x10] ss:$8 sps:$4 sm:$0xff]   ;;  %v448_v50 = vunpack.c.l.bf16 %v874_v42  ;;  %v876_v51 = vld [vmem:[%s1058_s11 + $0x2] sm:$0x3]  ;;  %v939_v53 = vld [vmem:[%s1178_s6 + $0x4] ss:$8 sps:$4 sm:$0xff]  }
  0x16   : > { %701 = vmatprep.subr.bf16.mxu0 %v927_v9  ;;  %v412_v47 = vmul.f32 %v410_v34, %v400_v28  ;;  %v440_v48 = vmul.f32 %v438_v41, %v400_v28  ;;  %v427_v55 = vmul.f32 %v425_v40, %v415_v35  ;;  %v458_v56 = vrot.slane %v875_v43, %v1061_v14  ;;  %v941_v62 = vld [vmem:[%s1178_s6] ss:$8 sps:$4 sm:$0xff]   ;;  %v942_v63 = vld [vmem:[%s1178_s6 + $0xb4] ss:$8 sps:$4 sm:$0xff]   ;;  %v944_v8 = vld [vmem:[%s1178_s6 + $0xb0] ss:$8 sps:$4 sm:$0xff]  }
  0x17   : > { %v381_v45 = vadd.f32 %v380_v38, %v365_v33  ;;  %v869_v46 = vrot.slane %v393_v39, 9  ;;  %v487_v57 = vrot.slane %v878_v44, %v1061_v14  ;;  %v464_v60 = vunpack.c.l.bf16 %v876_v51  ;;  %v495_v9 = vld [vmem:[%s1177_s5] sm:$0x3]  ;;  %v945_v10 = vld [vmem:[%s1178_s6 + $0xa4] ss:$8 sps:$4 sm:$0xff]   ;;  %s866_s12 = sshll.u32 %s1182_s28, 1 }
  0x18   : > { %v873_v59 = vrot.slane %v440_v48, 9  ;;  %v474_v61 = vrot.slane %v877_v52, %v1061_v14  ;;  %v460_v1 = vmul.f32 %v458_v56, %v448_v50  ;;  %v963_v5 = vmov 1966171168   ;;  %v947_v18 = vld [vmem:[%s1178_s6 + $0xa0] ss:$8 sps:$4 sm:$0xff]   ;;  %s351_s16 = scalar_lea.vmem %s1180_s8, %s866_s12 }
  0x19   : > { %702 = vmatpush1.bf16.msra.mxu0 %v929_v12  ;;  %v398_v54 = vadd.f32 %v869_v46, %v381_v45  ;;  %v489_v2 = vmul.f32 %v487_v57, %v448_v50  ;;  %v509_v6 = vunpack.c.l.s4 %v963_v5  ;;  %v948_v19 = vld [vmem:[%s1178_s6 + $0x94] ss:$8 sps:$4 sm:$0xff]   ;;  %v951_v23 = vld [vmem:[%s1178_s6 + $0x84] ss:$8 sps:$4 sm:$0xff]   ;;  %v953_v26 = vld [vmem:[%s1178_s6 + $0x80] ss:$8 sps:$4 sm:$0xff]  }
  0x1a   : > { %703 = vmatprep.subr.bf16.mxu0 %v930_v13  ;;  %v476_v4 = vmul.f32 %v474_v61, %v464_v60  ;;  %v525_v27 = vsub.s32 0, %v1041_v11  ;;  %v529_v28 = vsub.s32 1, %v1041_v11  ;;  %vm691_vm1 = vcmask 523264   ;;  %v559_v33 = vld [vmem:[%s1179_s7] sm:$0x3] }
  0x1b   : > { %v413_v58 = vadd.f32 %v412_v47, %v398_v54  ;;  %v879_v13 = vrot.slane %v489_v2, 9  ;;  %v510_v17 = vunpack.c.0.s8 %v509_v6  ;;  %vm758_vm2 = vcmask 1040384   ;;  %v765_v45 = vld [vmem:[%s351_s16] sm:$0x3] }
  0x1c   : > { %v684_v34 = vrot.slane %v559_v33, %v525_v27  ;;  %v688_v35 = vrot.slane %v559_v33, %v529_v28  ;;  %vm759_vm3 = vsmask.f32 256  ;;  %vm761_vm4 = vcmask 517121  }
  0x1d   : > { %704 = vmatpush1.bf16.msra.mxu0 %v932_v15  ;;  %v428_v0 = vadd.f32 %v427_v55, %v413_v58  ;;  %v513_v22 = vsub.s32 %v510_v17, %v1041_v11  ;;  %vm762_vm5 = vsmask.f32 1280  ;;  %vm760_vm6 = vmand %vm758_vm2, %vm759_vm3 }
  0x1e   : > { %705 = vmatprep.subr.bf16.mxu0 %v933_v16  ;;  %v503_v16 = vrot.slane %v495_v9, %v1061_v14  ;;  %v950_v14 = vld [vmem:[%s1178_s6 + $0x90] ss:$8 sps:$4 sm:$0xff]   ;;  %vm763_vm7 = vmand %vm761_vm4, %vm762_vm5 }
  0x1f   : > { %v445_v3 = vadd.f32 %v873_v59, %v428_v0  ;;  %vm764_vm8 = vmor %vm763_vm7, %vm760_vm6 }
  0x21   : > { %706 = vmatpush1.bf16.msra.mxu0 %v935_v32  ;;  %v461_v12 = vadd.f32 %v460_v1, %v445_v3 }
  0x22   : > { %707 = vmatprep.subr.bf16.mxu0 %v936_v37 }
  0x23   : > { %v477_v15 = vadd.f32 %v476_v4, %v461_v12 }
  0x25   : > { %708 = vmatpush1.bf16.msra.mxu0 %v938_v49  ;;  %v494_v20 = vadd.f32 %v879_v13, %v477_v15 }
  0x26   : > { %709 = vmatprep.subr.bf16.mxu0 %v939_v53 }
  0x27   : > { %v505_v21 = vadd.f32 %v503_v16, %v494_v20 }
  0x29   : > { %710 = vmatpush1.bf16.msra.mxu0 %v941_v62  ;;  %v506_v24 = vmax.f32 %v505_v21, 0.0 }
  0x2a   : > { %719 = vmatprep.subr.bf16.mxu0 %v942_v63 }
  0x2b   : > { %v514_v25 = vrot.slane %v506_v24, %v513_v22 }
  0x2d   : > { %720 = vmatpush2.bf16.msra.mxu0 %v944_v8  ;;  %520 = vst.msk [vmem:[#allocation2] sm:$0x3] %vm518_vm0, %v514_v25 }
  0x2e   : > { %721 = vmatprep.subr.bf16.mxu0 %v945_v10 }
  0x31   : > { %722 = vmatpush2.bf16.msra.mxu0 %v947_v18 }
  0x32   : > { %723 = vmatprep.subr.bf16.mxu0 %v948_v19 }
  0x34   : > { %v521_v29 = vld [vmem:[#allocation2] sm:$0x3] }
  0x35   : > { %724 = vmatpush2.bf16.msra.mxu0 %v950_v14  ;;  %v526_v30 = vrot.slane %v521_v29, %v525_v27  ;;  %v530_v31 = vrot.slane %v521_v29, %v529_v28 }
  0x36   : > { %725 = vmatprep.subr.bf16.mxu0 %v951_v23 }
  0x37   : > { %v534_v32 = vpack.c.bf16 %v530_v31, %v530_v31  ;;  %v533_v7 = vpack.c.bf16 %v526_v30, %v526_v30 }
  0x39   : > { %726 = vmatpush2.bf16.msra.mxu0 %v953_v26  ;;  %904 = vmatprep.mubr.msk.bf16.mxu0 %vm691_vm1, %v534_v32 }
  0x3c   : > { %728 = vmatmul.mubr.bf16.vlgmr.msra.gmra.mxu0 %v533_v7 }
  0xfc   : > { %v729_v36 = vpop.f32.mrf.mxu0 }
  0xfd   : > { %v730_v37 = vadd.f32 %v729_v36, %v684_v34 }
  0xfe   : > { %v731_v38 = vpop.f32.mrf.mxu0 }
  0xff   : > { %v732_v39 = vadd.f32 %v731_v38, %v688_v35  ;;  %v736_v40 = vmax.f32 %v730_v37, 0.0 }
 0x100   : > { %v733_v11 = vpop.f32.mrf.mxu0 }
 0x101   : > { %v737_v41 = vmax.f32 %v732_v39, 0.0 }
 0x102   : > { %v734_v42 = vpop.f32.mrf.mxu0 }
 0x103   : > { %v905_v43 = vpack.c.bf16 %v737_v41, %v736_v40 }
 0x105   : > { %v749_v44 = vrot.slane %v905_v43, %v513_v22 }
 0x107   : > { %v756_v46 = vrot.slane %v749_v44, %v513_v22 }
 0x109   : > { %v766_v47 = vsel %vm764_vm8, %v756_v46, %v765_v45 }
 0x10a   : > { %767 = vst [vmem:[%s351_s16] sm:$0x3] %v766_v47 }
 0x10b PF: > { %s18_s27 = sadd.s32 1, %s960_s27  }
 0x10c   : > { %p15_p4 = scmp.ge.s32.totalorder %s18_s27, 4  }
 0x10e   :  { %17 = sbr.rel (!%p15_p4) target bundleno = 1 (0x1), region = 101 }

// kernel: _lambda_.37
= control target key start
LH: loop header
LB: loop body
LE: loop exit
PB: predicated region body
PF: predicated region fallthrough
CT: control target
= control target key end

     0   :  { %vm726_vm0 = vcmask 130048   ;;  %s1195_s1 = inlined_call_operand.vmem [shape: bf16[1024,16], index: 1, kind: input, shape index: {}]   ;;  %s1196_s0 = inlined_call_operand.vmem [shape: bf16[8,1024], index: 0, kind: input, shape index: {}]   ;;  %s1197_s2 = inlined_call_operand.vmem [shape: f32[1,16], index: 2, kind: input, shape index: {}]   ;;  %s1198_s3 = inlined_call_operand.vmem [shape: f32[8,16], index: 3, kind: output, shape index: {}]  }
   0x1   :  { %v893_v0 = vld [vmem:[%s1195_s1 + $0x78] sm:$0xff]   ;;  %v897_v4 = vld [vmem:[%s1195_s1 + $0x70] sm:$0xff]   ;;  %v901_v8 = vld [vmem:[%s1195_s1 + $0x68] sm:$0xff]  }
   0x2   :  { %v894_v1 = vld [vmem:[%s1195_s1 + $0xf8] sm:$0xff]   ;;  %805 = vmatprep.subr.bf16.mxu0 %v893_v0  ;;  %v898_v5 = vld [vmem:[%s1195_s1 + $0xf0] sm:$0xff]   ;;  %v902_v9 = vld [vmem:[%s1195_s1 + $0xe8] sm:$0xff]  }
   0x3   :  { %v895_v2 = vld [vmem:[%s1195_s1 + $0x38] sm:$0xff]   ;;  %827 = vmatprep.subr.bf16.mxu1 %v894_v1  ;;  %v899_v6 = vld [vmem:[%s1195_s1 + $0x30] sm:$0xff]   ;;  %v903_v10 = vld [vmem:[%s1195_s1 + $0x28] sm:$0xff]  }
   0x4   :  { %v896_v3 = vld [vmem:[%s1195_s1 + $0xb8] sm:$0xff]   ;;  %806 = vmatpush3.bf16.msra.mxu0 %v895_v2  ;;  %v900_v7 = vld [vmem:[%s1195_s1 + $0xb0] sm:$0xff]   ;;  %v904_v11 = vld [vmem:[%s1195_s1 + $0xa8] sm:$0xff]  }
   0x5   :  { %828 = vmatpush3.bf16.msra.mxu1 %v896_v3  ;;  %807 = vmatprep.subr.bf16.mxu0 %v897_v4  ;;  %v905_v12 = vld [vmem:[%s1195_s1 + $0x60] sm:$0xff]   ;;  %v909_v16 = vld [vmem:[%s1195_s1 + $0x58] sm:$0xff]   ;;  %v913_v20 = vld [vmem:[%s1195_s1 + $0x50] sm:$0xff]  }
   0x6   :  { %829 = vmatprep.subr.bf16.mxu1 %v898_v5  ;;  %v906_v13 = vld [vmem:[%s1195_s1 + $0xe0] sm:$0xff]   ;;  %v910_v17 = vld [vmem:[%s1195_s1 + $0xd8] sm:$0xff]   ;;  %v914_v21 = vld [vmem:[%s1195_s1 + $0xd0] sm:$0xff]  }
   0x7   :  { %v907_v14 = vld [vmem:[%s1195_s1 + $0x20] sm:$0xff]   ;;  %v911_v18 = vld [vmem:[%s1195_s1 + $0x18] sm:$0xff]   ;;  %v915_v22 = vld [vmem:[%s1195_s1 + $0x10] sm:$0xff]  }
   0x8   :  { %808 = vmatpush3.bf16.msra.mxu0 %v899_v6  ;;  %v908_v15 = vld [vmem:[%s1195_s1 + $0xa0] sm:$0xff]   ;;  %v912_v19 = vld [vmem:[%s1195_s1 + $0x98] sm:$0xff]   ;;  %v916_v23 = vld [vmem:[%s1195_s1 + $0x90] sm:$0xff]  }
   0x9   :  { %830 = vmatpush3.bf16.msra.mxu1 %v900_v7  ;;  %809 = vmatprep.subr.bf16.mxu0 %v901_v8  ;;  %v917_v24 = vld [vmem:[%s1195_s1 + $0x48] sm:$0xff]   ;;  %v921_v28 = vld [vmem:[%s1195_s1 + $0x40] sm:$0xff]   ;;  %v929_v38 = vld [vmem:[%s1195_s1 + $0x178] sm:$0xff]  }
   0xa   :  { %831 = vmatprep.subr.bf16.mxu1 %v902_v9  ;;  %v918_v25 = vld [vmem:[%s1195_s1 + $0xc8] sm:$0xff]   ;;  %v922_v29 = vld [vmem:[%s1195_s1 + $0xc0] sm:$0xff]   ;;  %v930_v39 = vld [vmem:[%s1195_s1 + $0x1f8] sm:$0xff]  }
   0xb   :  { %v919_v26 = vld [vmem:[%s1195_s1 + $0x8] sm:$0xff]   ;;  %v923_v30 = vld [vmem:[%s1195_s1] sm:$0xff]   ;;  %v931_v40 = vld [vmem:[%s1195_s1 + $0x138] sm:$0xff]  }
   0xc   :  { %810 = vmatpush3.bf16.msra.mxu0 %v903_v10  ;;  %v920_v27 = vld [vmem:[%s1195_s1 + $0x88] sm:$0xff]   ;;  %v924_v31 = vld [vmem:[%s1195_s1 + $0x80] sm:$0xff]   ;;  %v932_v41 = vld [vmem:[%s1195_s1 + $0x1b8] sm:$0xff]  }
   0xd   :  { %832 = vmatpush3.bf16.msra.mxu1 %v904_v11  ;;  %811 = vmatprep.subr.bf16.mxu0 %v905_v12  ;;  %v15_v32 = vld [vmem:[%s1196_s0] sm:$0xff]  ;;  %v16_v33 = vld [vmem:[%s1196_s0 + $0x8] sm:$0xff]  ;;  %v933_v42 = vld [vmem:[%s1195_s1 + $0x170] sm:$0xff]  }
   0xe   :  { %833 = vmatprep.subr.bf16.mxu1 %v906_v13  ;;  %v733_v34 = vcombine.low %v15_v32, %v15_v32  ;;  %v734_v35 = vcombine.high %v15_v32, %v15_v32  ;;  %v735_v36 = vcombine.low %v16_v33, %v16_v33  ;;  %v736_v37 = vcombine.high %v16_v33, %v16_v33  ;;  %v934_v43 = vld [vmem:[%s1195_s1 + $0x1f0] sm:$0xff]   ;;  %v937_v46 = vld [vmem:[%s1195_s1 + $0x168] sm:$0xff]   ;;  %v941_v50 = vld [vmem:[%s1195_s1 + $0x160] sm:$0xff]  }
   0xf   :  { %v935_v44 = vld [vmem:[%s1195_s1 + $0x130] sm:$0xff]   ;;  %v938_v47 = vld [vmem:[%s1195_s1 + $0x1e8] sm:$0xff]   ;;  %v942_v51 = vld [vmem:[%s1195_s1 + $0x1e0] sm:$0xff]  }
  0x10   :  { %812 = vmatpush3.bf16.msra.mxu0 %v907_v14  ;;  %598 = vmatprep.mubr.bf16.mxu0 %v734_v35  ;;  %v936_v45 = vld [vmem:[%s1195_s1 + $0x1b0] sm:$0xff]   ;;  %v939_v48 = vld [vmem:[%s1195_s1 + $0x128] sm:$0xff]   ;;  %v943_v52 = vld [vmem:[%s1195_s1 + $0x120] sm:$0xff]  }
  0x11   :  { %834 = vmatpush3.bf16.msra.mxu1 %v908_v15  ;;  %813 = vmatprep.subr.bf16.mxu0 %v909_v16  ;;  %v940_v49 = vld [vmem:[%s1195_s1 + $0x1a8] sm:$0xff]   ;;  %v944_v53 = vld [vmem:[%s1195_s1 + $0x1a0] sm:$0xff]   ;;  %v945_v54 = vld [vmem:[%s1195_s1 + $0x158] sm:$0xff]  }
  0x12   :  { %835 = vmatprep.subr.bf16.mxu1 %v910_v17  ;;  %638 = vmatprep.mubr.bf16.mxu1 %v736_v37  ;;  %v946_v55 = vld [vmem:[%s1195_s1 + $0x1d8] sm:$0xff]   ;;  %v949_v58 = vld [vmem:[%s1195_s1 + $0x150] sm:$0xff]   ;;  %v953_v62 = vld [vmem:[%s1195_s1 + $0x148] sm:$0xff]  }
  0x13   :  { %v947_v56 = vld [vmem:[%s1195_s1 + $0x118] sm:$0xff]   ;;  %v950_v59 = vld [vmem:[%s1195_s1 + $0x1d0] sm:$0xff]   ;;  %v954_v63 = vld [vmem:[%s1195_s1 + $0x1c8] sm:$0xff]  }
  0x14   :  { %814 = vmatpush3.bf16.msra.mxu0 %v911_v18  ;;  %v948_v57 = vld [vmem:[%s1195_s1 + $0x198] sm:$0xff]   ;;  %v951_v60 = vld [vmem:[%s1195_s1 + $0x110] sm:$0xff]   ;;  %v955_v0 = vld [vmem:[%s1195_s1 + $0x108] sm:$0xff]  }
  0x15   :  { %836 = vmatpush3.bf16.msra.mxu1 %v912_v19  ;;  %815 = vmatprep.subr.bf16.mxu0 %v913_v20  ;;  %v952_v61 = vld [vmem:[%s1195_s1 + $0x190] sm:$0xff]   ;;  %v956_v1 = vld [vmem:[%s1195_s1 + $0x188] sm:$0xff]   ;;  %v957_v2 = vld [vmem:[%s1195_s1 + $0x140] sm:$0xff]  }
  0x16   :  { %837 = vmatprep.subr.bf16.mxu1 %v914_v21  ;;  %v958_v3 = vld [vmem:[%s1195_s1 + $0x1c0] sm:$0xff]   ;;  %v17_v6 = vld [vmem:[%s1196_s0 + $0x10] sm:$0xff]  ;;  %v18_v9 = vld [vmem:[%s1196_s0 + $0x18] sm:$0xff] }
  0x17   :  { %v959_v4 = vld [vmem:[%s1195_s1 + $0x100] sm:$0xff]   ;;  %v737_v7 = vcombine.low %v17_v6, %v17_v6  ;;  %v738_v8 = vcombine.high %v17_v6, %v17_v6  ;;  %v739_v10 = vcombine.low %v18_v9, %v18_v9  ;;  %v740_v11 = vcombine.high %v18_v9, %v18_v9 }
  0x18   :  { %816 = vmatpush3.bf16.msra.mxu0 %v915_v22  ;;  %v960_v5 = vld [vmem:[%s1195_s1 + $0x180] sm:$0xff]  }
  0x19   :  { %838 = vmatpush3.bf16.msra.mxu1 %v916_v23  ;;  %817 = vmatprep.subr.bf16.mxu0 %v917_v24  ;;  %v732_v21 = vld [vmem:[%s1197_s2] ss:$0 sm:$0xff] }
  0x1a   :  { %839 = vmatprep.subr.bf16.mxu1 %v918_v25 }
  0x1c   :  { %818 = vmatpush3.bf16.msra.mxu0 %v919_v26 }
  0x1d   :  { %840 = vmatpush3.bf16.msra.mxu1 %v920_v27  ;;  %819 = vmatprep.subr.bf16.mxu0 %v921_v28 }
  0x1e   :  { %841 = vmatprep.subr.bf16.mxu1 %v922_v29 }
  0x20   :  { %820 = vmatpush3.bf16.msra.mxu0 %v923_v30 }
  0x21   :  { %842 = vmatpush3.bf16.msra.mxu1 %v924_v31  ;;  %849 = vmatprep.subr.bf16.mxu0 %v929_v38 }
  0x22   :  { %871 = vmatprep.subr.bf16.mxu1 %v930_v39 }
  0x23   :  { %599 = vmatmul.mubr.bf16.vlgmr.msra.gmra.mxu0 %v733_v34 }
  0x24   :  { %639 = vmatmul.mubr.bf16.vlgmr.msra.gmra.mxu1 %v735_v36  ;;  %850 = vmatpush3.bf16.msra.mxu0 %v931_v40 }
  0x25   :  { %872 = vmatpush3.bf16.msra.mxu1 %v932_v41  ;;  %851 = vmatprep.subr.bf16.mxu0 %v933_v42 }
  0x26   :  { %873 = vmatprep.subr.bf16.mxu1 %v934_v43  ;;  %678 = vmatprep.mubr.bf16.mxu0 %v738_v8 }
  0x27   :  { %718 = vmatprep.mubr.bf16.mxu1 %v740_v11 }
  0x28   :  { %852 = vmatpush3.bf16.msra.mxu0 %v935_v44 }
  0x29   :  { %874 = vmatpush3.bf16.msra.mxu1 %v936_v45  ;;  %853 = vmatprep.subr.bf16.mxu0 %v937_v46 }
  0x2a   :  { %875 = vmatprep.subr.bf16.mxu1 %v938_v47 }
  0x2c   :  { %854 = vmatpush3.bf16.msra.mxu0 %v939_v48 }
  0x2d   :  { %876 = vmatpush3.bf16.msra.mxu1 %v940_v49  ;;  %855 = vmatprep.subr.bf16.mxu0 %v941_v50 }
  0x2e   :  { %877 = vmatprep.subr.bf16.mxu1 %v942_v51 }
  0x30   :  { %856 = vmatpush3.bf16.msra.mxu0 %v943_v52 }
  0x31   :  { %878 = vmatpush3.bf16.msra.mxu1 %v944_v53  ;;  %857 = vmatprep.subr.bf16.mxu0 %v945_v54 }
  0x32   :  { %879 = vmatprep.subr.bf16.mxu1 %v946_v55 }
  0x34   :  { %858 = vmatpush3.bf16.msra.mxu0 %v947_v56 }
  0x35   :  { %880 = vmatpush3.bf16.msra.mxu1 %v948_v57  ;;  %859 = vmatprep.subr.bf16.mxu0 %v949_v58 }
  0x36   :  { %881 = vmatprep.subr.bf16.mxu1 %v950_v59 }
  0x38   :  { %860 = vmatpush3.bf16.msra.mxu0 %v951_v60 }
  0x39   :  { %882 = vmatpush3.bf16.msra.mxu1 %v952_v61  ;;  %861 = vmatprep.subr.bf16.mxu0 %v953_v62 }
  0x3a   :  { %883 = vmatprep.subr.bf16.mxu1 %v954_v63 }
  0x3c   :  { %862 = vmatpush3.bf16.msra.mxu0 %v955_v0 }
  0x3d   :  { %884 = vmatpush3.bf16.msra.mxu1 %v956_v1  ;;  %863 = vmatprep.subr.bf16.mxu0 %v957_v2 }
  0x3e   :  { %885 = vmatprep.subr.bf16.mxu1 %v958_v3 }
  0x40   :  { %864 = vmatpush3.bf16.msra.mxu0 %v959_v4 }
  0x41   :  { %886 = vmatpush3.bf16.msra.mxu1 %v960_v5 }
  0x43   :  { %679 = vmatmul.mubr.bf16.vlgmr.msra.gmra.mxu0 %v737_v7 }
  0x44   :  { %719 = vmatmul.mubr.bf16.vlgmr.msra.gmra.mxu1 %v739_v10 }
  0xe3   :  { %v821_v12 = vpop.f32.mrf.mxu0 }
  0xe4   :  { %v843_v13 = vpop.f32.mrf.mxu1 }
  0xe5   :  { %v822_v14 = vpop.f32.mrf.mxu0 }
  0xe6   :  { %v844_v15 = vpop.f32.mrf.mxu1  ;;  %v823_v20 = vadd.f32 %v822_v14, %v821_v12 }
  0xe7   :  { %v824_v16 = vpop.f32.mrf.mxu0  ;;  %v845_v23 = vadd.f32 %v844_v15, %v843_v13 }
  0xe8   :  { %v846_v17 = vpop.f32.mrf.mxu1  ;;  %v601_v22 = vadd.f32 %v823_v20, %v732_v21 }
  0xe9   :  { %v825_v18 = vpop.f32.mrf.mxu0 }
  0xea   :  { %v847_v19 = vpop.f32.mrf.mxu1  ;;  %v641_v28 = vadd.f32 %v845_v23, %v601_v22 }
 0x103   :  { %v865_v24 = vpop.f32.mrf.mxu0 }
 0x104   :  { %v887_v25 = vpop.f32.mrf.mxu1 }
 0x105   :  { %v866_v26 = vpop.f32.mrf.mxu0 }
 0x106   :  { %v888_v27 = vpop.f32.mrf.mxu1  ;;  %v867_v29 = vadd.f32 %v866_v26, %v865_v24 }
 0x107   :  { %v868_v30 = vpop.f32.mrf.mxu0  ;;  %v889_v33 = vadd.f32 %v888_v27, %v887_v25 }
 0x108   :  { %v890_v31 = vpop.f32.mrf.mxu1  ;;  %v681_v32 = vadd.f32 %v867_v29, %v641_v28 }
 0x109   :  { %v869_v34 = vpop.f32.mrf.mxu0 }
 0x10a   :  { %v891_v35 = vpop.f32.mrf.mxu1  ;;  %v721_v36 = vadd.f32 %v889_v33, %v681_v32 }
 0x10c   :  { %727 = vst.msk [vmem:[%s1198_s3] sm:$0xff] %vm726_vm0, %v721_v36 }

// kernel: _lambda_.36
= control target key start
LH: loop header
LB: loop body
LE: loop exit
PB: predicated region body
PF: predicated region fallthrough
CT: control target
= control target key end

     0   :  { %s1721_s12 = smov 0   ;;  %s1723_s13 = smov 0   ;;  %s2109_s0 = inlined_call_operand.vmem [shape: bf16[8,384], index: 0, kind: input, shape index: {}]   ;;  %s2110_s1 = inlined_call_operand.vmem [shape: bf16[384,1024], index: 1, kind: input, shape index: {}]   ;;  %s2111_s2 = inlined_call_operand.vmem [shape: f32[1,1024], index: 2, kind: input, shape index: {}]   ;;  %s2112_s3 = inlined_call_operand.vmem [shape: bf16[8,1024], index: 3, kind: output, shape index: {}]  }
   0x1   :  { %s1725_s14 = smov 0   ;;  %s1727_s15 = smov 0  }
   0x2   :  { %s1729_s16 = smov 0  }
   0x3 LB: > { %s22_s17 = sadd.s32 1, %s1694_s15  ;;  %p65_p1 = scmp.ne.s32.totalorder %s1686_s13, %s1682_s12  ;;  %s1698_s16 = sphi %s1729_s16, %s13_s16   ;;  %s1694_s15 = sphi %s1727_s15, %s2116_s15   ;;  %s1690_s14 = sphi %s1725_s14, %s2115_s14   ;;  %s1686_s13 = sphi %s1723_s13, %s2114_s13   ;;  %s1682_s12 = sphi %s1721_s12, %s2113_s12  }
   0x4   : > { %p23_p0 = scmp.ge.s32.totalorder %s22_s17, 2  ;;  %p66_p2 = scmp.eq.s32.totalorder %s1698_s16, 0 }
   0x5   : > { %s58_s19 = sadd.s32 1, %s1686_s13  ;;  %p1357_p5 = scmp.ge.s32.totalorder %s1698_s16, 2 }
   0x6   : > { %s2118_s17 = smov (%p23_p0, %s22_s17), 0  ;;  %p67_p3 = por %p66_p2, %p65_p1 }
   0x7   : > { %s55_s18 = ssub.s32 %s1694_s15, %s2118_s17  ;;  %153 = sbr.rel (%p1357_p5) target bundleno = 64 (0x40), region = 20 }
   0x8   : > { %p56_p4 = scmp.eq.s32.totalorder %s55_s18, 0 }
   0xa   : > { %s1756_s20 = scalar_select %p56_p4, %s1686_s13, %s58_s19  }
   0xc   : > { %156 = sbr.rel (!%p67_p3) target bundleno = 64 (0x40), region = 24  ;;  %s158_s21 = sand.u32 (%p67_p3), 1, %s1686_s13  }
   0xd   : > { %s1467_s22 = sshll.u32 (%p67_p3), %s1694_s15, 4  ;;  %s1470_s23 = smul.u32 (%p67_p3), 768, %s158_s21 }
   0xe   : > { %s1764_s26 = scalar_lea.vmem (%p67_p3), %s2110_s1, %s1467_s22 }
   0xf   : > { %v176_v0 = vld [vmem:[%s1764_s26] sm:$0xff] (%p67_p3)  ;;  %v178_v1 = vld [vmem:[%s1764_s26 + $0x8] sm:$0xff] (%p67_p3)  ;;  %s1772_s27 = scalar_lea.vmem (%p67_p3), [#allocation2], %s1470_s23 }
  0x10   : > { %v180_v2 = vld [vmem:[%s1764_s26 + $0x20] sm:$0xff] (%p67_p3)  ;;  %v182_v3 = vld [vmem:[%s1764_s26 + $0x28] sm:$0xff] (%p67_p3)  ;;  %177 = vst [vmem:[%s1772_s27] sm:$0xff] (%p67_p3), %v176_v0  ;;  %179 = vst [vmem:[%s1772_s27 + $0x8] sm:$0xff] (%p67_p3), %v178_v1 }
  0x11   : > { %v184_v4 = vld [vmem:[%s1764_s26 + $0x40] sm:$0xff]  ;;  %v186_v5 = vld [vmem:[%s1764_s26 + $0x48] sm:$0xff]  ;;  %181 = vst [vmem:[%s1772_s27 + $0x10] sm:$0xff] %v180_v2  ;;  %183 = vst [vmem:[%s1772_s27 + $0x18] sm:$0xff] %v182_v3 }
  0x12   : > { %185 = vst [vmem:[%s1772_s27 + $0x20] sm:$0xff] %v184_v4  ;;  %187 = vst [vmem:[%s1772_s27 + $0x28] sm:$0xff] %v186_v5  ;;  %v188_v6 = vld [vmem:[%s1764_s26 + $0x60] sm:$0xff]  ;;  %v190_v7 = vld [vmem:[%s1764_s26 + $0x68] sm:$0xff] }
  0x13   : > { %v192_v8 = vld [vmem:[%s1764_s26 + $0x80] sm:$0xff]  ;;  %189 = vst [vmem:[%s1772_s27 + $0x30] sm:$0xff] %v188_v6  ;;  %191 = vst [vmem:[%s1772_s27 + $0x38] sm:$0xff] %v190_v7  ;;  %v194_v9 = vld [vmem:[%s1764_s26 + $0x88] sm:$0xff] }
  0x14   : > { %193 = vst [vmem:[%s1772_s27 + $0x40] sm:$0xff] %v192_v8  ;;  %v196_v10 = vld [vmem:[%s1764_s26 + $0xa0] sm:$0xff]  ;;  %v198_v11 = vld [vmem:[%s1764_s26 + $0xa8] sm:$0xff]  ;;  %195 = vst [vmem:[%s1772_s27 + $0x48] sm:$0xff] %v194_v9 }
  0x15   : > { %197 = vst [vmem:[%s1772_s27 + $0x50] sm:$0xff] %v196_v10  ;;  %199 = vst [vmem:[%s1772_s27 + $0x58] sm:$0xff] %v198_v11  ;;  %v200_v12 = vld [vmem:[%s1764_s26 + $0xc0] sm:$0xff]  ;;  %v202_v13 = vld [vmem:[%s1764_s26 + $0xc8] sm:$0xff] }
  0x16   : > { %v204_v14 = vld [vmem:[%s1764_s26 + $0xe0] sm:$0xff]  ;;  %201 = vst [vmem:[%s1772_s27 + $0x60] sm:$0xff] %v200_v12  ;;  %203 = vst [vmem:[%s1772_s27 + $0x68] sm:$0xff] %v202_v13  ;;  %v206_v15 = vld [vmem:[%s1764_s26 + $0xe8] sm:$0xff] }
  0x17   : > { %205 = vst [vmem:[%s1772_s27 + $0x70] sm:$0xff] %v204_v14  ;;  %v208_v16 = vld [vmem:[%s1764_s26 + $0x100] sm:$0xff]  ;;  %v210_v17 = vld [vmem:[%s1764_s26 + $0x108] sm:$0xff]  ;;  %207 = vst [vmem:[%s1772_s27 + $0x78] sm:$0xff] %v206_v15 }
  0x18   : > { %209 = vst [vmem:[%s1772_s27 + $0x80] sm:$0xff] %v208_v16  ;;  %211 = vst [vmem:[%s1772_s27 + $0x88] sm:$0xff] %v210_v17  ;;  %v212_v18 = vld [vmem:[%s1764_s26 + $0x120] sm:$0xff]  ;;  %v214_v19 = vld [vmem:[%s1764_s26 + $0x128] sm:$0xff] }
  0x19   : > { %v216_v20 = vld [vmem:[%s1764_s26 + $0x140] sm:$0xff]  ;;  %213 = vst [vmem:[%s1772_s27 + $0x90] sm:$0xff] %v212_v18  ;;  %215 = vst [vmem:[%s1772_s27 + $0x98] sm:$0xff] %v214_v19  ;;  %v218_v21 = vld [vmem:[%s1764_s26 + $0x148] sm:$0xff] }
  0x1a   : > { %217 = vst [vmem:[%s1772_s27 + $0xa0] sm:$0xff] %v216_v20  ;;  %v220_v22 = vld [vmem:[%s1764_s26 + $0x160] sm:$0xff]  ;;  %v222_v23 = vld [vmem:[%s1764_s26 + $0x168] sm:$0xff]  ;;  %219 = vst [vmem:[%s1772_s27 + $0xa8] sm:$0xff] %v218_v21 }
  0x1b   : > { %221 = vst [vmem:[%s1772_s27 + $0xb0] sm:$0xff] %v220_v22  ;;  %223 = vst [vmem:[%s1772_s27 + $0xb8] sm:$0xff] %v222_v23  ;;  %v224_v24 = vld [vmem:[%s1764_s26 + $0x180] sm:$0xff]  ;;  %v226_v25 = vld [vmem:[%s1764_s26 + $0x188] sm:$0xff] }
  0x1c   : > { %v228_v26 = vld [vmem:[%s1764_s26 + $0x1a0] sm:$0xff]  ;;  %225 = vst [vmem:[%s1772_s27 + $0xc0] sm:$0xff] %v224_v24  ;;  %227 = vst [vmem:[%s1772_s27 + $0xc8] sm:$0xff] %v226_v25  ;;  %v230_v27 = vld [vmem:[%s1764_s26 + $0x1a8] sm:$0xff] }
  0x1d   : > { %229 = vst [vmem:[%s1772_s27 + $0xd0] sm:$0xff] %v228_v26  ;;  %v232_v28 = vld [vmem:[%s1764_s26 + $0x1c0] sm:$0xff]  ;;  %v234_v29 = vld [vmem:[%s1764_s26 + $0x1c8] sm:$0xff]  ;;  %231 = vst [vmem:[%s1772_s27 + $0xd8] sm:$0xff] %v230_v27 }
  0x1e   : > { %233 = vst [vmem:[%s1772_s27 + $0xe0] sm:$0xff] %v232_v28  ;;  %235 = vst [vmem:[%s1772_s27 + $0xe8] sm:$0xff] %v234_v29  ;;  %v236_v30 = vld [vmem:[%s1764_s26 + $0x1e0] sm:$0xff]  ;;  %v238_v31 = vld [vmem:[%s1764_s26 + $0x1e8] sm:$0xff] }
  0x1f   : > { %v240_v32 = vld [vmem:[%s1764_s26 + $0x200] sm:$0xff]  ;;  %237 = vst [vmem:[%s1772_s27 + $0xf0] sm:$0xff] %v236_v30  ;;  %239 = vst [vmem:[%s1772_s27 + $0xf8] sm:$0xff] %v238_v31  ;;  %v242_v33 = vld [vmem:[%s1764_s26 + $0x208] sm:$0xff] }
  0x20   : > { %241 = vst [vmem:[%s1772_s27 + $0x100] sm:$0xff] %v240_v32  ;;  %v244_v34 = vld [vmem:[%s1764_s26 + $0x220] sm:$0xff]  ;;  %v246_v35 = vld [vmem:[%s1764_s26 + $0x228] sm:$0xff]  ;;  %243 = vst [vmem:[%s1772_s27 + $0x108] sm:$0xff] %v242_v33 }
  0x21   : > { %245 = vst [vmem:[%s1772_s27 + $0x110] sm:$0xff] %v244_v34  ;;  %247 = vst [vmem:[%s1772_s27 + $0x118] sm:$0xff] %v246_v35  ;;  %v248_v36 = vld [vmem:[%s1764_s26 + $0x240] sm:$0xff]  ;;  %v250_v37 = vld [vmem:[%s1764_s26 + $0x248] sm:$0xff] }
  0x22   : > { %v252_v38 = vld [vmem:[%s1764_s26 + $0x260] sm:$0xff]  ;;  %249 = vst [vmem:[%s1772_s27 + $0x120] sm:$0xff] %v248_v36  ;;  %251 = vst [vmem:[%s1772_s27 + $0x128] sm:$0xff] %v250_v37  ;;  %v254_v39 = vld [vmem:[%s1764_s26 + $0x268] sm:$0xff] }
  0x23   : > { %253 = vst [vmem:[%s1772_s27 + $0x130] sm:$0xff] %v252_v38  ;;  %v256_v40 = vld [vmem:[%s1764_s26 + $0x280] sm:$0xff]  ;;  %v258_v41 = vld [vmem:[%s1764_s26 + $0x288] sm:$0xff]  ;;  %255 = vst [vmem:[%s1772_s27 + $0x138] sm:$0xff] %v254_v39 }
  0x24   : > { %257 = vst [vmem:[%s1772_s27 + $0x140] sm:$0xff] %v256_v40  ;;  %259 = vst [vmem:[%s1772_s27 + $0x148] sm:$0xff] %v258_v41  ;;  %v260_v42 = vld [vmem:[%s1764_s26 + $0x2a0] sm:$0xff]  ;;  %v262_v43 = vld [vmem:[%s1764_s26 + $0x2a8] sm:$0xff] }
  0x25   : > { %v264_v44 = vld [vmem:[%s1764_s26 + $0x2c0] sm:$0xff]  ;;  %261 = vst [vmem:[%s1772_s27 + $0x150] sm:$0xff] %v260_v42  ;;  %263 = vst [vmem:[%s1772_s27 + $0x158] sm:$0xff] %v262_v43  ;;  %v266_v45 = vld [vmem:[%s1764_s26 + $0x2c8] sm:$0xff] }
  0x26   : > { %265 = vst [vmem:[%s1772_s27 + $0x160] sm:$0xff] %v264_v44  ;;  %v268_v46 = vld [vmem:[%s1764_s26 + $0x2e0] sm:$0xff]  ;;  %v270_v47 = vld [vmem:[%s1764_s26 + $0x2e8] sm:$0xff]  ;;  %267 = vst [vmem:[%s1772_s27 + $0x168] sm:$0xff] %v266_v45 }
  0x27   : > { %269 = vst [vmem:[%s1772_s27 + $0x170] sm:$0xff] %v268_v46  ;;  %271 = vst [vmem:[%s1772_s27 + $0x178] sm:$0xff] %v270_v47  ;;  %v272_v48 = vld [vmem:[%s1764_s26 + $0x300] sm:$0xff]  ;;  %v274_v49 = vld [vmem:[%s1764_s26 + $0x308] sm:$0xff] }
  0x28   : > { %v276_v50 = vld [vmem:[%s1764_s26 + $0x320] sm:$0xff]  ;;  %273 = vst [vmem:[%s1772_s27 + $0x180] sm:$0xff] %v272_v48  ;;  %275 = vst [vmem:[%s1772_s27 + $0x188] sm:$0xff] %v274_v49  ;;  %v278_v51 = vld [vmem:[%s1764_s26 + $0x328] sm:$0xff] }
  0x29   : > { %277 = vst [vmem:[%s1772_s27 + $0x190] sm:$0xff] %v276_v50  ;;  %v280_v52 = vld [vmem:[%s1764_s26 + $0x340] sm:$0xff]  ;;  %v282_v53 = vld [vmem:[%s1764_s26 + $0x348] sm:$0xff]  ;;  %279 = vst [vmem:[%s1772_s27 + $0x198] sm:$0xff] %v278_v51 }
  0x2a   : > { %281 = vst [vmem:[%s1772_s27 + $0x1a0] sm:$0xff] %v280_v52  ;;  %283 = vst [vmem:[%s1772_s27 + $0x1a8] sm:$0xff] %v282_v53  ;;  %v284_v54 = vld [vmem:[%s1764_s26 + $0x360] sm:$0xff]  ;;  %v286_v55 = vld [vmem:[%s1764_s26 + $0x368] sm:$0xff] }
  0x2b   : > { %v288_v56 = vld [vmem:[%s1764_s26 + $0x380] sm:$0xff]  ;;  %285 = vst [vmem:[%s1772_s27 + $0x1b0] sm:$0xff] %v284_v54  ;;  %287 = vst [vmem:[%s1772_s27 + $0x1b8] sm:$0xff] %v286_v55  ;;  %v290_v57 = vld [vmem:[%s1764_s26 + $0x388] sm:$0xff] }
  0x2c   : > { %289 = vst [vmem:[%s1772_s27 + $0x1c0] sm:$0xff] %v288_v56  ;;  %v292_v58 = vld [vmem:[%s1764_s26 + $0x3a0] sm:$0xff]  ;;  %v294_v59 = vld [vmem:[%s1764_s26 + $0x3a8] sm:$0xff]  ;;  %291 = vst [vmem:[%s1772_s27 + $0x1c8] sm:$0xff] %v290_v57 }
  0x2d   : > { %293 = vst [vmem:[%s1772_s27 + $0x1d0] sm:$0xff] %v292_v58  ;;  %295 = vst [vmem:[%s1772_s27 + $0x1d8] sm:$0xff] %v294_v59  ;;  %v296_v60 = vld [vmem:[%s1764_s26 + $0x3c0] sm:$0xff]  ;;  %v298_v61 = vld [vmem:[%s1764_s26 + $0x3c8] sm:$0xff] }
  0x2e   : > { %v300_v62 = vld [vmem:[%s1764_s26 + $0x3e0] sm:$0xff]  ;;  %297 = vst [vmem:[%s1772_s27 + $0x1e0] sm:$0xff] %v296_v60  ;;  %299 = vst [vmem:[%s1772_s27 + $0x1e8] sm:$0xff] %v298_v61  ;;  %v302_v63 = vld [vmem:[%s1764_s26 + $0x3e8] sm:$0xff] }
  0x2f   : > { %301 = vst [vmem:[%s1772_s27 + $0x1f0] sm:$0xff] %v300_v62  ;;  %v304_v0 = vld [vmem:[%s1764_s26 + $0x400] sm:$0xff]  ;;  %v306_v1 = vld [vmem:[%s1764_s26 + $0x408] sm:$0xff]  ;;  %303 = vst [vmem:[%s1772_s27 + $0x1f8] sm:$0xff] %v302_v63 }
  0x30   : > { %305 = vst [vmem:[%s1772_s27 + $0x200] sm:$0xff] %v304_v0  ;;  %307 = vst [vmem:[%s1772_s27 + $0x208] sm:$0xff] %v306_v1  ;;  %v308_v2 = vld [vmem:[%s1764_s26 + $0x420] sm:$0xff]  ;;  %v310_v3 = vld [vmem:[%s1764_s26 + $0x428] sm:$0xff] }
  0x31   : > { %v312_v4 = vld [vmem:[%s1764_s26 + $0x440] sm:$0xff]  ;;  %309 = vst [vmem:[%s1772_s27 + $0x210] sm:$0xff] %v308_v2  ;;  %311 = vst [vmem:[%s1772_s27 + $0x218] sm:$0xff] %v310_v3  ;;  %v314_v5 = vld [vmem:[%s1764_s26 + $0x448] sm:$0xff] }
  0x32   : > { %313 = vst [vmem:[%s1772_s27 + $0x220] sm:$0xff] %v312_v4  ;;  %v316_v6 = vld [vmem:[%s1764_s26 + $0x460] sm:$0xff]  ;;  %v318_v7 = vld [vmem:[%s1764_s26 + $0x468] sm:$0xff]  ;;  %315 = vst [vmem:[%s1772_s27 + $0x228] sm:$0xff] %v314_v5 }
  0x33   : > { %317 = vst [vmem:[%s1772_s27 + $0x230] sm:$0xff] %v316_v6  ;;  %319 = vst [vmem:[%s1772_s27 + $0x238] sm:$0xff] %v318_v7  ;;  %v320_v8 = vld [vmem:[%s1764_s26 + $0x480] sm:$0xff]  ;;  %v322_v9 = vld [vmem:[%s1764_s26 + $0x488] sm:$0xff] }
  0x34   : > { %v324_v10 = vld [vmem:[%s1764_s26 + $0x4a0] sm:$0xff]  ;;  %321 = vst [vmem:[%s1772_s27 + $0x240] sm:$0xff] %v320_v8  ;;  %323 = vst [vmem:[%s1772_s27 + $0x248] sm:$0xff] %v322_v9  ;;  %v326_v11 = vld [vmem:[%s1764_s26 + $0x4a8] sm:$0xff] }
  0x35   : > { %325 = vst [vmem:[%s1772_s27 + $0x250] sm:$0xff] %v324_v10  ;;  %v328_v12 = vld [vmem:[%s1764_s26 + $0x4c0] sm:$0xff]  ;;  %v330_v13 = vld [vmem:[%s1764_s26 + $0x4c8] sm:$0xff]  ;;  %327 = vst [vmem:[%s1772_s27 + $0x258] sm:$0xff] %v326_v11 }
  0x36   : > { %329 = vst [vmem:[%s1772_s27 + $0x260] sm:$0xff] %v328_v12  ;;  %331 = vst [vmem:[%s1772_s27 + $0x268] sm:$0xff] %v330_v13  ;;  %v332_v14 = vld [vmem:[%s1764_s26 + $0x4e0] sm:$0xff]  ;;  %v334_v15 = vld [vmem:[%s1764_s26 + $0x4e8] sm:$0xff] }
  0x37   : > { %v336_v16 = vld [vmem:[%s1764_s26 + $0x500] sm:$0xff]  ;;  %333 = vst [vmem:[%s1772_s27 + $0x270] sm:$0xff] %v332_v14  ;;  %335 = vst [vmem:[%s1772_s27 + $0x278] sm:$0xff] %v334_v15  ;;  %v338_v17 = vld [vmem:[%s1764_s26 + $0x508] sm:$0xff] }
  0x38   : > { %337 = vst [vmem:[%s1772_s27 + $0x280] sm:$0xff] %v336_v16  ;;  %v340_v18 = vld [vmem:[%s1764_s26 + $0x520] sm:$0xff]  ;;  %v342_v19 = vld [vmem:[%s1764_s26 + $0x528] sm:$0xff]  ;;  %339 = vst [vmem:[%s1772_s27 + $0x288] sm:$0xff] %v338_v17 }
  0x39   : > { %341 = vst [vmem:[%s1772_s27 + $0x290] sm:$0xff] %v340_v18  ;;  %343 = vst [vmem:[%s1772_s27 + $0x298] sm:$0xff] %v342_v19  ;;  %v344_v20 = vld [vmem:[%s1764_s26 + $0x540] sm:$0xff]  ;;  %v346_v21 = vld [vmem:[%s1764_s26 + $0x548] sm:$0xff] }
  0x3a   : > { %v348_v22 = vld [vmem:[%s1764_s26 + $0x560] sm:$0xff]  ;;  %345 = vst [vmem:[%s1772_s27 + $0x2a0] sm:$0xff] %v344_v20  ;;  %347 = vst [vmem:[%s1772_s27 + $0x2a8] sm:$0xff] %v346_v21  ;;  %v350_v23 = vld [vmem:[%s1764_s26 + $0x568] sm:$0xff] }
  0x3b   : > { %349 = vst [vmem:[%s1772_s27 + $0x2b0] sm:$0xff] %v348_v22  ;;  %v352_v24 = vld [vmem:[%s1764_s26 + $0x580] sm:$0xff]  ;;  %v354_v25 = vld [vmem:[%s1764_s26 + $0x588] sm:$0xff]  ;;  %351 = vst [vmem:[%s1772_s27 + $0x2b8] sm:$0xff] %v350_v23 }
  0x3c   : > { %353 = vst [vmem:[%s1772_s27 + $0x2c0] sm:$0xff] %v352_v24  ;;  %355 = vst [vmem:[%s1772_s27 + $0x2c8] sm:$0xff] %v354_v25  ;;  %v356_v26 = vld [vmem:[%s1764_s26 + $0x5a0] sm:$0xff]  ;;  %v358_v27 = vld [vmem:[%s1764_s26 + $0x5a8] sm:$0xff] }
  0x3d   : > { %v360_v28 = vld [vmem:[%s1764_s26 + $0x5c0] sm:$0xff]  ;;  %357 = vst [vmem:[%s1772_s27 + $0x2d0] sm:$0xff] %v356_v26  ;;  %359 = vst [vmem:[%s1772_s27 + $0x2d8] sm:$0xff] %v358_v27  ;;  %v362_v29 = vld [vmem:[%s1764_s26 + $0x5c8] sm:$0xff] }
  0x3e   : > { %361 = vst [vmem:[%s1772_s27 + $0x2e0] sm:$0xff] %v360_v28  ;;  %v364_v30 = vld [vmem:[%s1764_s26 + $0x5e0] sm:$0xff]  ;;  %v366_v31 = vld [vmem:[%s1764_s26 + $0x5e8] sm:$0xff]  ;;  %363 = vst [vmem:[%s1772_s27 + $0x2e8] sm:$0xff] %v362_v29 }
  0x3f   : > { %365 = vst [vmem:[%s1772_s27 + $0x2f0] sm:$0xff] %v364_v30  ;;  %367 = vst [vmem:[%s1772_s27 + $0x2f8] sm:$0xff] %v366_v31 }
  0x40 PF: > { %p1360_p6 = scmp.ge.s32.totalorder %s1698_s16, 1  ;;  %p380_p7 = scmp.lt.s32.totalorder %s1698_s16, 3 }
  0x42   : > { %p381_p8 = pnand %p1360_p6, %p380_p7 }
  0x43   : > { %s387_s28 = sand.u32 (!%p381_p8), 1, %s1682_s12   ;;  %s1361_s8 = sshll.u32 (!%p381_p8), %s1690_s14, 2 }
  0x44   : > { %384 = sbr.rel (%p381_p8) target bundleno = 376 (0x178), region = 51  ;;  %p430_p9 = scmp.lt.s32.totalorder (!%p381_p8), %s1361_s8, 7 }
  0x45   : > { %s1471_s29 = smul.u32 (!%p381_p8), 768, %s387_s28 }
  0x47   : > { %s1973_s5 = scalar_lea.vmem (!%p381_p8), [#allocation2], %s1471_s29 }
  0x49   : > { %v1700_v32 = vmov 0   ;;  %v1967_v33 = vld [vmem:[%s2109_s0] sm:$0xff]  ;;  %v1566_v4 = vld [vmem:[%s1973_s5 + $0xec] ss:$16 sps:$4 sm:$0xff]   ;;  %v2013_v5 = vld [vmem:[%s2109_s0 + $0x8] ss:$0 sps:$4 sm:$0xff]  }
  0x4a   : > { %1129 = vmatprep.mubr.bf16.mxu1 %v1700_v32  ;;  %v1971_v34 = vcombine.high %v1967_v33, %v1967_v33  ;;  %v1513_v35 = vld [vmem:[%s1973_s5 + $0xe4] ss:$16 sps:$4 sm:$0xff]   ;;  %v1517_v37 = vld [vmem:[%s1973_s5 + $0xe0] ss:$16 sps:$4 sm:$0xff]   ;;  %v1564_v6 = vld [vmem:[%s1973_s5 + $0xe8] ss:$16 sps:$4 sm:$0xff]  }
  0x4b   : > { %v1515_v36 = vld [vmem:[%s1973_s5 + $0x2e4] ss:$16 sps:$4 sm:$0xff]   ;;  %1056 = vmatprep.subr.bf16.mxu0 %v1513_v35  ;;  %v1518_v38 = vld [vmem:[%s1973_s5 + $0x2e0] ss:$16 sps:$4 sm:$0xff]   ;;  %v1572_v9 = vld [vmem:[%s1973_s5 + $0xcc] ss:$16 sps:$4 sm:$0xff]  }
  0x4c   : > { %1088 = vmatprep.mubr.bf16.mxu0 %v1971_v34  ;;  %1097 = vmatprep.subr.bf16.mxu1 %v1515_v36  ;;  %v1519_v39 = vld [vmem:[%s1973_s5 + $0xc4] ss:$16 sps:$4 sm:$0xff]   ;;  %v1523_v41 = vld [vmem:[%s1973_s5 + $0xc0] ss:$16 sps:$4 sm:$0xff]   ;;  %v1570_v10 = vld [vmem:[%s1973_s5 + $0xc8] ss:$16 sps:$4 sm:$0xff]  }
  0x4d   : > { %1057 = vmatpush1.bf16.msra.mxu0 %v1517_v37  ;;  %1098 = vmatpush1.bf16.msra.mxu1 %v1518_v38  ;;  %v1521_v40 = vld [vmem:[%s1973_s5 + $0x2c4] ss:$16 sps:$4 sm:$0xff]   ;;  %v1524_v42 = vld [vmem:[%s1973_s5 + $0x2c0] ss:$16 sps:$4 sm:$0xff]   ;;  %v1578_v13 = vld [vmem:[%s1973_s5 + $0xac] ss:$16 sps:$4 sm:$0xff]  }
  0x4e   : > { %1058 = vmatprep.subr.bf16.mxu0 %v1519_v39  ;;  %1099 = vmatprep.subr.bf16.mxu1 %v1521_v40  ;;  %v1525_v43 = vld [vmem:[%s1973_s5 + $0xa4] ss:$16 sps:$4 sm:$0xff]   ;;  %v1529_v45 = vld [vmem:[%s1973_s5 + $0xa0] ss:$16 sps:$4 sm:$0xff]   ;;  %v1576_v14 = vld [vmem:[%s1973_s5 + $0xa8] ss:$16 sps:$4 sm:$0xff]   ;;  %v2051_v40 = vcombine.low %v1967_v33, %v1967_v33 }
  0x4f   : > { %v1527_v44 = vld [vmem:[%s1973_s5 + $0x2a4] ss:$16 sps:$4 sm:$0xff]   ;;  %v1530_v46 = vld [vmem:[%s1973_s5 + $0x2a0] ss:$16 sps:$4 sm:$0xff]   ;;  %v1584_v17 = vld [vmem:[%s1973_s5 + $0x8c] ss:$16 sps:$4 sm:$0xff]  }
  0x50   : > { %v1531_v47 = vld [vmem:[%s1973_s5 + $0x84] ss:$16 sps:$4 sm:$0xff]   ;;  %v1535_v49 = vld [vmem:[%s1973_s5 + $0x80] ss:$16 sps:$4 sm:$0xff]   ;;  %v1582_v18 = vld [vmem:[%s1973_s5 + $0x88] ss:$16 sps:$4 sm:$0xff]  }
  0x51   : > { %1059 = vmatpush1.bf16.msra.mxu0 %v1523_v41  ;;  %1100 = vmatpush1.bf16.msra.mxu1 %v1524_v42  ;;  %v1533_v48 = vld [vmem:[%s1973_s5 + $0x284] ss:$16 sps:$4 sm:$0xff]   ;;  %v1536_v50 = vld [vmem:[%s1973_s5 + $0x280] ss:$16 sps:$4 sm:$0xff]   ;;  %v1590_v21 = vld [vmem:[%s1973_s5 + $0x6c] ss:$16 sps:$4 sm:$0xff]  }
  0x52   : > { %1060 = vmatprep.subr.bf16.mxu0 %v1525_v43  ;;  %1101 = vmatprep.subr.bf16.mxu1 %v1527_v44  ;;  %v1537_v51 = vld [vmem:[%s1973_s5 + $0x64] ss:$16 sps:$4 sm:$0xff]   ;;  %v1541_v53 = vld [vmem:[%s1973_s5 + $0x60] ss:$16 sps:$4 sm:$0xff]   ;;  %v1588_v22 = vld [vmem:[%s1973_s5 + $0x68] ss:$16 sps:$4 sm:$0xff]  }
  0x53   : > { %v1539_v52 = vld [vmem:[%s1973_s5 + $0x264] ss:$16 sps:$4 sm:$0xff]   ;;  %v1542_v54 = vld [vmem:[%s1973_s5 + $0x260] ss:$16 sps:$4 sm:$0xff]   ;;  %v1596_v25 = vld [vmem:[%s1973_s5 + $0x4c] ss:$16 sps:$4 sm:$0xff]  }
  0x54   : > { %v1543_v55 = vld [vmem:[%s1973_s5 + $0x44] ss:$16 sps:$4 sm:$0xff]   ;;  %v1547_v57 = vld [vmem:[%s1973_s5 + $0x40] ss:$16 sps:$4 sm:$0xff]   ;;  %v1594_v26 = vld [vmem:[%s1973_s5 + $0x48] ss:$16 sps:$4 sm:$0xff]  }
  0x55   : > { %1061 = vmatpush1.bf16.msra.mxu0 %v1529_v45  ;;  %1102 = vmatpush1.bf16.msra.mxu1 %v1530_v46  ;;  %v1545_v56 = vld [vmem:[%s1973_s5 + $0x244] ss:$16 sps:$4 sm:$0xff]   ;;  %v1548_v58 = vld [vmem:[%s1973_s5 + $0x240] ss:$16 sps:$4 sm:$0xff]   ;;  %v1602_v29 = vld [vmem:[%s1973_s5 + $0x2c] ss:$16 sps:$4 sm:$0xff]  }
  0x56   : > { %1062 = vmatprep.subr.bf16.mxu0 %v1531_v47  ;;  %1103 = vmatprep.subr.bf16.mxu1 %v1533_v48  ;;  %v1549_v59 = vld [vmem:[%s1973_s5 + $0x24] ss:$16 sps:$4 sm:$0xff]   ;;  %v1553_v61 = vld [vmem:[%s1973_s5 + $0x20] ss:$16 sps:$4 sm:$0xff]   ;;  %v1600_v30 = vld [vmem:[%s1973_s5 + $0x28] ss:$16 sps:$4 sm:$0xff]  }
  0x57   : > { %v1551_v60 = vld [vmem:[%s1973_s5 + $0x224] ss:$16 sps:$4 sm:$0xff]   ;;  %v1554_v62 = vld [vmem:[%s1973_s5 + $0x220] ss:$16 sps:$4 sm:$0xff]   ;;  %v1608_v35 = vld [vmem:[%s1973_s5 + $0xc] ss:$16 sps:$4 sm:$0xff]  }
  0x58   : > { %v1555_v63 = vld [vmem:[%s1973_s5 + $0x4] ss:$16 sps:$4 sm:$0xff]   ;;  %v1559_v1 = vld [vmem:[%s1973_s5] ss:$16 sps:$4 sm:$0xff]   ;;  %v1606_v36 = vld [vmem:[%s1973_s5 + $0x8] ss:$16 sps:$4 sm:$0xff]  }
  0x59   : > { %1063 = vmatpush1.bf16.msra.mxu0 %v1535_v49  ;;  %1104 = vmatpush1.bf16.msra.mxu1 %v1536_v50  ;;  %v1557_v0 = vld [vmem:[%s1973_s5 + $0x204] ss:$16 sps:$4 sm:$0xff]   ;;  %v1560_v2 = vld [vmem:[%s1973_s5 + $0x200] ss:$16 sps:$4 sm:$0xff]   ;;  %v1614_v38 = vld [vmem:[%s1973_s5 + $0x1ec] ss:$16 sps:$4 sm:$0xff]  }
  0x5a   : > { %1064 = vmatprep.subr.bf16.mxu0 %v1537_v51  ;;  %1105 = vmatprep.subr.bf16.mxu1 %v1539_v52  ;;  %v1561_v3 = vld [vmem:[%s1973_s5 + $0x1e4] ss:$16 sps:$4 sm:$0xff]   ;;  %v1567_v7 = vld [vmem:[%s1973_s5 + $0x1e0] ss:$16 sps:$4 sm:$0xff]   ;;  %v1617_v39 = vld [vmem:[%s1973_s5 + $0x2ec] ss:$16 sps:$4 sm:$0xff]  }
  0x5b   : > { %v1568_v8 = vld [vmem:[%s1973_s5 + $0x1c4] ss:$16 sps:$4 sm:$0xff]   ;;  %v1573_v11 = vld [vmem:[%s1973_s5 + $0x1c0] ss:$16 sps:$4 sm:$0xff]   ;;  %v1612_v41 = vld [vmem:[%s1973_s5 + $0x1e8] ss:$16 sps:$4 sm:$0xff]  }
  0x5c   : > { %v1574_v12 = vld [vmem:[%s1973_s5 + $0x1a4] ss:$16 sps:$4 sm:$0xff]   ;;  %v1579_v15 = vld [vmem:[%s1973_s5 + $0x1a0] ss:$16 sps:$4 sm:$0xff]   ;;  %v1615_v42 = vld [vmem:[%s1973_s5 + $0x2e8] ss:$16 sps:$4 sm:$0xff]  }
  0x5d   : > { %1065 = vmatpush1.bf16.msra.mxu0 %v1541_v53  ;;  %1106 = vmatpush1.bf16.msra.mxu1 %v1542_v54  ;;  %v1580_v16 = vld [vmem:[%s1973_s5 + $0x184] ss:$16 sps:$4 sm:$0xff]   ;;  %v1585_v19 = vld [vmem:[%s1973_s5 + $0x180] ss:$16 sps:$4 sm:$0xff]   ;;  %v1620_v43 = vld [vmem:[%s1973_s5 + $0x1cc] ss:$16 sps:$4 sm:$0xff]  }
  0x5e   : > { %1066 = vmatprep.subr.bf16.mxu0 %v1543_v55  ;;  %1107 = vmatprep.subr.bf16.mxu1 %v1545_v56  ;;  %v1586_v20 = vld [vmem:[%s1973_s5 + $0x164] ss:$16 sps:$4 sm:$0xff]   ;;  %v1591_v23 = vld [vmem:[%s1973_s5 + $0x160] ss:$16 sps:$4 sm:$0xff]   ;;  %v1623_v44 = vld [vmem:[%s1973_s5 + $0x2cc] ss:$16 sps:$4 sm:$0xff]  }
  0x5f   : > { %v1592_v24 = vld [vmem:[%s1973_s5 + $0x144] ss:$16 sps:$4 sm:$0xff]   ;;  %v1597_v27 = vld [vmem:[%s1973_s5 + $0x140] ss:$16 sps:$4 sm:$0xff]   ;;  %v1618_v33 = vld [vmem:[%s1973_s5 + $0x1c8] ss:$16 sps:$4 sm:$0xff]  }
  0x60   : > { %v1598_v28 = vld [vmem:[%s1973_s5 + $0x124] ss:$16 sps:$4 sm:$0xff]   ;;  %v1603_v31 = vld [vmem:[%s1973_s5 + $0x120] ss:$16 sps:$4 sm:$0xff]   ;;  %v1621_v45 = vld [vmem:[%s1973_s5 + $0x2c8] ss:$16 sps:$4 sm:$0xff]  }
  0x61   : > { %1067 = vmatpush1.bf16.msra.mxu0 %v1547_v57  ;;  %1108 = vmatpush1.bf16.msra.mxu1 %v1548_v58  ;;  %v1609_v37 = vld [vmem:[%s1973_s5 + $0x100] ss:$16 sps:$4 sm:$0xff]   ;;  %v1626_v46 = vld [vmem:[%s1973_s5 + $0x1ac] ss:$16 sps:$4 sm:$0xff]   ;;  %v1624_v48 = vld [vmem:[%s1973_s5 + $0x1a8] ss:$16 sps:$4 sm:$0xff]  }
  0x62   : > { %1068 = vmatprep.subr.bf16.mxu0 %v1549_v59  ;;  %1109 = vmatprep.subr.bf16.mxu1 %v1551_v60  ;;  %v1629_v47 = vld [vmem:[%s1973_s5 + $0x2ac] ss:$16 sps:$4 sm:$0xff]   ;;  %v1627_v49 = vld [vmem:[%s1973_s5 + $0x2a8] ss:$16 sps:$4 sm:$0xff]   ;;  %s2120_s8 = smov (!%p430_p9, %s1361_s8), 7 }
  0x63   : > { %v1632_v50 = vld [vmem:[%s1973_s5 + $0x18c] ss:$16 sps:$4 sm:$0xff]   ;;  %v1630_v52 = vld [vmem:[%s1973_s5 + $0x188] ss:$16 sps:$4 sm:$0xff]   ;;  %s432_s11 = scalar_lea.vmem %s2111_s2, %s2120_s8  ;;  %s1363_s12 = sshll.u32 %s2120_s8, 2 }
  0x64   : > { %v1635_v51 = vld [vmem:[%s1973_s5 + $0x28c] ss:$16 sps:$4 sm:$0xff]   ;;  %v1633_v53 = vld [vmem:[%s1973_s5 + $0x288] ss:$16 sps:$4 sm:$0xff]   ;;  %s442_s19 = scalar_lea.vmem %s2112_s3, %s1363_s12 }
  0x65   : > { %1069 = vmatpush1.bf16.msra.mxu0 %v1553_v61  ;;  %1110 = vmatpush1.bf16.msra.mxu1 %v1554_v62  ;;  %v1641_v54 = vld [vmem:[%s1973_s5 + $0x26c] ss:$16 sps:$4 sm:$0xff]   ;;  %v1636_v55 = vld [vmem:[%s1973_s5 + $0x168] ss:$16 sps:$4 sm:$0xff]  }
  0x66   : > { %1070 = vmatprep.subr.bf16.mxu0 %v1555_v63  ;;  %1111 = vmatprep.subr.bf16.mxu1 %v1557_v0  ;;  %v1639_v56 = vld [vmem:[%s1973_s5 + $0x268] ss:$16 sps:$4 sm:$0xff]   ;;  %v1644_v57 = vld [vmem:[%s1973_s5 + $0x14c] ss:$16 sps:$4 sm:$0xff]  }
  0x67   : > { %v1647_v58 = vld [vmem:[%s1973_s5 + $0x24c] ss:$16 sps:$4 sm:$0xff]   ;;  %v1642_v59 = vld [vmem:[%s1973_s5 + $0x148] ss:$16 sps:$4 sm:$0xff]  }
  0x68   : > { %v1645_v60 = vld [vmem:[%s1973_s5 + $0x248] ss:$16 sps:$4 sm:$0xff]   ;;  %v1650_v61 = vld [vmem:[%s1973_s5 + $0x12c] ss:$16 sps:$4 sm:$0xff]  }
  0x69   : > { %1071 = vmatpush1.bf16.msra.mxu0 %v1559_v1  ;;  %1112 = vmatpush1.bf16.msra.mxu1 %v1560_v2  ;;  %v1653_v62 = vld [vmem:[%s1973_s5 + $0x22c] ss:$16 sps:$4 sm:$0xff]   ;;  %v1648_v63 = vld [vmem:[%s1973_s5 + $0x128] ss:$16 sps:$4 sm:$0xff]  }
  0x6a   : > { %1072 = vmatprep.subr.bf16.mxu0 %v1561_v3  ;;  %1138 = vmatprep.subr.bf16.mxu1 %v1566_v4  ;;  %v1651_v0 = vld [vmem:[%s1973_s5 + $0x228] ss:$16 sps:$4 sm:$0xff]   ;;  %v1656_v1 = vld [vmem:[%s1973_s5 + $0x10c] ss:$16 sps:$4 sm:$0xff]  }
  0x6b   : > { %v1659_v2 = vld [vmem:[%s1973_s5 + $0x20c] ss:$16 sps:$4 sm:$0xff]   ;;  %v1654_v3 = vld [vmem:[%s1973_s5 + $0x108] ss:$16 sps:$4 sm:$0xff]  }
  0x6c   : > { %1130 = vmatmul.mubr.bf16.vlgmr.msra.gmra.mxu1 %v2013_v5  ;;  %v1657_v4 = vld [vmem:[%s1973_s5 + $0x208] ss:$16 sps:$4 sm:$0xff]  }
  0x6d   : > { %1073 = vmatpush2.bf16.msra.mxu0 %v1567_v7  ;;  %1139 = vmatpush1.bf16.msra.mxu1 %v1564_v6 }
  0x6e   : > { %1074 = vmatprep.subr.bf16.mxu0 %v1568_v8  ;;  %1140 = vmatprep.subr.bf16.mxu1 %v1572_v9 }
  0x6f   : > { %1170 = vmatprep.mubr.bf16.mxu1 %v1971_v34  ;;  %v1604_v34 = vld [vmem:[%s1973_s5 + $0x104] ss:$16 sps:$4 sm:$0xff]  }
  0x71   : > { %1075 = vmatpush2.bf16.msra.mxu0 %v1573_v11  ;;  %1141 = vmatpush1.bf16.msra.mxu1 %v1570_v10  ;;  %v545_v10 = vlaneseq }
  0x72   : > { %1076 = vmatprep.subr.bf16.mxu0 %v1574_v12  ;;  %1142 = vmatprep.subr.bf16.mxu1 %v1578_v13  ;;  %v543_v13 = vld [vmem:[%s432_s11] sm:$0xf] }
  0x73   : > { %v546_v11 = vshrl.u32 %v545_v10, 7 }
  0x75   : > { %1077 = vmatpush2.bf16.msra.mxu0 %v1579_v15  ;;  %1143 = vmatpush1.bf16.msra.mxu1 %v1576_v14  ;;  %v547_v12 = vsub.s32 0, %v546_v11  ;;  %v551_v14 = vsub.s32 1, %v546_v11 }
  0x76   : > { %1078 = vmatprep.subr.bf16.mxu0 %v1580_v16  ;;  %1144 = vmatprep.subr.bf16.mxu1 %v1584_v17 }
  0x77   : > { %v548_v15 = vrot.slane %v543_v13, %v547_v12  ;;  %v552_v16 = vrot.slane %v543_v13, %v551_v14 }
  0x79   : > { %1079 = vmatpush2.bf16.msra.mxu0 %v1585_v19  ;;  %1145 = vmatpush1.bf16.msra.mxu1 %v1582_v18 }
  0x7a   : > { %1080 = vmatprep.subr.bf16.mxu0 %v1586_v20  ;;  %1146 = vmatprep.subr.bf16.mxu1 %v1590_v21 }
  0x7d   : > { %1081 = vmatpush2.bf16.msra.mxu0 %v1591_v23  ;;  %1147 = vmatpush1.bf16.msra.mxu1 %v1588_v22 }
  0x7e   : > { %1082 = vmatprep.subr.bf16.mxu0 %v1592_v24  ;;  %1148 = vmatprep.subr.bf16.mxu1 %v1596_v25 }
  0x81   : > { %1083 = vmatpush2.bf16.msra.mxu0 %v1597_v27  ;;  %1149 = vmatpush1.bf16.msra.mxu1 %v1594_v26  ;;  %v555_v27 = vsub.s32 2, %v546_v11 }
  0x82   : > { %1084 = vmatprep.subr.bf16.mxu0 %v1598_v28  ;;  %1150 = vmatprep.subr.bf16.mxu1 %v1602_v29  ;;  %v559_v28 = vsub.s32 3, %v546_v11 }
  0x83   : > { %v556_v29 = vrot.slane %v543_v13, %v555_v27 }
  0x85   : > { %1085 = vmatpush2.bf16.msra.mxu0 %v1603_v31  ;;  %1151 = vmatpush1.bf16.msra.mxu1 %v1600_v30  ;;  %v560_v30 = vrot.slane %v543_v13, %v559_v28 }
  0x86   : > { %1086 = vmatprep.subr.bf16.mxu0 %v1604_v34  ;;  %1152 = vmatprep.subr.bf16.mxu1 %v1608_v35 }
  0x89   : > { %1087 = vmatpush2.bf16.msra.mxu0 %v1609_v37  ;;  %1153 = vmatpush1.bf16.msra.mxu1 %v1606_v36 }
  0x8a   : > { %1154 = vmatprep.subr.bf16.mxu1 %v1614_v38  ;;  %1179 = vmatprep.subr.bf16.mxu0 %v1617_v39 }
  0x8c   : > { %1089 = vmatmul.mubr.bf16.vlgmr.msra.gmra.mxu0 %v2051_v40 }
  0x8d   : > { %1155 = vmatpush2.bf16.msra.mxu1 %v1612_v41  ;;  %1180 = vmatpush1.bf16.msra.mxu0 %v1615_v42 }
  0x8e   : > { %1156 = vmatprep.subr.bf16.mxu1 %v1620_v43  ;;  %1181 = vmatprep.subr.bf16.mxu0 %v1623_v44 }
  0x8f   : > { %1211 = vmatprep.mubr.bf16.mxu0 %v1700_v32  ;;  %v1638_v32 = vld [vmem:[%s1973_s5 + $0x16c] ss:$16 sps:$4 sm:$0xff]  }
  0x91   : > { %1157 = vmatpush2.bf16.msra.mxu1 %v1618_v33  ;;  %1182 = vmatpush1.bf16.msra.mxu0 %v1621_v45 }
  0x92   : > { %1158 = vmatprep.subr.bf16.mxu1 %v1626_v46  ;;  %1183 = vmatprep.subr.bf16.mxu0 %v1629_v47 }
  0x95   : > { %1159 = vmatpush2.bf16.msra.mxu1 %v1624_v48  ;;  %1184 = vmatpush1.bf16.msra.mxu0 %v1627_v49 }
  0x96   : > { %1160 = vmatprep.subr.bf16.mxu1 %v1632_v50  ;;  %1185 = vmatprep.subr.bf16.mxu0 %v1635_v51 }
  0x99   : > { %1161 = vmatpush2.bf16.msra.mxu1 %v1630_v52  ;;  %1186 = vmatpush1.bf16.msra.mxu0 %v1633_v53 }
  0x9a   : > { %1162 = vmatprep.subr.bf16.mxu1 %v1638_v32  ;;  %1187 = vmatprep.subr.bf16.mxu0 %v1641_v54 }
  0x9d   : > { %1163 = vmatpush2.bf16.msra.mxu1 %v1636_v55  ;;  %1188 = vmatpush1.bf16.msra.mxu0 %v1639_v56 }
  0x9e   : > { %1164 = vmatprep.subr.bf16.mxu1 %v1644_v57  ;;  %1189 = vmatprep.subr.bf16.mxu0 %v1647_v58 }
  0xa1   : > { %1165 = vmatpush2.bf16.msra.mxu1 %v1642_v59  ;;  %1190 = vmatpush1.bf16.msra.mxu0 %v1645_v60 }
  0xa2   : > { %1166 = vmatprep.subr.bf16.mxu1 %v1650_v61  ;;  %1191 = vmatprep.subr.bf16.mxu0 %v1653_v62 }
  0xa5   : > { %1167 = vmatpush2.bf16.msra.mxu1 %v1648_v63  ;;  %1192 = vmatpush1.bf16.msra.mxu0 %v1651_v0 }
  0xa6   : > { %1168 = vmatprep.subr.bf16.mxu1 %v1656_v1  ;;  %1193 = vmatprep.subr.bf16.mxu0 %v1659_v2 }
  0xa9   : > { %1169 = vmatpush2.bf16.msra.mxu1 %v1654_v3  ;;  %1194 = vmatpush1.bf16.msra.mxu0 %v1657_v4 }
  0xac   : > { %1171 = vmatmul.mubr.bf16.vlgmr.msra.gmra.mxu1 %v2051_v40  ;;  %1212 = vmatmul.mubr.bf16.vlgmr.msra.gmra.mxu0 %v2013_v5 }
 0x12c   : > { %v1131_v6 = vpop.f32.mrf.mxu1 }
 0x12e   : > { %v1133_v7 = vpop.f32.mrf.mxu1 }
 0x130   : > { %v1135_v8 = vpop.f32.mrf.mxu1 }
 0x132   : > { %v1136_v9 = vpop.f32.mrf.mxu1 }
 0x14c   : > { %v1090_v17 = vpop.f32.mrf.mxu0 }
 0x14d   : > { %v1091_v5 = vadd.f32 %v1090_v17, %v548_v15 }
 0x14e   : > { %v1092_v18 = vpop.f32.mrf.mxu0 }
 0x14f   : > { %v1132_v19 = vadd.f32 %v1131_v6, %v1091_v5  ;;  %v1093_v20 = vadd.f32 %v1092_v18, %v552_v16 }
 0x150   : > { %v1094_v21 = vpop.f32.mrf.mxu0 }
 0x151   : > { %v1134_v22 = vadd.f32 %v1133_v7, %v1093_v20  ;;  %v1220_v24 = vmax.f32 %v1132_v19, 0.0 }
 0x152   : > { %v1095_v23 = vpop.f32.mrf.mxu0 }
 0x153   : > { %v1221_v25 = vmax.f32 %v1134_v22, 0.0 }
 0x155   : > { %v1468_v26 = vpack.c.bf16 %v1221_v25, %v1220_v24 }
 0x157   : > { %1240 = vst [vmem:[%s442_s19] sm:$0xff] %v1468_v26 }
 0x16c   : > { %v1172_v31 = vpop.f32.mrf.mxu1  ;;  %v1213_v34 = vpop.f32.mrf.mxu0 }
 0x16d   : > { %v1173_v35 = vadd.f32 %v1172_v31, %v556_v29 }
 0x16e   : > { %v1174_v36 = vpop.f32.mrf.mxu1  ;;  %v1215_v37 = vpop.f32.mrf.mxu0 }
 0x16f   : > { %v1214_v38 = vadd.f32 %v1213_v34, %v1173_v35  ;;  %v1175_v39 = vadd.f32 %v1174_v36, %v560_v30 }
 0x170   : > { %v1176_v40 = vpop.f32.mrf.mxu1  ;;  %v1217_v41 = vpop.f32.mrf.mxu0 }
 0x171   : > { %v1216_v42 = vadd.f32 %v1215_v37, %v1175_v39  ;;  %v1222_v33 = vmax.f32 %v1214_v38, 0.0 }
 0x172   : > { %v1177_v43 = vpop.f32.mrf.mxu1  ;;  %v1218_v44 = vpop.f32.mrf.mxu0 }
 0x173   : > { %v1223_v45 = vmax.f32 %v1216_v42, 0.0 }
 0x175   : > { %v1469_v46 = vpack.c.bf16 %v1223_v45, %v1222_v33 }
 0x177   : > { %1241 = vst [vmem:[%s442_s19 + $0x8] sm:$0xff] %v1469_v46 }
 0x178 PF: > { %s13_s16 = sadd.s32 1, %s1698_s16   ;;  %s2113_s12 = smov %s1686_s13 }
 0x179   : > { %p10_p10 = scmp.ge.s32.totalorder %s13_s16, 4   ;;  %s2114_s13 = smov %s1756_s20 }
 0x17a   : > { %s2115_s14 = smov %s1694_s15  ;;  %s2116_s15 = smov %s2118_s17 }
 0x17b   :  { %12 = sbr.rel (!%p10_p10) target bundleno = 3 (0x3), region = 96 }

</bundles_post_ra>
